<compile_context>
chip_gen: v7x
topology: tpu7x:2x2x1
jax: 0.10.0
libtpu: 0.0.40
codegen_flags: <defaults>
</compile_context>

<pallas_src>
import functools

import jax
import jax.numpy as jnp
from jax.experimental import pallas as pl
from jax.experimental.pallas import tpu as pltpu

LANE = 128  # channel padding / MXU lane width


def _round_up(x, m):
    return (x + m - 1) // m * m


# --------------------------------------------------------------------------------------
# Fused conv GEMM kernels: out = [relu]( A @ W + bias [+ residual] )
#   A: (tm, K) bf16 im2col patches, W: (K, N) bf16 BN-folded weights, bias: (1, N) f32.
#   Single K step, f32 accumulation on the MXU.
# --------------------------------------------------------------------------------------
def _gemm_kernel(a_ref, w_ref, b_ref, o_ref, *, relu):
    y = jnp.dot(a_ref[...], w_ref[...], preferred_element_type=jnp.float32) + b_ref[...]
    if relu:
        y = jnp.maximum(y, 0.0)
    o_ref[...] = y.astype(o_ref.dtype)


def _gemm_residual_kernel(a_ref, w_ref, b_ref, r_ref, o_ref):
    # conv2 + bn2 + skip-add + ReLU in one epilogue.
    y = jnp.dot(a_ref[...], w_ref[...], preferred_element_type=jnp.float32)
    y = y + b_ref[...] + r_ref[...].astype(jnp.float32)
    o_ref[...] = jnp.maximum(y, 0.0).astype(o_ref.dtype)


def _gemm_split_kernel(a_ref, w_ref, b_ref, o1_ref, o2_ref, *, n1):
    # conv1 (ReLU) and the fused 1x1 downsample identity branch share one A read / one
    # N=256 GEMM; ReLU is applied to the first n1 lanes only.
    y = jnp.dot(a_ref[...], w_ref[...], preferred_element_type=jnp.float32) + b_ref[...]
    o1_ref[...] = jnp.maximum(y[:, :n1], 0.0).astype(o1_ref.dtype)
    o2_ref[...] = y[:, n1:].astype(o2_ref.dtype)


def _pick_tm(mp):
    # >= 2 grid steps when M allows (v7x has 2 TensorCores on the "parallel" axis; a grid
    # of >= 2 also restores DMA/compute overlap on v5e/v6e); cap at 256 rows per tile.
    return min(256, _round_up(max(pl.cdiv(mp, 2), 16), 16))


def _gemm_call(patches, w, bias, *, relu, residual=None, split=None,
               out_dtype=jnp.bfloat16):
    """patches: (M, K) bf16 (K == w.shape[0]); w: (K, N) bf16; bias: (1, N) f32.
    split=None -> one (M, N) output; split=n1 -> two outputs (M, n1) ReLU'd / (M, N-n1)."""
    M, K = patches.shape
    _, N = w.shape
    tm = _pick_tm(_round_up(M, 16))
    Mp = _round_up(M, tm)
    if Mp != M:  # only triggers for the tiny last stage / head (M=8 -> 16)
        patches = jnp.pad(patches, ((0, Mp - M), (0, 0)))
    grid = (Mp // tm,)
    in_specs = [
        pl.BlockSpec((tm, K), lambda i: (i, 0)),
        pl.BlockSpec((K, N), lambda i: (0, 0)),
        pl.BlockSpec((1, N), lambda i: (0, 0)),
    ]
    args = [patches, w, bias]
    cp = pltpu.CompilerParams(dimension_semantics=("parallel",))

    if split is not None:
        o1, o2 = pl.pallas_call(
            functools.partial(_gemm_split_kernel, n1=split),
            out_shape=(jax.ShapeDtypeStruct((Mp, split), out_dtype),
                       jax.ShapeDtypeStruct((Mp, N - split), out_dtype)),
            grid=grid, in_specs=in_specs,
            out_specs=(pl.BlockSpec((tm, split), lambda i: (i, 0)),
                       pl.BlockSpec((tm, N - split), lambda i: (i, 0))),
            compiler_params=cp,
        )(*args)
        return (o1[:M] if Mp != M else o1), (o2[:M] if Mp != M else o2)

    if residual is not None:
        if residual.shape[0] != Mp:
            residual = jnp.pad(residual, ((0, Mp - residual.shape[0]), (0, 0)))
        in_specs.append(pl.BlockSpec((tm, N), lambda i: (i, 0)))
        args.append(residual)
        kernel = _gemm_residual_kernel
    else:
        kernel = functools.partial(_gemm_kernel, relu=relu)

    out = pl.pallas_call(
        kernel,
        out_shape=jax.ShapeDtypeStruct((Mp, N), out_dtype),
        grid=grid, in_specs=in_specs,
        out_specs=pl.BlockSpec((tm, N), lambda i: (i, 0)),
        compiler_params=cp,
    )(*args)
    return out[:M] if Mp != M else out


def conv_gemm(x, cw, *, stride, padding, relu=True, residual=None, split=False,
              out_dtype=jnp.bfloat16):
    """x: (B, H, W, Cp) NHWC bf16, channel axis already padded (no per-layer slicing).
    Returns NHWC with padded channels, or a (conv_branch, identity_branch) pair if split."""
    B, H, W, Cp = x.shape
    kh, kw = cw["kh"], cw["kw"]
    Ho = (H + 2 * padding - kh) // stride + 1
    Wo = (W + 2 * padding - kw) // stride + 1
    M = B * Ho * Wo

    if kh == 1 and kw == 1 and stride == 1 and padding == 0:
        patches = x.reshape(M, Cp)                       # 1x1 conv: no patch build at all
    else:
        xp = (jnp.pad(x, ((0, 0), (padding, padding), (padding, padding), (0, 0)))
              if padding else x)
        cols = [xp[:, ki:ki + stride * (Ho - 1) + 1:stride,
                   kj:kj + stride * (Wo - 1) + 1:stride, :]
                for ki in range(kh) for kj in range(kw)]
        # channel-axis concat -> columns ordered (ki, kj, cin), matching the weight prep;
        # K is already a multiple of 128 (padded channels), already bf16 -> no re-pad/cast.
        patches = jnp.concatenate(cols, axis=-1).reshape(M, kh * kw * Cp)
    K = cw["w"].shape[0]
    if patches.shape[1] != K:  # only the 7x7 stem (Cin=3, K=147->256) needs a K pad
        patches = jnp.pad(patches, ((0, 0), (0, K - patches.shape[1])))
    patches = patches.astype(jnp.bfloat16)

    if split:
        o1, o2 = _gemm_call(patches, cw["w"], cw["b"], relu=True, split=LANE,
                            out_dtype=out_dtype)
        return o1.reshape(B, Ho, Wo, LANE), o2.reshape(B, Ho, Wo, LANE)

    res2d = residual.reshape(M, residual.shape[-1]) if residual is not None else None
    out = _gemm_call(patches, cw["w"], cw["b"], relu=relu, residual=res2d,
                     out_dtype=out_dtype)
    return out.reshape(B, Ho, Wo, out.shape[-1])


# --------------------------------------------------------------------------------------
# MaxPool2d(kernel=3, stride=2, padding=1), one Pallas kernel.
# Host supplies the 3 stride-2 H-tap views of the zero-padded slab (post-ReLU input, so
# zero padding == -inf padding); the 3 W shifts + all maxes run in VMEM in one kernel.
# --------------------------------------------------------------------------------------
def _maxpool_kernel(a_ref, b_ref, c_ref, o_ref):
    t = jnp.maximum(jnp.maximum(a_ref[...], b_ref[...]), c_ref[...])   # (1, Ho, Wp, C)
    wo = o_ref.shape[2]
    m = jnp.maximum(t[:, :, 0:wo, :], t[:, :, 1:wo + 1, :])
    o_ref[...] = jnp.maximum(m, t[:, :, 2:wo + 2, :])


def maxpool2d_nhwc(x):
    B, H, W, C = x.shape
    Ho = (H + 2 - 3) // 2 + 1
    Wo = (W + 2 - 3) // 2 + 1
    Wp = W + 2
    xp = jnp.pad(x, ((0, 0), (1, 1), (1, 1), (0, 0)))
    hv = [xp[:, k:k + 2 * (Ho - 1) + 1:2, :, :] for k in range(3)]     # (B, Ho, Wp, C) x3
    pooled = pl.pallas_call(
        _maxpool_kernel,
        out_shape=jax.ShapeDtypeStruct((B, Ho, Wp - 2, C), x.dtype),
        grid=(B,),
        in_specs=[pl.BlockSpec((1, Ho, Wp, C), lambda b: (b, 0, 0, 0))] * 3,
        out_specs=pl.BlockSpec((1, Ho, Wp - 2, C), lambda b: (b, 0, 0, 0)),
        compiler_params=pltpu.CompilerParams(dimension_semantics=("parallel",)),
    )(*hv)
    return pooled[:, :, 0:2 * (Wo - 1) + 1:2, :]                       # (B, Ho, Wo, C)


# --------------------------------------------------------------------------------------
# Parameters: PyTorch-style init, then a one-time prepare step (BN folding, channel
# padding to 128, (ki,kj,cin) row ordering, downsample N-concatenation, bf16 cast).
# --------------------------------------------------------------------------------------
def _init_conv(key, cout, cin, kh, kw):
    fan_in = cin * kh * kw
    return jax.random.normal(key, (cout, cin, kh, kw), jnp.float32) * jnp.sqrt(2.0 / fan_in)


def _init_bn(key, c):
    k1, k2 = jax.random.split(key)
    return dict(gamma=1.0 + 0.1 * jax.random.normal(k1, (c,), jnp.float32),
                beta=0.1 * jax.random.normal(k2, (c,), jnp.float32),
                mean=jnp.zeros((c,), jnp.float32),
                var=jnp.ones((c,), jnp.float32))


def init_params(key, embed_size=48, in_channels=3, widths=(8, 16, 32, 64), blocks=(1, 1, 1, 1)):
    keys = iter(jax.random.split(key, 128))
    params = {"conv1_w": _init_conv(next(keys), widths[0], in_channels, 7, 7),
              "bn1": _init_bn(next(keys), widths[0])}
    cin = widths[0]
    for li, (cout, nb) in enumerate(zip(widths, blocks)):
        stride = 1 if li == 0 else 2
        layer = []
        for bi in range(nb):
            s = stride if bi == 0 else 1
            bp = {"conv1_w": _init_conv(next(keys), cout, cin, 3, 3),
                  "bn1": _init_bn(next(keys), cout),
                  "conv2_w": _init_conv(next(keys), cout, cout, 3, 3),
                  "bn2": _init_bn(next(keys), cout)}
            if s != 1 or cin != cout:
                bp["ds_conv_w"] = _init_conv(next(keys), cout, cin, 1, 1)
                bp["ds_bn"] = _init_bn(next(keys), cout)
            layer.append(bp)
            cin = cout
        params[f"layer{li + 1}"] = layer
    if widths[-1] != embed_size:  # _build_adaptation_head: Conv1x1(no bias)->Dropout->BN->ReLU
        params["head"] = {"conv_w": _init_conv(next(keys), embed_size, widths[-1], 1, 1),
                          "bn": _init_bn(next(keys), embed_size)}
    else:
        params["head"] = None
    return params


def _fold_bn(conv_w, bn, eps=1e-5):
    scale = bn["gamma"] / jnp.sqrt(bn["var"] + eps)
    bias = bn["beta"] - bn["mean"] * scale
    return conv_w * scale[:, None, None, None], bias


def _pack_weight(w, bias, cin_pad, cout_pad, k_pad=None):
    """w: (cout, cin, kh, kw) BN-folded -> (kh*kw*cin_pad [, k_pad], cout_pad) bf16 GEMM
    weight with rows ordered (ki, kj, cin) to match the channel-axis patch concat, plus
    the (1, cout_pad) f32 bias.  Zero padding keeps padded lanes exactly 0 end-to-end."""
    cout, cin, kh, kw = w.shape
    w = jnp.pad(w, ((0, cout_pad - cout), (0, cin_pad - cin), (0, 0), (0, 0)))
    wmat = jnp.transpose(w, (2, 3, 1, 0)).reshape(kh * kw * cin_pad, cout_pad)
    if k_pad is not None and k_pad > wmat.shape[0]:
        wmat = jnp.pad(wmat, ((0, k_pad - wmat.shape[0]), (0, 0)))
    bvec = jnp.pad(bias, (0, cout_pad - cout)).reshape(1, cout_pad)
    return wmat.astype(jnp.bfloat16), bvec.astype(jnp.float32)


def _pack_block_conv1_with_ds(conv1_w, bn1, ds_w, ds_bn):
    """Fuse the 1x1 stride-s downsample into conv1's GEMM: its weights live in the centre
    tap (ki=1,kj=1) rows (same input element as the 3x3 centre tap) and are concatenated
    along N -> one (K, 256) weight, N=256 filling the 256-wide MXU on v6e/v7x."""
    w1, b1 = _fold_bn(conv1_w, bn1)
    w1m, b1v = _pack_weight(w1, b1, LANE, LANE)                 # (9*128, 128)
    wd, bd = _fold_bn(ds_w, ds_bn)
    wdm, bdv = _pack_weight(wd, bd, LANE, LANE)                 # (128, 128)
    K = w1m.shape[0]
    ctr = (1 * 3 + 1) * LANE                                    # centre-tap row offset
    wds_full = jnp.zeros((K, LANE), jnp.bfloat16).at[ctr:ctr + LANE, :].set(wdm)
    return dict(w=jnp.concatenate([w1m, wds_full], axis=1),
                b=jnp.concatenate([b1v, bdv], axis=1), kh=3, kw=3)


def prepare_params(params):
    # Stem: Cin=3 kept un-padded (K = 49*3 -> 256); all later convs use 128-padded Cin.
    w1, b1 = _fold_bn(params["conv1_w"], params["bn1"])
    cout0, cin0, kh, kw = params["conv1_w"].shape
    stem_w, stem_b = _pack_weight(w1, b1, cin0, LANE, k_pad=_round_up(kh * kw * cin0, LANE))
    prep = {"conv1": dict(w=stem_w, b=stem_b, kh=kh, kw=kw)}
    layers = []
    for li in range(4):
        base_stride = 1 if li == 0 else 2
        layer = []
        for bi, bp in enumerate(params[f"layer{li + 1}"]):
            blk = {"stride": base_stride if bi == 0 else 1}
            if "ds_conv_w" in bp:
                blk["conv1ds"] = _pack_block_conv1_with_ds(bp["conv1_w"], bp["bn1"],
                                                           bp["ds_conv_w"], bp["ds_bn"])
            else:
                wc1, bc1 = _fold_bn(bp["conv1_w"], bp["bn1"])
                wm, bv = _pack_weight(wc1, bc1, LANE, LANE)
                blk["conv1"] = dict(w=wm, b=bv, kh=3, kw=3)
            wc2, bc2 = _fold_bn(bp["conv2_w"], bp["bn2"])
            wm2, bv2 = _pack_weight(wc2, bc2, LANE, LANE)
            blk["conv2"] = dict(w=wm2, b=bv2, kh=3, kw=3)
            layer.append(blk)
        layers.append(layer)
    prep["layers"] = layers
    if params.get("head") is not None:
        wh, bh = _fold_bn(params["head"]["conv_w"], params["head"]["bn"])
        whm, bhv = _pack_weight(wh, bh, LANE, LANE)
        prep["head"] = dict(w=whm, b=bhv, kh=1, kw=1)
        prep["out_channels"] = params["head"]["conv_w"].shape[0]
    else:
        prep["head"] = None
        prep["out_channels"] = params["layer4"][-1]["conv2_w"].shape[0]
    return prep


# --------------------------------------------------------------------------------------
# Forward pass (NHWC + padded channels internally, NCHW interface like PyTorch)
# --------------------------------------------------------------------------------------
def basic_block_forward(x, blk):
    s = blk["stride"]
    if "conv1ds" in blk:
        # one GEMM produces both the ReLU'd conv1 branch and the downsample identity branch
        h, identity = conv_gemm(x, blk["conv1ds"], stride=s, padding=1, split=True)
    else:
        h = conv_gemm(x, blk["conv1"], stride=s, padding=1, relu=True)
        identity = x
    # conv2 + bn2 + residual add + relu fused into one GEMM epilogue
    return conv_gemm(h, blk["conv2"], stride=1, padding=1, relu=True, residual=identity)


def resnet_image_encoder_forward(images, prep, return_reshaped_features=True):
    if images is None:
        return None
    x = jnp.transpose(images, (0, 2, 3, 1)).astype(jnp.bfloat16)      # NCHW -> NHWC once
    # _forward_encoder: conv1 -> bn1 -> relu -> maxpool -> layer1..4 (flatten removed)
    x = conv_gemm(x, prep["conv1"], stride=2, padding=3, relu=True)
    x = maxpool2d_nhwc(x)
    for layer in prep["layers"]:
        for blk in layer:
            x = basic_block_forward(x, blk)
    # adaptation head (last_module): Conv1x1 -> Dropout(identity) -> BN -> ReLU, fused
    if prep["head"] is not None:
        # TODO(synk): training-mode Dropout RNG and batch-statistics BN not implemented; eval semantics used.
        x = conv_gemm(x, prep["head"], stride=1, padding=0, relu=True, out_dtype=jnp.float32)
    else:
        x = x.astype(jnp.float32)
    c = prep["out_channels"]
    feats = jnp.transpose(x[..., :c], (0, 3, 1, 2))   # drop channel padding once, NHWC->NCHW
    if return_reshaped_features:
        B, C, H, W = feats.shape
        return feats.reshape(B, C, H * W)
    return feats


if __name__ == "__main__":
    key = jax.random.PRNGKey(0)
    pkey, xkey = jax.random.split(key)
    embed_size = 48
    params = init_params(pkey, embed_size=embed_size)
    prep = prepare_params(params)  # one-time BN folding / weight packing (hoisted out of forward)
    images = jax.random.normal(xkey, (2, 3, 64, 64), jnp.float32)      # NCHW, like PyTorch

    fwd = jax.jit(functools.partial(resnet_image_encoder_forward, prep=prep))
    out = jax.block_until_ready(fwd(images))

    # 64x64 input -> conv1 s2 (32) -> maxpool s2 (16) -> layers s(1,2,2,2) -> 2x2 spatial
    assert out.shape == (2, embed_size, 2 * 2), out.shape
    assert out.dtype == jnp.float32
    assert bool(jnp.all(jnp.isfinite(out)))
    print("KERNEL_OK")
</pallas_src>

<mosaic_0001>
module attributes {stable_mosaic.version = 11 : i64} {
  func.func @_gemm_kernel(%arg0: i32, %arg1: memref<256x256xbf16, #tpu.memory_space<vmem>>, %arg2: memref<256x128xbf16, #tpu.memory_space<vmem>>, %arg3: memref<1x128xf32, #tpu.memory_space<vmem>>, %arg4: memref<256x128xbf16, #tpu.memory_space<vmem>>) attributes {dimension_semantics = [#tpu.dimension_semantics<parallel>], iteration_bounds = array<i64: 8>, scalar_prefetch = 0 : i64, scratch_operands = 0 : i64, tpu.core_type = #tpu.core_type<tc>, window_params = [{transform_indices = @transform_0, window_bounds = array<i64: 256, 256>}, {pipeline_mode = #tpu.pipeline_mode<synchronous>, transform_indices = @transform_1, window_bounds = array<i64: 256, 128>}, {pipeline_mode = #tpu.pipeline_mode<synchronous>, transform_indices = @transform_2, window_bounds = array<i64: 1, 128>}, {transform_indices = @transform_3, window_bounds = array<i64: 256, 128>}]} {
    %c0 = arith.constant 0 : index
    %c0_0 = arith.constant 0 : index
    %0 = vector.load %arg1[%c0, %c0_0] : memref<256x256xbf16, #tpu.memory_space<vmem>>, vector<256x256xbf16>
    %c0_1 = arith.constant 0 : index
    %c0_2 = arith.constant 0 : index
    %1 = vector.load %arg2[%c0_1, %c0_2] : memref<256x128xbf16, #tpu.memory_space<vmem>>, vector<256x128xbf16>
    %cst = arith.constant dense<0.000000e+00> : vector<256x128xf32>
    %2 = tpu.matmul %0, %1, %cst {dimension_numbers = #tpu.dot_dimension_numbers<[1], [0], [0], [1], [0, 0, 1, 1], [], []>} : vector<256x256xbf16>, vector<256x128xbf16>, vector<256x128xf32> -> vector<256x128xf32>
    %c0_3 = arith.constant 0 : index
    %c0_4 = arith.constant 0 : index
    %3 = vector.load %arg3[%c0_3, %c0_4] : memref<1x128xf32, #tpu.memory_space<vmem>>, vector<1x128xf32>
    %4 = vector.broadcast %3 : vector<1x128xf32> to vector<256x128xf32>
    %5 = arith.addf %2, %4 : vector<256x128xf32>
    %cst_5 = arith.constant 0.000000e+00 : f32
    %6 = vector.broadcast %cst_5 : f32 to vector<256x128xf32>
    %7 = arith.maximumf %5, %6 : vector<256x128xf32>
    %8 = arith.truncf %7 : vector<256x128xf32> to vector<256x128xbf16>
    %c0_6 = arith.constant 0 : index
    %c0_7 = arith.constant 0 : index
    %9 = vector.load %arg4[%c0_6, %c0_7] : memref<256x128xbf16, #tpu.memory_space<vmem>>, vector<256x128xbf16>
    tpu.vector_store %arg4[%c0_6, %c0_7], %8 {strides = array<i32>} : memref<256x128xbf16, #tpu.memory_space<vmem>>, vector<256x128xbf16>,
    return
  }
  func.func @transform_0(%arg0: i32) -> (i32, i32) {
    %c0_i32 = arith.constant 0 : i32
    %c0_i32_0 = arith.constant 0 : i32
    return %arg0, %c0_i32 : i32, i32
  }
  func.func @transform_1(%arg0: i32) -> (i32, i32) {
    %c0_i32 = arith.constant 0 : i32
    %c0_i32_0 = arith.constant 0 : i32
    %c0_i32_1 = arith.constant 0 : i32
    return %c0_i32, %c0_i32_0 : i32, i32
  }
  func.func @transform_2(%arg0: i32) -> (i32, i32) {
    %c0_i32 = arith.constant 0 : i32
    %c0_i32_0 = arith.constant 0 : i32
    %c0_i32_1 = arith.constant 0 : i32
    return %c0_i32, %c0_i32_0 : i32, i32
  }
  func.func @transform_3(%arg0: i32) -> (i32, i32) {
    %c0_i32 = arith.constant 0 : i32
    %c0_i32_0 = arith.constant 0 : i32
    return %arg0, %c0_i32 : i32, i32
  }
}

module attributes {stable_mosaic.version = 11 : i64} {
  func.func @_maxpool_kernel(%arg0: i32, %arg1: memref<1x16x34x128xbf16, #tpu.memory_space<vmem>>, %arg2: memref<1x16x34x128xbf16, #tpu.memory_space<vmem>>, %arg3: memref<1x16x34x128xbf16, #tpu.memory_space<vmem>>, %arg4: memref<1x16x32x128xbf16, #tpu.memory_space<vmem>>) attributes {dimension_semantics = [#tpu.dimension_semantics<parallel>], iteration_bounds = array<i64: 2>, scalar_prefetch = 0 : i64, scratch_operands = 0 : i64, tpu.core_type = #tpu.core_type<tc>, window_params = [{transform_indices = @transform_0, window_bounds = array<i64: 1, 16, 34, 128>}, {transform_indices = @transform_1, window_bounds = array<i64: 1, 16, 34, 128>}, {transform_indices = @transform_2, window_bounds = array<i64: 1, 16, 34, 128>}, {transform_indices = @transform_3, window_bounds = array<i64: 1, 16, 32, 128>}]} {
    %c0 = arith.constant 0 : index
    %c0_0 = arith.constant 0 : index
    %c0_1 = arith.constant 0 : index
    %c0_2 = arith.constant 0 : index
    %0 = vector.load %arg1[%c0, %c0_0, %c0_1, %c0_2] : memref<1x16x34x128xbf16, #tpu.memory_space<vmem>>, vector<1x16x34x128xbf16>
    %c0_3 = arith.constant 0 : index
    %c0_4 = arith.constant 0 : index
    %c0_5 = arith.constant 0 : index
    %c0_6 = arith.constant 0 : index
    %1 = vector.load %arg2[%c0_3, %c0_4, %c0_5, %c0_6] : memref<1x16x34x128xbf16, #tpu.memory_space<vmem>>, vector<1x16x34x128xbf16>
    %2 = arith.maximumf %0, %1 : vector<1x16x34x128xbf16>
    %c0_7 = arith.constant 0 : index
    %c0_8 = arith.constant 0 : index
    %c0_9 = arith.constant 0 : index
    %c0_10 = arith.constant 0 : index
    %3 = vector.load %arg3[%c0_7, %c0_8, %c0_9, %c0_10] : memref<1x16x34x128xbf16, #tpu.memory_space<vmem>>, vector<1x16x34x128xbf16>
    %4 = arith.maximumf %2, %3 : vector<1x16x34x128xbf16>
    %5 = vector.extract_strided_slice %4 {offsets = [0, 0, 0, 0], sizes = [1, 16, 32, 128], strides = [1, 1, 1, 1]} : vector<1x16x34x128xbf16> to vector<1x16x32x128xbf16>
    %6 = vector.extract_strided_slice %4 {offsets = [0, 0, 1, 0], sizes = [1, 16, 32, 128], strides = [1, 1, 1, 1]} : vector<1x16x34x128xbf16> to vector<1x16x32x128xbf16>
    %7 = arith.maximumf %5, %6 : vector<1x16x32x128xbf16>
    %8 = vector.extract_strided_slice %4 {offsets = [0, 0, 2, 0], sizes = [1, 16, 32, 128], strides = [1, 1, 1, 1]} : vector<1x16x34x128xbf16> to vector<1x16x32x128xbf16>
    %9 = arith.maximumf %7, %8 : vector<1x16x32x128xbf16>
    %c0_11 = arith.constant 0 : index
    %c0_12 = arith.constant 0 : index
    %c0_13 = arith.constant 0 : index
    %c0_14 = arith.constant 0 : index
    %10 = vector.load %arg4[%c0_11, %c0_12, %c0_13, %c0_14] : memref<1x16x32x128xbf16, #tpu.memory_space<vmem>>, vector<1x16x32x128xbf16>
    tpu.vector_store %arg4[%c0_11, %c0_12, %c0_13, %c0_14], %9 {strides = array<i32>} : memref<1x16x32x128xbf16, #tpu.memory_space<vmem>>, vector<1x16x32x128xbf16>,
    return
  }
  func.func @transform_0(%arg0: i32) -> (i32, i32, i32, i32) {
    %c0_i32 = arith.constant 0 : i32
    %c0_i32_0 = arith.constant 0 : i32
    %c0_i32_1 = arith.constant 0 : i32
    %c0_i32_2 = arith.constant 0 : i32
    return %arg0, %c0_i32, %c0_i32_0, %c0_i32_1 : i32, i32, i32, i32
  }
  func.func @transform_1(%arg0: i32) -> (i32, i32, i32, i32) {
    %c0_i32 = arith.constant 0 : i32
    %c0_i32_0 = arith.constant 0 : i32
    %c0_i32_1 = arith.constant 0 : i32
    %c0_i32_2 = arith.constant 0 : i32
    return %arg0, %c0_i32, %c0_i32_0, %c0_i32_1 : i32, i32, i32, i32
  }
  func.func @transform_2(%arg0: i32) -> (i32, i32, i32, i32) {
    %c0_i32 = arith.constant 0 : i32
    %c0_i32_0 = arith.constant 0 : i32
    %c0_i32_1 = arith.constant 0 : i32
    %c0_i32_2 = arith.constant 0 : i32
    return %arg0, %c0_i32, %c0_i32_0, %c0_i32_1 : i32, i32, i32, i32
  }
  func.func @transform_3(%arg0: i32) -> (i32, i32, i32, i32) {
    %c0_i32 = arith.constant 0 : i32
    %c0_i32_0 = arith.constant 0 : i32
    %c0_i32_1 = arith.constant 0 : i32
    %c0_i32_2 = arith.constant 0 : i32
    return %arg0, %c0_i32, %c0_i32_0, %c0_i32_1 : i32, i32, i32, i32
  }
}

module attributes {stable_mosaic.version = 11 : i64} {
  func.func @_gemm_kernel(%arg0: i32, %arg1: memref<256x1152xbf16, #tpu.memory_space<vmem>>, %arg2: memref<1152x128xbf16, #tpu.memory_space<vmem>>, %arg3: memref<1x128xf32, #tpu.memory_space<vmem>>, %arg4: memref<256x128xbf16, #tpu.memory_space<vmem>>) attributes {dimension_semantics = [#tpu.dimension_semantics<parallel>], iteration_bounds = array<i64: 2>, scalar_prefetch = 0 : i64, scratch_operands = 0 : i64, tpu.core_type = #tpu.core_type<tc>, window_params = [{transform_indices = @transform_0, window_bounds = array<i64: 256, 1152>}, {pipeline_mode = #tpu.pipeline_mode<synchronous>, transform_indices = @transform_1, window_bounds = array<i64: 1152, 128>}, {pipeline_mode = #tpu.pipeline_mode<synchronous>, transform_indices = @transform_2, window_bounds = array<i64: 1, 128>}, {transform_indices = @transform_3, window_bounds = array<i64: 256, 128>}]} {
    %c0 = arith.constant 0 : index
    %c0_0 = arith.constant 0 : index
    %0 = vector.load %arg1[%c0, %c0_0] : memref<256x1152xbf16, #tpu.memory_space<vmem>>, vector<256x1152xbf16>
    %c0_1 = arith.constant 0 : index
    %c0_2 = arith.constant 0 : index
    %1 = vector.load %arg2[%c0_1, %c0_2] : memref<1152x128xbf16, #tpu.memory_space<vmem>>, vector<1152x128xbf16>
    %cst = arith.constant dense<0.000000e+00> : vector<256x128xf32>
    %2 = tpu.matmul %0, %1, %cst {dimension_numbers = #tpu.dot_dimension_numbers<[1], [0], [0], [1], [0, 0, 1, 1], [], []>} : vector<256x1152xbf16>, vector<1152x128xbf16>, vector<256x128xf32> -> vector<256x128xf32>
    %c0_3 = arith.constant 0 : index
    %c0_4 = arith.constant 0 : index
    %3 = vector.load %arg3[%c0_3, %c0_4] : memref<1x128xf32, #tpu.memory_space<vmem>>, vector<1x128xf32>
    %4 = vector.broadcast %3 : vector<1x128xf32> to vector<256x128xf32>
    %5 = arith.addf %2, %4 : vector<256x128xf32>
    %cst_5 = arith.constant 0.000000e+00 : f32
    %6 = vector.broadcast %cst_5 : f32 to vector<256x128xf32>
    %7 = arith.maximumf %5, %6 : vector<256x128xf32>
    %8 = arith.truncf %7 : vector<256x128xf32> to vector<256x128xbf16>
    %c0_6 = arith.constant 0 : index
    %c0_7 = arith.constant 0 : index
    %9 = vector.load %arg4[%c0_6, %c0_7] : memref<256x128xbf16, #tpu.memory_space<vmem>>, vector<256x128xbf16>
    tpu.vector_store %arg4[%c0_6, %c0_7], %8 {strides = array<i32>} : memref<256x128xbf16, #tpu.memory_space<vmem>>, vector<256x128xbf16>,
    return
  }
  func.func @transform_0(%arg0: i32) -> (i32, i32) {
    %c0_i32 = arith.constant 0 : i32
    %c0_i32_0 = arith.constant 0 : i32
    return %arg0, %c0_i32 : i32, i32
  }
  func.func @transform_1(%arg0: i32) -> (i32, i32) {
    %c0_i32 = arith.constant 0 : i32
    %c0_i32_0 = arith.constant 0 : i32
    %c0_i32_1 = arith.constant 0 : i32
    return %c0_i32, %c0_i32_0 : i32, i32
  }
  func.func @transform_2(%arg0: i32) -> (i32, i32) {
    %c0_i32 = arith.constant 0 : i32
    %c0_i32_0 = arith.constant 0 : i32
    %c0_i32_1 = arith.constant 0 : i32
    return %c0_i32, %c0_i32_0 : i32, i32
  }
  func.func @transform_3(%arg0: i32) -> (i32, i32) {
    %c0_i32 = arith.constant 0 : i32
    %c0_i32_0 = arith.constant 0 : i32
    return %arg0, %c0_i32 : i32, i32
  }
}

module attributes {stable_mosaic.version = 11 : i64} {
  func.func @_gemm_residual_kernel(%arg0: i32, %arg1: memref<256x1152xbf16, #tpu.memory_space<vmem>>, %arg2: memref<1152x128xbf16, #tpu.memory_space<vmem>>, %arg3: memref<1x128xf32, #tpu.memory_space<vmem>>, %arg4: memref<256x128xbf16, #tpu.memory_space<vmem>>, %arg5: memref<256x128xbf16, #tpu.memory_space<vmem>>) attributes {dimension_semantics = [#tpu.dimension_semantics<parallel>], iteration_bounds = array<i64: 2>, scalar_prefetch = 0 : i64, scratch_operands = 0 : i64, tpu.core_type = #tpu.core_type<tc>, window_params = [{transform_indices = @transform_0, window_bounds = array<i64: 256, 1152>}, {pipeline_mode = #tpu.pipeline_mode<synchronous>, transform_indices = @transform_1, window_bounds = array<i64: 1152, 128>}, {pipeline_mode = #tpu.pipeline_mode<synchronous>, transform_indices = @transform_2, window_bounds = array<i64: 1, 128>}, {transform_indices = @transform_3, window_bounds = array<i64: 256, 128>}, {transform_indices = @transform_4, window_bounds = array<i64: 256, 128>}]} {
    %c0 = arith.constant 0 : index
    %c0_0 = arith.constant 0 : index
    %0 = vector.load %arg1[%c0, %c0_0] : memref<256x1152xbf16, #tpu.memory_space<vmem>>, vector<256x1152xbf16>
    %c0_1 = arith.constant 0 : index
    %c0_2 = arith.constant 0 : index
    %1 = vector.load %arg2[%c0_1, %c0_2] : memref<1152x128xbf16, #tpu.memory_space<vmem>>, vector<1152x128xbf16>
    %cst = arith.constant dense<0.000000e+00> : vector<256x128xf32>
    %2 = tpu.matmul %0, %1, %cst {dimension_numbers = #tpu.dot_dimension_numbers<[1], [0], [0], [1], [0, 0, 1, 1], [], []>} : vector<256x1152xbf16>, vector<1152x128xbf16>, vector<256x128xf32> -> vector<256x128xf32>
    %c0_3 = arith.constant 0 : index
    %c0_4 = arith.constant 0 : index
    %3 = vector.load %arg3[%c0_3, %c0_4] : memref<1x128xf32, #tpu.memory_space<vmem>>, vector<1x128xf32>
    %4 = vector.broadcast %3 : vector<1x128xf32> to vector<256x128xf32>
    %5 = arith.addf %2, %4 : vector<256x128xf32>
    %c0_5 = arith.constant 0 : index
    %c0_6 = arith.constant 0 : index
    %6 = vector.load %arg4[%c0_5, %c0_6] : memref<256x128xbf16, #tpu.memory_space<vmem>>, vector<256x128xbf16>
    %7 = arith.extf %6 : vector<256x128xbf16> to vector<256x128xf32>
    %8 = arith.addf %5, %7 : vector<256x128xf32>
    %cst_7 = arith.constant 0.000000e+00 : f32
    %9 = vector.broadcast %cst_7 : f32 to vector<256x128xf32>
    %10 = arith.maximumf %8, %9 : vector<256x128xf32>
    %11 = arith.truncf %10 : vector<256x128xf32> to vector<256x128xbf16>
    %c0_8 = arith.constant 0 : index
    %c0_9 = arith.constant 0 : index
    %12 = vector.load %arg5[%c0_8, %c0_9] : memref<256x128xbf16, #tpu.memory_space<vmem>>, vector<256x128xbf16>
    tpu.vector_store %arg5[%c0_8, %c0_9], %11 {strides = array<i32>} : memref<256x128xbf16, #tpu.memory_space<vmem>>, vector<256x128xbf16>,
    return
  }
  func.func @transform_0(%arg0: i32) -> (i32, i32) {
    %c0_i32 = arith.constant 0 : i32
    %c0_i32_0 = arith.constant 0 : i32
    return %arg0, %c0_i32 : i32, i32
  }
  func.func @transform_1(%arg0: i32) -> (i32, i32) {
    %c0_i32 = arith.constant 0 : i32
    %c0_i32_0 = arith.constant 0 : i32
    %c0_i32_1 = arith.constant 0 : i32
    return %c0_i32, %c0_i32_0 : i32, i32
  }
  func.func @transform_2(%arg0: i32) -> (i32, i32) {
    %c0_i32 = arith.constant 0 : i32
    %c0_i32_0 = arith.constant 0 : i32
    %c0_i32_1 = arith.constant 0 : i32
    return %c0_i32, %c0_i32_0 : i32, i32
  }
  func.func @transform_3(%arg0: i32) -> (i32, i32) {
    %c0_i32 = arith.constant 0 : i32
    %c0_i32_0 = arith.constant 0 : i32
    return %arg0, %c0_i32 : i32, i32
  }
  func.func @transform_4(%arg0: i32) -> (i32, i32) {
    %c0_i32 = arith.constant 0 : i32
    %c0_i32_0 = arith.constant 0 : i32
    return %arg0, %c0_i32 : i32, i32
  }
}

module attributes {stable_mosaic.version = 11 : i64} {
  func.func @_gemm_split_kernel(%arg0: i32, %arg1: memref<64x1152xbf16, #tpu.memory_space<vmem>>, %arg2: memref<1152x256xbf16, #tpu.memory_space<vmem>>, %arg3: memref<1x256xf32, #tpu.memory_space<vmem>>, %arg4: memref<64x128xbf16, #tpu.memory_space<vmem>>, %arg5: memref<64x128xbf16, #tpu.memory_space<vmem>>) attributes {dimension_semantics = [#tpu.dimension_semantics<parallel>], iteration_bounds = array<i64: 2>, scalar_prefetch = 0 : i64, scratch_operands = 0 : i64, tpu.core_type = #tpu.core_type<tc>, window_params = [{transform_indices = @transform_0, window_bounds = array<i64: 64, 1152>}, {pipeline_mode = #tpu.pipeline_mode<synchronous>, transform_indices = @transform_1, window_bounds = array<i64: 1152, 256>}, {pipeline_mode = #tpu.pipeline_mode<synchronous>, transform_indices = @transform_2, window_bounds = array<i64: 1, 256>}, {transform_indices = @transform_3, window_bounds = array<i64: 64, 128>}, {transform_indices = @transform_4, window_bounds = array<i64: 64, 128>}]} {
    %c0 = arith.constant 0 : index
    %c0_0 = arith.constant 0 : index
    %0 = vector.load %arg1[%c0, %c0_0] : memref<64x1152xbf16, #tpu.memory_space<vmem>>, vector<64x1152xbf16>
    %c0_1 = arith.constant 0 : index
    %c0_2 = arith.constant 0 : index
    %1 = vector.load %arg2[%c0_1, %c0_2] : memref<1152x256xbf16, #tpu.memory_space<vmem>>, vector<1152x256xbf16>
    %cst = arith.constant dense<0.000000e+00> : vector<64x256xf32>
    %2 = tpu.matmul %0, %1, %cst {dimension_numbers = #tpu.dot_dimension_numbers<[1], [0], [0], [1], [0, 0, 1, 1], [], []>} : vector<64x1152xbf16>, vector<1152x256xbf16>, vector<64x256xf32> -> vector<64x256xf32>
    %c0_3 = arith.constant 0 : index
    %c0_4 = arith.constant 0 : index
    %3 = vector.load %arg3[%c0_3, %c0_4] : memref<1x256xf32, #tpu.memory_space<vmem>>, vector<1x256xf32>
    %4 = vector.broadcast %3 : vector<1x256xf32> to vector<64x256xf32>
    %5 = arith.addf %2, %4 : vector<64x256xf32>
    %6 = vector.extract_strided_slice %5 {offsets = [0, 0], sizes = [64, 128], strides = [1, 1]} : vector<64x256xf32> to vector<64x128xf32>
    %cst_5 = arith.constant 0.000000e+00 : f32
    %7 = vector.broadcast %cst_5 : f32 to vector<64x128xf32>
    %8 = arith.maximumf %6, %7 : vector<64x128xf32>
    %9 = arith.truncf %8 : vector<64x128xf32> to vector<64x128xbf16>
    %c0_6 = arith.constant 0 : index
    %c0_7 = arith.constant 0 : index
    %10 = vector.load %arg4[%c0_6, %c0_7] : memref<64x128xbf16, #tpu.memory_space<vmem>>, vector<64x128xbf16>
    tpu.vector_store %arg4[%c0_6, %c0_7], %9 {strides = array<i32>} : memref<64x128xbf16, #tpu.memory_space<vmem>>, vector<64x128xbf16>,
    %11 = vector.extract_strided_slice %5 {offsets = [0, 128], sizes = [64, 128], strides = [1, 1]} : vector<64x256xf32> to vector<64x128xf32>
    %12 = arith.truncf %11 : vector<64x128xf32> to vector<64x128xbf16>
    %c0_8 = arith.constant 0 : index
    %c0_9 = arith.constant 0 : index
    %13 = vector.load %arg5[%c0_8, %c0_9] : memref<64x128xbf16, #tpu.memory_space<vmem>>, vector<64x128xbf16>
    tpu.vector_store %arg5[%c0_8, %c0_9], %12 {strides = array<i32>} : memref<64x128xbf16, #tpu.memory_space<vmem>>, vector<64x128xbf16>,
    return
  }
  func.func @transform_0(%arg0: i32) -> (i32, i32) {
    %c0_i32 = arith.constant 0 : i32
    %c0_i32_0 = arith.constant 0 : i32
    return %arg0, %c0_i32 : i32, i32
  }
  func.func @transform_1(%arg0: i32) -> (i32, i32) {
    %c0_i32 = arith.constant 0 : i32
    %c0_i32_0 = arith.constant 0 : i32
    %c0_i32_1 = arith.constant 0 : i32
    return %c0_i32, %c0_i32_0 : i32, i32
  }
  func.func @transform_2(%arg0: i32) -> (i32, i32) {
    %c0_i32 = arith.constant 0 : i32
    %c0_i32_0 = arith.constant 0 : i32
    %c0_i32_1 = arith.constant 0 : i32
    return %c0_i32, %c0_i32_0 : i32, i32
  }
  func.func @transform_3(%arg0: i32) -> (i32, i32) {
    %c0_i32 = arith.constant 0 : i32
    %c0_i32_0 = arith.constant 0 : i32
    return %arg0, %c0_i32 : i32, i32
  }
  func.func @transform_4(%arg0: i32) -> (i32, i32) {
    %c0_i32 = arith.constant 0 : i32
    %c0_i32_0 = arith.constant 0 : i32
    return %arg0, %c0_i32 : i32, i32
  }
}

module attributes {stable_mosaic.version = 11 : i64} {
  func.func @_gemm_residual_kernel(%arg0: i32, %arg1: memref<64x1152xbf16, #tpu.memory_space<vmem>>, %arg2: memref<1152x128xbf16, #tpu.memory_space<vmem>>, %arg3: memref<1x128xf32, #tpu.memory_space<vmem>>, %arg4: memref<64x128xbf16, #tpu.memory_space<vmem>>, %arg5: memref<64x128xbf16, #tpu.memory_space<vmem>>) attributes {dimension_semantics = [#tpu.dimension_semantics<parallel>], iteration_bounds = array<i64: 2>, scalar_prefetch = 0 : i64, scratch_operands = 0 : i64, tpu.core_type = #tpu.core_type<tc>, window_params = [{transform_indices = @transform_0, window_bounds = array<i64: 64, 1152>}, {pipeline_mode = #tpu.pipeline_mode<synchronous>, transform_indices = @transform_1, window_bounds = array<i64: 1152, 128>}, {pipeline_mode = #tpu.pipeline_mode<synchronous>, transform_indices = @transform_2, window_bounds = array<i64: 1, 128>}, {transform_indices = @transform_3, window_bounds = array<i64: 64, 128>}, {transform_indices = @transform_4, window_bounds = array<i64: 64, 128>}]} {
    %c0 = arith.constant 0 : index
    %c0_0 = arith.constant 0 : index
    %0 = vector.load %arg1[%c0, %c0_0] : memref<64x1152xbf16, #tpu.memory_space<vmem>>, vector<64x1152xbf16>
    %c0_1 = arith.constant 0 : index
    %c0_2 = arith.constant 0 : index
    %1 = vector.load %arg2[%c0_1, %c0_2] : memref<1152x128xbf16, #tpu.memory_space<vmem>>, vector<1152x128xbf16>
    %cst = arith.constant dense<0.000000e+00> : vector<64x128xf32>
    %2 = tpu.matmul %0, %1, %cst {dimension_numbers = #tpu.dot_dimension_numbers<[1], [0], [0], [1], [0, 0, 1, 1], [], []>} : vector<64x1152xbf16>, vector<1152x128xbf16>, vector<64x128xf32> -> vector<64x128xf32>
    %c0_3 = arith.constant 0 : index
    %c0_4 = arith.constant 0 : index
    %3 = vector.load %arg3[%c0_3, %c0_4] : memref<1x128xf32, #tpu.memory_space<vmem>>, vector<1x128xf32>
    %4 = vector.broadcast %3 : vector<1x128xf32> to vector<64x128xf32>
    %5 = arith.addf %2, %4 : vector<64x128xf32>
    %c0_5 = arith.constant 0 : index
    %c0_6 = arith.constant 0 : index
    %6 = vector.load %arg4[%c0_5, %c0_6] : memref<64x128xbf16, #tpu.memory_space<vmem>>, vector<64x128xbf16>
    %7 = arith.extf %6 : vector<64x128xbf16> to vector<64x128xf32>
    %8 = arith.addf %5, %7 : vector<64x128xf32>
    %cst_7 = arith.constant 0.000000e+00 : f32
    %9 = vector.broadcast %cst_7 : f32 to vector<64x128xf32>
    %10 = arith.maximumf %8, %9 : vector<64x128xf32>
    %11 = arith.truncf %10 : vector<64x128xf32> to vector<64x128xbf16>
    %c0_8 = arith.constant 0 : index
    %c0_9 = arith.constant 0 : index
    %12 = vector.load %arg5[%c0_8, %c0_9] : memref<64x128xbf16, #tpu.memory_space<vmem>>, vector<64x128xbf16>
    tpu.vector_store %arg5[%c0_8, %c0_9], %11 {strides = array<i32>} : memref<64x128xbf16, #tpu.memory_space<vmem>>, vector<64x128xbf16>,
    return
  }
  func.func @transform_0(%arg0: i32) -> (i32, i32) {
    %c0_i32 = arith.constant 0 : i32
    %c0_i32_0 = arith.constant 0 : i32
    return %arg0, %c0_i32 : i32, i32
  }
  func.func @transform_1(%arg0: i32) -> (i32, i32) {
    %c0_i32 = arith.constant 0 : i32
    %c0_i32_0 = arith.constant 0 : i32
    %c0_i32_1 = arith.constant 0 : i32
    return %c0_i32, %c0_i32_0 : i32, i32
  }
  func.func @transform_2(%arg0: i32) -> (i32, i32) {
    %c0_i32 = arith.constant 0 : i32
    %c0_i32_0 = arith.constant 0 : i32
    %c0_i32_1 = arith.constant 0 : i32
    return %c0_i32, %c0_i32_0 : i32, i32
  }
  func.func @transform_3(%arg0: i32) -> (i32, i32) {
    %c0_i32 = arith.constant 0 : i32
    %c0_i32_0 = arith.constant 0 : i32
    return %arg0, %c0_i32 : i32, i32
  }
  func.func @transform_4(%arg0: i32) -> (i32, i32) {
    %c0_i32 = arith.constant 0 : i32
    %c0_i32_0 = arith.constant 0 : i32
    return %arg0, %c0_i32 : i32, i32
  }
}

module attributes {stable_mosaic.version = 11 : i64} {
  func.func @_gemm_split_kernel(%arg0: i32, %arg1: memref<16x1152xbf16, #tpu.memory_space<vmem>>, %arg2: memref<1152x256xbf16, #tpu.memory_space<vmem>>, %arg3: memref<1x256xf32, #tpu.memory_space<vmem>>, %arg4: memref<16x128xbf16, #tpu.memory_space<vmem>>, %arg5: memref<16x128xbf16, #tpu.memory_space<vmem>>) attributes {dimension_semantics = [#tpu.dimension_semantics<parallel>], iteration_bounds = array<i64: 2>, scalar_prefetch = 0 : i64, scratch_operands = 0 : i64, tpu.core_type = #tpu.core_type<tc>, window_params = [{transform_indices = @transform_0, window_bounds = array<i64: 16, 1152>}, {pipeline_mode = #tpu.pipeline_mode<synchronous>, transform_indices = @transform_1, window_bounds = array<i64: 1152, 256>}, {pipeline_mode = #tpu.pipeline_mode<synchronous>, transform_indices = @transform_2, window_bounds = array<i64: 1, 256>}, {transform_indices = @transform_3, window_bounds = array<i64: 16, 128>}, {transform_indices = @transform_4, window_bounds = array<i64: 16, 128>}]} {
    %c0 = arith.constant 0 : index
    %c0_0 = arith.constant 0 : index
    %0 = vector.load %arg1[%c0, %c0_0] : memref<16x1152xbf16, #tpu.memory_space<vmem>>, vector<16x1152xbf16>
    %c0_1 = arith.constant 0 : index
    %c0_2 = arith.constant 0 : index
    %1 = vector.load %arg2[%c0_1, %c0_2] : memref<1152x256xbf16, #tpu.memory_space<vmem>>, vector<1152x256xbf16>
    %cst = arith.constant dense<0.000000e+00> : vector<16x256xf32>
    %2 = tpu.matmul %0, %1, %cst {dimension_numbers = #tpu.dot_dimension_numbers<[1], [0], [0], [1], [0, 0, 1, 1], [], []>} : vector<16x1152xbf16>, vector<1152x256xbf16>, vector<16x256xf32> -> vector<16x256xf32>
    %c0_3 = arith.constant 0 : index
    %c0_4 = arith.constant 0 : index
    %3 = vector.load %arg3[%c0_3, %c0_4] : memref<1x256xf32, #tpu.memory_space<vmem>>, vector<1x256xf32>
    %4 = vector.broadcast %3 : vector<1x256xf32> to vector<16x256xf32>
    %5 = arith.addf %2, %4 : vector<16x256xf32>
    %6 = vector.extract_strided_slice %5 {offsets = [0, 0], sizes = [16, 128], strides = [1, 1]} : vector<16x256xf32> to vector<16x128xf32>
    %cst_5 = arith.constant 0.000000e+00 : f32
    %7 = vector.broadcast %cst_5 : f32 to vector<16x128xf32>
    %8 = arith.maximumf %6, %7 : vector<16x128xf32>
    %9 = arith.truncf %8 : vector<16x128xf32> to vector<16x128xbf16>
    %c0_6 = arith.constant 0 : index
    %c0_7 = arith.constant 0 : index
    %10 = vector.load %arg4[%c0_6, %c0_7] : memref<16x128xbf16, #tpu.memory_space<vmem>>, vector<16x128xbf16>
    tpu.vector_store %arg4[%c0_6, %c0_7], %9 {strides = array<i32>} : memref<16x128xbf16, #tpu.memory_space<vmem>>, vector<16x128xbf16>,
    %11 = vector.extract_strided_slice %5 {offsets = [0, 128], sizes = [16, 128], strides = [1, 1]} : vector<16x256xf32> to vector<16x128xf32>
    %12 = arith.truncf %11 : vector<16x128xf32> to vector<16x128xbf16>
    %c0_8 = arith.constant 0 : index
    %c0_9 = arith.constant 0 : index
    %13 = vector.load %arg5[%c0_8, %c0_9] : memref<16x128xbf16, #tpu.memory_space<vmem>>, vector<16x128xbf16>
    tpu.vector_store %arg5[%c0_8, %c0_9], %12 {strides = array<i32>} : memref<16x128xbf16, #tpu.memory_space<vmem>>, vector<16x128xbf16>,
    return
  }
  func.func @transform_0(%arg0: i32) -> (i32, i32) {
    %c0_i32 = arith.constant 0 : i32
    %c0_i32_0 = arith.constant 0 : i32
    return %arg0, %c0_i32 : i32, i32
  }
  func.func @transform_1(%arg0: i32) -> (i32, i32) {
    %c0_i32 = arith.constant 0 : i32
    %c0_i32_0 = arith.constant 0 : i32
    %c0_i32_1 = arith.constant 0 : i32
    return %c0_i32, %c0_i32_0 : i32, i32
  }
  func.func @transform_2(%arg0: i32) -> (i32, i32) {
    %c0_i32 = arith.constant 0 : i32
    %c0_i32_0 = arith.constant 0 : i32
    %c0_i32_1 = arith.constant 0 : i32
    return %c0_i32, %c0_i32_0 : i32, i32
  }
  func.func @transform_3(%arg0: i32) -> (i32, i32) {
    %c0_i32 = arith.constant 0 : i32
    %c0_i32_0 = arith.constant 0 : i32
    return %arg0, %c0_i32 : i32, i32
  }
  func.func @transform_4(%arg0: i32) -> (i32, i32) {
    %c0_i32 = arith.constant 0 : i32
    %c0_i32_0 = arith.constant 0 : i32
    return %arg0, %c0_i32 : i32, i32
  }
}

module attributes {stable_mosaic.version = 11 : i64} {
  func.func @_gemm_residual_kernel(%arg0: i32, %arg1: memref<16x1152xbf16, #tpu.memory_space<vmem>>, %arg2: memref<1152x128xbf16, #tpu.memory_space<vmem>>, %arg3: memref<1x128xf32, #tpu.memory_space<vmem>>, %arg4: memref<16x128xbf16, #tpu.memory_space<vmem>>, %arg5: memref<16x128xbf16, #tpu.memory_space<vmem>>) attributes {dimension_semantics = [#tpu.dimension_semantics<parallel>], iteration_bounds = array<i64: 2>, scalar_prefetch = 0 : i64, scratch_operands = 0 : i64, tpu.core_type = #tpu.core_type<tc>, window_params = [{transform_indices = @transform_0, window_bounds = array<i64: 16, 1152>}, {pipeline_mode = #tpu.pipeline_mode<synchronous>, transform_indices = @transform_1, window_bounds = array<i64: 1152, 128>}, {pipeline_mode = #tpu.pipeline_mode<synchronous>, transform_indices = @transform_2, window_bounds = array<i64: 1, 128>}, {transform_indices = @transform_3, window_bounds = array<i64: 16, 128>}, {transform_indices = @transform_4, window_bounds = array<i64: 16, 128>}]} {
    %c0 = arith.constant 0 : index
    %c0_0 = arith.constant 0 : index
    %0 = vector.load %arg1[%c0, %c0_0] : memref<16x1152xbf16, #tpu.memory_space<vmem>>, vector<16x1152xbf16>
    %c0_1 = arith.constant 0 : index
    %c0_2 = arith.constant 0 : index
    %1 = vector.load %arg2[%c0_1, %c0_2] : memref<1152x128xbf16, #tpu.memory_space<vmem>>, vector<1152x128xbf16>
    %cst = arith.constant dense<0.000000e+00> : vector<16x128xf32>
    %2 = tpu.matmul %0, %1, %cst {dimension_numbers = #tpu.dot_dimension_numbers<[1], [0], [0], [1], [0, 0, 1, 1], [], []>} : vector<16x1152xbf16>, vector<1152x128xbf16>, vector<16x128xf32> -> vector<16x128xf32>
    %c0_3 = arith.constant 0 : index
    %c0_4 = arith.constant 0 : index
    %3 = vector.load %arg3[%c0_3, %c0_4] : memref<1x128xf32, #tpu.memory_space<vmem>>, vector<1x128xf32>
    %4 = vector.broadcast %3 : vector<1x128xf32> to vector<16x128xf32>
    %5 = arith.addf %2, %4 : vector<16x128xf32>
    %c0_5 = arith.constant 0 : index
    %c0_6 = arith.constant 0 : index
    %6 = vector.load %arg4[%c0_5, %c0_6] : memref<16x128xbf16, #tpu.memory_space<vmem>>, vector<16x128xbf16>
    %7 = arith.extf %6 : vector<16x128xbf16> to vector<16x128xf32>
    %8 = arith.addf %5, %7 : vector<16x128xf32>
    %cst_7 = arith.constant 0.000000e+00 : f32
    %9 = vector.broadcast %cst_7 : f32 to vector<16x128xf32>
    %10 = arith.maximumf %8, %9 : vector<16x128xf32>
    %11 = arith.truncf %10 : vector<16x128xf32> to vector<16x128xbf16>
    %c0_8 = arith.constant 0 : index
    %c0_9 = arith.constant 0 : index
    %12 = vector.load %arg5[%c0_8, %c0_9] : memref<16x128xbf16, #tpu.memory_space<vmem>>, vector<16x128xbf16>
    tpu.vector_store %arg5[%c0_8, %c0_9], %11 {strides = array<i32>} : memref<16x128xbf16, #tpu.memory_space<vmem>>, vector<16x128xbf16>,
    return
  }
  func.func @transform_0(%arg0: i32) -> (i32, i32) {
    %c0_i32 = arith.constant 0 : i32
    %c0_i32_0 = arith.constant 0 : i32
    return %arg0, %c0_i32 : i32, i32
  }
  func.func @transform_1(%arg0: i32) -> (i32, i32) {
    %c0_i32 = arith.constant 0 : i32
    %c0_i32_0 = arith.constant 0 : i32
    %c0_i32_1 = arith.constant 0 : i32
    return %c0_i32, %c0_i32_0 : i32, i32
  }
  func.func @transform_2(%arg0: i32) -> (i32, i32) {
    %c0_i32 = arith.constant 0 : i32
    %c0_i32_0 = arith.constant 0 : i32
    %c0_i32_1 = arith.constant 0 : i32
    return %c0_i32, %c0_i32_0 : i32, i32
  }
  func.func @transform_3(%arg0: i32) -> (i32, i32) {
    %c0_i32 = arith.constant 0 : i32
    %c0_i32_0 = arith.constant 0 : i32
    return %arg0, %c0_i32 : i32, i32
  }
  func.func @transform_4(%arg0: i32) -> (i32, i32) {
    %c0_i32 = arith.constant 0 : i32
    %c0_i32_0 = arith.constant 0 : i32
    return %arg0, %c0_i32 : i32, i32
  }
}

module attributes {stable_mosaic.version = 11 : i64} {
  func.func @_gemm_split_kernel(%arg0: i32, %arg1: memref<16x1152xbf16, #tpu.memory_space<vmem>>, %arg2: memref<1152x256xbf16, #tpu.memory_space<vmem>>, %arg3: memref<1x256xf32, #tpu.memory_space<vmem>>, %arg4: memref<16x128xbf16, #tpu.memory_space<vmem>>, %arg5: memref<16x128xbf16, #tpu.memory_space<vmem>>) attributes {dimension_semantics = [#tpu.dimension_semantics<parallel>], iteration_bounds = array<i64: 1>, scalar_prefetch = 0 : i64, scratch_operands = 0 : i64, tpu.core_type = #tpu.core_type<tc>, window_params = [{transform_indices = @transform_0, window_bounds = array<i64: 16, 1152>}, {pipeline_mode = #tpu.pipeline_mode<synchronous>, transform_indices = @transform_1, window_bounds = array<i64: 1152, 256>}, {pipeline_mode = #tpu.pipeline_mode<synchronous>, transform_indices = @transform_2, window_bounds = array<i64: 1, 256>}, {transform_indices = @transform_3, window_bounds = array<i64: 16, 128>}, {transform_indices = @transform_4, window_bounds = array<i64: 16, 128>}]} {
    %c0 = arith.constant 0 : index
    %c0_0 = arith.constant 0 : index
    %0 = vector.load %arg1[%c0, %c0_0] : memref<16x1152xbf16, #tpu.memory_space<vmem>>, vector<16x1152xbf16>
    %c0_1 = arith.constant 0 : index
    %c0_2 = arith.constant 0 : index
    %1 = vector.load %arg2[%c0_1, %c0_2] : memref<1152x256xbf16, #tpu.memory_space<vmem>>, vector<1152x256xbf16>
    %cst = arith.constant dense<0.000000e+00> : vector<16x256xf32>
    %2 = tpu.matmul %0, %1, %cst {dimension_numbers = #tpu.dot_dimension_numbers<[1], [0], [0], [1], [0, 0, 1, 1], [], []>} : vector<16x1152xbf16>, vector<1152x256xbf16>, vector<16x256xf32> -> vector<16x256xf32>
    %c0_3 = arith.constant 0 : index
    %c0_4 = arith.constant 0 : index
    %3 = vector.load %arg3[%c0_3, %c0_4] : memref<1x256xf32, #tpu.memory_space<vmem>>, vector<1x256xf32>
    %4 = vector.broadcast %3 : vector<1x256xf32> to vector<16x256xf32>
    %5 = arith.addf %2, %4 : vector<16x256xf32>
    %6 = vector.extract_strided_slice %5 {offsets = [0, 0], sizes = [16, 128], strides = [1, 1]} : vector<16x256xf32> to vector<16x128xf32>
    %cst_5 = arith.constant 0.000000e+00 : f32
    %7 = vector.broadcast %cst_5 : f32 to vector<16x128xf32>
    %8 = arith.maximumf %6, %7 : vector<16x128xf32>
    %9 = arith.truncf %8 : vector<16x128xf32> to vector<16x128xbf16>
    %c0_6 = arith.constant 0 : index
    %c0_7 = arith.constant 0 : index
    %10 = vector.load %arg4[%c0_6, %c0_7] : memref<16x128xbf16, #tpu.memory_space<vmem>>, vector<16x128xbf16>
    tpu.vector_store %arg4[%c0_6, %c0_7], %9 {strides = array<i32>} : memref<16x128xbf16, #tpu.memory_space<vmem>>, vector<16x128xbf16>,
    %11 = vector.extract_strided_slice %5 {offsets = [0, 128], sizes = [16, 128], strides = [1, 1]} : vector<16x256xf32> to vector<16x128xf32>
    %12 = arith.truncf %11 : vector<16x128xf32> to vector<16x128xbf16>
    %c0_8 = arith.constant 0 : index
    %c0_9 = arith.constant 0 : index
    %13 = vector.load %arg5[%c0_8, %c0_9] : memref<16x128xbf16, #tpu.memory_space<vmem>>, vector<16x128xbf16>
    tpu.vector_store %arg5[%c0_8, %c0_9], %12 {strides = array<i32>} : memref<16x128xbf16, #tpu.memory_space<vmem>>, vector<16x128xbf16>,
    return
  }
  func.func @transform_0(%arg0: i32) -> (i32, i32) {
    %c0_i32 = arith.constant 0 : i32
    %c0_i32_0 = arith.constant 0 : i32
    return %arg0, %c0_i32 : i32, i32
  }
  func.func @transform_1(%arg0: i32) -> (i32, i32) {
    %c0_i32 = arith.constant 0 : i32
    %c0_i32_0 = arith.constant 0 : i32
    %c0_i32_1 = arith.constant 0 : i32
    return %c0_i32, %c0_i32_0 : i32, i32
  }
  func.func @transform_2(%arg0: i32) -> (i32, i32) {
    %c0_i32 = arith.constant 0 : i32
    %c0_i32_0 = arith.constant 0 : i32
    %c0_i32_1 = arith.constant 0 : i32
    return %c0_i32, %c0_i32_0 : i32, i32
  }
  func.func @transform_3(%arg0: i32) -> (i32, i32) {
    %c0_i32 = arith.constant 0 : i32
    %c0_i32_0 = arith.constant 0 : i32
    return %arg0, %c0_i32 : i32, i32
  }
  func.func @transform_4(%arg0: i32) -> (i32, i32) {
    %c0_i32 = arith.constant 0 : i32
    %c0_i32_0 = arith.constant 0 : i32
    return %arg0, %c0_i32 : i32, i32
  }
}

module attributes {stable_mosaic.version = 11 : i64} {
  func.func @_gemm_residual_kernel(%arg0: i32, %arg1: memref<16x1152xbf16, #tpu.memory_space<vmem>>, %arg2: memref<1152x128xbf16, #tpu.memory_space<vmem>>, %arg3: memref<1x128xf32, #tpu.memory_space<vmem>>, %arg4: memref<16x128xbf16, #tpu.memory_space<vmem>>, %arg5: memref<16x128xbf16, #tpu.memory_space<vmem>>) attributes {dimension_semantics = [#tpu.dimension_semantics<parallel>], iteration_bounds = array<i64: 1>, scalar_prefetch = 0 : i64, scratch_operands = 0 : i64, tpu.core_type = #tpu.core_type<tc>, window_params = [{transform_indices = @transform_0, window_bounds = array<i64: 16, 1152>}, {pipeline_mode = #tpu.pipeline_mode<synchronous>, transform_indices = @transform_1, window_bounds = array<i64: 1152, 128>}, {pipeline_mode = #tpu.pipeline_mode<synchronous>, transform_indices = @transform_2, window_bounds = array<i64: 1, 128>}, {transform_indices = @transform_3, window_bounds = array<i64: 16, 128>}, {transform_indices = @transform_4, window_bounds = array<i64: 16, 128>}]} {
    %c0 = arith.constant 0 : index
    %c0_0 = arith.constant 0 : index
    %0 = vector.load %arg1[%c0, %c0_0] : memref<16x1152xbf16, #tpu.memory_space<vmem>>, vector<16x1152xbf16>
    %c0_1 = arith.constant 0 : index
    %c0_2 = arith.constant 0 : index
    %1 = vector.load %arg2[%c0_1, %c0_2] : memref<1152x128xbf16, #tpu.memory_space<vmem>>, vector<1152x128xbf16>
    %cst = arith.constant dense<0.000000e+00> : vector<16x128xf32>
    %2 = tpu.matmul %0, %1, %cst {dimension_numbers = #tpu.dot_dimension_numbers<[1], [0], [0], [1], [0, 0, 1, 1], [], []>} : vector<16x1152xbf16>, vector<1152x128xbf16>, vector<16x128xf32> -> vector<16x128xf32>
    %c0_3 = arith.constant 0 : index
    %c0_4 = arith.constant 0 : index
    %3 = vector.load %arg3[%c0_3, %c0_4] : memref<1x128xf32, #tpu.memory_space<vmem>>, vector<1x128xf32>
    %4 = vector.broadcast %3 : vector<1x128xf32> to vector<16x128xf32>
    %5 = arith.addf %2, %4 : vector<16x128xf32>
    %c0_5 = arith.constant 0 : index
    %c0_6 = arith.constant 0 : index
    %6 = vector.load %arg4[%c0_5, %c0_6] : memref<16x128xbf16, #tpu.memory_space<vmem>>, vector<16x128xbf16>
    %7 = arith.extf %6 : vector<16x128xbf16> to vector<16x128xf32>
    %8 = arith.addf %5, %7 : vector<16x128xf32>
    %cst_7 = arith.constant 0.000000e+00 : f32
    %9 = vector.broadcast %cst_7 : f32 to vector<16x128xf32>
    %10 = arith.maximumf %8, %9 : vector<16x128xf32>
    %11 = arith.truncf %10 : vector<16x128xf32> to vector<16x128xbf16>
    %c0_8 = arith.constant 0 : index
    %c0_9 = arith.constant 0 : index
    %12 = vector.load %arg5[%c0_8, %c0_9] : memref<16x128xbf16, #tpu.memory_space<vmem>>, vector<16x128xbf16>
    tpu.vector_store %arg5[%c0_8, %c0_9], %11 {strides = array<i32>} : memref<16x128xbf16, #tpu.memory_space<vmem>>, vector<16x128xbf16>,
    return
  }
  func.func @transform_0(%arg0: i32) -> (i32, i32) {
    %c0_i32 = arith.constant 0 : i32
    %c0_i32_0 = arith.constant 0 : i32
    return %arg0, %c0_i32 : i32, i32
  }
  func.func @transform_1(%arg0: i32) -> (i32, i32) {
    %c0_i32 = arith.constant 0 : i32
    %c0_i32_0 = arith.constant 0 : i32
    %c0_i32_1 = arith.constant 0 : i32
    return %c0_i32, %c0_i32_0 : i32, i32
  }
  func.func @transform_2(%arg0: i32) -> (i32, i32) {
    %c0_i32 = arith.constant 0 : i32
    %c0_i32_0 = arith.constant 0 : i32
    %c0_i32_1 = arith.constant 0 : i32
    return %c0_i32, %c0_i32_0 : i32, i32
  }
  func.func @transform_3(%arg0: i32) -> (i32, i32) {
    %c0_i32 = arith.constant 0 : i32
    %c0_i32_0 = arith.constant 0 : i32
    return %arg0, %c0_i32 : i32, i32
  }
  func.func @transform_4(%arg0: i32) -> (i32, i32) {
    %c0_i32 = arith.constant 0 : i32
    %c0_i32_0 = arith.constant 0 : i32
    return %arg0, %c0_i32 : i32, i32
  }
}

module attributes {stable_mosaic.version = 11 : i64} {
  func.func @_gemm_kernel(%arg0: i32, %arg1: memref<16x128xbf16, #tpu.memory_space<vmem>>, %arg2: memref<128x128xbf16, #tpu.memory_space<vmem>>, %arg3: memref<1x128xf32, #tpu.memory_space<vmem>>, %arg4: memref<16x128xf32, #tpu.memory_space<vmem>>) attributes {dimension_semantics = [#tpu.dimension_semantics<parallel>], iteration_bounds = array<i64: 1>, scalar_prefetch = 0 : i64, scratch_operands = 0 : i64, tpu.core_type = #tpu.core_type<tc>, window_params = [{transform_indices = @transform_0, window_bounds = array<i64: 16, 128>}, {pipeline_mode = #tpu.pipeline_mode<synchronous>, transform_indices = @transform_1, window_bounds = array<i64: 128, 128>}, {pipeline_mode = #tpu.pipeline_mode<synchronous>, transform_indices = @transform_2, window_bounds = array<i64: 1, 128>}, {transform_indices = @transform_3, window_bounds = array<i64: 16, 128>}]} {
    %c0 = arith.constant 0 : index
    %c0_0 = arith.constant 0 : index
    %0 = vector.load %arg1[%c0, %c0_0] : memref<16x128xbf16, #tpu.memory_space<vmem>>, vector<16x128xbf16>
    %c0_1 = arith.constant 0 : index
    %c0_2 = arith.constant 0 : index
    %1 = vector.load %arg2[%c0_1, %c0_2] : memref<128x128xbf16, #tpu.memory_space<vmem>>, vector<128x128xbf16>
    %cst = arith.constant dense<0.000000e+00> : vector<16x128xf32>
    %2 = tpu.matmul %0, %1, %cst {dimension_numbers = #tpu.dot_dimension_numbers<[1], [0], [0], [1], [0, 0, 1, 1], [], []>} : vector<16x128xbf16>, vector<128x128xbf16>, vector<16x128xf32> -> vector<16x128xf32>
    %c0_3 = arith.constant 0 : index
    %c0_4 = arith.constant 0 : index
    %3 = vector.load %arg3[%c0_3, %c0_4] : memref<1x128xf32, #tpu.memory_space<vmem>>, vector<1x128xf32>
    %4 = vector.broadcast %3 : vector<1x128xf32> to vector<16x128xf32>
    %5 = arith.addf %2, %4 : vector<16x128xf32>
    %cst_5 = arith.constant 0.000000e+00 : f32
    %6 = vector.broadcast %cst_5 : f32 to vector<16x128xf32>
    %7 = arith.maximumf %5, %6 : vector<16x128xf32>
    %c0_6 = arith.constant 0 : index
    %c0_7 = arith.constant 0 : index
    %8 = vector.load %arg4[%c0_6, %c0_7] : memref<16x128xf32, #tpu.memory_space<vmem>>, vector<16x128xf32>
    tpu.vector_store %arg4[%c0_6, %c0_7], %7 {strides = array<i32>} : memref<16x128xf32, #tpu.memory_space<vmem>>, vector<16x128xf32>,
    return
  }
  func.func @transform_0(%arg0: i32) -> (i32, i32) {
    %c0_i32 = arith.constant 0 : i32
    %c0_i32_0 = arith.constant 0 : i32
    return %arg0, %c0_i32 : i32, i32
  }
  func.func @transform_1(%arg0: i32) -> (i32, i32) {
    %c0_i32 = arith.constant 0 : i32
    %c0_i32_0 = arith.constant 0 : i32
    %c0_i32_1 = arith.constant 0 : i32
    return %c0_i32, %c0_i32_0 : i32, i32
  }
  func.func @transform_2(%arg0: i32) -> (i32, i32) {
    %c0_i32 = arith.constant 0 : i32
    %c0_i32_0 = arith.constant 0 : i32
    %c0_i32_1 = arith.constant 0 : i32
    return %c0_i32, %c0_i32_0 : i32, i32
  }
  func.func @transform_3(%arg0: i32) -> (i32, i32) {
    %c0_i32 = arith.constant 0 : i32
    %c0_i32_0 = arith.constant 0 : i32
    return %arg0, %c0_i32 : i32, i32
  }
}

</mosaic_0001>

<bundles_post_ra>
// kernel: resnet_image_encoder_forward.11
= control target key start
LH: loop header
LB: loop body
LE: loop exit
PB: predicated region body
PF: predicated region fallthrough
CT: control target
= control target key end

     0   :  { %s1363_s12 = smov 0   ;;  %s1521_s0 = inlined_call_operand.vmem [shape: bf16[2048,256], index: 0, kind: input, shape index: {}]   ;;  %s1522_s1 = inlined_call_operand.vmem [shape: bf16[256,128], index: 1, kind: input, shape index: {}]   ;;  %s1523_s2 = inlined_call_operand.vmem [shape: f32[1,128], index: 2, kind: input, shape index: {}]   ;;  %s1524_s3 = inlined_call_operand.vmem [shape: bf16[2048,128], index: 3, kind: output, shape index: {}]  }
   0x1 LB: > { %s914_s13 = sadd.s32 4294967295, %s1341_s12   ;;  %p918_p0 = scmp.ge.s32.totalorder %s1341_s12, 1  ;;  %s1341_s12 = sphi %s1363_s12, %s13_s12  }
   0x2   : > { %p139_p1 = scmp.lt.s32.totalorder %s1341_s12, 9 }
   0x4   : > { %p140_p2 = pnand %p918_p0, %p139_p1 }
   0x5   : > { %v1271_v0 = vld [vmem:[%s1522_s1 + $0x40] sm:$0xff] (!%p140_p2)   ;;  %s919_s16 = sshll.u32 (!%p140_p2), %s914_s13, 5  ;;  %v1273_v2 = vld [vmem:[%s1522_s1 + $0x48] sm:$0xff] (!%p140_p2)   ;;  %v1275_v4 = vld [vmem:[%s1522_s1 + $0x50] sm:$0xff] (!%p140_p2)  }
   0x6   : > { %143 = sbr.rel (%p140_p2) target bundleno = 319 (0x13f), region = 32  ;;  %v1272_v1 = vld [vmem:[%s1522_s1] sm:$0xff] (!%p140_p2)   ;;  %1135 = vmatprep.subr.bf16.mxu0 (!%p140_p2), %v1271_v0  ;;  %1247 = vmatprep.subr.bf16.mxu1 (!%p140_p2), %v1271_v0  ;;  %v1274_v3 = vld [vmem:[%s1522_s1 + $0x8] sm:$0xff] (!%p140_p2)   ;;  %p165_p3 = scmp.lt.s32.totalorder (!%p140_p2), %s919_s16, 255  ;;  %v1276_v5 = vld [vmem:[%s1522_s1 + $0x10] sm:$0xff] (!%p140_p2)  }
   0x7   : > { %1136 = vmatpush3.bf16.msra.mxu0 (!%p140_p2), %v1272_v1  ;;  %1255 = vmatpush3.bf16.msra.mxu1 (!%p140_p2), %v1272_v1  ;;  %v1277_v6 = vld [vmem:[%s1522_s1 + $0x58] sm:$0xff] (!%p140_p2)   ;;  %v1279_v8 = vld [vmem:[%s1522_s1 + $0x60] sm:$0xff] (!%p140_p2)   ;;  %v1281_v10 = vld [vmem:[%s1522_s1 + $0x68] sm:$0xff] (!%p140_p2)  }
   0x8   : > { %1137 = vmatprep.subr.bf16.mxu0 (!%p140_p2), %v1273_v2  ;;  %1248 = vmatprep.subr.bf16.mxu1 (!%p140_p2), %v1273_v2  ;;  %v1278_v7 = vld [vmem:[%s1522_s1 + $0x18] sm:$0xff] (!%p140_p2)   ;;  %v1280_v9 = vld [vmem:[%s1522_s1 + $0x20] sm:$0xff] (!%p140_p2)   ;;  %v1282_v13 = vld [vmem:[%s1522_s1 + $0x28] sm:$0xff] (!%p140_p2)  }
   0x9   : > { %v1283_v14 = vld [vmem:[%s1522_s1 + $0x70] sm:$0xff] (!%p140_p2)   ;;  %v1285_v16 = vld [vmem:[%s1522_s1 + $0x78] sm:$0xff] (!%p140_p2)   ;;  %v1462_v50 = vld [vmem:[%s1523_s2] ss:$0 sm:$0xff] (!%p140_p2) }
   0xa   : > { %v1284_v15 = vld [vmem:[%s1522_s1 + $0x30] sm:$0xff] (!%p140_p2)   ;;  %v1286_v17 = vld [vmem:[%s1522_s1 + $0x38] sm:$0xff] (!%p140_p2)  }
   0xb   : > { %1138 = vmatpush3.bf16.msra.mxu0 (!%p140_p2), %v1274_v3  ;;  %1256 = vmatpush3.bf16.msra.mxu1 (!%p140_p2), %v1274_v3 }
   0xc   : > { %1139 = vmatprep.subr.bf16.mxu0 (!%p140_p2), %v1275_v4  ;;  %1249 = vmatprep.subr.bf16.mxu1 (!%p140_p2), %v1275_v4 }
   0xd   : > { %s1526_s16 = smov (!%p165_p3, %s919_s16), 255 }
   0xe   : > { %s1007_s4 = sshll.u32 %s1526_s16, 3  ;;  %s923_s28 = sshll.u32 %s1526_s16, 2 }
   0xf   : > { %1140 = vmatpush3.bf16.msra.mxu0 %v1276_v5  ;;  %1257 = vmatpush3.bf16.msra.mxu1 %v1276_v5  ;;  %s1404_s9 = scalar_lea.vmem %s1521_s0, %s1007_s4  ;;  %s1472_s4 = scalar_lea.vmem %s1524_s3, %s923_s28 }
  0x10   : > { %1141 = vmatprep.subr.bf16.mxu0 %v1277_v6  ;;  %1250 = vmatprep.subr.bf16.mxu1 %v1277_v6  ;;  %v1289_v11 = vld [vmem:[%s1404_s9 + $0x4] ss:$8 sps:$4 sm:$0xff]   ;;  %v1287_v18 = vld [vmem:[%s1404_s9] ss:$8 sps:$4 sm:$0xff]   ;;  %v1293_v20 = vld [vmem:[%s1404_s9 + $0x14] ss:$8 sps:$4 sm:$0xff]  }
  0x11   : > { %v1292_v12 = vld [vmem:[%s1404_s9 + $0x84] ss:$8 sps:$4 sm:$0xff]   ;;  %537 = vmatprep.mubr.bf16.mxu0 %v1289_v11  ;;  %v1290_v19 = vld [vmem:[%s1404_s9 + $0x80] ss:$8 sps:$4 sm:$0xff]   ;;  %v1295_v21 = vld [vmem:[%s1404_s9 + $0x94] ss:$8 sps:$4 sm:$0xff]  }
  0x12   : > { %601 = vmatprep.mubr.bf16.mxu1 %v1292_v12  ;;  %v1297_v22 = vld [vmem:[%s1404_s9 + $0x10] ss:$8 sps:$4 sm:$0xff]   ;;  %v1299_v24 = vld [vmem:[%s1404_s9 + $0x24] ss:$8 sps:$4 sm:$0xff]   ;;  %v1303_v26 = vld [vmem:[%s1404_s9 + $0x20] ss:$8 sps:$4 sm:$0xff]  }
  0x13   : > { %1142 = vmatpush3.bf16.msra.mxu0 %v1278_v7  ;;  %1258 = vmatpush3.bf16.msra.mxu1 %v1278_v7  ;;  %v1298_v23 = vld [vmem:[%s1404_s9 + $0x90] ss:$8 sps:$4 sm:$0xff]   ;;  %v1301_v25 = vld [vmem:[%s1404_s9 + $0xa4] ss:$8 sps:$4 sm:$0xff]   ;;  %v1304_v27 = vld [vmem:[%s1404_s9 + $0xa0] ss:$8 sps:$4 sm:$0xff]  }
  0x14   : > { %1143 = vmatprep.subr.bf16.mxu0 %v1279_v8  ;;  %1251 = vmatprep.subr.bf16.mxu1 %v1279_v8  ;;  %v1305_v28 = vld [vmem:[%s1404_s9 + $0x34] ss:$8 sps:$4 sm:$0xff]   ;;  %v1309_v30 = vld [vmem:[%s1404_s9 + $0x30] ss:$8 sps:$4 sm:$0xff]   ;;  %v1311_v32 = vld [vmem:[%s1404_s9 + $0x44] ss:$8 sps:$4 sm:$0xff]  }
  0x15   : > { %v1307_v29 = vld [vmem:[%s1404_s9 + $0xb4] ss:$8 sps:$4 sm:$0xff]   ;;  %v1310_v31 = vld [vmem:[%s1404_s9 + $0xb0] ss:$8 sps:$4 sm:$0xff]   ;;  %v1313_v33 = vld [vmem:[%s1404_s9 + $0xc4] ss:$8 sps:$4 sm:$0xff]  }
  0x16   : > { %v1315_v34 = vld [vmem:[%s1404_s9 + $0x40] ss:$8 sps:$4 sm:$0xff]   ;;  %v1317_v36 = vld [vmem:[%s1404_s9 + $0x54] ss:$8 sps:$4 sm:$0xff]   ;;  %v1321_v38 = vld [vmem:[%s1404_s9 + $0x50] ss:$8 sps:$4 sm:$0xff]  }
  0x17   : > { %1144 = vmatpush3.bf16.msra.mxu0 %v1280_v9  ;;  %1259 = vmatpush3.bf16.msra.mxu1 %v1280_v9  ;;  %v1316_v35 = vld [vmem:[%s1404_s9 + $0xc0] ss:$8 sps:$4 sm:$0xff]   ;;  %v1319_v37 = vld [vmem:[%s1404_s9 + $0xd4] ss:$8 sps:$4 sm:$0xff]   ;;  %v1322_v39 = vld [vmem:[%s1404_s9 + $0xd0] ss:$8 sps:$4 sm:$0xff]  }
  0x18   : > { %1145 = vmatprep.subr.bf16.mxu0 %v1281_v10  ;;  %1252 = vmatprep.subr.bf16.mxu1 %v1281_v10  ;;  %v1323_v40 = vld [vmem:[%s1404_s9 + $0x64] ss:$8 sps:$4 sm:$0xff]   ;;  %v1327_v42 = vld [vmem:[%s1404_s9 + $0x60] ss:$8 sps:$4 sm:$0xff]   ;;  %v1329_v44 = vld [vmem:[%s1404_s9 + $0x74] ss:$8 sps:$4 sm:$0xff]  }
  0x19   : > { %v1325_v41 = vld [vmem:[%s1404_s9 + $0xe4] ss:$8 sps:$4 sm:$0xff]   ;;  %v1328_v43 = vld [vmem:[%s1404_s9 + $0xe0] ss:$8 sps:$4 sm:$0xff]   ;;  %v1331_v45 = vld [vmem:[%s1404_s9 + $0xf4] ss:$8 sps:$4 sm:$0xff]  }
  0x1a   : > { %v1333_v46 = vld [vmem:[%s1404_s9 + $0x70] ss:$8 sps:$4 sm:$0xff]  }
  0x1b   : > { %1146 = vmatpush3.bf16.msra.mxu0 %v1282_v13  ;;  %1260 = vmatpush3.bf16.msra.mxu1 %v1282_v13  ;;  %v1334_v47 = vld [vmem:[%s1404_s9 + $0xf0] ss:$8 sps:$4 sm:$0xff]  }
  0x1c   : > { %1147 = vmatprep.subr.bf16.mxu0 %v1283_v14  ;;  %1253 = vmatprep.subr.bf16.mxu1 %v1283_v14 }
  0x1f   : > { %1148 = vmatpush3.bf16.msra.mxu0 %v1284_v15  ;;  %1261 = vmatpush3.bf16.msra.mxu1 %v1284_v15 }
  0x20   : > { %1149 = vmatprep.subr.bf16.mxu0 %v1285_v16  ;;  %1254 = vmatprep.subr.bf16.mxu1 %v1285_v16 }
  0x23   : > { %1150 = vmatpush3.bf16.msra.mxu0 %v1286_v17  ;;  %1262 = vmatpush3.bf16.msra.mxu1 %v1286_v17 }
  0x26   : > { %538 = vmatmul.mubr.bf16.vlgmr.msra.gmra.mrb[0].mxu0 %v1287_v18  ;;  %602 = vmatmul.mubr.bf16.vlgmr.msra.gmra.mrb[0].mxu1 %v1290_v19 }
  0x27   : > { %545 = vmatprep.mubr.bf16.mxu0 %v1293_v20  ;;  %609 = vmatprep.mubr.bf16.mxu1 %v1295_v21 }
  0x2e   : > { %546 = vmatmul.mubr.bf16.gmra.mrb[4].mxu0 %v1297_v22  ;;  %610 = vmatmul.mubr.bf16.gmra.mrb[4].mxu1 %v1298_v23 }
  0x2f   : > { %553 = vmatprep.mubr.bf16.mxu0 %v1299_v24  ;;  %617 = vmatprep.mubr.bf16.mxu1 %v1301_v25 }
  0x36   : > { %554 = vmatmul.mubr.bf16.gmra.mrb[8].mxu0 %v1303_v26  ;;  %618 = vmatmul.mubr.bf16.gmra.mrb[8].mxu1 %v1304_v27 }
  0x37   : > { %561 = vmatprep.mubr.bf16.mxu0 %v1305_v28  ;;  %625 = vmatprep.mubr.bf16.mxu1 %v1307_v29 }
  0x3e   : > { %562 = vmatmul.mubr.bf16.gmra.mrb[12].mxu0 %v1309_v30  ;;  %626 = vmatmul.mubr.bf16.gmra.mrb[12].mxu1 %v1310_v31 }
  0x3f   : > { %569 = vmatprep.mubr.bf16.mxu0 %v1311_v32  ;;  %633 = vmatprep.mubr.bf16.mxu1 %v1313_v33 }
  0x46   : > { %570 = vmatmul.mubr.bf16.gmra.mrb[16].mxu0 %v1315_v34  ;;  %634 = vmatmul.mubr.bf16.gmra.mrb[16].mxu1 %v1316_v35 }
  0x47   : > { %577 = vmatprep.mubr.bf16.mxu0 %v1317_v36  ;;  %641 = vmatprep.mubr.bf16.mxu1 %v1319_v37 }
  0x4e   : > { %578 = vmatmul.mubr.bf16.gmra.mrb[20].mxu0 %v1321_v38  ;;  %642 = vmatmul.mubr.bf16.gmra.mrb[20].mxu1 %v1322_v39 }
  0x4f   : > { %585 = vmatprep.mubr.bf16.mxu0 %v1323_v40  ;;  %649 = vmatprep.mubr.bf16.mxu1 %v1325_v41 }
  0x56   : > { %586 = vmatmul.mubr.bf16.gmra.mrb[24].mxu0 %v1327_v42  ;;  %650 = vmatmul.mubr.bf16.gmra.mrb[24].mxu1 %v1328_v43 }
  0x57   : > { %593 = vmatprep.mubr.bf16.mxu0 %v1329_v44  ;;  %657 = vmatprep.mubr.bf16.mxu1 %v1331_v45 }
  0x5e   : > { %594 = vmatmul.mubr.bf16.gmra.mrb[28].mxu0 %v1333_v46  ;;  %658 = vmatmul.mubr.bf16.gmra.mrb[28].mxu1 %v1334_v47 }
  0xf9   : > { %v1151_v48 = vpop.f32.mrb[0].mxu0  ;;  %v1199_v49 = vpop.f32.mrb[0].mxu1 }
  0xfa   : > { %v1152_v51 = vpop.f32.mrb[1].mxu0  ;;  %v1200_v52 = vpop.f32.mrb[1].mxu1 }
  0xfb   : > { %v1153_v53 = vadd.f32 %v1152_v51, %v1151_v48  ;;  %v1201_v54 = vadd.f32 %v1200_v52, %v1199_v49  ;;  %v1154_v55 = vpop.f32.mrb[2].mxu0  ;;  %v1202_v56 = vpop.f32.mrb[2].mxu1 }
  0xfc   : > { %v1155_v57 = vpop.f32.mrb[3].mxu0  ;;  %v1203_v58 = vpop.f32.mrb[3].mxu1 }
  0xfd   : > { %v540_v59 = vadd.f32 %v1153_v53, %v1462_v50  ;;  %v604_v60 = vadd.f32 %v1201_v54, %v1462_v50  ;;  %v1156_v61 = vadd.f32 %v1155_v57, %v1154_v55  ;;  %v1204_v62 = vadd.f32 %v1203_v58, %v1202_v56 }
  0xff   : > { %v543_v63 = vadd.f32 %v1156_v61, %v1462_v50  ;;  %v607_v0 = vadd.f32 %v1204_v62, %v1462_v50  ;;  %v666_v1 = vmax.f32 %v540_v59, 0.0  ;;  %v682_v2 = vmax.f32 %v604_v60, 0.0 }
 0x101   : > { %v667_v3 = vmax.f32 %v543_v63, 0.0  ;;  %v683_v4 = vmax.f32 %v607_v0, 0.0  ;;  %v1157_v5 = vpop.f32.mrb[4].mxu0  ;;  %v1205_v6 = vpop.f32.mrb[4].mxu1 }
 0x102   : > { %v1158_v7 = vpop.f32.mrb[5].mxu0  ;;  %v1206_v8 = vpop.f32.mrb[5].mxu1 }
 0x103   : > { %v1043_v9 = vpack.c.bf16 %v667_v3, %v666_v1  ;;  %v1083_v10 = vpack.c.bf16 %v683_v4, %v682_v2  ;;  %v1159_v11 = vadd.f32 %v1158_v7, %v1157_v5  ;;  %v1207_v12 = vadd.f32 %v1206_v8, %v1205_v6  ;;  %v1160_v13 = vpop.f32.mrb[6].mxu0  ;;  %v1208_v14 = vpop.f32.mrb[6].mxu1 }
 0x104   : > { %v1161_v15 = vpop.f32.mrb[7].mxu0  ;;  %v1209_v16 = vpop.f32.mrb[7].mxu1 }
 0x105   : > { %1044 = vst [vmem:[%s1472_s4] sm:$0xff] %v1043_v9   ;;  %1127 = vst [vmem:[%s1472_s4 + $0x40] sm:$0xff] %v1083_v10   ;;  %v548_v17 = vadd.f32 %v1159_v11, %v1462_v50  ;;  %v612_v18 = vadd.f32 %v1207_v12, %v1462_v50  ;;  %v1162_v19 = vadd.f32 %v1161_v15, %v1160_v13 }
 0x106   : > { %v1210_v20 = vadd.f32 %v1209_v16, %v1208_v14 }
 0x107   : > { %v551_v21 = vadd.f32 %v1162_v19, %v1462_v50  ;;  %v668_v23 = vmax.f32 %v548_v17, 0.0  ;;  %v684_v24 = vmax.f32 %v612_v18, 0.0 }
 0x108   : > { %v615_v22 = vadd.f32 %v1210_v20, %v1462_v50 }
 0x109   : > { %v669_v25 = vmax.f32 %v551_v21, 0.0  ;;  %v1163_v27 = vpop.f32.mrb[8].mxu0  ;;  %v1211_v28 = vpop.f32.mrb[8].mxu1 }
 0x10a   : > { %v685_v26 = vmax.f32 %v615_v22, 0.0  ;;  %v1164_v29 = vpop.f32.mrb[9].mxu0  ;;  %v1212_v30 = vpop.f32.mrb[9].mxu1 }
 0x10b   : > { %v1048_v31 = vpack.c.bf16 %v669_v25, %v668_v23  ;;  %v1165_v33 = vadd.f32 %v1164_v29, %v1163_v27  ;;  %v1213_v34 = vadd.f32 %v1212_v30, %v1211_v28  ;;  %v1166_v35 = vpop.f32.mrb[10].mxu0  ;;  %v1214_v36 = vpop.f32.mrb[10].mxu1 }
 0x10c   : > { %v1088_v32 = vpack.c.bf16 %v685_v26, %v684_v24  ;;  %v1167_v37 = vpop.f32.mrb[11].mxu0  ;;  %v1215_v38 = vpop.f32.mrb[11].mxu1 }
 0x10d   : > { %1120 = vst [vmem:[%s1472_s4 + $0x8] sm:$0xff] %v1048_v31   ;;  %v556_v39 = vadd.f32 %v1165_v33, %v1462_v50  ;;  %v620_v40 = vadd.f32 %v1213_v34, %v1462_v50  ;;  %v1168_v41 = vadd.f32 %v1167_v37, %v1166_v35  ;;  %v1216_v42 = vadd.f32 %v1215_v38, %v1214_v36 }
 0x10e   : > { %1128 = vst [vmem:[%s1472_s4 + $0x48] sm:$0xff] %v1088_v32  }
 0x10f   : > { %v559_v43 = vadd.f32 %v1168_v41, %v1462_v50  ;;  %v623_v44 = vadd.f32 %v1216_v42, %v1462_v50  ;;  %v670_v45 = vmax.f32 %v556_v39, 0.0  ;;  %v686_v46 = vmax.f32 %v620_v40, 0.0 }
 0x111   : > { %v671_v47 = vmax.f32 %v559_v43, 0.0  ;;  %v687_v48 = vmax.f32 %v623_v44, 0.0  ;;  %v1169_v49 = vpop.f32.mrb[12].mxu0  ;;  %v1217_v51 = vpop.f32.mrb[12].mxu1 }
 0x112   : > { %v1170_v52 = vpop.f32.mrb[13].mxu0  ;;  %v1218_v53 = vpop.f32.mrb[13].mxu1 }
 0x113   : > { %v1053_v54 = vpack.c.bf16 %v671_v47, %v670_v45  ;;  %v1093_v55 = vpack.c.bf16 %v687_v48, %v686_v46  ;;  %v1171_v56 = vadd.f32 %v1170_v52, %v1169_v49  ;;  %v1219_v57 = vadd.f32 %v1218_v53, %v1217_v51  ;;  %v1172_v58 = vpop.f32.mrb[14].mxu0  ;;  %v1220_v59 = vpop.f32.mrb[14].mxu1 }
 0x114   : > { %v1173_v60 = vpop.f32.mrb[15].mxu0  ;;  %v1221_v61 = vpop.f32.mrb[15].mxu1 }
 0x115   : > { %1121 = vst [vmem:[%s1472_s4 + $0x10] sm:$0xff] %v1053_v54   ;;  %1129 = vst [vmem:[%s1472_s4 + $0x50] sm:$0xff] %v1093_v55   ;;  %v564_v62 = vadd.f32 %v1171_v56, %v1462_v50  ;;  %v628_v63 = vadd.f32 %v1219_v57, %v1462_v50  ;;  %v1174_v0 = vadd.f32 %v1173_v60, %v1172_v58 }
 0x116   : > { %v1222_v1 = vadd.f32 %v1221_v61, %v1220_v59 }
 0x117   : > { %v567_v2 = vadd.f32 %v1174_v0, %v1462_v50  ;;  %v672_v4 = vmax.f32 %v564_v62, 0.0  ;;  %v688_v5 = vmax.f32 %v628_v63, 0.0 }
 0x118   : > { %v631_v3 = vadd.f32 %v1222_v1, %v1462_v50 }
 0x119   : > { %v673_v6 = vmax.f32 %v567_v2, 0.0  ;;  %v1175_v8 = vpop.f32.mrb[16].mxu0  ;;  %v1223_v9 = vpop.f32.mrb[16].mxu1 }
 0x11a   : > { %v689_v7 = vmax.f32 %v631_v3, 0.0  ;;  %v1176_v10 = vpop.f32.mrb[17].mxu0  ;;  %v1224_v11 = vpop.f32.mrb[17].mxu1 }
 0x11b   : > { %v1058_v12 = vpack.c.bf16 %v673_v6, %v672_v4  ;;  %v1177_v14 = vadd.f32 %v1176_v10, %v1175_v8  ;;  %v1225_v15 = vadd.f32 %v1224_v11, %v1223_v9  ;;  %v1178_v16 = vpop.f32.mrb[18].mxu0  ;;  %v1226_v17 = vpop.f32.mrb[18].mxu1 }
 0x11c   : > { %v1098_v13 = vpack.c.bf16 %v689_v7, %v688_v5  ;;  %v1179_v18 = vpop.f32.mrb[19].mxu0  ;;  %v1227_v19 = vpop.f32.mrb[19].mxu1 }
 0x11d   : > { %1122 = vst [vmem:[%s1472_s4 + $0x18] sm:$0xff] %v1058_v12   ;;  %v572_v20 = vadd.f32 %v1177_v14, %v1462_v50  ;;  %v636_v21 = vadd.f32 %v1225_v15, %v1462_v50  ;;  %v1180_v22 = vadd.f32 %v1179_v18, %v1178_v16  ;;  %v1228_v23 = vadd.f32 %v1227_v19, %v1226_v17 }
 0x11e   : > { %1130 = vst [vmem:[%s1472_s4 + $0x58] sm:$0xff] %v1098_v13  }
 0x11f   : > { %v575_v24 = vadd.f32 %v1180_v22, %v1462_v50  ;;  %v639_v25 = vadd.f32 %v1228_v23, %v1462_v50  ;;  %v674_v26 = vmax.f32 %v572_v20, 0.0  ;;  %v690_v27 = vmax.f32 %v636_v21, 0.0 }
 0x121   : > { %v675_v28 = vmax.f32 %v575_v24, 0.0  ;;  %v691_v29 = vmax.f32 %v639_v25, 0.0  ;;  %v1181_v30 = vpop.f32.mrb[20].mxu0  ;;  %v1229_v31 = vpop.f32.mrb[20].mxu1 }
 0x122   : > { %v1182_v32 = vpop.f32.mrb[21].mxu0  ;;  %v1230_v33 = vpop.f32.mrb[21].mxu1 }
 0x123   : > { %v1063_v34 = vpack.c.bf16 %v675_v28, %v674_v26  ;;  %v1103_v35 = vpack.c.bf16 %v691_v29, %v690_v27  ;;  %v1183_v36 = vadd.f32 %v1182_v32, %v1181_v30  ;;  %v1231_v37 = vadd.f32 %v1230_v33, %v1229_v31  ;;  %v1184_v38 = vpop.f32.mrb[22].mxu0  ;;  %v1232_v39 = vpop.f32.mrb[22].mxu1 }
 0x124   : > { %v1185_v40 = vpop.f32.mrb[23].mxu0  ;;  %v1233_v41 = vpop.f32.mrb[23].mxu1 }
 0x125   : > { %1123 = vst [vmem:[%s1472_s4 + $0x20] sm:$0xff] %v1063_v34   ;;  %1131 = vst [vmem:[%s1472_s4 + $0x60] sm:$0xff] %v1103_v35   ;;  %v580_v42 = vadd.f32 %v1183_v36, %v1462_v50  ;;  %v644_v43 = vadd.f32 %v1231_v37, %v1462_v50  ;;  %v1186_v44 = vadd.f32 %v1185_v40, %v1184_v38 }
 0x126   : > { %v1234_v45 = vadd.f32 %v1233_v41, %v1232_v39 }
 0x127   : > { %v583_v46 = vadd.f32 %v1186_v44, %v1462_v50  ;;  %v676_v48 = vmax.f32 %v580_v42, 0.0  ;;  %v692_v49 = vmax.f32 %v644_v43, 0.0 }
 0x128   : > { %v647_v47 = vadd.f32 %v1234_v45, %v1462_v50 }
 0x129   : > { %v677_v51 = vmax.f32 %v583_v46, 0.0  ;;  %v1187_v53 = vpop.f32.mrb[24].mxu0  ;;  %v1235_v54 = vpop.f32.mrb[24].mxu1 }
 0x12a   : > { %v693_v52 = vmax.f32 %v647_v47, 0.0  ;;  %v1188_v55 = vpop.f32.mrb[25].mxu0  ;;  %v1236_v56 = vpop.f32.mrb[25].mxu1 }
 0x12b   : > { %v1068_v57 = vpack.c.bf16 %v677_v51, %v676_v48  ;;  %v1189_v59 = vadd.f32 %v1188_v55, %v1187_v53  ;;  %v1237_v60 = vadd.f32 %v1236_v56, %v1235_v54  ;;  %v1190_v61 = vpop.f32.mrb[26].mxu0  ;;  %v1238_v62 = vpop.f32.mrb[26].mxu1 }
 0x12c   : > { %v1108_v58 = vpack.c.bf16 %v693_v52, %v692_v49  ;;  %v1191_v63 = vpop.f32.mrb[27].mxu0  ;;  %v1239_v0 = vpop.f32.mrb[27].mxu1 }
 0x12d   : > { %1124 = vst [vmem:[%s1472_s4 + $0x28] sm:$0xff] %v1068_v57   ;;  %v588_v1 = vadd.f32 %v1189_v59, %v1462_v50  ;;  %v652_v2 = vadd.f32 %v1237_v60, %v1462_v50  ;;  %v1192_v3 = vadd.f32 %v1191_v63, %v1190_v61  ;;  %v1240_v4 = vadd.f32 %v1239_v0, %v1238_v62 }
 0x12e   : > { %1132 = vst [vmem:[%s1472_s4 + $0x68] sm:$0xff] %v1108_v58  }
 0x12f   : > { %v591_v5 = vadd.f32 %v1192_v3, %v1462_v50  ;;  %v655_v6 = vadd.f32 %v1240_v4, %v1462_v50  ;;  %v678_v7 = vmax.f32 %v588_v1, 0.0  ;;  %v694_v8 = vmax.f32 %v652_v2, 0.0 }
 0x131   : > { %v679_v9 = vmax.f32 %v591_v5, 0.0  ;;  %v695_v10 = vmax.f32 %v655_v6, 0.0  ;;  %v1193_v11 = vpop.f32.mrb[28].mxu0  ;;  %v1241_v12 = vpop.f32.mrb[28].mxu1 }
 0x132   : > { %v1194_v13 = vpop.f32.mrb[29].mxu0  ;;  %v1242_v14 = vpop.f32.mrb[29].mxu1 }
 0x133   : > { %v1073_v15 = vpack.c.bf16 %v679_v9, %v678_v7  ;;  %v1113_v16 = vpack.c.bf16 %v695_v10, %v694_v8  ;;  %v1195_v17 = vadd.f32 %v1194_v13, %v1193_v11  ;;  %v1243_v18 = vadd.f32 %v1242_v14, %v1241_v12  ;;  %v1196_v19 = vpop.f32.mrb[30].mxu0  ;;  %v1244_v20 = vpop.f32.mrb[30].mxu1 }
 0x134   : > { %v1197_v21 = vpop.f32.mrb[31].mxu0  ;;  %v1245_v22 = vpop.f32.mrb[31].mxu1 }
 0x135   : > { %1125 = vst [vmem:[%s1472_s4 + $0x30] sm:$0xff] %v1073_v15   ;;  %1133 = vst [vmem:[%s1472_s4 + $0x70] sm:$0xff] %v1113_v16   ;;  %v596_v23 = vadd.f32 %v1195_v17, %v1462_v50  ;;  %v660_v24 = vadd.f32 %v1243_v18, %v1462_v50  ;;  %v1198_v25 = vadd.f32 %v1197_v21, %v1196_v19 }
 0x136   : > { %v1246_v26 = vadd.f32 %v1245_v22, %v1244_v20 }
 0x137   : > { %v599_v27 = vadd.f32 %v1198_v25, %v1462_v50  ;;  %v680_v29 = vmax.f32 %v596_v23, 0.0  ;;  %v696_v30 = vmax.f32 %v660_v24, 0.0 }
 0x138   : > { %v663_v28 = vadd.f32 %v1246_v26, %v1462_v50 }
 0x139   : > { %v681_v31 = vmax.f32 %v599_v27, 0.0 }
 0x13a   : > { %v697_v32 = vmax.f32 %v663_v28, 0.0 }
 0x13b   : > { %v1078_v33 = vpack.c.bf16 %v681_v31, %v680_v29 }
 0x13c   : > { %v1118_v34 = vpack.c.bf16 %v697_v32, %v696_v30 }
 0x13d   : > { %1126 = vst [vmem:[%s1472_s4 + $0x38] sm:$0xff] %v1078_v33  }
 0x13e   : > { %1134 = vst [vmem:[%s1472_s4 + $0x78] sm:$0xff] %v1118_v34  }
 0x13f PF: > { %s13_s12 = sadd.s32 1, %s1341_s12  }
 0x140   : > { %p10_p4 = scmp.ge.s32.totalorder %s13_s12, 10  }
 0x142   :  { %12 = sbr.rel (!%p10_p4) target bundleno = 1 (0x1), region = 62 }

// kernel: resnet_image_encoder_forward.12
= control target key start
LH: loop header
LB: loop body
LE: loop exit
PB: predicated region body
PF: predicated region fallthrough
CT: control target
= control target key end

     0   :  { %s2297_s12 = smov 0   ;;  %s2962_s0 = inlined_call_operand.vmem [shape: bf16[2,16,34,128], index: 0, kind: input, shape index: {}]   ;;  %s2963_s1 = inlined_call_operand.vmem [shape: bf16[2,16,34,128], index: 1, kind: input, shape index: {}]   ;;  %s2964_s2 = inlined_call_operand.vmem [shape: bf16[2,16,34,128], index: 2, kind: input, shape index: {}]   ;;  %s2965_s3 = inlined_call_operand.vmem [shape: bf16[2,16,32,128], index: 3, kind: output, shape index: {}]  }
   0x1 LB: > { %s2008_s13 = sadd.s32 4294967295, %s2275_s12   ;;  %p2012_p0 = scmp.ge.s32.totalorder %s2275_s12, 1  ;;  %s2275_s12 = sphi %s2297_s12, %s13_s12  }
   0x2   : > { %p157_p1 = scmp.lt.s32.totalorder %s2275_s12, 3 }
   0x4   : > { %p158_p2 = pnand %p2012_p0, %p157_p1 }
   0x5   : > { %p191_p3 = scmp.lt.s32.totalorder (!%p158_p2), %s2008_s13, 1  ;;  %vm1526_vm0 = vcmask (!%p158_p2), 1042432   ;;  %vm1527_vm1 = vcmask (!%p158_p2), 1046532   ;;  %vm611_vm2 = vsmask.f32 (!%p158_p2), 3328 }
   0x6   : > { %161 = sbr.rel (%p158_p2) target bundleno = 277 (0x115), region = 32  ;;  %vm612_vm3 = vsmask.f32 (!%p158_p2), 7440  ;;  %vm2340_vm4 = vmor (!%p158_p2), %vm1526_vm0, %vm1527_vm1 }
   0x7   : > { %vm2353_vm5 = vmor (!%p158_p2), %vm611_vm2, %vm612_vm3 }
   0xd   : > { %s2971_s13 = smov (!%p191_p3, %s2008_s13), 1 }
   0xe   : > { %s2260_s14 = smul.u32 320, %s2971_s13  ;;  %s2036_s24 = sshll.u32 %s2971_s13, 8 }
   0xf   : > { %s2378_s27 = scalar_lea.vmem %s2965_s3, %s2036_s24 }
  0x10   : > { %s2311_s17 = scalar_lea.vmem %s2962_s0, %s2260_s14  ;;  %s2316_s20 = scalar_lea.vmem %s2963_s1, %s2260_s14 }
  0x11   : > { %s2321_s23 = scalar_lea.vmem %s2964_s2, %s2260_s14  ;;  %v211_v0 = vld [vmem:[%s2311_s17] sm:$0xf]  ;;  %v212_v1 = vld [vmem:[%s2311_s17 + $0x4] sm:$0xf]  ;;  %v213_v2 = vld [vmem:[%s2311_s17 + $0x8] sm:$0xf] }
  0x12   : > { %v291_v3 = vld [vmem:[%s2316_s20] sm:$0xf]  ;;  %v292_v4 = vld [vmem:[%s2316_s20 + $0x4] sm:$0xf]  ;;  %v293_v5 = vld [vmem:[%s2316_s20 + $0x8] sm:$0xf] }
  0x13   : > { %v371_v6 = vmax.bf16 %v291_v3, %v211_v0  ;;  %v372_v7 = vmax.bf16 %v292_v4, %v212_v1  ;;  %v373_v8 = vmax.bf16 %v293_v5, %v213_v2  ;;  %v451_v9 = vld [vmem:[%s2321_s23] sm:$0xf]  ;;  %v452_v10 = vld [vmem:[%s2321_s23 + $0x4] sm:$0xf]  ;;  %v453_v11 = vld [vmem:[%s2321_s23 + $0x8] sm:$0xf] }
  0x14   : > { %v214_v12 = vld [vmem:[%s2311_s17 + $0xc] sm:$0xf]  ;;  %v215_v13 = vld [vmem:[%s2311_s17 + $0x10] sm:$0x1]  ;;  %v216_v49 = vld [vmem:[%s2311_s17 + $0x14] sm:$0xf] }
  0x15   : > { %v294_v14 = vld [vmem:[%s2316_s20 + $0xc] sm:$0xf]  ;;  %v531_v15 = vmax.bf16 %v451_v9, %v371_v6  ;;  %v532_v16 = vmax.bf16 %v452_v10, %v372_v7  ;;  %v2335_v17 = vmax.bf16 %v453_v11, %v373_v8  ;;  %v295_v18 = vld [vmem:[%s2316_s20 + $0x10] sm:$0x1]  ;;  %v217_v50 = vld [vmem:[%s2311_s17 + $0x18] sm:$0xf] }
  0x16   : > { %v374_v19 = vmax.bf16 %v294_v14, %v214_v12  ;;  %v375_v20 = vmax.bf16 %v295_v18, %v215_v13  ;;  %v454_v26 = vld [vmem:[%s2321_s23 + $0xc] sm:$0xf]  ;;  %v455_v31 = vld [vmem:[%s2321_s23 + $0x10] sm:$0x1]  ;;  %v296_v55 = vld [vmem:[%s2316_s20 + $0x14] sm:$0xf] }
  0x17   : > { %v615_v21 = vshrl.u32 %v531_v15, 16  ;;  %v618_v22 = vshll.u32 %v531_v15, 16  ;;  %v624_v23 = vshll.u32 %v532_v16, 16  ;;  %v628_v24 = vshrl.u32 %v532_v16, 16  ;;  %v297_v60 = vld [vmem:[%s2316_s20 + $0x18] sm:$0xf] }
  0x18   : > { %v634_v27 = vshll.u32 %v2335_v17, 16  ;;  %v2018_v28 = vrot.slane %v531_v15, 9  ;;  %v1531_v29 = vrot.slane %v532_v16, 5  ;;  %v1534_v30 = vrot.slane %v2335_v17, 5  ;;  %v218_v1 = vld [vmem:[%s2311_s17 + $0x1c] sm:$0xf] }
  0x19   : > { %v617_v32 = vrot.slane %v615_v21, 4  ;;  %v620_v33 = vrot.slane %v618_v22, 5  ;;  %v626_v34 = vrot.slane %v624_v23, 5  ;;  %v630_v35 = vrot.slane %v628_v24, 4  ;;  %v298_v2 = vld [vmem:[%s2316_s20 + $0x1c] sm:$0xf] }
  0x1a   : > { %v636_v36 = vrot.slane %v634_v27, 5  ;;  %v1532_v37 = vsel %vm2340_vm4, %v2018_v28, %v1531_v29  ;;  %v1533_v38 = vrot.slane %v1531_v29, 4  ;;  %v534_v39 = vmax.bf16 %v454_v26, %v374_v19  ;;  %v456_v7 = vld [vmem:[%s2321_s23 + $0x14] sm:$0xf]  ;;  %v457_v8 = vld [vmem:[%s2321_s23 + $0x18] sm:$0xf] }
  0x1b   : > { %v621_v40 = vor.u32 %v620_v33, %v617_v32  ;;  %v631_v41 = vor.u32 %v630_v35, %v626_v34  ;;  %v535_v42 = vmax.bf16 %v455_v31, %v375_v20  ;;  %v638_v43 = vshrl.u32 %v2335_v17, 16  ;;  %v458_v13 = vld [vmem:[%s2321_s23 + $0x1c] sm:$0xf]  ;;  %v219_v28 = vld [vmem:[%s2311_s17 + $0x20] sm:$0xf] }
  0x1c   : > { %v1535_v45 = vsel %vm2340_vm4, %v1533_v38, %v1534_v30  ;;  %v644_v46 = vshll.u32 %v534_v39, 16  ;;  %v648_v47 = vshrl.u32 %v534_v39, 16  ;;  %v1536_v48 = vrot.slane %v1534_v30, 4  ;;  %v220_v29 = vld [vmem:[%s2311_s17 + $0x24] sm:$0x1] }
  0x1d   : > { %v622_v51 = vrot.slane %v621_v40, 4  ;;  %v632_v52 = vrot.slane %v631_v41, 4  ;;  %v640_v53 = vrot.slane %v638_v43, 4  ;;  %v654_v54 = vshll.u32 %v535_v42, 16  ;;  %v300_v40 = vld [vmem:[%s2316_s20 + $0x24] sm:$0x1] }
  0x1e   : > { %v646_v56 = vrot.slane %v644_v46, 5  ;;  %v650_v57 = vrot.slane %v648_v47, 4  ;;  %v1537_v58 = vrot.slane %v534_v39, 5  ;;  %v1540_v59 = vrot.slane %v535_v42, 5 }
  0x1f   : > { %v627_v61 = vsel %vm2353_vm5, %v622_v51, %v626_v34  ;;  %v637_v62 = vsel %vm2353_vm5, %v632_v52, %v636_v36  ;;  %v641_v63 = vor.u32 %v640_v53, %v636_v36  ;;  %v656_v0 = vrot.slane %v654_v54, 5  ;;  %v299_v34 = vld [vmem:[%s2316_s20 + $0x20] sm:$0xf]  ;;  %v221_v54 = vld [vmem:[%s2311_s17 + $0x28] sm:$0xf] }
  0x20   : > { %v1382_v3 = vmax.bf16 %v627_v61, %v531_v15  ;;  %v1383_v4 = vmax.bf16 %v637_v62, %v532_v16  ;;  %v651_v5 = vor.u32 %v650_v57, %v646_v56  ;;  %v1538_v6 = vsel %vm2340_vm4, %v1536_v48, %v1537_v58 }
  0x21   : > { %v642_v9 = vrot.slane %v641_v63, 4  ;;  %v1539_v10 = vrot.slane %v1537_v58, 4  ;;  %v376_v11 = vmax.bf16 %v296_v55, %v216_v49  ;;  %v377_v12 = vmax.bf16 %v297_v60, %v217_v50  ;;  %v460_v49 = vld [vmem:[%s2321_s23 + $0x24] sm:$0x1]  ;;  %v301_v55 = vld [vmem:[%s2316_s20 + $0x28] sm:$0xf] }
  0x22   : > { %v1801_v14 = vmax.bf16 %v1532_v37, %v1382_v3  ;;  %v1802_v18 = vmax.bf16 %v1535_v45, %v1383_v4  ;;  %v652_v19 = vrot.slane %v651_v5, 4  ;;  %v378_v20 = vmax.bf16 %v298_v2, %v218_v1  ;;  %v459_v45 = vld [vmem:[%s2321_s23 + $0x20] sm:$0xf]  ;;  %v222_v3 = vld [vmem:[%s2311_s17 + $0x2c] sm:$0xf] }
  0x23   : > { %v647_v15 = vsel %vm2353_vm5, %v642_v9, %v646_v56  ;;  %v1541_v16 = vsel %vm2340_vm4, %v1539_v10, %v1540_v59  ;;  %v536_v21 = vmax.bf16 %v456_v7, %v376_v11  ;;  %v537_v22 = vmax.bf16 %v457_v8, %v377_v12  ;;  %v302_v4 = vld [vmem:[%s2316_s20 + $0x2c] sm:$0xf]  ;;  %v223_v10 = vld [vmem:[%s2311_s17 + $0x30] sm:$0xf] }
  0x24   : > { %v2197_v23 = vcombine.low %v1801_v14, %v1802_v18  ;;  %v657_v24 = vsel %vm2353_vm5, %v652_v19, %v656_v0  ;;  %v1384_v26 = vmax.bf16 %v647_v15, %v2335_v17  ;;  %v2387_v27 = vmax.bf16 %v458_v13, %v378_v20  ;;  %v303_v11 = vld [vmem:[%s2316_s20 + $0x30] sm:$0xf]  ;;  %v461_v19 = vld [vmem:[%s2321_s23 + $0x28] sm:$0xf]  ;;  %v224_v20 = vld [vmem:[%s2311_s17 + $0x34] sm:$0xf] }
  0x25   : > { %v1385_v30 = vmax.bf16 %v657_v24, %v534_v39  ;;  %v659_v31 = vshrl.u32 %v536_v21, 16  ;;  %v662_v32 = vshll.u32 %v536_v21, 16  ;;  %v668_v33 = vshll.u32 %v537_v22, 16 }
  0x26   : > { %2041 = vst [vmem:[%s2378_s27] sm:$0xff] %v2197_v23   ;;  %v1803_v35 = vmax.bf16 %v1538_v6, %v1384_v26  ;;  %v672_v36 = vshrl.u32 %v537_v22, 16  ;;  %v678_v37 = vshll.u32 %v2387_v27, 16  ;;  %v2019_v38 = vrot.slane %v536_v21, 9  ;;  %v304_v26 = vld [vmem:[%s2316_s20 + $0x34] sm:$0xf] }
  0x27   : > { %v1804_v17 = vmax.bf16 %v1541_v16, %v1385_v30  ;;  %v661_v41 = vrot.slane %v659_v31, 4  ;;  %v664_v42 = vrot.slane %v662_v32, 5  ;;  %v670_v43 = vrot.slane %v668_v33, 5 }
  0x28   : > { %v674_v39 = vrot.slane %v672_v36, 4  ;;  %v680_v46 = vrot.slane %v678_v37, 5  ;;  %v1544_v47 = vrot.slane %v537_v22, 5  ;;  %v1547_v48 = vrot.slane %v2387_v27, 5  ;;  %v463_v36 = vld [vmem:[%s2321_s23 + $0x30] sm:$0xf] }
  0x29   : > { %v2198_v50 = vcombine.low %v1803_v35, %v1804_v17  ;;  %v665_v51 = vor.u32 %v664_v42, %v661_v41  ;;  %v379_v52 = vmax.bf16 %v299_v34, %v219_v28  ;;  %v380_v53 = vmax.bf16 %v300_v40, %v220_v29  ;;  %v462_v35 = vld [vmem:[%s2321_s23 + $0x2c] sm:$0xf]  ;;  %v225_v40 = vld [vmem:[%s2311_s17 + $0x38] sm:$0x1] }
  0x2a   : > { %v675_v56 = vor.u32 %v674_v39, %v670_v43  ;;  %v1545_v57 = vsel %vm2340_vm4, %v2019_v38, %v1544_v47  ;;  %v1546_v58 = vrot.slane %v1544_v47, 4  ;;  %v682_v59 = vshrl.u32 %v2387_v27, 16  ;;  %v305_v17 = vld [vmem:[%s2316_s20 + $0x38] sm:$0x1] }
  0x2b   : > { %2199 = vst [vmem:[%s2378_s27 + $0x8] sm:$0xff] %v2198_v50   ;;  %v666_v60 = vrot.slane %v665_v51, 4  ;;  %v539_v61 = vmax.bf16 %v459_v45, %v379_v52  ;;  %v540_v62 = vmax.bf16 %v460_v49, %v380_v53  ;;  %v1549_v63 = vrot.slane %v1547_v48, 4 }
  0x2c   : > { %v676_v0 = vrot.slane %v675_v56, 4  ;;  %v1548_v1 = vsel %vm2340_vm4, %v1546_v58, %v1547_v48  ;;  %v684_v2 = vrot.slane %v682_v59, 4  ;;  %v381_v5 = vmax.bf16 %v301_v55, %v221_v54  ;;  %v464_v54 = vld [vmem:[%s2321_s23 + $0x34] sm:$0xf] }
  0x2d   : > { %v671_v6 = vsel %vm2353_vm5, %v666_v60, %v670_v43  ;;  %v688_v7 = vshll.u32 %v539_v61, 16  ;;  %v692_v8 = vshrl.u32 %v539_v61, 16  ;;  %v698_v9 = vshll.u32 %v540_v62, 16 }
  0x2e   : > { %v681_v12 = vsel %vm2353_vm5, %v676_v0, %v680_v46  ;;  %v1386_v13 = vmax.bf16 %v671_v6, %v536_v21  ;;  %v685_v14 = vor.u32 %v684_v2, %v680_v46  ;;  %v1550_v18 = vrot.slane %v539_v61, 5 }
  0x2f   : > { %v1387_v15 = vmax.bf16 %v681_v12, %v537_v22  ;;  %v690_v16 = vrot.slane %v688_v7, 5  ;;  %v694_v23 = vrot.slane %v692_v8, 4  ;;  %v700_v24 = vrot.slane %v698_v9, 5 }
  0x30   : > { %v1805_v28 = vmax.bf16 %v1545_v57, %v1386_v13  ;;  %v686_v29 = vrot.slane %v685_v14, 4  ;;  %v1551_v30 = vsel %vm2340_vm4, %v1549_v63, %v1550_v18  ;;  %v1552_v31 = vrot.slane %v1550_v18, 4  ;;  %v465_v63 = vld [vmem:[%s2321_s23 + $0x38] sm:$0x1]  ;;  %v226_v18 = vld [vmem:[%s2311_s17 + $0x3c] sm:$0xf] }
  0x31   : > { %v1806_v21 = vmax.bf16 %v1548_v1, %v1387_v15  ;;  %v695_v32 = vor.u32 %v694_v23, %v690_v16  ;;  %v1553_v33 = vrot.slane %v540_v62, 5  ;;  %v382_v34 = vmax.bf16 %v302_v4, %v222_v3 }
  0x32   : > { %v691_v22 = vsel %vm2353_vm5, %v686_v29, %v690_v16  ;;  %v383_v37 = vmax.bf16 %v303_v11, %v223_v10  ;;  %v541_v38 = vmax.bf16 %v461_v19, %v381_v5  ;;  %v384_v41 = vmax.bf16 %v304_v26, %v224_v20  ;;  %v306_v19 = vld [vmem:[%s2316_s20 + $0x3c] sm:$0xf]  ;;  %v228_v26 = vld [vmem:[%s2311_s17 + $0x44] sm:$0xf] }
  0x33   : > { %v2200_v42 = vcombine.low %v1805_v28, %v1806_v21  ;;  %v696_v43 = vrot.slane %v695_v32, 4  ;;  %v1388_v45 = vmax.bf16 %v691_v22, %v2387_v27  ;;  %v1554_v39 = vsel %vm2340_vm4, %v1552_v31, %v1553_v33  ;;  %v307_v28 = vld [vmem:[%s2316_s20 + $0x40] sm:$0xf]  ;;  %v308_v32 = vld [vmem:[%s2316_s20 + $0x44] sm:$0xf] }
  0x34   : > { %v542_v46 = vmax.bf16 %v462_v35, %v382_v34  ;;  %v2428_v47 = vmax.bf16 %v463_v36, %v383_v37  ;;  %v703_v48 = vshrl.u32 %v541_v38, 16  ;;  %v706_v49 = vshll.u32 %v541_v38, 16  ;;  %v466_v22 = vld [vmem:[%s2321_s23 + $0x3c] sm:$0xf] }
  0x35   : > { %2201 = vst [vmem:[%s2378_s27 + $0x10] sm:$0xff] %v2200_v42   ;;  %v701_v50 = vsel %vm2353_vm5, %v696_v43, %v700_v24  ;;  %v1807_v51 = vmax.bf16 %v1551_v30, %v1388_v45  ;;  %v2020_v52 = vrot.slane %v541_v38, 9  ;;  %v385_v53 = vmax.bf16 %v305_v17, %v225_v40  ;;  %v227_v24 = vld [vmem:[%s2311_s17 + $0x40] sm:$0xf]  ;;  %v229_v42 = vld [vmem:[%s2311_s17 + $0x48] sm:$0xf] }
  0x36   : > { %v1389_v55 = vmax.bf16 %v701_v50, %v539_v61  ;;  %v705_v56 = vrot.slane %v703_v48, 4  ;;  %v708_v27 = vrot.slane %v706_v49, 5  ;;  %v712_v57 = vshll.u32 %v542_v46, 16  ;;  %v309_v43 = vld [vmem:[%s2316_s20 + $0x48] sm:$0xf] }
  0x37   : > { %v716_v58 = vshrl.u32 %v542_v46, 16  ;;  %v722_v59 = vshll.u32 %v2428_v47, 16  ;;  %v1557_v60 = vrot.slane %v542_v46, 5  ;;  %v1560_v62 = vrot.slane %v2428_v47, 5  ;;  %v467_v49 = vld [vmem:[%s2321_s23 + $0x40] sm:$0xf] }
  0x38   : > { %v1808_v0 = vmax.bf16 %v1554_v39, %v1389_v55  ;;  %v709_v1 = vor.u32 %v708_v27, %v705_v56  ;;  %v714_v2 = vrot.slane %v712_v57, 5  ;;  %v544_v3 = vmax.bf16 %v464_v54, %v384_v41  ;;  %v468_v50 = vld [vmem:[%s2321_s23 + $0x44] sm:$0xf] }
  0x39   : > { %v718_v4 = vrot.slane %v716_v58, 4  ;;  %v724_v5 = vrot.slane %v722_v59, 5  ;;  %v1558_v61 = vsel %vm2340_vm4, %v2020_v52, %v1557_v60  ;;  %v1559_v6 = vrot.slane %v1557_v60, 4 }
  0x3a   : > { %v2202_v7 = vcombine.low %v1807_v51, %v1808_v0  ;;  %v710_v8 = vrot.slane %v709_v1, 4  ;;  %v545_v9 = vmax.bf16 %v465_v63, %v385_v53  ;;  %v726_v10 = vshrl.u32 %v2428_v47, 16 }
  0x3b   : > { %v719_v11 = vor.u32 %v718_v4, %v714_v2  ;;  %v1561_v12 = vsel %vm2340_vm4, %v1559_v6, %v1560_v62  ;;  %v732_v13 = vshll.u32 %v544_v3, 16  ;;  %v736_v14 = vshrl.u32 %v544_v3, 16 }
  0x3c   : > { %2203 = vst [vmem:[%s2378_s27 + $0x18] sm:$0xff] %v2202_v7   ;;  %v715_v20 = vsel %vm2353_vm5, %v710_v8, %v714_v2  ;;  %v728_v15 = vrot.slane %v726_v10, 4  ;;  %v742_v16 = vshll.u32 %v545_v9, 16  ;;  %v1562_v23 = vrot.slane %v1560_v62, 4  ;;  %v230_v2 = vld [vmem:[%s2311_s17 + $0x4c] sm:$0x1] }
  0x3d   : > { %v720_v29 = vrot.slane %v719_v11, 4  ;;  %v1390_v30 = vmax.bf16 %v715_v20, %v541_v38  ;;  %v734_v31 = vrot.slane %v732_v13, 5  ;;  %v738_v21 = vrot.slane %v736_v14, 4  ;;  %v310_v7 = vld [vmem:[%s2316_s20 + $0x4c] sm:$0x1] }
  0x3e   : > { %v729_v33 = vor.u32 %v728_v15, %v724_v5  ;;  %v744_v34 = vrot.slane %v742_v16, 5  ;;  %v1563_v35 = vrot.slane %v544_v3, 5  ;;  %v1566_v36 = vrot.slane %v545_v9, 5  ;;  %v469_v11 = vld [vmem:[%s2321_s23 + $0x48] sm:$0xf] }
  0x3f   : > { %v725_v37 = vsel %vm2353_vm5, %v720_v29, %v724_v5  ;;  %v1809_v40 = vmax.bf16 %v1558_v61, %v1390_v30  ;;  %v739_v17 = vor.u32 %v738_v21, %v734_v31  ;;  %v386_v41 = vmax.bf16 %v306_v19, %v226_v18  ;;  %v470_v18 = vld [vmem:[%s2321_s23 + $0x4c] sm:$0x1] }
  0x40   : > { %v1391_v45 = vmax.bf16 %v725_v37, %v542_v46  ;;  %v730_v38 = vrot.slane %v729_v33, 4  ;;  %v1564_v39 = vsel %vm2340_vm4, %v1562_v23, %v1563_v35  ;;  %v1565_v48 = vrot.slane %v1563_v35, 4  ;;  %v311_v37 = vld [vmem:[%s2316_s20 + $0x50] sm:$0xf] }
  0x41   : > { %v740_v51 = vrot.slane %v739_v17, 4  ;;  %v387_v52 = vmax.bf16 %v307_v28, %v227_v24  ;;  %v388_v53 = vmax.bf16 %v308_v32, %v228_v26  ;;  %v546_v54 = vmax.bf16 %v466_v22, %v386_v41  ;;  %v232_v22 = vld [vmem:[%s2311_s17 + $0x54] sm:$0xf] }
  0x42   : > { %v1810_v55 = vmax.bf16 %v1561_v12, %v1391_v45  ;;  %v735_v56 = vsel %vm2353_vm5, %v730_v38, %v734_v31  ;;  %v1567_v46 = vsel %vm2340_vm4, %v1565_v48, %v1566_v36  ;;  %v389_v27 = vmax.bf16 %v309_v43, %v229_v42  ;;  %v231_v36 = vld [vmem:[%s2311_s17 + $0x50] sm:$0xf]  ;;  %v233_v43 = vld [vmem:[%s2311_s17 + $0x58] sm:$0xf]  ;;  %v312_v45 = vld [vmem:[%s2316_s20 + $0x54] sm:$0xf] }
  0x43   : > { %v745_v57 = vsel %vm2353_vm5, %v740_v51, %v744_v34  ;;  %v1392_v58 = vmax.bf16 %v735_v56, %v2428_v47  ;;  %v547_v59 = vmax.bf16 %v467_v49, %v387_v52  ;;  %v2467_v60 = vmax.bf16 %v468_v50, %v388_v53  ;;  %v313_v50 = vld [vmem:[%s2316_s20 + $0x58] sm:$0xf]  ;;  %v471_v51 = vld [vmem:[%s2321_s23 + $0x50] sm:$0xf] }
  0x44   : > { %v2204_v62 = vcombine.low %v1809_v40, %v1810_v55  ;;  %v1393_v63 = vmax.bf16 %v745_v57, %v544_v3  ;;  %v747_v0 = vshrl.u32 %v546_v54, 16  ;;  %v750_v1 = vshll.u32 %v546_v54, 16 }
  0x45   : > { %v1811_v4 = vmax.bf16 %v1564_v39, %v1392_v58  ;;  %v756_v5 = vshll.u32 %v547_v59, 16  ;;  %v760_v61 = vshrl.u32 %v547_v59, 16  ;;  %v766_v6 = vshll.u32 %v2467_v60, 16 }
  0x46   : > { %2205 = vst [vmem:[%s2378_s27 + $0x20] sm:$0xff] %v2204_v62   ;;  %v1812_v8 = vmax.bf16 %v1567_v46, %v1393_v63  ;;  %v749_v9 = vrot.slane %v747_v0, 4  ;;  %v752_v47 = vrot.slane %v750_v1, 5  ;;  %v2021_v10 = vrot.slane %v546_v54, 9  ;;  %v234_v46 = vld [vmem:[%s2311_s17 + $0x5c] sm:$0xf] }
  0x47   : > { %v758_v12 = vrot.slane %v756_v5, 5  ;;  %v762_v13 = vrot.slane %v760_v61, 4  ;;  %v768_v3 = vrot.slane %v766_v6, 5  ;;  %v1570_v14 = vrot.slane %v547_v59, 5  ;;  %v473_v0 = vld [vmem:[%s2321_s23 + $0x58] sm:$0xf] }
  0x48   : > { %v2206_v19 = vcombine.low %v1811_v4, %v1812_v8  ;;  %v753_v20 = vor.u32 %v752_v47, %v749_v9  ;;  %v1573_v15 = vrot.slane %v2467_v60, 5  ;;  %v390_v16 = vmax.bf16 %v310_v7, %v230_v2  ;;  %v235_v5 = vld [vmem:[%s2311_s17 + $0x60] sm:$0x1] }
  0x49   : > { %v763_v23 = vor.u32 %v762_v13, %v758_v12  ;;  %v1571_v24 = vsel %vm2340_vm4, %v2021_v10, %v1570_v14  ;;  %v1572_v26 = vrot.slane %v1570_v14, 4  ;;  %v549_v28 = vmax.bf16 %v469_v11, %v389_v27  ;;  %v314_v27 = vld [vmem:[%s2316_s20 + $0x5c] sm:$0xf]  ;;  %v315_v61 = vld [vmem:[%s2316_s20 + $0x60] sm:$0x1] }
  0x4a   : > { %2207 = vst [vmem:[%s2378_s27 + $0x28] sm:$0xff] %v2206_v19   ;;  %v754_v29 = vrot.slane %v753_v20, 4  ;;  %v550_v30 = vmax.bf16 %v470_v18, %v390_v16  ;;  %v770_v31 = vshrl.u32 %v2467_v60, 16  ;;  %v1575_v21 = vrot.slane %v1573_v15, 4 }
  0x4b   : > { %v764_v32 = vrot.slane %v763_v23, 4  ;;  %v1574_v33 = vsel %vm2340_vm4, %v1572_v26, %v1573_v15  ;;  %v776_v34 = vshll.u32 %v549_v28, 16  ;;  %v780_v35 = vshrl.u32 %v549_v28, 16  ;;  %v474_v23 = vld [vmem:[%s2321_s23 + $0x5c] sm:$0xf] }
  0x4c   : > { %v759_v40 = vsel %vm2353_vm5, %v754_v29, %v758_v12  ;;  %v772_v17 = vrot.slane %v770_v31, 4  ;;  %v786_v41 = vshll.u32 %v550_v30, 16  ;;  %v1576_v42 = vrot.slane %v549_v28, 5  ;;  %v475_v31 = vld [vmem:[%s2321_s23 + $0x60] sm:$0x1] }
  0x4d   : > { %v769_v38 = vsel %vm2353_vm5, %v764_v32, %v768_v3  ;;  %v1394_v39 = vmax.bf16 %v759_v40, %v546_v54  ;;  %v778_v48 = vrot.slane %v776_v34, 5  ;;  %v782_v49 = vrot.slane %v780_v35, 4  ;;  %v472_v54 = vld [vmem:[%s2321_s23 + $0x54] sm:$0xf] }
  0x4e   : > { %v1395_v52 = vmax.bf16 %v769_v38, %v547_v59  ;;  %v773_v53 = vor.u32 %v772_v17, %v768_v3  ;;  %v788_v55 = vrot.slane %v786_v41, 5  ;;  %v1577_v56 = vsel %vm2340_vm4, %v1575_v21, %v1576_v42 }
  0x4f   : > { %v1813_v57 = vmax.bf16 %v1571_v24, %v1394_v39  ;;  %v783_v58 = vor.u32 %v782_v49, %v778_v48  ;;  %v1578_v62 = vrot.slane %v1576_v42, 4  ;;  %v1579_v63 = vrot.slane %v550_v30, 5 }
  0x50   : > { %v1814_v1 = vmax.bf16 %v1574_v33, %v1395_v52  ;;  %v774_v2 = vrot.slane %v773_v53, 4  ;;  %v391_v4 = vmax.bf16 %v311_v37, %v231_v36  ;;  %v392_v59 = vmax.bf16 %v312_v45, %v232_v22 }
  0x51   : > { %v784_v6 = vrot.slane %v783_v58, 4  ;;  %v1580_v7 = vsel %vm2340_vm4, %v1578_v62, %v1579_v63  ;;  %v393_v8 = vmax.bf16 %v313_v50, %v233_v43  ;;  %v394_v9 = vmax.bf16 %v314_v27, %v234_v46  ;;  %v236_v50 = vld [vmem:[%s2311_s17 + $0x64] sm:$0xf]  ;;  %v238_v46 = vld [vmem:[%s2311_s17 + $0x6c] sm:$0xf] }
  0x52   : > { %v2208_v47 = vcombine.low %v1813_v57, %v1814_v1  ;;  %v779_v10 = vsel %vm2353_vm5, %v774_v2, %v778_v48  ;;  %v551_v11 = vmax.bf16 %v471_v51, %v391_v4  ;;  %v552_v12 = vmax.bf16 %v472_v54, %v392_v59  ;;  %v316_v27 = vld [vmem:[%s2316_s20 + $0x64] sm:$0xf]  ;;  %v317_v54 = vld [vmem:[%s2316_s20 + $0x68] sm:$0xf]  ;;  %v318_v59 = vld [vmem:[%s2316_s20 + $0x6c] sm:$0xf] }
  0x53   : > { %v789_v13 = vsel %vm2353_vm5, %v784_v6, %v788_v55  ;;  %v1396_v3 = vmax.bf16 %v779_v10, %v2467_v60  ;;  %v2508_v14 = vmax.bf16 %v473_v0, %v393_v8  ;;  %v395_v18 = vmax.bf16 %v315_v61, %v235_v5  ;;  %v476_v5 = vld [vmem:[%s2321_s23 + $0x64] sm:$0xf] }
  0x54   : > { %2209 = vst [vmem:[%s2378_s27 + $0x30] sm:$0xff] %v2208_v47   ;;  %v1397_v19 = vmax.bf16 %v789_v13, %v549_v28  ;;  %v791_v20 = vshrl.u32 %v551_v11, 16  ;;  %v794_v15 = vshll.u32 %v551_v11, 16  ;;  %v800_v16 = vshll.u32 %v552_v12, 16  ;;  %v319_v47 = vld [vmem:[%s2316_s20 + $0x70] sm:$0xf] }
  0x55   : > { %v1815_v24 = vmax.bf16 %v1577_v56, %v1396_v3  ;;  %v804_v26 = vshrl.u32 %v552_v12, 16  ;;  %v810_v29 = vshll.u32 %v2508_v14, 16  ;;  %v2022_v30 = vrot.slane %v551_v11, 9  ;;  %v237_v56 = vld [vmem:[%s2311_s17 + $0x68] sm:$0xf] }
  0x56   : > { %v1816_v21 = vmax.bf16 %v1580_v7, %v1397_v19  ;;  %v793_v32 = vrot.slane %v791_v20, 4  ;;  %v796_v33 = vrot.slane %v794_v15, 5  ;;  %v802_v60 = vrot.slane %v800_v16, 5  ;;  %v477_v19 = vld [vmem:[%s2321_s23 + $0x68] sm:$0xf] }
  0x57   : > { %v806_v34 = vrot.slane %v804_v26, 4  ;;  %v812_v35 = vrot.slane %v810_v29, 5  ;;  %v1583_v36 = vrot.slane %v552_v12, 5  ;;  %v1586_v28 = vrot.slane %v2508_v14, 5 }
  0x58   : > { %v2210_v22 = vcombine.low %v1815_v24, %v1816_v21  ;;  %v797_v37 = vor.u32 %v796_v33, %v793_v32  ;;  %v554_v40 = vmax.bf16 %v474_v23, %v394_v9  ;;  %v555_v17 = vmax.bf16 %v475_v31, %v395_v18  ;;  %v239_v9 = vld [vmem:[%s2311_s17 + $0x70] sm:$0xf]  ;;  %v478_v23 = vld [vmem:[%s2321_s23 + $0x6c] sm:$0xf] }
  0x59   : > { %v807_v41 = vor.u32 %v806_v34, %v802_v60  ;;  %v1584_v42 = vsel %vm2340_vm4, %v2022_v30, %v1583_v36  ;;  %v1585_v43 = vrot.slane %v1583_v36, 4  ;;  %v814_v45 = vshrl.u32 %v2508_v14, 16  ;;  %v240_v36 = vld [vmem:[%s2311_s17 + $0x74] sm:$0x1] }
  0x5a   : > { %2211 = vst [vmem:[%s2378_s27 + $0x38] sm:$0xff] %v2210_v22   ;;  %v798_v38 = vrot.slane %v797_v37, 4  ;;  %v820_v39 = vshll.u32 %v554_v40, 16  ;;  %v824_v48 = vshrl.u32 %v554_v40, 16  ;;  %v830_v49 = vshll.u32 %v555_v17, 16 }
  0x5b   : > { %v808_v51 = vrot.slane %v807_v41, 4  ;;  %v1587_v52 = vsel %vm2340_vm4, %v1585_v43, %v1586_v28  ;;  %v816_v53 = vrot.slane %v814_v45, 4  ;;  %v1588_v55 = vrot.slane %v1586_v28, 4  ;;  %v320_v41 = vld [vmem:[%s2316_s20 + $0x74] sm:$0x1] }
  0x5c   : > { %v803_v57 = vsel %vm2353_vm5, %v798_v38, %v802_v60  ;;  %v822_v58 = vrot.slane %v820_v39, 5  ;;  %v826_v62 = vrot.slane %v824_v48, 4  ;;  %v832_v63 = vrot.slane %v830_v49, 5  ;;  %v479_v38 = vld [vmem:[%s2321_s23 + $0x70] sm:$0xf] }
  0x5d   : > { %v813_v0 = vsel %vm2353_vm5, %v808_v51, %v812_v35  ;;  %v1398_v1 = vmax.bf16 %v803_v57, %v551_v11  ;;  %v817_v2 = vor.u32 %v816_v53, %v812_v35  ;;  %v1589_v4 = vrot.slane %v554_v40, 5 }
  0x5e   : > { %v1399_v61 = vmax.bf16 %v813_v0, %v552_v12  ;;  %v827_v6 = vor.u32 %v826_v62, %v822_v58  ;;  %v1592_v7 = vrot.slane %v555_v17, 5  ;;  %v396_v8 = vmax.bf16 %v316_v27, %v236_v50  ;;  %v480_v50 = vld [vmem:[%s2321_s23 + $0x74] sm:$0x1] }
  0x5f   : > { %v1817_v10 = vmax.bf16 %v1584_v42, %v1398_v1  ;;  %v818_v13 = vrot.slane %v817_v2, 4  ;;  %v1590_v3 = vsel %vm2340_vm4, %v1588_v55, %v1589_v4  ;;  %v1591_v18 = vrot.slane %v1589_v4, 4 }
  0x60   : > { %v1818_v20 = vmax.bf16 %v1587_v52, %v1399_v61  ;;  %v828_v11 = vrot.slane %v827_v6, 4  ;;  %v397_v15 = vmax.bf16 %v317_v54, %v237_v56  ;;  %v398_v16 = vmax.bf16 %v318_v59, %v238_v46  ;;  %v241_v59 = vld [vmem:[%s2311_s17 + $0x78] sm:$0xf] }
  0x61   : > { %v823_v12 = vsel %vm2353_vm5, %v818_v13, %v822_v58  ;;  %v1593_v24 = vsel %vm2340_vm4, %v1591_v18, %v1592_v7  ;;  %v556_v26 = vmax.bf16 %v476_v5, %v396_v8  ;;  %v399_v29 = vmax.bf16 %v319_v47, %v239_v9  ;;  %v242_v5 = vld [vmem:[%s2311_s17 + $0x7c] sm:$0xf]  ;;  %v321_v61 = vld [vmem:[%s2316_s20 + $0x78] sm:$0xf]  ;;  %v243_v47 = vld [vmem:[%s2311_s17 + $0x80] sm:$0xf] }
  0x62   : > { %v2212_v30 = vcombine.low %v1817_v10, %v1818_v20  ;;  %v833_v31 = vsel %vm2353_vm5, %v828_v11, %v832_v63  ;;  %v1400_v21 = vmax.bf16 %v823_v12, %v2508_v14  ;;  %v557_v32 = vmax.bf16 %v477_v19, %v397_v15  ;;  %v322_v10 = vld [vmem:[%s2316_s20 + $0x7c] sm:$0xf]  ;;  %v323_v20 = vld [vmem:[%s2316_s20 + $0x80] sm:$0xf]  ;;  %v481_v11 = vld [vmem:[%s2321_s23 + $0x78] sm:$0xf] }
  0x63   : > { %v1401_v33 = vmax.bf16 %v833_v31, %v554_v40  ;;  %v2545_v60 = vmax.bf16 %v478_v23, %v398_v16  ;;  %v835_v34 = vshrl.u32 %v556_v26, 16  ;;  %v838_v35 = vshll.u32 %v556_v26, 16 }
  0x64   : > { %2213 = vst [vmem:[%s2378_s27 + $0x40] sm:$0xff] %v2212_v30   ;;  %v1819_v28 = vmax.bf16 %v1590_v3, %v1400_v21  ;;  %v844_v22 = vshll.u32 %v557_v32, 16  ;;  %v848_v37 = vshrl.u32 %v557_v32, 16  ;;  %v2023_v17 = vrot.slane %v556_v26, 9 }
  0x65   : > { %v1820_v42 = vmax.bf16 %v1593_v24, %v1401_v33  ;;  %v837_v43 = vrot.slane %v835_v34, 4  ;;  %v840_v45 = vrot.slane %v838_v35, 5  ;;  %v854_v14 = vshll.u32 %v2545_v60, 16  ;;  %v244_v24 = vld [vmem:[%s2311_s17 + $0x84] sm:$0xf] }
  0x66   : > { %v846_v40 = vrot.slane %v844_v22, 5  ;;  %v850_v39 = vrot.slane %v848_v37, 4  ;;  %v1596_v48 = vrot.slane %v557_v32, 5  ;;  %v1599_v49 = vrot.slane %v2545_v60, 5  ;;  %v483_v34 = vld [vmem:[%s2321_s23 + $0x80] sm:$0xf] }
  0x67   : > { %v2214_v51 = vcombine.low %v1819_v28, %v1820_v42  ;;  %v841_v52 = vor.u32 %v840_v45, %v837_v43  ;;  %v856_v53 = vrot.slane %v854_v14, 5  ;;  %v400_v55 = vmax.bf16 %v320_v41, %v240_v36  ;;  %v245_v22 = vld [vmem:[%s2311_s17 + $0x88] sm:$0x1] }
  0x68   : > { %v851_v56 = vor.u32 %v850_v39, %v846_v40  ;;  %v1597_v46 = vsel %vm2340_vm4, %v2023_v17, %v1596_v48  ;;  %v1598_v27 = vrot.slane %v1596_v48, 4  ;;  %v559_v57 = vmax.bf16 %v479_v38, %v399_v29  ;;  %v324_v29 = vld [vmem:[%s2316_s20 + $0x84] sm:$0xf]  ;;  %v325_v37 = vld [vmem:[%s2316_s20 + $0x88] sm:$0x1] }
  0x69   : > { %2215 = vst [vmem:[%s2378_s27 + $0x48] sm:$0xff] %v2214_v51   ;;  %v842_v58 = vrot.slane %v841_v52, 4  ;;  %v560_v62 = vmax.bf16 %v480_v50, %v400_v55  ;;  %v858_v63 = vshrl.u32 %v2545_v60, 16  ;;  %v1601_v54 = vrot.slane %v1599_v49, 4 }
  0x6a   : > { %v852_v0 = vrot.slane %v851_v56, 4  ;;  %v1600_v1 = vsel %vm2340_vm4, %v1598_v27, %v1599_v49  ;;  %v864_v2 = vshll.u32 %v559_v57, 16  ;;  %v868_v4 = vshrl.u32 %v559_v57, 16  ;;  %v484_v56 = vld [vmem:[%s2321_s23 + $0x84] sm:$0xf] }
  0x6b   : > { %v847_v6 = vsel %vm2353_vm5, %v842_v58, %v846_v40  ;;  %v860_v7 = vrot.slane %v858_v63, 4  ;;  %v874_v8 = vshll.u32 %v560_v62, 16  ;;  %v1602_v9 = vrot.slane %v559_v57, 5  ;;  %v485_v63 = vld [vmem:[%s2321_s23 + $0x88] sm:$0x1] }
  0x6c   : > { %v857_v13 = vsel %vm2353_vm5, %v852_v0, %v856_v53  ;;  %v1402_v3 = vmax.bf16 %v847_v6, %v556_v26  ;;  %v866_v18 = vrot.slane %v864_v2, 5  ;;  %v870_v19 = vrot.slane %v868_v4, 4  ;;  %v482_v26 = vld [vmem:[%s2321_s23 + $0x7c] sm:$0xf] }
  0x6d   : > { %v1403_v15 = vmax.bf16 %v857_v13, %v557_v32  ;;  %v861_v16 = vor.u32 %v860_v7, %v856_v53  ;;  %v876_v23 = vrot.slane %v874_v8, 5  ;;  %v1603_v12 = vsel %vm2340_vm4, %v1601_v54, %v1602_v9 }
  0x6e   : > { %v1821_v30 = vmax.bf16 %v1597_v46, %v1402_v3  ;;  %v871_v31 = vor.u32 %v870_v19, %v866_v18  ;;  %v1604_v21 = vrot.slane %v1602_v9, 4  ;;  %v1605_v33 = vrot.slane %v560_v62, 5 }
  0x6f   : > { %v1822_v35 = vmax.bf16 %v1600_v1, %v1403_v15  ;;  %v862_v36 = vrot.slane %v861_v16, 4  ;;  %v401_v28 = vmax.bf16 %v321_v61, %v241_v59  ;;  %v402_v32 = vmax.bf16 %v322_v10, %v242_v5 }
  0x70   : > { %v872_v17 = vrot.slane %v871_v31, 4  ;;  %v1606_v41 = vsel %vm2340_vm4, %v1604_v21, %v1605_v33  ;;  %v403_v42 = vmax.bf16 %v323_v20, %v243_v47  ;;  %v404_v43 = vmax.bf16 %v324_v29, %v244_v24  ;;  %v246_v20 = vld [vmem:[%s2311_s17 + $0x8c] sm:$0xf]  ;;  %v248_v24 = vld [vmem:[%s2311_s17 + $0x94] sm:$0xf] }
  0x71   : > { %v2216_v45 = vcombine.low %v1821_v30, %v1822_v35  ;;  %v867_v14 = vsel %vm2353_vm5, %v862_v36, %v866_v18  ;;  %v561_v38 = vmax.bf16 %v481_v11, %v401_v28  ;;  %v562_v40 = vmax.bf16 %v482_v26, %v402_v32  ;;  %v326_v29 = vld [vmem:[%s2316_s20 + $0x8c] sm:$0xf]  ;;  %v327_v26 = vld [vmem:[%s2316_s20 + $0x90] sm:$0xf]  ;;  %v328_v32 = vld [vmem:[%s2316_s20 + $0x94] sm:$0xf] }
  0x72   : > { %v877_v39 = vsel %vm2353_vm5, %v872_v17, %v876_v23  ;;  %v1404_v48 = vmax.bf16 %v867_v14, %v2545_v60  ;;  %v2586_v49 = vmax.bf16 %v483_v34, %v403_v42  ;;  %v405_v50 = vmax.bf16 %v325_v37, %v245_v22  ;;  %v486_v22 = vld [vmem:[%s2321_s23 + $0x8c] sm:$0xf] }
  0x73   : > { %2217 = vst [vmem:[%s2378_s27 + $0x50] sm:$0xff] %v2216_v45   ;;  %v1405_v51 = vmax.bf16 %v877_v39, %v559_v57  ;;  %v879_v52 = vshrl.u32 %v561_v38, 16  ;;  %v882_v53 = vshll.u32 %v561_v38, 16  ;;  %v888_v55 = vshll.u32 %v562_v40, 16  ;;  %v329_v45 = vld [vmem:[%s2316_s20 + $0x98] sm:$0xf] }
  0x74   : > { %v1823_v46 = vmax.bf16 %v1603_v12, %v1404_v48  ;;  %v892_v27 = vshrl.u32 %v562_v40, 16  ;;  %v898_v58 = vshll.u32 %v2586_v49, 16  ;;  %v2024_v62 = vrot.slane %v561_v38, 9  ;;  %v247_v12 = vld [vmem:[%s2311_s17 + $0x90] sm:$0xf] }
  0x75   : > { %v1824_v54 = vmax.bf16 %v1606_v41, %v1405_v51  ;;  %v881_v0 = vrot.slane %v879_v52, 4  ;;  %v884_v1 = vrot.slane %v882_v53, 5  ;;  %v890_v60 = vrot.slane %v888_v55, 5  ;;  %v487_v51 = vld [vmem:[%s2321_s23 + $0x90] sm:$0xf] }
  0x76   : > { %v894_v2 = vrot.slane %v892_v27, 4  ;;  %v900_v4 = vrot.slane %v898_v58, 5  ;;  %v1609_v59 = vrot.slane %v562_v40, 5  ;;  %v1612_v57 = vrot.slane %v2586_v49, 5 }
  0x77   : > { %v2218_v5 = vcombine.low %v1823_v46, %v1824_v54  ;;  %v885_v61 = vor.u32 %v884_v1, %v881_v0  ;;  %v564_v6 = vmax.bf16 %v484_v56, %v404_v43  ;;  %v565_v7 = vmax.bf16 %v485_v63, %v405_v50  ;;  %v249_v43 = vld [vmem:[%s2311_s17 + $0x98] sm:$0xf]  ;;  %v488_v56 = vld [vmem:[%s2321_s23 + $0x94] sm:$0xf] }
  0x78   : > { %v895_v8 = vor.u32 %v894_v2, %v890_v60  ;;  %v1610_v9 = vsel %vm2340_vm4, %v2024_v62, %v1609_v59  ;;  %v1611_v47 = vrot.slane %v1609_v59, 4  ;;  %v902_v10 = vshrl.u32 %v2586_v49, 16  ;;  %v250_v59 = vld [vmem:[%s2311_s17 + $0x9c] sm:$0x1] }
  0x79   : > { %2219 = vst [vmem:[%s2378_s27 + $0x58] sm:$0xff] %v2218_v5   ;;  %v886_v13 = vrot.slane %v885_v61, 4  ;;  %v908_v3 = vshll.u32 %v564_v6, 16  ;;  %v912_v18 = vshrl.u32 %v564_v6, 16  ;;  %v918_v19 = vshll.u32 %v565_v7, 16 }
  0x7a   : > { %v896_v11 = vrot.slane %v895_v8, 4  ;;  %v1613_v15 = vsel %vm2340_vm4, %v1611_v47, %v1612_v57  ;;  %v904_v16 = vrot.slane %v902_v10, 4  ;;  %v1614_v23 = vrot.slane %v1612_v57, 4  ;;  %v330_v8 = vld [vmem:[%s2316_s20 + $0x9c] sm:$0x1] }
  0x7b   : > { %v891_v30 = vsel %vm2353_vm5, %v886_v13, %v890_v60  ;;  %v910_v31 = vrot.slane %v908_v3, 5  ;;  %v914_v21 = vrot.slane %v912_v18, 4  ;;  %v920_v33 = vrot.slane %v918_v19, 5  ;;  %v489_v13 = vld [vmem:[%s2321_s23 + $0x98] sm:$0xf] }
  0x7c   : > { %v901_v34 = vsel %vm2353_vm5, %v896_v11, %v900_v4  ;;  %v1406_v35 = vmax.bf16 %v891_v30, %v561_v38  ;;  %v905_v36 = vor.u32 %v904_v16, %v900_v4  ;;  %v1615_v28 = vrot.slane %v564_v6, 5 }
  0x7d   : > { %v1407_v37 = vmax.bf16 %v901_v34, %v562_v40  ;;  %v915_v17 = vor.u32 %v914_v21, %v910_v31  ;;  %v1618_v41 = vrot.slane %v565_v7, 5  ;;  %v406_v42 = vmax.bf16 %v326_v29, %v246_v20  ;;  %v490_v20 = vld [vmem:[%s2321_s23 + $0x9c] sm:$0x1] }
  0x7e   : > { %v1825_v14 = vmax.bf16 %v1610_v9, %v1406_v35  ;;  %v906_v39 = vrot.slane %v905_v36, 4  ;;  %v1616_v48 = vsel %vm2340_vm4, %v1614_v23, %v1615_v28  ;;  %v1617_v50 = vrot.slane %v1615_v28, 4 }
  0x7f   : > { %v1826_v52 = vmax.bf16 %v1613_v15, %v1407_v37  ;;  %v916_v38 = vrot.slane %v915_v17, 4  ;;  %v407_v53 = vmax.bf16 %v327_v26, %v247_v12  ;;  %v408_v55 = vmax.bf16 %v328_v32, %v248_v24  ;;  %v251_v32 = vld [vmem:[%s2311_s17 + $0xa0] sm:$0xf] }
  0x80   : > { %v911_v40 = vsel %vm2353_vm5, %v906_v39, %v910_v31  ;;  %v1619_v46 = vsel %vm2340_vm4, %v1617_v50, %v1618_v41  ;;  %v566_v27 = vmax.bf16 %v486_v22, %v406_v42  ;;  %v409_v58 = vmax.bf16 %v329_v45, %v249_v43  ;;  %v252_v22 = vld [vmem:[%s2311_s17 + $0xa4] sm:$0xf]  ;;  %v331_v37 = vld [vmem:[%s2316_s20 + $0xa0] sm:$0xf]  ;;  %v253_v45 = vld [vmem:[%s2311_s17 + $0xa8] sm:$0xf] }
  0x81   : > { %v2220_v62 = vcombine.low %v1825_v14, %v1826_v52  ;;  %v921_v63 = vsel %vm2353_vm5, %v916_v38, %v920_v33  ;;  %v1408_v54 = vmax.bf16 %v911_v40, %v2586_v49  ;;  %v567_v0 = vmax.bf16 %v487_v51, %v407_v53  ;;  %v332_v14 = vld [vmem:[%s2316_s20 + $0xa4] sm:$0xf]  ;;  %v333_v52 = vld [vmem:[%s2316_s20 + $0xa8] sm:$0xf]  ;;  %v491_v38 = vld [vmem:[%s2321_s23 + $0xa0] sm:$0xf] }
  0x82   : > { %v1409_v1 = vmax.bf16 %v921_v63, %v564_v6  ;;  %v2623_v60 = vmax.bf16 %v488_v56, %v408_v55  ;;  %v923_v2 = vshrl.u32 %v566_v27, 16  ;;  %v926_v4 = vshll.u32 %v566_v27, 16 }
  0x83   : > { %2221 = vst [vmem:[%s2378_s27 + $0x60] sm:$0xff] %v2220_v62   ;;  %v1827_v57 = vmax.bf16 %v1616_v48, %v1408_v54  ;;  %v932_v5 = vshll.u32 %v567_v0, 16  ;;  %v936_v61 = vshrl.u32 %v567_v0, 16  ;;  %v2025_v7 = vrot.slane %v566_v27, 9 }
  0x84   : > { %v1828_v9 = vmax.bf16 %v1619_v46, %v1409_v1  ;;  %v925_v47 = vrot.slane %v923_v2, 4  ;;  %v928_v10 = vrot.slane %v926_v4, 5  ;;  %v942_v49 = vshll.u32 %v2623_v60, 16  ;;  %v254_v46 = vld [vmem:[%s2311_s17 + $0xac] sm:$0xf] }
  0x85   : > { %v934_v6 = vrot.slane %v932_v5, 5  ;;  %v938_v3 = vrot.slane %v936_v61, 4  ;;  %v1622_v18 = vrot.slane %v567_v0, 5  ;;  %v1625_v19 = vrot.slane %v2623_v60, 5  ;;  %v493_v2 = vld [vmem:[%s2321_s23 + $0xa8] sm:$0xf] }
  0x86   : > { %v2222_v11 = vcombine.low %v1827_v57, %v1828_v9  ;;  %v929_v15 = vor.u32 %v928_v10, %v925_v47  ;;  %v944_v16 = vrot.slane %v942_v49, 5  ;;  %v410_v23 = vmax.bf16 %v330_v8, %v250_v59  ;;  %v255_v5 = vld [vmem:[%s2311_s17 + $0xb0] sm:$0x1] }
  0x87   : > { %v939_v12 = vor.u32 %v938_v3, %v934_v6  ;;  %v1623_v24 = vsel %vm2340_vm4, %v2025_v7, %v1622_v18  ;;  %v1624_v29 = vrot.slane %v1622_v18, 4  ;;  %v569_v30 = vmax.bf16 %v489_v13, %v409_v58  ;;  %v334_v58 = vld [vmem:[%s2316_s20 + $0xac] sm:$0xf]  ;;  %v335_v61 = vld [vmem:[%s2316_s20 + $0xb0] sm:$0x1] }
  0x88   : > { %2223 = vst [vmem:[%s2378_s27 + $0x68] sm:$0xff] %v2222_v11   ;;  %v930_v31 = vrot.slane %v929_v15, 4  ;;  %v570_v21 = vmax.bf16 %v490_v20, %v410_v23  ;;  %v946_v33 = vshrl.u32 %v2623_v60, 16  ;;  %v1627_v26 = vrot.slane %v1625_v19, 4 }
  0x89   : > { %v940_v34 = vrot.slane %v939_v12, 4  ;;  %v1626_v35 = vsel %vm2340_vm4, %v1624_v29, %v1625_v19  ;;  %v952_v36 = vshll.u32 %v569_v30, 16  ;;  %v956_v28 = vshrl.u32 %v569_v30, 16  ;;  %v494_v12 = vld [vmem:[%s2321_s23 + $0xac] sm:$0xf] }
  0x8a   : > { %v935_v17 = vsel %vm2353_vm5, %v930_v31, %v934_v6  ;;  %v948_v41 = vrot.slane %v946_v33, 4  ;;  %v962_v42 = vshll.u32 %v570_v21, 16  ;;  %v1628_v43 = vrot.slane %v569_v30, 5  ;;  %v495_v33 = vld [vmem:[%s2321_s23 + $0xb0] sm:$0x1] }
  0x8b   : > { %v945_v39 = vsel %vm2353_vm5, %v940_v34, %v944_v16  ;;  %v1410_v48 = vmax.bf16 %v935_v17, %v566_v27  ;;  %v954_v50 = vrot.slane %v952_v36, 5  ;;  %v958_v51 = vrot.slane %v956_v28, 4  ;;  %v492_v27 = vld [vmem:[%s2321_s23 + $0xa4] sm:$0xf] }
  0x8c   : > { %v1411_v53 = vmax.bf16 %v945_v39, %v567_v0  ;;  %v949_v55 = vor.u32 %v948_v41, %v944_v16  ;;  %v964_v56 = vrot.slane %v962_v42, 5  ;;  %v1629_v40 = vsel %vm2340_vm4, %v1627_v26, %v1628_v43 }
  0x8d   : > { %v1829_v62 = vmax.bf16 %v1623_v24, %v1410_v48  ;;  %v959_v63 = vor.u32 %v958_v51, %v954_v50  ;;  %v1630_v54 = vrot.slane %v1628_v43, 4  ;;  %v1631_v1 = vrot.slane %v570_v21, 5 }
  0x8e   : > { %v1830_v4 = vmax.bf16 %v1626_v35, %v1411_v53  ;;  %v950_v59 = vrot.slane %v949_v55, 4  ;;  %v411_v57 = vmax.bf16 %v331_v37, %v251_v32  ;;  %v412_v0 = vmax.bf16 %v332_v14, %v252_v22 }
  0x8f   : > { %v960_v7 = vrot.slane %v959_v63, 4  ;;  %v1632_v8 = vsel %vm2340_vm4, %v1630_v54, %v1631_v1  ;;  %v413_v9 = vmax.bf16 %v333_v52, %v253_v45  ;;  %v414_v47 = vmax.bf16 %v334_v58, %v254_v46  ;;  %v256_v52 = vld [vmem:[%s2311_s17 + $0xb4] sm:$0xf]  ;;  %v258_v46 = vld [vmem:[%s2311_s17 + $0xbc] sm:$0xf] }
  0x90   : > { %v2224_v10 = vcombine.low %v1829_v62, %v1830_v4  ;;  %v955_v49 = vsel %vm2353_vm5, %v950_v59, %v954_v50  ;;  %v571_v13 = vmax.bf16 %v491_v38, %v411_v57  ;;  %v572_v6 = vmax.bf16 %v492_v27, %v412_v0  ;;  %v336_v58 = vld [vmem:[%s2316_s20 + $0xb4] sm:$0xf]  ;;  %v337_v27 = vld [vmem:[%s2316_s20 + $0xb8] sm:$0xf]  ;;  %v338_v0 = vld [vmem:[%s2316_s20 + $0xbc] sm:$0xf] }
  0x91   : > { %v965_v3 = vsel %vm2353_vm5, %v960_v7, %v964_v56  ;;  %v1412_v18 = vmax.bf16 %v955_v49, %v2623_v60  ;;  %v2664_v19 = vmax.bf16 %v493_v2, %v413_v9  ;;  %v415_v20 = vmax.bf16 %v335_v61, %v255_v5  ;;  %v496_v5 = vld [vmem:[%s2321_s23 + $0xb4] sm:$0xf] }
  0x92   : > { %2225 = vst [vmem:[%s2378_s27 + $0x70] sm:$0xff] %v2224_v10   ;;  %v1413_v11 = vmax.bf16 %v965_v3, %v569_v30  ;;  %v967_v15 = vshrl.u32 %v571_v13, 16  ;;  %v970_v16 = vshll.u32 %v571_v13, 16  ;;  %v976_v23 = vshll.u32 %v572_v6, 16  ;;  %v339_v10 = vld [vmem:[%s2316_s20 + $0xc0] sm:$0xf] }
  0x93   : > { %v1831_v24 = vmax.bf16 %v1629_v40, %v1412_v18  ;;  %v980_v29 = vshrl.u32 %v572_v6, 16  ;;  %v986_v31 = vshll.u32 %v2664_v19, 16  ;;  %v2026_v21 = vrot.slane %v571_v13, 9  ;;  %v257_v40 = vld [vmem:[%s2311_s17 + $0xb8] sm:$0xf] }
  0x94   : > { %v1832_v26 = vmax.bf16 %v1632_v8, %v1413_v11  ;;  %v969_v34 = vrot.slane %v967_v15, 4  ;;  %v972_v35 = vrot.slane %v970_v16, 5  ;;  %v978_v60 = vrot.slane %v976_v23, 5  ;;  %v497_v11 = vld [vmem:[%s2321_s23 + $0xb8] sm:$0xf] }
  0x95   : > { %v982_v36 = vrot.slane %v980_v29, 4  ;;  %v988_v28 = vrot.slane %v986_v31, 5  ;;  %v1635_v32 = vrot.slane %v572_v6, 5  ;;  %v1638_v30 = vrot.slane %v2664_v19, 5 }
  0x96   : > { %v2226_v22 = vcombine.low %v1831_v24, %v1832_v26  ;;  %v973_v37 = vor.u32 %v972_v35, %v969_v34  ;;  %v574_v17 = vmax.bf16 %v494_v12, %v414_v47  ;;  %v575_v41 = vmax.bf16 %v495_v33, %v415_v20  ;;  %v259_v47 = vld [vmem:[%s2311_s17 + $0xc0] sm:$0xf]  ;;  %v498_v12 = vld [vmem:[%s2321_s23 + $0xbc] sm:$0xf] }
  0x97   : > { %v983_v42 = vor.u32 %v982_v36, %v978_v60  ;;  %v1636_v43 = vsel %vm2340_vm4, %v2026_v21, %v1635_v32  ;;  %v1637_v45 = vrot.slane %v1635_v32, 4  ;;  %v990_v14 = vshrl.u32 %v2664_v19, 16  ;;  %v260_v32 = vld [vmem:[%s2311_s17 + $0xc4] sm:$0x1] }
  0x98   : > { %2227 = vst [vmem:[%s2378_s27 + $0x78] sm:$0xff] %v2226_v22   ;;  %v974_v39 = vrot.slane %v973_v37, 4  ;;  %v996_v48 = vshll.u32 %v574_v17, 16  ;;  %v1000_v50 = vshrl.u32 %v574_v17, 16  ;;  %v1006_v51 = vshll.u32 %v575_v41, 16 }
  0x99   : > { %v984_v38 = vrot.slane %v983_v42, 4  ;;  %v1639_v53 = vsel %vm2340_vm4, %v1637_v45, %v1638_v30  ;;  %v992_v55 = vrot.slane %v990_v14, 4  ;;  %v1640_v56 = vrot.slane %v1638_v30, 4  ;;  %v340_v42 = vld [vmem:[%s2316_s20 + $0xc4] sm:$0x1] }
  0x9a   : > { %v979_v62 = vsel %vm2353_vm5, %v974_v39, %v978_v60  ;;  %v998_v63 = vrot.slane %v996_v48, 5  ;;  %v1002_v54 = vrot.slane %v1000_v50, 4  ;;  %v1008_v1 = vrot.slane %v1006_v51, 5  ;;  %v499_v39 = vld [vmem:[%s2321_s23 + $0xc0] sm:$0xf] }
  0x9b   : > { %v989_v2 = vsel %vm2353_vm5, %v984_v38, %v988_v28  ;;  %v1414_v4 = vmax.bf16 %v979_v62, %v571_v13  ;;  %v993_v59 = vor.u32 %v992_v55, %v988_v28  ;;  %v1641_v57 = vrot.slane %v574_v17, 5 }
  0x9c   : > { %v1415_v61 = vmax.bf16 %v989_v2, %v572_v6  ;;  %v1003_v7 = vor.u32 %v1002_v54, %v998_v63  ;;  %v1644_v8 = vrot.slane %v575_v41, 5  ;;  %v416_v9 = vmax.bf16 %v336_v58, %v256_v52  ;;  %v500_v52 = vld [vmem:[%s2321_s23 + $0xc4] sm:$0x1] }
  0x9d   : > { %v1833_v49 = vmax.bf16 %v1636_v43, %v1414_v4  ;;  %v994_v3 = vrot.slane %v993_v59, 4  ;;  %v1642_v18 = vsel %vm2340_vm4, %v1640_v56, %v1641_v57  ;;  %v1643_v20 = vrot.slane %v1641_v57, 4 }
  0x9e   : > { %v1834_v15 = vmax.bf16 %v1639_v53, %v1415_v61  ;;  %v1004_v13 = vrot.slane %v1003_v7, 4  ;;  %v417_v16 = vmax.bf16 %v337_v27, %v257_v40  ;;  %v418_v23 = vmax.bf16 %v338_v0, %v258_v46  ;;  %v261_v0 = vld [vmem:[%s2311_s17 + $0xc8] sm:$0xf] }
  0x9f   : > { %v999_v6 = vsel %vm2353_vm5, %v994_v3, %v998_v63  ;;  %v1645_v24 = vsel %vm2340_vm4, %v1643_v20, %v1644_v8  ;;  %v576_v29 = vmax.bf16 %v496_v5, %v416_v9  ;;  %v419_v31 = vmax.bf16 %v339_v10, %v259_v47  ;;  %v262_v5 = vld [vmem:[%s2311_s17 + $0xcc] sm:$0xf]  ;;  %v341_v61 = vld [vmem:[%s2316_s20 + $0xc8] sm:$0xf]  ;;  %v263_v10 = vld [vmem:[%s2311_s17 + $0xd0] sm:$0xf] }
  0xa0   : > { %v2228_v21 = vcombine.low %v1833_v49, %v1834_v15  ;;  %v1009_v33 = vsel %vm2353_vm5, %v1004_v13, %v1008_v1  ;;  %v1416_v26 = vmax.bf16 %v999_v6, %v2664_v19  ;;  %v577_v34 = vmax.bf16 %v497_v11, %v417_v16  ;;  %v342_v49 = vld [vmem:[%s2316_s20 + $0xcc] sm:$0xf]  ;;  %v343_v15 = vld [vmem:[%s2316_s20 + $0xd0] sm:$0xf]  ;;  %v501_v13 = vld [vmem:[%s2321_s23 + $0xc8] sm:$0xf] }
  0xa1   : > { %v1417_v35 = vmax.bf16 %v1009_v33, %v574_v17  ;;  %v2701_v60 = vmax.bf16 %v498_v12, %v418_v23  ;;  %v1011_v36 = vshrl.u32 %v576_v29, 16  ;;  %v1014_v28 = vshll.u32 %v576_v29, 16 }
  0xa2   : > { %2229 = vst [vmem:[%s2378_s27 + $0x80] sm:$0xff] %v2228_v21   ;;  %v1835_v30 = vmax.bf16 %v1642_v18, %v1416_v26  ;;  %v1020_v22 = vshll.u32 %v577_v34, 16  ;;  %v1024_v37 = vshrl.u32 %v577_v34, 16  ;;  %v2027_v41 = vrot.slane %v576_v29, 9 }
  0xa3   : > { %v1836_v43 = vmax.bf16 %v1645_v24, %v1417_v35  ;;  %v1013_v45 = vrot.slane %v1011_v36, 4  ;;  %v1016_v14 = vrot.slane %v1014_v28, 5  ;;  %v1030_v19 = vshll.u32 %v2701_v60, 16  ;;  %v264_v24 = vld [vmem:[%s2311_s17 + $0xd4] sm:$0xf] }
  0xa4   : > { %v1022_v17 = vrot.slane %v1020_v22, 5  ;;  %v1026_v48 = vrot.slane %v1024_v37, 4  ;;  %v1648_v50 = vrot.slane %v577_v34, 5  ;;  %v1651_v51 = vrot.slane %v2701_v60, 5  ;;  %v503_v36 = vld [vmem:[%s2321_s23 + $0xd0] sm:$0xf] }
  0xa5   : > { %v2230_v38 = vcombine.low %v1835_v30, %v1836_v43  ;;  %v1017_v53 = vor.u32 %v1016_v14, %v1013_v45  ;;  %v1032_v55 = vrot.slane %v1030_v19, 5  ;;  %v420_v56 = vmax.bf16 %v340_v42, %v260_v32  ;;  %v265_v22 = vld [vmem:[%s2311_s17 + $0xd8] sm:$0x1] }
  0xa6   : > { %v1027_v40 = vor.u32 %v1026_v48, %v1022_v17  ;;  %v1649_v46 = vsel %vm2340_vm4, %v2027_v41, %v1648_v50  ;;  %v1650_v58 = vrot.slane %v1648_v50, 4  ;;  %v579_v62 = vmax.bf16 %v499_v39, %v419_v31  ;;  %v344_v31 = vld [vmem:[%s2316_s20 + $0xd4] sm:$0xf]  ;;  %v345_v37 = vld [vmem:[%s2316_s20 + $0xd8] sm:$0x1] }
  0xa7   : > { %2231 = vst [vmem:[%s2378_s27 + $0x88] sm:$0xff] %v2230_v38   ;;  %v1018_v63 = vrot.slane %v1017_v53, 4  ;;  %v580_v54 = vmax.bf16 %v500_v52, %v420_v56  ;;  %v1034_v1 = vshrl.u32 %v2701_v60, 16  ;;  %v1653_v27 = vrot.slane %v1651_v51, 4 }
  0xa8   : > { %v1028_v2 = vrot.slane %v1027_v40, 4  ;;  %v1652_v4 = vsel %vm2340_vm4, %v1650_v58, %v1651_v51  ;;  %v1040_v59 = vshll.u32 %v579_v62, 16  ;;  %v1044_v57 = vshrl.u32 %v579_v62, 16  ;;  %v504_v40 = vld [vmem:[%s2321_s23 + $0xd4] sm:$0xf] }
  0xa9   : > { %v1023_v7 = vsel %vm2353_vm5, %v1018_v63, %v1022_v17  ;;  %v1036_v8 = vrot.slane %v1034_v1, 4  ;;  %v1050_v9 = vshll.u32 %v580_v54, 16  ;;  %v1654_v47 = vrot.slane %v579_v62, 5  ;;  %v505_v1 = vld [vmem:[%s2321_s23 + $0xd8] sm:$0x1] }
  0xaa   : > { %v1033_v3 = vsel %vm2353_vm5, %v1028_v2, %v1032_v55  ;;  %v1418_v18 = vmax.bf16 %v1023_v7, %v576_v29  ;;  %v1042_v20 = vrot.slane %v1040_v59, 5  ;;  %v1046_v11 = vrot.slane %v1044_v57, 4  ;;  %v502_v29 = vld [vmem:[%s2321_s23 + $0xcc] sm:$0xf] }
  0xab   : > { %v1419_v16 = vmax.bf16 %v1033_v3, %v577_v34  ;;  %v1037_v23 = vor.u32 %v1036_v8, %v1032_v55  ;;  %v1052_v12 = vrot.slane %v1050_v9, 5  ;;  %v1655_v6 = vsel %vm2340_vm4, %v1653_v27, %v1654_v47 }
  0xac   : > { %v1837_v21 = vmax.bf16 %v1649_v46, %v1418_v18  ;;  %v1047_v33 = vor.u32 %v1046_v11, %v1042_v20  ;;  %v1656_v26 = vrot.slane %v1654_v47, 4  ;;  %v1657_v35 = vrot.slane %v580_v54, 5 }
  0xad   : > { %v1838_v28 = vmax.bf16 %v1652_v4, %v1419_v16  ;;  %v1038_v32 = vrot.slane %v1037_v23, 4  ;;  %v421_v30 = vmax.bf16 %v341_v61, %v261_v0  ;;  %v422_v34 = vmax.bf16 %v342_v49, %v262_v5 }
  0xae   : > { %v1048_v41 = vrot.slane %v1047_v33, 4  ;;  %v1658_v42 = vsel %vm2340_vm4, %v1656_v26, %v1657_v35  ;;  %v423_v43 = vmax.bf16 %v343_v15, %v263_v10  ;;  %v424_v45 = vmax.bf16 %v344_v31, %v264_v24  ;;  %v266_v15 = vld [vmem:[%s2311_s17 + $0xdc] sm:$0xf]  ;;  %v268_v24 = vld [vmem:[%s2311_s17 + $0xe4] sm:$0xf] }
  0xaf   : > { %v2232_v14 = vcombine.low %v1837_v21, %v1838_v28  ;;  %v1043_v19 = vsel %vm2353_vm5, %v1038_v32, %v1042_v20  ;;  %v581_v39 = vmax.bf16 %v501_v13, %v421_v30  ;;  %v582_v17 = vmax.bf16 %v502_v29, %v422_v34  ;;  %v346_v31 = vld [vmem:[%s2316_s20 + $0xdc] sm:$0xf]  ;;  %v347_v29 = vld [vmem:[%s2316_s20 + $0xe0] sm:$0xf]  ;;  %v348_v34 = vld [vmem:[%s2316_s20 + $0xe4] sm:$0xf] }
  0xb0   : > { %v1053_v48 = vsel %vm2353_vm5, %v1048_v41, %v1052_v12  ;;  %v1420_v50 = vmax.bf16 %v1043_v19, %v2701_v60  ;;  %v2742_v51 = vmax.bf16 %v503_v36, %v423_v43  ;;  %v425_v52 = vmax.bf16 %v345_v37, %v265_v22  ;;  %v506_v22 = vld [vmem:[%s2321_s23 + $0xdc] sm:$0xf] }
  0xb1   : > { %2233 = vst [vmem:[%s2378_s27 + $0x90] sm:$0xff] %v2232_v14   ;;  %v1421_v38 = vmax.bf16 %v1053_v48, %v579_v62  ;;  %v1055_v53 = vshrl.u32 %v581_v39, 16  ;;  %v1058_v55 = vshll.u32 %v581_v39, 16  ;;  %v1064_v56 = vshll.u32 %v582_v17, 16  ;;  %v349_v14 = vld [vmem:[%s2316_s20 + $0xe8] sm:$0xf] }
  0xb2   : > { %v1839_v46 = vmax.bf16 %v1655_v6, %v1420_v50  ;;  %v1068_v58 = vshrl.u32 %v582_v17, 16  ;;  %v1074_v63 = vshll.u32 %v2742_v51, 16  ;;  %v2028_v54 = vrot.slane %v581_v39, 9  ;;  %v267_v6 = vld [vmem:[%s2311_s17 + $0xe0] sm:$0xf] }
  0xb3   : > { %v1840_v27 = vmax.bf16 %v1658_v42, %v1421_v38  ;;  %v1057_v2 = vrot.slane %v1055_v53, 4  ;;  %v1060_v4 = vrot.slane %v1058_v55, 5  ;;  %v1066_v60 = vrot.slane %v1064_v56, 5  ;;  %v507_v38 = vld [vmem:[%s2321_s23 + $0xe0] sm:$0xf] }
  0xb4   : > { %v1070_v59 = vrot.slane %v1068_v58, 4  ;;  %v1076_v57 = vrot.slane %v1074_v63, 5  ;;  %v1661_v0 = vrot.slane %v582_v17, 5  ;;  %v1664_v62 = vrot.slane %v2742_v51, 5 }
  0xb5   : > { %v2234_v5 = vcombine.low %v1839_v46, %v1840_v27  ;;  %v1061_v61 = vor.u32 %v1060_v4, %v1057_v2  ;;  %v584_v7 = vmax.bf16 %v504_v40, %v424_v45  ;;  %v585_v8 = vmax.bf16 %v505_v1, %v425_v52  ;;  %v269_v45 = vld [vmem:[%s2311_s17 + $0xe8] sm:$0xf]  ;;  %v508_v40 = vld [vmem:[%s2321_s23 + $0xe4] sm:$0xf] }
  0xb6   : > { %v1071_v9 = vor.u32 %v1070_v59, %v1066_v60  ;;  %v1662_v47 = vsel %vm2340_vm4, %v2028_v54, %v1661_v0  ;;  %v1663_v10 = vrot.slane %v1661_v0, 4  ;;  %v1078_v49 = vshrl.u32 %v2742_v51, 16  ;;  %v270_v0 = vld [vmem:[%s2311_s17 + $0xec] sm:$0x1] }
  0xb7   : > { %2235 = vst [vmem:[%s2378_s27 + $0x98] sm:$0xff] %v2234_v5   ;;  %v1062_v3 = vrot.slane %v1061_v61, 4  ;;  %v1084_v18 = vshll.u32 %v584_v7, 16  ;;  %v1088_v20 = vshrl.u32 %v584_v7, 16  ;;  %v1094_v11 = vshll.u32 %v585_v8, 16 }
  0xb8   : > { %v1072_v13 = vrot.slane %v1071_v9, 4  ;;  %v1665_v16 = vsel %vm2340_vm4, %v1663_v10, %v1664_v62  ;;  %v1080_v23 = vrot.slane %v1078_v49, 4  ;;  %v1666_v12 = vrot.slane %v1664_v62, 4  ;;  %v350_v9 = vld [vmem:[%s2316_s20 + $0xec] sm:$0x1] }
  0xb9   : > { %v1067_v21 = vsel %vm2353_vm5, %v1062_v3, %v1066_v60  ;;  %v1086_v33 = vrot.slane %v1084_v18, 5  ;;  %v1090_v26 = vrot.slane %v1088_v20, 4  ;;  %v1096_v35 = vrot.slane %v1094_v11, 5  ;;  %v509_v3 = vld [vmem:[%s2321_s23 + $0xe8] sm:$0xf] }
  0xba   : > { %v1077_v36 = vsel %vm2353_vm5, %v1072_v13, %v1076_v57  ;;  %v1422_v28 = vmax.bf16 %v1067_v21, %v581_v39  ;;  %v1081_v32 = vor.u32 %v1080_v23, %v1076_v57  ;;  %v1667_v30 = vrot.slane %v584_v7, 5 }
  0xbb   : > { %v1423_v37 = vmax.bf16 %v1077_v36, %v582_v17  ;;  %v1091_v41 = vor.u32 %v1090_v26, %v1086_v33  ;;  %v1670_v42 = vrot.slane %v585_v8, 5  ;;  %v426_v43 = vmax.bf16 %v346_v31, %v266_v15  ;;  %v510_v15 = vld [vmem:[%s2321_s23 + $0xec] sm:$0x1] }
  0xbc   : > { %v1841_v19 = vmax.bf16 %v1662_v47, %v1422_v28  ;;  %v1082_v48 = vrot.slane %v1081_v32, 4  ;;  %v1668_v50 = vsel %vm2340_vm4, %v1666_v12, %v1667_v30  ;;  %v1669_v52 = vrot.slane %v1667_v30, 4 }
  0xbd   : > { %v1842_v53 = vmax.bf16 %v1665_v16, %v1423_v37  ;;  %v1092_v39 = vrot.slane %v1091_v41, 4  ;;  %v427_v55 = vmax.bf16 %v347_v29, %v267_v6  ;;  %v428_v56 = vmax.bf16 %v348_v34, %v268_v24  ;;  %v271_v34 = vld [vmem:[%s2311_s17 + $0xf0] sm:$0xf] }
  0xbe   : > { %v1087_v17 = vsel %vm2353_vm5, %v1082_v48, %v1086_v33  ;;  %v1671_v46 = vsel %vm2340_vm4, %v1669_v52, %v1670_v42  ;;  %v586_v58 = vmax.bf16 %v506_v22, %v426_v43  ;;  %v429_v63 = vmax.bf16 %v349_v14, %v269_v45  ;;  %v272_v22 = vld [vmem:[%s2311_s17 + $0xf4] sm:$0xf]  ;;  %v351_v37 = vld [vmem:[%s2316_s20 + $0xf0] sm:$0xf]  ;;  %v273_v14 = vld [vmem:[%s2311_s17 + $0xf8] sm:$0xf] }
  0xbf   : > { %v2236_v54 = vcombine.low %v1841_v19, %v1842_v53  ;;  %v1097_v1 = vsel %vm2353_vm5, %v1092_v39, %v1096_v35  ;;  %v1424_v27 = vmax.bf16 %v1087_v17, %v2742_v51  ;;  %v587_v2 = vmax.bf16 %v507_v38, %v427_v55  ;;  %v352_v19 = vld [vmem:[%s2316_s20 + $0xf4] sm:$0xf]  ;;  %v353_v53 = vld [vmem:[%s2316_s20 + $0xf8] sm:$0xf]  ;;  %v511_v39 = vld [vmem:[%s2321_s23 + $0xf0] sm:$0xf] }
  0xc0   : > { %v1425_v4 = vmax.bf16 %v1097_v1, %v584_v7  ;;  %v2779_v60 = vmax.bf16 %v508_v40, %v428_v56  ;;  %v1099_v59 = vshrl.u32 %v586_v58, 16  ;;  %v1102_v57 = vshll.u32 %v586_v58, 16 }
  0xc1   : > { %2237 = vst [vmem:[%s2378_s27 + $0xa0] sm:$0xff] %v2236_v54   ;;  %v1843_v62 = vmax.bf16 %v1668_v50, %v1424_v27  ;;  %v1108_v5 = vshll.u32 %v587_v2, 16  ;;  %v1112_v61 = vshrl.u32 %v587_v2, 16  ;;  %v2029_v8 = vrot.slane %v586_v58, 9 }
  0xc2   : > { %v1844_v47 = vmax.bf16 %v1671_v46, %v1425_v4  ;;  %v1101_v10 = vrot.slane %v1099_v59, 4  ;;  %v1104_v49 = vrot.slane %v1102_v57, 5  ;;  %v1118_v51 = vshll.u32 %v2779_v60, 16  ;;  %v274_v46 = vld [vmem:[%s2311_s17 + $0xfc] sm:$0xf] }
  0xc3   : > { %v1110_v7 = vrot.slane %v1108_v5, 5  ;;  %v1114_v18 = vrot.slane %v1112_v61, 4  ;;  %v1674_v20 = vrot.slane %v587_v2, 5  ;;  %v1677_v11 = vrot.slane %v2779_v60, 5  ;;  %v513_v59 = vld [vmem:[%s2321_s23 + $0xf8] sm:$0xf] }
  0xc4   : > { %v2238_v13 = vcombine.low %v1843_v62, %v1844_v47  ;;  %v1105_v16 = vor.u32 %v1104_v49, %v1101_v10  ;;  %v1120_v23 = vrot.slane %v1118_v51, 5  ;;  %v430_v12 = vmax.bf16 %v350_v9, %v270_v0  ;;  %v275_v5 = vld [vmem:[%s2311_s17 + $0x100] sm:$0x1] }
  0xc5   : > { %v1115_v6 = vor.u32 %v1114_v18, %v1110_v7  ;;  %v1675_v24 = vsel %vm2340_vm4, %v2029_v8, %v1674_v20  ;;  %v1676_v31 = vrot.slane %v1674_v20, 4  ;;  %v589_v21 = vmax.bf16 %v509_v3, %v429_v63  ;;  %v354_v63 = vld [vmem:[%s2316_s20 + $0xfc] sm:$0xf]  ;;  %v355_v61 = vld [vmem:[%s2316_s20 + $0x100] sm:$0x1] }
  0xc6   : > { %2239 = vst [vmem:[%s2378_s27 + $0xa8] sm:$0xff] %v2238_v13   ;;  %v1106_v33 = vrot.slane %v1105_v16, 4  ;;  %v590_v26 = vmax.bf16 %v510_v15, %v430_v12  ;;  %v1122_v35 = vshrl.u32 %v2779_v60, 16  ;;  %v1679_v29 = vrot.slane %v1677_v11, 4 }
  0xc7   : > { %v1116_v36 = vrot.slane %v1115_v6, 4  ;;  %v1678_v28 = vsel %vm2340_vm4, %v1676_v31, %v1677_v11  ;;  %v1128_v32 = vshll.u32 %v589_v21, 16  ;;  %v1132_v30 = vshrl.u32 %v589_v21, 16  ;;  %v514_v6 = vld [vmem:[%s2321_s23 + $0xfc] sm:$0xf] }
  0xc8   : > { %v1111_v41 = vsel %vm2353_vm5, %v1106_v33, %v1110_v7  ;;  %v1124_v42 = vrot.slane %v1122_v35, 4  ;;  %v1138_v43 = vshll.u32 %v590_v26, 16  ;;  %v1680_v45 = vrot.slane %v589_v21, 5  ;;  %v515_v35 = vld [vmem:[%s2321_s23 + $0x100] sm:$0x1] }
  0xc9   : > { %v1121_v48 = vsel %vm2353_vm5, %v1116_v36, %v1120_v23  ;;  %v1426_v50 = vmax.bf16 %v1111_v41, %v586_v58  ;;  %v1130_v52 = vrot.slane %v1128_v32, 5  ;;  %v1134_v38 = vrot.slane %v1132_v30, 4  ;;  %v512_v58 = vld [vmem:[%s2321_s23 + $0xf4] sm:$0xf] }
  0xca   : > { %v1427_v55 = vmax.bf16 %v1121_v48, %v587_v2  ;;  %v1125_v56 = vor.u32 %v1124_v42, %v1120_v23  ;;  %v1140_v40 = vrot.slane %v1138_v43, 5  ;;  %v1681_v17 = vsel %vm2340_vm4, %v1679_v29, %v1680_v45 }
  0xcb   : > { %v1845_v54 = vmax.bf16 %v1675_v24, %v1426_v50  ;;  %v1135_v1 = vor.u32 %v1134_v38, %v1130_v52  ;;  %v1682_v27 = vrot.slane %v1680_v45, 4  ;;  %v1683_v4 = vrot.slane %v590_v26, 5 }
  0xcc   : > { %v1846_v57 = vmax.bf16 %v1678_v28, %v1427_v55  ;;  %v1126_v0 = vrot.slane %v1125_v56, 4  ;;  %v431_v62 = vmax.bf16 %v351_v37, %v271_v34  ;;  %v432_v2 = vmax.bf16 %v352_v19, %v272_v22 }
  0xcd   : > { %v1136_v8 = vrot.slane %v1135_v1, 4  ;;  %v1684_v9 = vsel %vm2340_vm4, %v1682_v27, %v1683_v4  ;;  %v433_v47 = vmax.bf16 %v353_v53, %v273_v14  ;;  %v434_v10 = vmax.bf16 %v354_v63, %v274_v46  ;;  %v276_v53 = vld [vmem:[%s2311_s17 + $0x104] sm:$0xf]  ;;  %v278_v46 = vld [vmem:[%s2311_s17 + $0x10c] sm:$0xf] }
  0xce   : > { %v2240_v49 = vcombine.low %v1845_v54, %v1846_v57  ;;  %v1131_v51 = vsel %vm2353_vm5, %v1126_v0, %v1130_v52  ;;  %v591_v3 = vmax.bf16 %v511_v39, %v431_v62  ;;  %v592_v7 = vmax.bf16 %v512_v58, %v432_v2  ;;  %v356_v63 = vld [vmem:[%s2316_s20 + $0x104] sm:$0xf]  ;;  %v357_v58 = vld [vmem:[%s2316_s20 + $0x108] sm:$0xf]  ;;  %v358_v2 = vld [vmem:[%s2316_s20 + $0x10c] sm:$0xf] }
  0xcf   : > { %v1141_v18 = vsel %vm2353_vm5, %v1136_v8, %v1140_v40  ;;  %v1428_v20 = vmax.bf16 %v1131_v51, %v2779_v60  ;;  %v2820_v11 = vmax.bf16 %v513_v59, %v433_v47  ;;  %v435_v15 = vmax.bf16 %v355_v61, %v275_v5  ;;  %v516_v5 = vld [vmem:[%s2321_s23 + $0x104] sm:$0xf] }
  0xd0   : > { %2241 = vst [vmem:[%s2378_s27 + $0xb0] sm:$0xff] %v2240_v49   ;;  %v1429_v13 = vmax.bf16 %v1141_v18, %v589_v21  ;;  %v1143_v16 = vshrl.u32 %v591_v3, 16  ;;  %v1146_v23 = vshll.u32 %v591_v3, 16  ;;  %v1152_v12 = vshll.u32 %v592_v7, 16  ;;  %v359_v49 = vld [vmem:[%s2316_s20 + $0x110] sm:$0xf] }
  0xd1   : > { %v1847_v24 = vmax.bf16 %v1681_v17, %v1428_v20  ;;  %v1156_v31 = vshrl.u32 %v592_v7, 16  ;;  %v1162_v33 = vshll.u32 %v2820_v11, 16  ;;  %v2030_v26 = vrot.slane %v591_v3, 9  ;;  %v277_v17 = vld [vmem:[%s2311_s17 + $0x108] sm:$0xf] }
  0xd2   : > { %v1848_v29 = vmax.bf16 %v1684_v9, %v1429_v13  ;;  %v1145_v36 = vrot.slane %v1143_v16, 4  ;;  %v1148_v28 = vrot.slane %v1146_v23, 5  ;;  %v1154_v60 = vrot.slane %v1152_v12, 5  ;;  %v517_v13 = vld [vmem:[%s2321_s23 + $0x108] sm:$0xf] }
  0xd3   : > { %v1158_v32 = vrot.slane %v1156_v31, 4  ;;  %v1164_v30 = vrot.slane %v1162_v33, 5  ;;  %v1687_v34 = vrot.slane %v592_v7, 5  ;;  %v1690_v21 = vrot.slane %v2820_v11, 5 }
  0xd4   : > { %v2242_v22 = vcombine.low %v1847_v24, %v1848_v29  ;;  %v1149_v37 = vor.u32 %v1148_v28, %v1145_v36  ;;  %v594_v41 = vmax.bf16 %v514_v6, %v434_v10  ;;  %v595_v42 = vmax.bf16 %v515_v35, %v435_v15  ;;  %v279_v10 = vld [vmem:[%s2311_s17 + $0x110] sm:$0xf]  ;;  %v518_v6 = vld [vmem:[%s2321_s23 + $0x10c] sm:$0xf] }
  0xd5   : > { %v1159_v43 = vor.u32 %v1158_v32, %v1154_v60  ;;  %v1688_v45 = vsel %vm2340_vm4, %v2030_v26, %v1687_v34  ;;  %v1689_v14 = vrot.slane %v1687_v34, 4  ;;  %v1166_v19 = vshrl.u32 %v2820_v11, 16  ;;  %v280_v34 = vld [vmem:[%s2311_s17 + $0x114] sm:$0x1] }
  0xd6   : > { %2243 = vst [vmem:[%s2378_s27 + $0xb8] sm:$0xff] %v2242_v22   ;;  %v1150_v48 = vrot.slane %v1149_v37, 4  ;;  %v1172_v50 = vshll.u32 %v594_v41, 16  ;;  %v1176_v52 = vshrl.u32 %v594_v41, 16  ;;  %v1182_v38 = vshll.u32 %v595_v42, 16 }
  0xd7   : > { %v1160_v39 = vrot.slane %v1159_v43, 4  ;;  %v1691_v55 = vsel %vm2340_vm4, %v1689_v14, %v1690_v21  ;;  %v1168_v56 = vrot.slane %v1166_v19, 4  ;;  %v1692_v40 = vrot.slane %v1690_v21, 4  ;;  %v360_v43 = vld [vmem:[%s2316_s20 + $0x114] sm:$0x1] }
  0xd8   : > { %v1155_v54 = vsel %vm2353_vm5, %v1150_v48, %v1154_v60  ;;  %v1174_v1 = vrot.slane %v1172_v50, 5  ;;  %v1178_v27 = vrot.slane %v1176_v52, 4  ;;  %v1184_v4 = vrot.slane %v1182_v38, 5  ;;  %v519_v48 = vld [vmem:[%s2321_s23 + $0x110] sm:$0xf] }
  0xd9   : > { %v1165_v59 = vsel %vm2353_vm5, %v1160_v39, %v1164_v30  ;;  %v1430_v57 = vmax.bf16 %v1155_v54, %v591_v3  ;;  %v1169_v0 = vor.u32 %v1168_v56, %v1164_v30  ;;  %v1693_v62 = vrot.slane %v594_v41, 5 }
  0xda   : > { %v1431_v61 = vmax.bf16 %v1165_v59, %v592_v7  ;;  %v1179_v8 = vor.u32 %v1178_v27, %v1174_v1  ;;  %v1696_v9 = vrot.slane %v595_v42, 5  ;;  %v436_v47 = vmax.bf16 %v356_v63, %v276_v53  ;;  %v520_v53 = vld [vmem:[%s2321_s23 + $0x114] sm:$0x1] }
  0xdb   : > { %v1849_v51 = vmax.bf16 %v1688_v45, %v1430_v57  ;;  %v1170_v18 = vrot.slane %v1169_v0, 4  ;;  %v1694_v20 = vsel %vm2340_vm4, %v1692_v40, %v1693_v62  ;;  %v1695_v15 = vrot.slane %v1693_v62, 4 }
  0xdc   : > { %v1850_v16 = vmax.bf16 %v1691_v55, %v1431_v61  ;;  %v1180_v3 = vrot.slane %v1179_v8, 4  ;;  %v437_v23 = vmax.bf16 %v357_v58, %v277_v17  ;;  %v438_v12 = vmax.bf16 %v358_v2, %v278_v46  ;;  %v281_v2 = vld [vmem:[%s2311_s17 + $0x118] sm:$0xf] }
  0xdd   : > { %v1175_v7 = vsel %vm2353_vm5, %v1170_v18, %v1174_v1  ;;  %v1697_v24 = vsel %vm2340_vm4, %v1695_v15, %v1696_v9  ;;  %v596_v31 = vmax.bf16 %v516_v5, %v436_v47  ;;  %v439_v33 = vmax.bf16 %v359_v49, %v279_v10  ;;  %v282_v5 = vld [vmem:[%s2311_s17 + $0x11c] sm:$0xf]  ;;  %v361_v61 = vld [vmem:[%s2316_s20 + $0x118] sm:$0xf]  ;;  %v283_v49 = vld [vmem:[%s2311_s17 + $0x120] sm:$0xf] }
  0xde   : > { %v2244_v26 = vcombine.low %v1849_v51, %v1850_v16  ;;  %v1185_v35 = vsel %vm2353_vm5, %v1180_v3, %v1184_v4  ;;  %v1432_v29 = vmax.bf16 %v1175_v7, %v2820_v11  ;;  %v597_v36 = vmax.bf16 %v517_v13, %v437_v23  ;;  %v362_v51 = vld [vmem:[%s2316_s20 + $0x11c] sm:$0xf]  ;;  %v363_v16 = vld [vmem:[%s2316_s20 + $0x120] sm:$0xf]  ;;  %v521_v3 = vld [vmem:[%s2321_s23 + $0x118] sm:$0xf] }
  0xdf   : > { %v1433_v28 = vmax.bf16 %v1185_v35, %v594_v41  ;;  %v2857_v60 = vmax.bf16 %v518_v6, %v438_v12  ;;  %v1187_v32 = vshrl.u32 %v596_v31, 16  ;;  %v1190_v30 = vshll.u32 %v596_v31, 16 }
  0xe0   : > { %2245 = vst [vmem:[%s2378_s27 + $0xc0] sm:$0xff] %v2244_v26   ;;  %v1851_v21 = vmax.bf16 %v1694_v20, %v1432_v29  ;;  %v1196_v22 = vshll.u32 %v597_v36, 16  ;;  %v1200_v37 = vshrl.u32 %v597_v36, 16  ;;  %v2031_v42 = vrot.slane %v596_v31, 9 }
  0xe1   : > { %v1852_v45 = vmax.bf16 %v1697_v24, %v1433_v28  ;;  %v1189_v14 = vrot.slane %v1187_v32, 4  ;;  %v1192_v19 = vrot.slane %v1190_v30, 5  ;;  %v1206_v11 = vshll.u32 %v2857_v60, 16  ;;  %v284_v24 = vld [vmem:[%s2311_s17 + $0x124] sm:$0xf] }
  0xe2   : > { %v1198_v41 = vrot.slane %v1196_v22, 5  ;;  %v1202_v50 = vrot.slane %v1200_v37, 4  ;;  %v1700_v52 = vrot.slane %v597_v36, 5  ;;  %v1703_v38 = vrot.slane %v2857_v60, 5  ;;  %v523_v32 = vld [vmem:[%s2321_s23 + $0x120] sm:$0xf] }
  0xe3   : > { %v2246_v39 = vcombine.low %v1851_v21, %v1852_v45  ;;  %v1193_v55 = vor.u32 %v1192_v19, %v1189_v14  ;;  %v1208_v56 = vrot.slane %v1206_v11, 5  ;;  %v440_v40 = vmax.bf16 %v360_v43, %v280_v34  ;;  %v285_v22 = vld [vmem:[%s2311_s17 + $0x128] sm:$0x1] }
  0xe4   : > { %v1203_v17 = vor.u32 %v1202_v50, %v1198_v41  ;;  %v1701_v46 = vsel %vm2340_vm4, %v2031_v42, %v1700_v52  ;;  %v1702_v63 = vrot.slane %v1700_v52, 4  ;;  %v599_v54 = vmax.bf16 %v519_v48, %v439_v33  ;;  %v364_v33 = vld [vmem:[%s2316_s20 + $0x124] sm:$0xf]  ;;  %v365_v37 = vld [vmem:[%s2316_s20 + $0x128] sm:$0x1] }
  0xe5   : > { %2247 = vst [vmem:[%s2378_s27 + $0xc8] sm:$0xff] %v2246_v39   ;;  %v1194_v1 = vrot.slane %v1193_v55, 4  ;;  %v600_v27 = vmax.bf16 %v520_v53, %v440_v40  ;;  %v1210_v4 = vshrl.u32 %v2857_v60, 16  ;;  %v1705_v58 = vrot.slane %v1703_v38, 4 }
  0xe6   : > { %v1204_v59 = vrot.slane %v1203_v17, 4  ;;  %v1704_v57 = vsel %vm2340_vm4, %v1702_v63, %v1703_v38  ;;  %v1216_v0 = vshll.u32 %v599_v54, 16  ;;  %v1220_v62 = vshrl.u32 %v599_v54, 16  ;;  %v524_v17 = vld [vmem:[%s2321_s23 + $0x124] sm:$0xf] }
  0xe7   : > { %v1199_v8 = vsel %vm2353_vm5, %v1194_v1, %v1198_v41  ;;  %v1212_v9 = vrot.slane %v1210_v4, 4  ;;  %v1226_v47 = vshll.u32 %v600_v27, 16  ;;  %v1706_v10 = vrot.slane %v599_v54, 5  ;;  %v525_v4 = vld [vmem:[%s2321_s23 + $0x128] sm:$0x1] }
  0xe8   : > { %v1209_v18 = vsel %vm2353_vm5, %v1204_v59, %v1208_v56  ;;  %v1434_v20 = vmax.bf16 %v1199_v8, %v596_v31  ;;  %v1218_v15 = vrot.slane %v1216_v0, 5  ;;  %v1222_v13 = vrot.slane %v1220_v62, 4  ;;  %v522_v31 = vld [vmem:[%s2321_s23 + $0x11c] sm:$0xf] }
  0xe9   : > { %v1435_v23 = vmax.bf16 %v1209_v18, %v597_v36  ;;  %v1213_v12 = vor.u32 %v1212_v9, %v1208_v56  ;;  %v1228_v6 = vrot.slane %v1226_v47, 5  ;;  %v1707_v7 = vsel %vm2340_vm4, %v1705_v58, %v1706_v10 }
  0xea   : > { %v1853_v26 = vmax.bf16 %v1701_v46, %v1434_v20  ;;  %v1223_v35 = vor.u32 %v1222_v13, %v1218_v15  ;;  %v1708_v29 = vrot.slane %v1706_v10, 4  ;;  %v1709_v28 = vrot.slane %v600_v27, 5 }
  0xeb   : > { %v1854_v30 = vmax.bf16 %v1704_v57, %v1435_v23  ;;  %v1214_v34 = vrot.slane %v1213_v12, 4  ;;  %v441_v21 = vmax.bf16 %v361_v61, %v281_v2  ;;  %v442_v36 = vmax.bf16 %v362_v51, %v282_v5 }
  0xec   : > { %v1224_v42 = vrot.slane %v1223_v35, 4  ;;  %v1710_v43 = vsel %vm2340_vm4, %v1708_v29, %v1709_v28  ;;  %v443_v45 = vmax.bf16 %v363_v16, %v283_v49  ;;  %v444_v14 = vmax.bf16 %v364_v33, %v284_v24  ;;  %v286_v16 = vld [vmem:[%s2311_s17 + $0x12c] sm:$0xf]  ;;  %v288_v24 = vld [vmem:[%s2311_s17 + $0x134] sm:$0xf] }
  0xed   : > { %v2248_v19 = vcombine.low %v1853_v26, %v1854_v30  ;;  %v1219_v11 = vsel %vm2353_vm5, %v1214_v34, %v1218_v15  ;;  %v601_v48 = vmax.bf16 %v521_v3, %v441_v21  ;;  %v602_v41 = vmax.bf16 %v522_v31, %v442_v36  ;;  %v366_v33 = vld [vmem:[%s2316_s20 + $0x12c] sm:$0xf]  ;;  %v367_v31 = vld [vmem:[%s2316_s20 + $0x130] sm:$0xf]  ;;  %v368_v36 = vld [vmem:[%s2316_s20 + $0x134] sm:$0xf] }
  0xee   : > { %v1229_v50 = vsel %vm2353_vm5, %v1224_v42, %v1228_v6  ;;  %v1436_v52 = vmax.bf16 %v1219_v11, %v2857_v60  ;;  %v2898_v38 = vmax.bf16 %v523_v32, %v443_v45  ;;  %v445_v53 = vmax.bf16 %v365_v37, %v285_v22  ;;  %v526_v22 = vld [vmem:[%s2321_s23 + $0x12c] sm:$0xf] }
  0xef   : > { %2249 = vst [vmem:[%s2378_s27 + $0xd0] sm:$0xff] %v2248_v19   ;;  %v1437_v39 = vmax.bf16 %v1229_v50, %v599_v54  ;;  %v1231_v55 = vshrl.u32 %v601_v48, 16  ;;  %v1234_v56 = vshll.u32 %v601_v48, 16  ;;  %v1240_v40 = vshll.u32 %v602_v41, 16  ;;  %v369_v19 = vld [vmem:[%s2316_s20 + $0x138] sm:$0xf] }
  0xf0   : > { %v1855_v46 = vmax.bf16 %v1707_v7, %v1436_v52  ;;  %v1244_v63 = vshrl.u32 %v602_v41, 16  ;;  %v1250_v1 = vshll.u32 %v2898_v38, 16  ;;  %v2032_v27 = vrot.slane %v601_v48, 9  ;;  %v287_v7 = vld [vmem:[%s2311_s17 + $0x130] sm:$0xf] }
  0xf1   : > { %v1856_v58 = vmax.bf16 %v1710_v43, %v1437_v39  ;;  %v1233_v59 = vrot.slane %v1231_v55, 4  ;;  %v1236_v57 = vrot.slane %v1234_v56, 5  ;;  %v1242_v60 = vrot.slane %v1240_v40, 5  ;;  %v527_v39 = vld [vmem:[%s2321_s23 + $0x130] sm:$0xf] }
  0xf2   : > { %v1246_v0 = vrot.slane %v1244_v63, 4  ;;  %v1252_v62 = vrot.slane %v1250_v1, 5  ;;  %v1713_v2 = vrot.slane %v602_v41, 5  ;;  %v1716_v54 = vrot.slane %v2898_v38, 5 }
  0xf3   : > { %v2250_v5 = vcombine.low %v1855_v46, %v1856_v58  ;;  %v1237_v61 = vor.u32 %v1236_v57, %v1233_v59  ;;  %v604_v8 = vmax.bf16 %v524_v17, %v444_v14  ;;  %v605_v9 = vmax.bf16 %v525_v4, %v445_v53  ;;  %v289_v14 = vld [vmem:[%s2311_s17 + $0x138] sm:$0xf]  ;;  %v528_v17 = vld [vmem:[%s2321_s23 + $0x134] sm:$0xf] }
  0xf4   : > { %v1247_v47 = vor.u32 %v1246_v0, %v1242_v60  ;;  %v1714_v10 = vsel %vm2340_vm4, %v2032_v27, %v1713_v2  ;;  %v1715_v49 = vrot.slane %v1713_v2, 4  ;;  %v1254_v51 = vshrl.u32 %v2898_v38, 16  ;;  %v290_v2 = vld [vmem:[%s2311_s17 + $0x13c] sm:$0x1] }
  0xf5   : > { %2251 = vst [vmem:[%s2378_s27 + $0xd8] sm:$0xff] %v2250_v5   ;;  %v1238_v18 = vrot.slane %v1237_v61, 4  ;;  %v1260_v20 = vshll.u32 %v604_v8, 16  ;;  %v1264_v15 = vshrl.u32 %v604_v8, 16  ;;  %v1270_v13 = vshll.u32 %v605_v9, 16 }
  0xf6   : > { %v1248_v3 = vrot.slane %v1247_v47, 4  ;;  %v1717_v23 = vsel %vm2340_vm4, %v1715_v49, %v1716_v54  ;;  %v1256_v12 = vrot.slane %v1254_v51, 4  ;;  %v1718_v6 = vrot.slane %v1716_v54, 4  ;;  %v370_v47 = vld [vmem:[%s2316_s20 + $0x13c] sm:$0x1] }
  0xf7   : > { %v1243_v26 = vsel %vm2353_vm5, %v1238_v18, %v1242_v60  ;;  %v1262_v35 = vrot.slane %v1260_v20, 5  ;;  %v1266_v29 = vrot.slane %v1264_v15, 4  ;;  %v1272_v28 = vrot.slane %v1270_v13, 5  ;;  %v530_v13 = vld [vmem:[%s2321_s23 + $0x13c] sm:$0x1] }
  0xf8   : > { %v1253_v32 = vsel %vm2353_vm5, %v1248_v3, %v1252_v62  ;;  %v1438_v30 = vmax.bf16 %v1243_v26, %v601_v48  ;;  %v1257_v34 = vor.u32 %v1256_v12, %v1252_v62  ;;  %v1719_v21 = vrot.slane %v604_v8, 5 }
  0xf9   : > { %v1439_v37 = vmax.bf16 %v1253_v32, %v602_v41  ;;  %v1267_v42 = vor.u32 %v1266_v29, %v1262_v35  ;;  %v1722_v43 = vrot.slane %v605_v9, 5  ;;  %v446_v45 = vmax.bf16 %v366_v33, %v286_v16 }
  0xfa   : > { %v1857_v11 = vmax.bf16 %v1714_v10, %v1438_v30  ;;  %v1258_v50 = vrot.slane %v1257_v34, 4  ;;  %v1720_v52 = vsel %vm2340_vm4, %v1718_v6, %v1719_v21  ;;  %v1721_v53 = vrot.slane %v1719_v21, 4 }
  0xfb   : > { %v1858_v55 = vmax.bf16 %v1717_v23, %v1439_v37  ;;  %v1268_v48 = vrot.slane %v1267_v42, 4  ;;  %v447_v56 = vmax.bf16 %v367_v31, %v287_v7  ;;  %v448_v40 = vmax.bf16 %v368_v36, %v288_v24 }
  0xfc   : > { %v1263_v41 = vsel %vm2353_vm5, %v1258_v50, %v1262_v35  ;;  %v1723_v46 = vsel %vm2340_vm4, %v1721_v53, %v1722_v43  ;;  %v606_v63 = vmax.bf16 %v526_v22, %v446_v45  ;;  %v449_v1 = vmax.bf16 %v369_v19, %v289_v14 }
  0xfd   : > { %v2252_v27 = vcombine.low %v1857_v11, %v1858_v55  ;;  %v1273_v4 = vsel %vm2353_vm5, %v1268_v48, %v1272_v28  ;;  %v1440_v58 = vmax.bf16 %v1263_v41, %v2898_v38  ;;  %v607_v59 = vmax.bf16 %v527_v39, %v447_v56  ;;  %v529_v38 = vld [vmem:[%s2321_s23 + $0x138] sm:$0xf] }
  0xfe   : > { %v1441_v57 = vmax.bf16 %v1273_v4, %v604_v8  ;;  %v608_v60 = vmax.bf16 %v528_v17, %v448_v40  ;;  %v1275_v0 = vshrl.u32 %v606_v63, 16  ;;  %v1278_v62 = vshll.u32 %v606_v63, 16 }
  0xff   : > { %2253 = vst [vmem:[%s2378_s27 + $0xe0] sm:$0xff] %v2252_v27   ;;  %v1859_v54 = vmax.bf16 %v1720_v52, %v1440_v58  ;;  %v1284_v5 = vshll.u32 %v607_v59, 16  ;;  %v1288_v61 = vshrl.u32 %v607_v59, 16  ;;  %v2033_v9 = vrot.slane %v606_v63, 9 }
 0x100   : > { %v1860_v10 = vmax.bf16 %v1723_v46, %v1441_v57  ;;  %v1277_v49 = vrot.slane %v1275_v0, 4  ;;  %v1280_v51 = vrot.slane %v1278_v62, 5  ;;  %v1294_v18 = vshll.u32 %v608_v60, 16 }
 0x101   : > { %v1286_v20 = vrot.slane %v1284_v5, 5  ;;  %v1290_v15 = vrot.slane %v1288_v61, 4  ;;  %v1726_v8 = vrot.slane %v607_v59, 5  ;;  %v1729_v23 = vrot.slane %v608_v60, 5 }
 0x102   : > { %v2254_v16 = vcombine.low %v1859_v54, %v1860_v10  ;;  %v1281_v3 = vor.u32 %v1280_v51, %v1277_v49  ;;  %v450_v12 = vmax.bf16 %v370_v47, %v290_v2  ;;  %v1296_v7 = vrot.slane %v1294_v18, 5 }
 0x103   : > { %v1291_v6 = vor.u32 %v1290_v15, %v1286_v20  ;;  %v1728_v24 = vrot.slane %v1726_v8, 4  ;;  %v609_v33 = vmax.bf16 %v529_v38, %v449_v1  ;;  %v1727_v35 = vsel %vm2340_vm4, %v2033_v9, %v1726_v8 }
 0x104   : > { %2255 = vst [vmem:[%s2378_s27 + $0xe8] sm:$0xff] %v2254_v16   ;;  %v1282_v26 = vrot.slane %v1281_v3, 4  ;;  %v610_v29 = vmax.bf16 %v530_v13, %v450_v12  ;;  %v1298_v28 = vshrl.u32 %v608_v60, 16  ;;  %v1731_v52 = vrot.slane %v1729_v23, 4 }
 0x105   : > { %v1292_v31 = vrot.slane %v1291_v6, 4  ;;  %v1730_v32 = vsel %vm2340_vm4, %v1728_v24, %v1729_v23  ;;  %v1304_v30 = vshll.u32 %v609_v33, 16  ;;  %v1308_v34 = vshrl.u32 %v609_v33, 16 }
 0x106   : > { %v1287_v21 = vsel %vm2353_vm5, %v1282_v26, %v1286_v20  ;;  %v1300_v36 = vrot.slane %v1298_v28, 4  ;;  %v1314_v22 = vshll.u32 %v610_v29, 16  ;;  %v1732_v37 = vrot.slane %v609_v33, 5 }
 0x107   : > { %v1297_v42 = vsel %vm2353_vm5, %v1292_v31, %v1296_v7  ;;  %v1442_v43 = vmax.bf16 %v1287_v21, %v606_v63  ;;  %v1306_v45 = vrot.slane %v1304_v30, 5  ;;  %v1310_v14 = vrot.slane %v1308_v34, 4 }
 0x108   : > { %v1443_v19 = vmax.bf16 %v1297_v42, %v607_v59  ;;  %v1301_v11 = vor.u32 %v1300_v36, %v1296_v7  ;;  %v1316_v50 = vrot.slane %v1314_v22, 5  ;;  %v1734_v55 = vrot.slane %v1732_v37, 4 }
 0x109   : > { %v1861_v53 = vmax.bf16 %v1727_v35, %v1442_v43  ;;  %v1311_v39 = vor.u32 %v1310_v14, %v1306_v45  ;;  %v1735_v48 = vrot.slane %v610_v29, 5  ;;  %v1733_v63 = vsel %vm2340_vm4, %v1731_v52, %v1732_v37 }
 0x10a   : > { %v1862_v56 = vmax.bf16 %v1730_v32, %v1443_v19  ;;  %v1302_v40 = vrot.slane %v1301_v11, 4 }
 0x10b   : > { %v1312_v17 = vrot.slane %v1311_v39, 4  ;;  %v1736_v4 = vsel %vm2340_vm4, %v1734_v55, %v1735_v48 }
 0x10c   : > { %v2256_v41 = vcombine.low %v1861_v53, %v1862_v56  ;;  %v1307_v46 = vsel %vm2353_vm5, %v1302_v40, %v1306_v45 }
 0x10d   : > { %v1317_v1 = vsel %vm2353_vm5, %v1312_v17, %v1316_v50  ;;  %v1444_v27 = vmax.bf16 %v1307_v46, %v608_v60 }
 0x10e   : > { %2257 = vst [vmem:[%s2378_s27 + $0xf0] sm:$0xff] %v2256_v41   ;;  %v1445_v58 = vmax.bf16 %v1317_v1, %v609_v33 }
 0x10f   : > { %v1863_v59 = vmax.bf16 %v1733_v63, %v1444_v27 }
 0x110   : > { %v1864_v57 = vmax.bf16 %v1736_v4, %v1445_v58 }
 0x112   : > { %v2258_v0 = vcombine.low %v1863_v59, %v1864_v57 }
 0x114   : > { %2259 = vst [vmem:[%s2378_s27 + $0xf8] sm:$0xff] %v2258_v0  }
 0x115 PF: > { %s13_s12 = sadd.s32 1, %s2275_s12  }
 0x116   : > { %p10_p4 = scmp.ge.s32.totalorder %s13_s12, 4  }
 0x118   :  { %12 = sbr.rel (!%p10_p4) target bundleno = 1 (0x1), region = 68 }

// kernel: resnet_image_encoder_forward.13
= control target key start
LH: loop header
LB: loop body
LE: loop exit
PB: predicated region body
PF: predicated region fallthrough
CT: control target
= control target key end

     0   :  { %s3950_s12 = smov 0   ;;  %s4730_s0 = inlined_call_operand.vmem [shape: bf16[512,1152], index: 0, kind: input, shape index: {}]   ;;  %s4731_s1 = inlined_call_operand.vmem [shape: bf16[1152,128], index: 1, kind: input, shape index: {}]   ;;  %s4732_s2 = inlined_call_operand.vmem [shape: f32[1,128], index: 2, kind: input, shape index: {}]   ;;  %s4733_s3 = inlined_call_operand.vmem [shape: bf16[512,128], index: 3, kind: output, shape index: {}]  }
   0x1 LB: > { %s2710_s13 = sadd.s32 4294967295, %s3928_s12   ;;  %p2714_p0 = scmp.ge.s32.totalorder %s3928_s12, 1  ;;  %s3928_s12 = sphi %s3950_s12, %s13_s12  }
   0x2   : > { %p139_p1 = scmp.lt.s32.totalorder %s3928_s12, 3 }
   0x4   : > { %p140_p2 = pnand %p2714_p0, %p139_p1 }
   0x5   : > { %v3642_v0 = vld [vmem:[%s4731_s1 + $0x40] sm:$0xff] (!%p140_p2)   ;;  %s2715_s16 = sshll.u32 (!%p140_p2), %s2710_s13, 5  ;;  %v3644_v2 = vld [vmem:[%s4731_s1 + $0x48] sm:$0xff] (!%p140_p2)   ;;  %v3646_v4 = vld [vmem:[%s4731_s1 + $0x50] sm:$0xff] (!%p140_p2)  }
   0x6   : > { %143 = sbr.rel (%p140_p2) target bundleno = 544 (0x220), region = 32  ;;  %v3643_v1 = vld [vmem:[%s4731_s1] sm:$0xff] (!%p140_p2)   ;;  %3097 = vmatprep.subr.bf16.mxu0 (!%p140_p2), %v3642_v0  ;;  %3617 = vmatprep.subr.bf16.mxu1 (!%p140_p2), %v3642_v0  ;;  %p165_p3 = scmp.lt.s32.totalorder (!%p140_p2), %s2715_s16, 63  ;;  %v3645_v3 = vld [vmem:[%s4731_s1 + $0x8] sm:$0xff] (!%p140_p2)   ;;  %v3647_v5 = vld [vmem:[%s4731_s1 + $0x10] sm:$0xff] (!%p140_p2)  }
   0x7   : > { %3098 = vmatpush3.bf16.msra.mxu0 (!%p140_p2), %v3643_v1  ;;  %3625 = vmatpush3.bf16.msra.mxu1 (!%p140_p2), %v3643_v1  ;;  %v3648_v6 = vld [vmem:[%s4731_s1 + $0x58] sm:$0xff] (!%p140_p2)   ;;  %v3650_v8 = vld [vmem:[%s4731_s1 + $0x60] sm:$0xff] (!%p140_p2)   ;;  %v3652_v10 = vld [vmem:[%s4731_s1 + $0x68] sm:$0xff] (!%p140_p2)  }
   0x8   : > { %3099 = vmatprep.subr.bf16.mxu0 (!%p140_p2), %v3644_v2  ;;  %3618 = vmatprep.subr.bf16.mxu1 (!%p140_p2), %v3644_v2  ;;  %v3649_v7 = vld [vmem:[%s4731_s1 + $0x18] sm:$0xff] (!%p140_p2)   ;;  %v3651_v9 = vld [vmem:[%s4731_s1 + $0x20] sm:$0xff] (!%p140_p2)   ;;  %v3653_v13 = vld [vmem:[%s4731_s1 + $0x28] sm:$0xff] (!%p140_p2)  }
   0x9   : > { %v3654_v14 = vld [vmem:[%s4731_s1 + $0x70] sm:$0xff] (!%p140_p2)   ;;  %v3656_v16 = vld [vmem:[%s4731_s1 + $0x78] sm:$0xff] (!%p140_p2)   ;;  %v3664_v18 = vld [vmem:[%s4731_s1 + $0xc0] sm:$0xff] (!%p140_p2)  }
   0xa   : > { %v3655_v15 = vld [vmem:[%s4731_s1 + $0x30] sm:$0xff] (!%p140_p2)   ;;  %v3657_v17 = vld [vmem:[%s4731_s1 + $0x38] sm:$0xff] (!%p140_p2)   ;;  %v3667_v21 = vld [vmem:[%s4731_s1 + $0x140] sm:$0xff] (!%p140_p2)  }
   0xb   : > { %3100 = vmatpush3.bf16.msra.mxu0 (!%p140_p2), %v3645_v3  ;;  %3626 = vmatpush3.bf16.msra.mxu1 (!%p140_p2), %v3645_v3  ;;  %v3665_v22 = vld [vmem:[%s4731_s1 + $0x80] sm:$0xff] (!%p140_p2)   ;;  %v3666_v23 = vld [vmem:[%s4731_s1 + $0xc8] sm:$0xff] (!%p140_p2)   ;;  %v3676_v31 = vld [vmem:[%s4731_s1 + $0xd0] sm:$0xff] (!%p140_p2)  }
   0xc   : > { %3101 = vmatprep.subr.bf16.mxu0 (!%p140_p2), %v3646_v4  ;;  %3619 = vmatprep.subr.bf16.mxu1 (!%p140_p2), %v3646_v4  ;;  %v3669_v24 = vld [vmem:[%s4731_s1 + $0x100] sm:$0xff] (!%p140_p2)   ;;  %v3668_v27 = vld [vmem:[%s4731_s1 + $0x88] sm:$0xff] (!%p140_p2)   ;;  %v3677_v32 = vld [vmem:[%s4731_s1 + $0x90] sm:$0xff] (!%p140_p2)  }
   0xd   : > { %s4735_s16 = smov (!%p165_p3, %s2715_s16), 63  ;;  %v3687_v28 = vld [vmem:[%s4731_s1 + $0x148] sm:$0xff]   ;;  %v3678_v34 = vld [vmem:[%s4731_s1 + $0xd8] sm:$0xff]   ;;  %v3686_v40 = vld [vmem:[%s4731_s1 + $0xe0] sm:$0xff]  }
   0xe   : > { %s3633_s29 = smul.u32 36, %s4735_s16  ;;  %v3689_v33 = vld [vmem:[%s4731_s1 + $0x108] sm:$0xff]   ;;  %v3679_v37 = vld [vmem:[%s4731_s1 + $0x98] sm:$0xff]   ;;  %v3688_v41 = vld [vmem:[%s4731_s1 + $0xa0] sm:$0xff]  }
   0xf   : > { %3102 = vmatpush3.bf16.msra.mxu0 %v3647_v5  ;;  %3627 = vmatpush3.bf16.msra.mxu1 %v3647_v5  ;;  %v3690_v42 = vld [vmem:[%s4731_s1 + $0xe8] sm:$0xff]   ;;  %v3701_v43 = vld [vmem:[%s4731_s1 + $0x150] sm:$0xff]   ;;  %v3700_v52 = vld [vmem:[%s4731_s1 + $0xf8] sm:$0xff]  }
  0x10   : > { %3103 = vmatprep.subr.bf16.mxu0 %v3648_v6  ;;  %3620 = vmatprep.subr.bf16.mxu1 %v3648_v6  ;;  %s3991_s9 = scalar_lea.vmem %s4730_s0, %s3633_s29  ;;  %v3703_v46 = vld [vmem:[%s4731_s1 + $0x110] sm:$0xff]   ;;  %v3691_v47 = vld [vmem:[%s4731_s1 + $0xa8] sm:$0xff]   ;;  %v3718_v55 = vld [vmem:[%s4731_s1 + $0x158] sm:$0xff]  }
  0x11   : > { %v3660_v11 = vld [vmem:[%s3991_s9 + $0x4] ss:$36 sps:$4 sm:$0xff]   ;;  %v3670_v25 = vld [vmem:[%s3991_s9 + $0x4c] ss:$36 sps:$4 sm:$0xff]   ;;  %v3680_v35 = vld [vmem:[%s3991_s9 + $0x94] ss:$36 sps:$4 sm:$0xff]  }
  0x12   : > { %v3663_v12 = vld [vmem:[%s3991_s9 + $0x364] ss:$36 sps:$4 sm:$0xff]   ;;  %1689 = vmatprep.mubr.bf16.mxu0 %v3660_v11  ;;  %v3672_v26 = vld [vmem:[%s3991_s9 + $0x3ac] ss:$36 sps:$4 sm:$0xff]   ;;  %v3682_v36 = vld [vmem:[%s3991_s9 + $0x3f4] ss:$36 sps:$4 sm:$0xff]  }
  0x13   : > { %3104 = vmatpush3.bf16.msra.mxu0 %v3649_v7  ;;  %3628 = vmatpush3.bf16.msra.mxu1 %v3649_v7  ;;  %v3658_v19 = vld [vmem:[%s3991_s9] ss:$36 sps:$4 sm:$0xff]   ;;  %v3674_v29 = vld [vmem:[%s3991_s9 + $0x48] ss:$36 sps:$4 sm:$0xff]   ;;  %v3684_v38 = vld [vmem:[%s3991_s9 + $0x90] ss:$36 sps:$4 sm:$0xff]  }
  0x14   : > { %3105 = vmatprep.subr.bf16.mxu0 %v3650_v8  ;;  %3621 = vmatprep.subr.bf16.mxu1 %v3650_v8  ;;  %v3661_v20 = vld [vmem:[%s3991_s9 + $0x360] ss:$36 sps:$4 sm:$0xff]   ;;  %v3675_v30 = vld [vmem:[%s3991_s9 + $0x3a8] ss:$36 sps:$4 sm:$0xff]   ;;  %v3685_v39 = vld [vmem:[%s3991_s9 + $0x3f0] ss:$36 sps:$4 sm:$0xff]  }
  0x15   : > { %1785 = vmatprep.mubr.bf16.mxu1 %v3663_v12  ;;  %v3692_v44 = vld [vmem:[%s3991_s9 + $0xdc] ss:$36 sps:$4 sm:$0xff]   ;;  %v3698_v48 = vld [vmem:[%s4731_s1 + $0xf0] sm:$0xff]   ;;  %v3704_v53 = vld [vmem:[%s3991_s9 + $0x124] ss:$36 sps:$4 sm:$0xff]  }
  0x16   : > { %v3694_v45 = vld [vmem:[%s3991_s9 + $0x43c] ss:$36 sps:$4 sm:$0xff]   ;;  %v3699_v51 = vld [vmem:[%s4731_s1 + $0xb0] sm:$0xff]   ;;  %v3706_v58 = vld [vmem:[%s3991_s9 + $0x8] ss:$36 sps:$4 sm:$0xff]  }
  0x17   : > { %3106 = vmatpush3.bf16.msra.mxu0 %v3651_v9  ;;  %3629 = vmatpush3.bf16.msra.mxu1 %v3651_v9  ;;  %v3696_v49 = vld [vmem:[%s3991_s9 + $0xd8] ss:$36 sps:$4 sm:$0xff]   ;;  %v3708_v54 = vld [vmem:[%s3991_s9 + $0xc] ss:$36 sps:$4 sm:$0xff]   ;;  %v3709_v59 = vld [vmem:[%s3991_s9 + $0x120] ss:$36 sps:$4 sm:$0xff]  }
  0x18   : > { %3107 = vmatprep.subr.bf16.mxu0 %v3652_v10  ;;  %3622 = vmatprep.subr.bf16.mxu1 %v3652_v10  ;;  %v3697_v50 = vld [vmem:[%s3991_s9 + $0x438] ss:$36 sps:$4 sm:$0xff]   ;;  %v3710_v60 = vld [vmem:[%s4731_s1 + $0x1c0] sm:$0xff]   ;;  %v3712_v62 = vld [vmem:[%s3991_s9 + $0x16c] ss:$36 sps:$4 sm:$0xff]  }
  0x19   : > { %v3719_v56 = vld [vmem:[%s4731_s1 + $0x118] sm:$0xff]   ;;  %v3711_v61 = vld [vmem:[%s4731_s1 + $0x180] sm:$0xff]   ;;  %v3726_v1 = vld [vmem:[%s4731_s1 + $0x1c8] sm:$0xff]  }
  0x1a   : > { %v3702_v57 = vld [vmem:[%s4731_s1 + $0xb8] sm:$0xff]   ;;  %v3728_v0 = vld [vmem:[%s4731_s1 + $0x160] sm:$0xff]   ;;  %v3727_v3 = vld [vmem:[%s4731_s1 + $0x188] sm:$0xff]  }
  0x1b   : > { %3108 = vmatpush3.bf16.msra.mxu0 %v3653_v13  ;;  %3630 = vmatpush3.bf16.msra.mxu1 %v3653_v13  ;;  %v3714_v63 = vld [vmem:[%s3991_s9 + $0x54] ss:$36 sps:$4 sm:$0xff]   ;;  %v3729_v2 = vld [vmem:[%s4731_s1 + $0x120] sm:$0xff]   ;;  %v3716_v4 = vld [vmem:[%s3991_s9 + $0x168] ss:$36 sps:$4 sm:$0xff]  }
  0x1c   : > { %3109 = vmatprep.subr.bf16.mxu0 %v3654_v14  ;;  %3623 = vmatprep.subr.bf16.mxu1 %v3654_v14  ;;  %v3717_v5 = vld [vmem:[%s3991_s9 + $0x50] ss:$36 sps:$4 sm:$0xff]   ;;  %v3722_v7 = vld [vmem:[%s3991_s9 + $0x9c] ss:$36 sps:$4 sm:$0xff]   ;;  %v3742_v8 = vld [vmem:[%s4731_s1 + $0x168] sm:$0xff]  }
  0x1d   : > { %v3720_v6 = vld [vmem:[%s3991_s9 + $0x1b4] ss:$36 sps:$4 sm:$0xff]   ;;  %v3744_v10 = vld [vmem:[%s4731_s1 + $0x128] sm:$0xff]   ;;  %v3730_v14 = vld [vmem:[%s3991_s9 + $0x1fc] ss:$36 sps:$4 sm:$0xff]  }
  0x1e   : > { %v3743_v9 = vld [vmem:[%s4731_s1 + $0x1d0] sm:$0xff]   ;;  %v3725_v13 = vld [vmem:[%s3991_s9 + $0x98] ss:$36 sps:$4 sm:$0xff]  }
  0x1f   : > { %3110 = vmatpush3.bf16.msra.mxu0 %v3655_v15  ;;  %3631 = vmatpush3.bf16.msra.mxu1 %v3655_v15  ;;  %v3745_v11 = vld [vmem:[%s4731_s1 + $0x190] sm:$0xff]  }
  0x20   : > { %3111 = vmatprep.subr.bf16.mxu0 %v3656_v16  ;;  %3624 = vmatprep.subr.bf16.mxu1 %v3656_v16  ;;  %v3724_v12 = vld [vmem:[%s3991_s9 + $0x1b0] ss:$36 sps:$4 sm:$0xff]  }
  0x21   : > { %v3752_v15 = vld [vmem:[%s4731_s1 + $0x170] sm:$0xff]  }
  0x22   : > { %v3753_v16 = vld [vmem:[%s4731_s1 + $0x130] sm:$0xff]  }
  0x23   : > { %3112 = vmatpush3.bf16.msra.mxu0 %v3657_v17  ;;  %3632 = vmatpush3.bf16.msra.mxu1 %v3657_v17  ;;  %v3732_v17 = vld [vmem:[%s3991_s9 + $0xe4] ss:$36 sps:$4 sm:$0xff]  }
  0x24   : > { %3209 = vmatprep.subr.bf16.mxu1 %v3664_v18  ;;  %3321 = vmatprep.subr.bf16.mxu0 %v3667_v21  ;;  %v3760_v18 = vld [vmem:[%s4731_s1 + $0x1d8] sm:$0xff]   ;;  %v3735_v21 = vld [vmem:[%s3991_s9 + $0xe0] ss:$36 sps:$4 sm:$0xff]  }
  0x26   : > { %1690 = vmatmul.mubr.bf16.vlgmr.msra.gmra.mrb[0].mxu0 %v3658_v19  ;;  %1786 = vmatmul.mubr.bf16.vlgmr.msra.gmra.mrb[0].mxu1 %v3661_v20  ;;  %v3761_v19 = vld [vmem:[%s4731_s1 + $0x198] sm:$0xff]  }
  0x27   : > { %3210 = vmatpush3.bf16.msra.mxu1 %v3665_v22  ;;  %3322 = vmatpush3.bf16.msra.mxu0 %v3669_v24  ;;  %v3734_v20 = vld [vmem:[%s3991_s9 + $0x1f8] ss:$36 sps:$4 sm:$0xff]   ;;  %v3736_v22 = vld [vmem:[%s3991_s9 + $0x244] ss:$36 sps:$4 sm:$0xff]  }
  0x28   : > { %3211 = vmatprep.subr.bf16.mxu1 %v3666_v23  ;;  %1697 = vmatprep.mubr.bf16.mxu0 %v3670_v25  ;;  %v3738_v23 = vld [vmem:[%s3991_s9 + $0x12c] ss:$36 sps:$4 sm:$0xff]   ;;  %v3768_v24 = vld [vmem:[%s4731_s1 + $0x178] sm:$0xff]  }
  0x29   : > { %1793 = vmatprep.mubr.bf16.mxu1 %v3672_v26  ;;  %3323 = vmatprep.subr.bf16.mxu0 %v3687_v28  ;;  %v3769_v25 = vld [vmem:[%s4731_s1 + $0x138] sm:$0xff]   ;;  %v3776_v26 = vld [vmem:[%s4731_s1 + $0x1e0] sm:$0xff]  }
  0x2a   : > { %v3777_v28 = vld [vmem:[%s4731_s1 + $0x1a0] sm:$0xff]  }
  0x2b   : > { %3212 = vmatpush3.bf16.msra.mxu1 %v3668_v27  ;;  %3324 = vmatpush3.bf16.msra.mxu0 %v3689_v33  ;;  %v3740_v27 = vld [vmem:[%s3991_s9 + $0x240] ss:$36 sps:$4 sm:$0xff]   ;;  %v3791_v33 = vld [vmem:[%s4731_s1 + $0x1e8] sm:$0xff]  }
  0x2c   : > { %3213 = vmatprep.subr.bf16.mxu1 %v3676_v31  ;;  %3325 = vmatprep.subr.bf16.mxu0 %v3701_v43  ;;  %v3746_v31 = vld [vmem:[%s3991_s9 + $0x28c] ss:$36 sps:$4 sm:$0xff]   ;;  %v3762_v43 = vld [vmem:[%s3991_s9 + $0x31c] ss:$36 sps:$4 sm:$0xff]  }
  0x2e   : > { %1698 = vmatmul.mubr.bf16.gmra.mrb[4].mxu0 %v3674_v29  ;;  %1794 = vmatmul.mubr.bf16.gmra.mrb[4].mxu1 %v3675_v30  ;;  %v3778_v29 = vld [vmem:[%s4731_s1 + $0x200] sm:$0xff]   ;;  %v3741_v30 = vld [vmem:[%s3991_s9 + $0x128] ss:$36 sps:$4 sm:$0xff]  }
  0x2f   : > { %3214 = vmatpush3.bf16.msra.mxu1 %v3677_v32  ;;  %1705 = vmatprep.mubr.bf16.mxu0 %v3680_v35  ;;  %v3748_v32 = vld [vmem:[%s3991_s9 + $0x174] ss:$36 sps:$4 sm:$0xff]   ;;  %v3792_v35 = vld [vmem:[%s4731_s1 + $0x1a8] sm:$0xff]  }
  0x30   : > { %3215 = vmatprep.subr.bf16.mxu1 %v3678_v34  ;;  %1801 = vmatprep.mubr.bf16.mxu1 %v3682_v36  ;;  %v3750_v34 = vld [vmem:[%s3991_s9 + $0x288] ss:$36 sps:$4 sm:$0xff]   ;;  %v3751_v36 = vld [vmem:[%s3991_s9 + $0x170] ss:$36 sps:$4 sm:$0xff]  }
  0x31   : > { %3326 = vmatpush3.bf16.msra.mxu0 %v3703_v46  ;;  %v3767_v46 = vld [vmem:[%s3991_s9 + $0x200] ss:$36 sps:$4 sm:$0xff]  }
  0x32   : > { %3327 = vmatprep.subr.bf16.mxu0 %v3718_v55  ;;  %v3793_v55 = vld [vmem:[%s4731_s1 + $0x208] sm:$0xff]  }
  0x33   : > { %3216 = vmatpush3.bf16.msra.mxu1 %v3679_v37  ;;  %v3754_v37 = vld [vmem:[%s3991_s9 + $0x2d4] ss:$36 sps:$4 sm:$0xff]  }
  0x34   : > { %3217 = vmatprep.subr.bf16.mxu1 %v3686_v40  ;;  %v3759_v40 = vld [vmem:[%s3991_s9 + $0x1b8] ss:$36 sps:$4 sm:$0xff]  }
  0x35   : > { %3328 = vmatpush3.bf16.msra.mxu0 %v3719_v56  ;;  %v3808_v56 = vld [vmem:[%s4731_s1 + $0x210] sm:$0xff]  }
  0x36   : > { %1706 = vmatmul.mubr.bf16.gmra.mrb[8].mxu0 %v3684_v38  ;;  %1802 = vmatmul.mubr.bf16.gmra.mrb[8].mxu1 %v3685_v39  ;;  %v3756_v38 = vld [vmem:[%s3991_s9 + $0x1bc] ss:$36 sps:$4 sm:$0xff]   ;;  %v3758_v39 = vld [vmem:[%s3991_s9 + $0x2d0] ss:$36 sps:$4 sm:$0xff]  }
  0x37   : > { %3218 = vmatpush3.bf16.msra.mxu1 %v3688_v41  ;;  %1713 = vmatprep.mubr.bf16.mxu0 %v3692_v44  ;;  %v3806_v41 = vld [vmem:[%s4731_s1 + $0x1f0] sm:$0xff]   ;;  %v3764_v44 = vld [vmem:[%s3991_s9 + $0x204] ss:$36 sps:$4 sm:$0xff]  }
  0x38   : > { %3219 = vmatprep.subr.bf16.mxu1 %v3690_v42  ;;  %1809 = vmatprep.mubr.bf16.mxu1 %v3694_v45  ;;  %v3807_v42 = vld [vmem:[%s4731_s1 + $0x1b0] sm:$0xff]   ;;  %v3766_v45 = vld [vmem:[%s3991_s9 + $0x318] ss:$36 sps:$4 sm:$0xff]  }
  0x39   : > { %3329 = vmatprep.subr.bf16.mxu0 %v3728_v0  ;;  %v3790_v0 = vld [vmem:[%s3991_s9 + $0xa0] ss:$36 sps:$4 sm:$0xff]  }
  0x3a   : > { %3330 = vmatpush3.bf16.msra.mxu0 %v3729_v2  ;;  %v3796_v2 = vld [vmem:[%s3991_s9 + $0xec] ss:$36 sps:$4 sm:$0xff]  }
  0x3b   : > { %3220 = vmatpush3.bf16.msra.mxu1 %v3691_v47  ;;  %3331 = vmatprep.subr.bf16.mxu0 %v3742_v8  ;;  %v3821_v47 = vld [vmem:[%s4731_s1 + $0x1f8] sm:$0xff]  }
  0x3c   : > { %3221 = vmatprep.subr.bf16.mxu1 %v3698_v48  ;;  %v3822_v48 = vld [vmem:[%s4731_s1 + $0x1b8] sm:$0xff]  }
  0x3d   : > { %v3802_v8 = vld [vmem:[%s3991_s9 + $0x134] ss:$36 sps:$4 sm:$0xff]  }
  0x3e   : > { %1714 = vmatmul.mubr.bf16.gmra.mrb[12].mxu0 %v3696_v49  ;;  %1810 = vmatmul.mubr.bf16.gmra.mrb[12].mxu1 %v3697_v50  ;;  %v3770_v49 = vld [vmem:[%s3991_s9 + $0x24c] ss:$36 sps:$4 sm:$0xff]   ;;  %v3774_v50 = vld [vmem:[%s3991_s9 + $0x14] ss:$36 sps:$4 sm:$0xff]  }
  0x3f   : > { %3222 = vmatpush3.bf16.msra.mxu1 %v3699_v51  ;;  %1721 = vmatprep.mubr.bf16.mxu0 %v3704_v53  ;;  %v3772_v51 = vld [vmem:[%s3991_s9 + $0x10] ss:$36 sps:$4 sm:$0xff]  }
  0x40   : > { %3223 = vmatprep.subr.bf16.mxu1 %v3700_v52  ;;  %1850 = vmatprep.mubr.bf16.mxu1 %v3708_v54  ;;  %v3775_v52 = vld [vmem:[%s3991_s9 + $0x248] ss:$36 sps:$4 sm:$0xff]   ;;  %v3779_v53 = vld [vmem:[%s3991_s9 + $0x294] ss:$36 sps:$4 sm:$0xff]   ;;  %v3781_v54 = vld [vmem:[%s3991_s9 + $0x5c] ss:$36 sps:$4 sm:$0xff]  }
  0x41   : > { %3332 = vmatpush3.bf16.msra.mxu0 %v3744_v10  ;;  %v3804_v10 = vld [vmem:[%s3991_s9 + $0x368] ss:$36 sps:$4 sm:$0xff]  }
  0x42   : > { %3333 = vmatprep.subr.bf16.mxu0 %v3752_v15  ;;  %v3814_v15 = vld [vmem:[%s3991_s9 + $0x178] ss:$36 sps:$4 sm:$0xff]  }
  0x43   : > { %3224 = vmatpush3.bf16.msra.mxu1 %v3702_v57  ;;  %v3783_v57 = vld [vmem:[%s3991_s9 + $0x290] ss:$36 sps:$4 sm:$0xff]  }
  0x44   : > { %3433 = vmatprep.subr.bf16.mxu1 %v3710_v60  ;;  %v3787_v60 = vld [vmem:[%s3991_s9 + $0xa4] ss:$36 sps:$4 sm:$0xff]  }
  0x45   : > { %3334 = vmatpush3.bf16.msra.mxu0 %v3753_v16  ;;  %v3815_v16 = vld [vmem:[%s3991_s9 + $0x3fc] ss:$36 sps:$4 sm:$0xff]  }
  0x46   : > { %1722 = vmatmul.mubr.bf16.gmra.mrb[16].mxu0 %v3709_v59  ;;  %1851 = vmatmul.mubr.bf16.vlgmr.msra.gmra.mrb[16].mxu1 %v3706_v58  ;;  %v3784_v58 = vld [vmem:[%s3991_s9 + $0x58] ss:$36 sps:$4 sm:$0xff]  }
  0x47   : > { %3434 = vmatpush3.bf16.msra.mxu1 %v3711_v61  ;;  %1729 = vmatprep.mubr.bf16.mxu0 %v3712_v62  ;;  %v3785_v59 = vld [vmem:[%s3991_s9 + $0x2dc] ss:$36 sps:$4 sm:$0xff]  }
  0x48   : > { %1858 = vmatprep.mubr.bf16.mxu1 %v3714_v63  ;;  %3435 = vmatprep.subr.bf16.mxu1 %v3726_v1  ;;  %v3823_v61 = vld [vmem:[%s4731_s1 + $0x218] sm:$0xff]   ;;  %v3836_v62 = vld [vmem:[%s4731_s1 + $0x220] sm:$0xff]  }
  0x49   : > { %3335 = vmatprep.subr.bf16.mxu0 %v3768_v24  ;;  %v3789_v63 = vld [vmem:[%s3991_s9 + $0x2d8] ss:$36 sps:$4 sm:$0xff]   ;;  %v3794_v1 = vld [vmem:[%s3991_s9 + $0x324] ss:$36 sps:$4 sm:$0xff]  }
  0x4a   : > { %3336 = vmatpush3.bf16.msra.mxu0 %v3769_v25  ;;  %v3830_v24 = vld [vmem:[%s3991_s9 + $0x254] ss:$36 sps:$4 sm:$0xff]   ;;  %v3834_v25 = vld [vmem:[%s3991_s9 + $0x1c] ss:$36 sps:$4 sm:$0xff]  }
  0x4b   : > { %3436 = vmatpush3.bf16.msra.mxu1 %v3727_v3  ;;  %3569 = vmatprep.subr.bf16.mxu0 %v3778_v29  ;;  %v3849_v3 = vld [vmem:[%s4731_s1 + $0x228] sm:$0xff]  }
  0x4c   : > { %3437 = vmatprep.subr.bf16.mxu1 %v3743_v9  ;;  %v3875_v9 = vld [vmem:[%s4731_s1 + $0x238] sm:$0xff]  }
  0x4e   : > { %1730 = vmatmul.mubr.bf16.gmra.mrb[20].mxu0 %v3716_v4  ;;  %1859 = vmatmul.mubr.bf16.gmra.mrb[20].mxu1 %v3717_v5  ;;  %v3798_v4 = vld [vmem:[%s3991_s9 + $0x320] ss:$36 sps:$4 sm:$0xff]   ;;  %v3799_v5 = vld [vmem:[%s3991_s9 + $0xe8] ss:$36 sps:$4 sm:$0xff]  }
  0x4f   : > { %1737 = vmatprep.mubr.bf16.mxu0 %v3720_v6  ;;  %1866 = vmatprep.mubr.bf16.mxu1 %v3722_v7  ;;  %v3862_v6 = vld [vmem:[%s4731_s1 + $0x230] sm:$0xff]  }
  0x50   : > { %3438 = vmatpush3.bf16.msra.mxu1 %v3745_v11  ;;  %v3800_v7 = vld [vmem:[%s3991_s9 + $0x36c] ss:$36 sps:$4 sm:$0xff]  }
  0x51   : > { %3439 = vmatprep.subr.bf16.mxu1 %v3760_v18  ;;  %v3805_v11 = vld [vmem:[%s3991_s9 + $0x130] ss:$36 sps:$4 sm:$0xff]   ;;  %v3819_v18 = vld [vmem:[%s3991_s9 + $0x3f8] ss:$36 sps:$4 sm:$0xff]  }
  0x54   : > { %3440 = vmatpush3.bf16.msra.mxu1 %v3761_v19  ;;  %v3820_v19 = vld [vmem:[%s3991_s9 + $0x1c0] ss:$36 sps:$4 sm:$0xff]  }
  0x55   : > { %3441 = vmatprep.subr.bf16.mxu1 %v3776_v26  ;;  %v3832_v26 = vld [vmem:[%s3991_s9 + $0x18] ss:$36 sps:$4 sm:$0xff]  }
  0x56   : > { %1738 = vmatmul.mubr.bf16.gmra.mrb[24].mxu0 %v3724_v12  ;;  %1867 = vmatmul.mubr.bf16.gmra.mrb[24].mxu1 %v3725_v13  ;;  %v3809_v12 = vld [vmem:[%s3991_s9 + $0x3b4] ss:$36 sps:$4 sm:$0xff]   ;;  %v3811_v13 = vld [vmem:[%s3991_s9 + $0x17c] ss:$36 sps:$4 sm:$0xff]  }
  0x57   : > { %1745 = vmatprep.mubr.bf16.mxu0 %v3730_v14  ;;  %1874 = vmatprep.mubr.bf16.mxu1 %v3732_v17  ;;  %v3813_v14 = vld [vmem:[%s3991_s9 + $0x3b0] ss:$36 sps:$4 sm:$0xff]   ;;  %v3817_v17 = vld [vmem:[%s3991_s9 + $0x1c4] ss:$36 sps:$4 sm:$0xff]  }
  0x58   : > { %3442 = vmatpush3.bf16.msra.mxu1 %v3777_v28  ;;  %v3837_v28 = vld [vmem:[%s3991_s9 + $0x29c] ss:$36 sps:$4 sm:$0xff]  }
  0x59   : > { %3443 = vmatprep.subr.bf16.mxu1 %v3791_v33  ;;  %v3845_v33 = vld [vmem:[%s3991_s9 + $0xac] ss:$36 sps:$4 sm:$0xff]  }
  0x5c   : > { %3444 = vmatpush3.bf16.msra.mxu1 %v3792_v35  ;;  %v3848_v35 = vld [vmem:[%s3991_s9 + $0xa8] ss:$36 sps:$4 sm:$0xff]  }
  0x5d   : > { %3445 = vmatprep.subr.bf16.mxu1 %v3806_v41  ;;  %v3858_v41 = vld [vmem:[%s3991_s9 + $0x13c] ss:$36 sps:$4 sm:$0xff]  }
  0x5e   : > { %1746 = vmatmul.mubr.bf16.gmra.mrb[28].mxu0 %v3734_v20  ;;  %1875 = vmatmul.mubr.bf16.gmra.mrb[28].mxu1 %v3735_v21  ;;  %v3824_v20 = vld [vmem:[%s3991_s9 + $0x444] ss:$36 sps:$4 sm:$0xff]   ;;  %v3826_v21 = vld [vmem:[%s3991_s9 + $0x20c] ss:$36 sps:$4 sm:$0xff]  }
  0x5f   : > { %1753 = vmatprep.mubr.bf16.mxu0 %v3736_v22  ;;  %1882 = vmatprep.mubr.bf16.mxu1 %v3738_v23  ;;  %v3828_v22 = vld [vmem:[%s3991_s9 + $0x440] ss:$36 sps:$4 sm:$0xff]   ;;  %v3829_v23 = vld [vmem:[%s3991_s9 + $0x208] ss:$36 sps:$4 sm:$0xff]  }
  0x60   : > { %3446 = vmatpush3.bf16.msra.mxu1 %v3807_v42  ;;  %v3860_v42 = vld [vmem:[%s3991_s9 + $0x370] ss:$36 sps:$4 sm:$0xff]  }
  0x61   : > { %3447 = vmatprep.subr.bf16.mxu1 %v3821_v47  ;;  %v3868_v47 = vld [vmem:[%s3991_s9 + $0x180] ss:$36 sps:$4 sm:$0xff]  }
  0x64   : > { %3448 = vmatpush3.bf16.msra.mxu1 %v3822_v48  ;;  %v3869_v48 = vld [vmem:[%s3991_s9 + $0x404] ss:$36 sps:$4 sm:$0xff]  }
  0x66   : > { %1754 = vmatmul.mubr.bf16.gmra.mrb[32].mxu0 %v3740_v27  ;;  %1883 = vmatmul.mubr.bf16.gmra.mrb[32].mxu1 %v3741_v30  ;;  %v3835_v27 = vld [vmem:[%s3991_s9 + $0x250] ss:$36 sps:$4 sm:$0xff]   ;;  %v3841_v30 = vld [vmem:[%s3991_s9 + $0x298] ss:$36 sps:$4 sm:$0xff]  }
  0x67   : > { %1761 = vmatprep.mubr.bf16.mxu0 %v3746_v31  ;;  %1890 = vmatprep.mubr.bf16.mxu1 %v3748_v32  ;;  %v3842_v31 = vld [vmem:[%s3991_s9 + $0x60] ss:$36 sps:$4 sm:$0xff]  }
  0x68   : > { %v3843_v32 = vld [vmem:[%s3991_s9 + $0x2e4] ss:$36 sps:$4 sm:$0xff]  }
  0x6e   : > { %1762 = vmatmul.mubr.bf16.gmra.mrb[36].mxu0 %v3750_v34  ;;  %1891 = vmatmul.mubr.bf16.gmra.mrb[36].mxu1 %v3751_v36  ;;  %v3847_v34 = vld [vmem:[%s3991_s9 + $0x2e0] ss:$36 sps:$4 sm:$0xff]   ;;  %v3850_v36 = vld [vmem:[%s3991_s9 + $0x32c] ss:$36 sps:$4 sm:$0xff]  }
  0x6f   : > { %1769 = vmatprep.mubr.bf16.mxu0 %v3754_v37  ;;  %1898 = vmatprep.mubr.bf16.mxu1 %v3756_v38  ;;  %v3852_v37 = vld [vmem:[%s3991_s9 + $0xf4] ss:$36 sps:$4 sm:$0xff]   ;;  %v3854_v38 = vld [vmem:[%s3991_s9 + $0x328] ss:$36 sps:$4 sm:$0xff]  }
  0x76   : > { %1770 = vmatmul.mubr.bf16.gmra.mrb[40].mxu0 %v3758_v39  ;;  %1899 = vmatmul.mubr.bf16.gmra.mrb[40].mxu1 %v3759_v40  ;;  %v3855_v39 = vld [vmem:[%s3991_s9 + $0xf0] ss:$36 sps:$4 sm:$0xff]  }
  0x77   : > { %1777 = vmatprep.mubr.bf16.mxu0 %v3762_v43  ;;  %1906 = vmatprep.mubr.bf16.mxu1 %v3764_v44  ;;  %v3856_v40 = vld [vmem:[%s3991_s9 + $0x374] ss:$36 sps:$4 sm:$0xff]   ;;  %v3863_v44 = vld [vmem:[%s3991_s9 + $0x3bc] ss:$36 sps:$4 sm:$0xff]  }
  0x78   : > { %v3861_v43 = vld [vmem:[%s3991_s9 + $0x138] ss:$36 sps:$4 sm:$0xff]  }
  0x7e   : > { %1778 = vmatmul.mubr.bf16.gmra.mrb[44].mxu0 %v3766_v45  ;;  %1907 = vmatmul.mubr.bf16.gmra.mrb[44].mxu1 %v3767_v46  ;;  %v3865_v45 = vld [vmem:[%s3991_s9 + $0x184] ss:$36 sps:$4 sm:$0xff]   ;;  %v3867_v46 = vld [vmem:[%s3991_s9 + $0x3b8] ss:$36 sps:$4 sm:$0xff]  }
  0x7f   : > { %1914 = vmatprep.mubr.bf16.mxu1 %v3770_v49  ;;  %2011 = vmatprep.mubr.bf16.mxu0 %v3774_v50  ;;  %v3871_v49 = vld [vmem:[%s3991_s9 + $0x1cc] ss:$36 sps:$4 sm:$0xff]   ;;  %v3873_v50 = vld [vmem:[%s3991_s9 + $0x400] ss:$36 sps:$4 sm:$0xff]  }
  0x86   : > { %1915 = vmatmul.mubr.bf16.gmra.mrb[48].mxu1 %v3775_v52  ;;  %2012 = vmatmul.mubr.bf16.vlgmr.msra.gmra.mrb[48].mxu0 %v3772_v51  ;;  %v3874_v51 = vld [vmem:[%s3991_s9 + $0x1c8] ss:$36 sps:$4 sm:$0xff]  }
  0x87   : > { %3570 = vmatpush3.bf16.msra.mxu0 %v3778_v29  ;;  %1922 = vmatprep.mubr.bf16.mxu1 %v3779_v53  ;;  %v3839_v29 = vld [vmem:[%s3991_s9 + $0x64] ss:$36 sps:$4 sm:$0xff]   ;;  %v3876_v52 = vld [vmem:[%s3991_s9 + $0x44c] ss:$36 sps:$4 sm:$0xff]   ;;  %v3878_v53 = vld [vmem:[%s3991_s9 + $0x214] ss:$36 sps:$4 sm:$0xff]  }
  0x88   : > { %2019 = vmatprep.mubr.bf16.mxu0 %v3781_v54  ;;  %3571 = vmatprep.subr.bf16.mxu0 %v3793_v55 }
  0x8b   : > { %3572 = vmatpush3.bf16.msra.mxu0 %v3793_v55 }
  0x8c   : > { %3573 = vmatprep.subr.bf16.mxu0 %v3808_v56 }
  0x8e   : > { %1923 = vmatmul.mubr.bf16.gmra.mrb[52].mxu1 %v3783_v57  ;;  %2020 = vmatmul.mubr.bf16.gmra.mrb[52].mxu0 %v3784_v58  ;;  %v3880_v58 = vld [vmem:[%s3991_s9 + $0x448] ss:$36 sps:$4 sm:$0xff]  }
  0x8f   : > { %1930 = vmatprep.mubr.bf16.mxu1 %v3785_v59  ;;  %2027 = vmatprep.mubr.bf16.mxu0 %v3787_v60  ;;  %v3881_v59 = vld [vmem:[%s3991_s9 + $0x210] ss:$36 sps:$4 sm:$0xff]  }
  0x90   : > { %3574 = vmatpush3.bf16.msra.mxu0 %v3808_v56 }
  0x91   : > { %3575 = vmatprep.subr.bf16.mxu0 %v3823_v61 }
  0x94   : > { %3576 = vmatpush3.bf16.msra.mxu0 %v3823_v61 }
  0x95   : > { %3577 = vmatprep.subr.bf16.mxu0 %v3836_v62 }
  0x96   : > { %1931 = vmatmul.mubr.bf16.gmra.mrb[56].mxu1 %v3789_v63  ;;  %2028 = vmatmul.mubr.bf16.gmra.mrb[56].mxu0 %v3790_v0  ;;  %v3882_v0 = vld [vmem:[%s3991_s9 + $0x25c] ss:$36 sps:$4 sm:$0xff]  }
  0x97   : > { %1938 = vmatprep.mubr.bf16.mxu1 %v3794_v1  ;;  %2035 = vmatprep.mubr.bf16.mxu0 %v3796_v2  ;;  %v3884_v1 = vld [vmem:[%s3991_s9 + $0x20] ss:$36 sps:$4 sm:$0xff]  }
  0x98   : > { %3578 = vmatpush3.bf16.msra.mxu0 %v3836_v62 }
  0x99   : > { %3579 = vmatprep.subr.bf16.mxu0 %v3849_v3 }
  0x9c   : > { %3580 = vmatpush3.bf16.msra.mxu0 %v3849_v3 }
  0x9d   : > { %3581 = vmatprep.subr.bf16.mxu0 %v3862_v6 }
  0x9e   : > { %1939 = vmatmul.mubr.bf16.gmra.mrb[60].mxu1 %v3798_v4  ;;  %2036 = vmatmul.mubr.bf16.gmra.mrb[60].mxu0 %v3799_v5 }
  0x9f   : > { %1946 = vmatprep.mubr.bf16.mxu1 %v3800_v7  ;;  %2043 = vmatprep.mubr.bf16.mxu0 %v3802_v8 }
  0xa0   : > { %3582 = vmatpush3.bf16.msra.mxu0 %v3862_v6 }
  0xa1   : > { %3583 = vmatprep.subr.bf16.mxu0 %v3875_v9 }
  0xa4   : > { %3584 = vmatpush3.bf16.msra.mxu0 %v3875_v9 }
  0xa6   : > { %1947 = vmatmul.mubr.bf16.gmra.mrb[64].mxu1 %v3804_v10  ;;  %2044 = vmatmul.mubr.bf16.gmra.mrb[64].mxu0 %v3805_v11  ;;  %v3885_v10 = vld [vmem:[%s3991_s9 + $0x258] ss:$36 sps:$4 sm:$0xff]   ;;  %v3886_v11 = vld [vmem:[%s3991_s9 + $0x68] ss:$36 sps:$4 sm:$0xff]  }
  0xa7   : > { %1954 = vmatprep.mubr.bf16.mxu1 %v3809_v12  ;;  %2051 = vmatprep.mubr.bf16.mxu0 %v3811_v13 }
  0xae   : > { %1955 = vmatmul.mubr.bf16.gmra.mrb[68].mxu1 %v3813_v14  ;;  %2052 = vmatmul.mubr.bf16.gmra.mrb[68].mxu0 %v3814_v15 }
  0xaf   : > { %1962 = vmatprep.mubr.bf16.mxu1 %v3815_v16  ;;  %2059 = vmatprep.mubr.bf16.mxu0 %v3817_v17  ;;  %v3887_v16 = vld [vmem:[%s3991_s9 + $0x2a4] ss:$36 sps:$4 sm:$0xff]   ;;  %v3889_v17 = vld [vmem:[%s3991_s9 + $0xb0] ss:$36 sps:$4 sm:$0xff]  }
  0xb6   : > { %1963 = vmatmul.mubr.bf16.gmra.mrb[72].mxu1 %v3819_v18  ;;  %2060 = vmatmul.mubr.bf16.gmra.mrb[72].mxu0 %v3820_v19 }
  0xb7   : > { %1970 = vmatprep.mubr.bf16.mxu1 %v3824_v20  ;;  %2067 = vmatprep.mubr.bf16.mxu0 %v3826_v21 }
  0xbe   : > { %1971 = vmatmul.mubr.bf16.gmra.mrb[76].mxu1 %v3828_v22  ;;  %2068 = vmatmul.mubr.bf16.gmra.mrb[76].mxu0 %v3829_v23 }
  0xbf   : > { %2075 = vmatprep.mubr.bf16.mxu0 %v3830_v24  ;;  %2172 = vmatprep.mubr.bf16.mxu1 %v3834_v25 }
  0xc6   : > { %2076 = vmatmul.mubr.bf16.gmra.mrb[80].mxu0 %v3835_v27  ;;  %2173 = vmatmul.mubr.bf16.vlgmr.msra.gmra.mrb[80].mxu1 %v3832_v26  ;;  %v3890_v26 = vld [vmem:[%s3991_s9 + $0x2a0] ss:$36 sps:$4 sm:$0xff]   ;;  %v3891_v27 = vld [vmem:[%s3991_s9 + $0xf8] ss:$36 sps:$4 sm:$0xff]  }
  0xc7   : > { %2083 = vmatprep.mubr.bf16.mxu0 %v3837_v28  ;;  %2180 = vmatprep.mubr.bf16.mxu1 %v3839_v29 }
  0xce   : > { %2084 = vmatmul.mubr.bf16.gmra.mrb[84].mxu0 %v3841_v30  ;;  %2181 = vmatmul.mubr.bf16.gmra.mrb[84].mxu1 %v3842_v31 }
  0xcf   : > { %2091 = vmatprep.mubr.bf16.mxu0 %v3843_v32  ;;  %2188 = vmatprep.mubr.bf16.mxu1 %v3845_v33  ;;  %v3892_v32 = vld [vmem:[%s3991_s9 + $0x2ec] ss:$36 sps:$4 sm:$0xff]   ;;  %v3894_v33 = vld [vmem:[%s3991_s9 + $0x140] ss:$36 sps:$4 sm:$0xff]  }
  0xd6   : > { %2092 = vmatmul.mubr.bf16.gmra.mrb[88].mxu0 %v3847_v34  ;;  %2189 = vmatmul.mubr.bf16.gmra.mrb[88].mxu1 %v3848_v35 }
  0xd7   : > { %2099 = vmatprep.mubr.bf16.mxu0 %v3850_v36  ;;  %2196 = vmatprep.mubr.bf16.mxu1 %v3852_v37 }
  0xde   : > { %2100 = vmatmul.mubr.bf16.gmra.mrb[92].mxu0 %v3854_v38  ;;  %2197 = vmatmul.mubr.bf16.gmra.mrb[92].mxu1 %v3855_v39 }
  0xdf   : > { %2107 = vmatprep.mubr.bf16.mxu0 %v3856_v40  ;;  %2204 = vmatprep.mubr.bf16.mxu1 %v3858_v41 }
  0xe6   : > { %2108 = vmatmul.mubr.bf16.gmra.mrb[96].mxu0 %v3860_v42  ;;  %2205 = vmatmul.mubr.bf16.gmra.mrb[96].mxu1 %v3861_v43  ;;  %v3895_v42 = vld [vmem:[%s3991_s9 + $0x2e8] ss:$36 sps:$4 sm:$0xff]  }
  0xe7   : > { %2115 = vmatprep.mubr.bf16.mxu0 %v3863_v44  ;;  %2212 = vmatprep.mubr.bf16.mxu1 %v3865_v45  ;;  %v3896_v43 = vld [vmem:[%s3991_s9 + $0x188] ss:$36 sps:$4 sm:$0xff]  }
  0xee   : > { %2116 = vmatmul.mubr.bf16.gmra.mrb[100].mxu0 %v3867_v46  ;;  %2213 = vmatmul.mubr.bf16.gmra.mrb[100].mxu1 %v3868_v47 }
  0xef   : > { %2123 = vmatprep.mubr.bf16.mxu0 %v3869_v48  ;;  %2220 = vmatprep.mubr.bf16.mxu1 %v3871_v49  ;;  %v3897_v48 = vld [vmem:[%s3991_s9 + $0x334] ss:$36 sps:$4 sm:$0xff]  }
  0xf0   : > { %v3899_v49 = vld [vmem:[%s3991_s9 + $0x1d0] ss:$36 sps:$4 sm:$0xff]  }
  0xf6   : > { %2124 = vmatmul.mubr.bf16.gmra.mrb[104].mxu0 %v3873_v50  ;;  %2221 = vmatmul.mubr.bf16.gmra.mrb[104].mxu1 %v3874_v51 }
  0xf7   : > { %2131 = vmatprep.mubr.bf16.mxu0 %v3876_v52  ;;  %2228 = vmatprep.mubr.bf16.mxu1 %v3878_v53 }
  0xf9   : > { %v3185_v54 = vpop.f32.mrb[0].mxu1  ;;  %v3113_v55 = vpop.f32.mrb[0].mxu0 }
  0xfa   : > { %v3186_v56 = vpop.f32.mrb[1].mxu1  ;;  %v3114_v57 = vpop.f32.mrb[1].mxu0 }
  0xfb   : > { %v4294_v60 = vadd.f32 %v3186_v56, %v3185_v54  ;;  %v3188_v61 = vpop.f32.mrb[2].mxu1  ;;  %v4296_v62 = vadd.f32 %v3114_v57, %v3113_v55  ;;  %v3116_v63 = vpop.f32.mrb[2].mxu0  ;;  %v4343_v54 = vld [vmem:[%s4732_s2] ss:$0 sm:$0xff] }
  0xfc   : > { %v3189_v2 = vpop.f32.mrb[3].mxu1  ;;  %v3117_v3 = vpop.f32.mrb[3].mxu0 }
  0xfd   : > { %v4300_v4 = vadd.f32 %v3189_v2, %v3188_v61  ;;  %v4302_v5 = vadd.f32 %v3117_v3, %v3116_v63  ;;  %v3901_v61 = vld [vmem:[%s3991_s9 + $0x218] ss:$36 sps:$4 sm:$0xff]   ;;  %v1692_v63 = vadd.f32 %v4296_v62, %v4343_v54 }
  0xfe   : > { %2132 = vmatmul.mubr.bf16.gmra.mrb[108].mxu0 %v3880_v58  ;;  %2229 = vmatmul.mubr.bf16.gmra.mrb[108].mxu1 %v3881_v59  ;;  %v3900_v59 = vld [vmem:[%s3991_s9 + $0x330] ss:$36 sps:$4 sm:$0xff]  }
  0xff   : > { %2236 = vmatprep.mubr.bf16.mxu1 %v3882_v0  ;;  %3585 = vmatprep.mubr.bf16.mxu0 %v3884_v1 }
 0x101   : > { %v3191_v6 = vpop.f32.mrb[4].mxu1  ;;  %v3119_v7 = vpop.f32.mrb[4].mxu0 }
 0x102   : > { %v3192_v8 = vpop.f32.mrb[5].mxu1  ;;  %v3120_v9 = vpop.f32.mrb[5].mxu0 }
 0x103   : > { %v4306_v12 = vadd.f32 %v3192_v8, %v3191_v6  ;;  %v3194_v13 = vpop.f32.mrb[6].mxu1  ;;  %v4308_v14 = vadd.f32 %v3120_v9, %v3119_v7  ;;  %v3122_v15 = vpop.f32.mrb[6].mxu0  ;;  %v3902_v6 = vld [vmem:[%s3991_s9 + $0x37c] ss:$36 sps:$4 sm:$0xff]  }
 0x104   : > { %v3195_v18 = vpop.f32.mrb[7].mxu1  ;;  %v3123_v19 = vpop.f32.mrb[7].mxu0  ;;  %v3904_v7 = vld [vmem:[%s3991_s9 + $0x260] ss:$36 sps:$4 sm:$0xff]  }
 0x105   : > { %v4312_v20 = vadd.f32 %v3195_v18, %v3194_v13  ;;  %v4314_v21 = vadd.f32 %v3123_v19, %v3122_v15 }
 0x106   : > { %2237 = vmatmul.mubr.bf16.gmra.mrb[112].mxu1 %v3885_v10  ;;  %3586 = vmatmul.mubr.bf16.vlgmr.msra.gmra.mrb[112].mxu0 %v3886_v11  ;;  %v1695_v10 = vadd.f32 %v4302_v5, %v4343_v54  ;;  %v1700_v5 = vadd.f32 %v4308_v14, %v4343_v54 }
 0x107   : > { %2244 = vmatprep.mubr.bf16.mxu1 %v3887_v16  ;;  %3589 = vmatprep.mubr.bf16.mxu0 %v3889_v17 }
 0x109   : > { %v3197_v22 = vpop.f32.mrb[8].mxu1  ;;  %v3125_v23 = vpop.f32.mrb[8].mxu0 }
 0x10a   : > { %v3198_v24 = vpop.f32.mrb[9].mxu1  ;;  %v3126_v25 = vpop.f32.mrb[9].mxu0 }
 0x10b   : > { %v4318_v28 = vadd.f32 %v3198_v24, %v3197_v22  ;;  %v3200_v29 = vpop.f32.mrb[10].mxu1  ;;  %v4320_v30 = vadd.f32 %v3126_v25, %v3125_v23  ;;  %v3128_v31 = vpop.f32.mrb[10].mxu0  ;;  %v3905_v22 = vld [vmem:[%s3991_s9 + $0x378] ss:$36 sps:$4 sm:$0xff]   ;;  %v3906_v23 = vld [vmem:[%s3991_s9 + $0x2a8] ss:$36 sps:$4 sm:$0xff]  }
 0x10c   : > { %v3201_v34 = vpop.f32.mrb[11].mxu1  ;;  %v3129_v35 = vpop.f32.mrb[11].mxu0 }
 0x10d   : > { %v4324_v36 = vadd.f32 %v3201_v34, %v3200_v29  ;;  %v4326_v37 = vadd.f32 %v3129_v35, %v3128_v31  ;;  %v3907_v29 = vld [vmem:[%s3991_s9 + $0x3c4] ss:$36 sps:$4 sm:$0xff]   ;;  %v3909_v31 = vld [vmem:[%s3991_s9 + $0x2f0] ss:$36 sps:$4 sm:$0xff]   ;;  %v1703_v34 = vadd.f32 %v4314_v21, %v4343_v54  ;;  %v1708_v21 = vadd.f32 %v4320_v30, %v4343_v54 }
 0x10e   : > { %2245 = vmatmul.mubr.bf16.gmra.mrb[116].mxu1 %v3890_v26  ;;  %3590 = vmatmul.mubr.bf16.gmra.mrb[116].mxu0 %v3891_v27 }
 0x10f   : > { %2252 = vmatprep.mubr.bf16.mxu1 %v3892_v32  ;;  %3593 = vmatprep.mubr.bf16.mxu0 %v3894_v33 }
 0x111   : > { %v3203_v38 = vpop.f32.mrb[12].mxu1  ;;  %v3131_v39 = vpop.f32.mrb[12].mxu0 }
 0x112   : > { %v3204_v40 = vpop.f32.mrb[13].mxu1  ;;  %v3132_v41 = vpop.f32.mrb[13].mxu0 }
 0x113   : > { %v4330_v44 = vadd.f32 %v3204_v40, %v3203_v38  ;;  %v3206_v45 = vpop.f32.mrb[14].mxu1  ;;  %v4332_v46 = vadd.f32 %v3132_v41, %v3131_v39  ;;  %v3134_v47 = vpop.f32.mrb[14].mxu0 }
 0x114   : > { %v3207_v50 = vpop.f32.mrb[15].mxu1  ;;  %v3135_v51 = vpop.f32.mrb[15].mxu0 }
 0x115   : > { %v4336_v52 = vadd.f32 %v3207_v50, %v3206_v45  ;;  %v4338_v53 = vadd.f32 %v3135_v51, %v3134_v47  ;;  %v3910_v45 = vld [vmem:[%s3991_s9 + $0x3c0] ss:$36 sps:$4 sm:$0xff]   ;;  %v3911_v47 = vld [vmem:[%s3991_s9 + $0x338] ss:$36 sps:$4 sm:$0xff]  }
 0x116   : > { %2253 = vmatmul.mubr.bf16.gmra.mrb[120].mxu1 %v3895_v42  ;;  %3594 = vmatmul.mubr.bf16.gmra.mrb[120].mxu0 %v3896_v43 }
 0x117   : > { %2260 = vmatprep.mubr.bf16.mxu1 %v3897_v48  ;;  %3597 = vmatprep.mubr.bf16.mxu0 %v3899_v49 }
 0x119   : > { %v3225_v55 = vpop.f32.mrb[16].mxu1  ;;  %v3137_v56 = vpop.f32.mrb[16].mxu0 }
 0x11a   : > { %v3226_v57 = vpop.f32.mrb[17].mxu1  ;;  %v3138_v58 = vpop.f32.mrb[17].mxu0 }
 0x11b   : > { %v3227_v0 = vadd.f32 %v3226_v57, %v3225_v55  ;;  %v3228_v1 = vpop.f32.mrb[18].mxu1  ;;  %v4349_v2 = vadd.f32 %v3138_v58, %v3137_v56  ;;  %v3140_v3 = vpop.f32.mrb[18].mxu0  ;;  %v3912_v55 = vld [vmem:[%s3991_s9 + $0x40c] ss:$36 sps:$4 sm:$0xff]   ;;  %v3914_v56 = vld [vmem:[%s3991_s9 + $0x380] ss:$36 sps:$4 sm:$0xff]  }
 0x11c   : > { %v3229_v8 = vpop.f32.mrb[19].mxu1  ;;  %v3141_v9 = vpop.f32.mrb[19].mxu0 }
 0x11d   : > { %v4355_v11 = vadd.f32 %v3227_v0, %v1692_v63  ;;  %v3230_v13 = vadd.f32 %v3229_v8, %v3228_v1  ;;  %v4357_v15 = vadd.f32 %v3141_v9, %v3140_v3  ;;  %v3915_v8 = vld [vmem:[%s3991_s9 + $0x408] ss:$36 sps:$4 sm:$0xff]  }
 0x11e   : > { %2261 = vmatmul.mubr.bf16.gmra.mrb[124].mxu1 %v3900_v59  ;;  %3598 = vmatmul.mubr.bf16.gmra.mrb[124].mxu0 %v3901_v61  ;;  %v1711_v59 = vadd.f32 %v4326_v37, %v4343_v54  ;;  %v3916_v9 = vld [vmem:[%s3991_s9 + $0x3c8] ss:$36 sps:$4 sm:$0xff]   ;;  %v1716_v37 = vadd.f32 %v4332_v46, %v4343_v54 }
 0x11f   : > { %v4359_v62 = vadd.f32 %v3230_v13, %v1695_v10  ;;  %2268 = vmatprep.mubr.bf16.mxu1 %v3902_v6  ;;  %3601 = vmatprep.mubr.bf16.mxu0 %v3904_v7 }
 0x121   : > { %v3231_v16 = vpop.f32.mrb[20].mxu1  ;;  %v3143_v17 = vpop.f32.mrb[20].mxu0 }
 0x122   : > { %v3232_v18 = vpop.f32.mrb[21].mxu1  ;;  %v3144_v19 = vpop.f32.mrb[21].mxu0 }
 0x123   : > { %v3233_v24 = vadd.f32 %v3232_v18, %v3231_v16  ;;  %v3234_v25 = vpop.f32.mrb[22].mxu1  ;;  %v4365_v26 = vadd.f32 %v3144_v19, %v3143_v17  ;;  %v3146_v27 = vpop.f32.mrb[22].mxu0  ;;  %v3917_v18 = vld [vmem:[%s3991_s9 + $0x454] ss:$36 sps:$4 sm:$0xff]  }
 0x124   : > { %v3235_v32 = vpop.f32.mrb[23].mxu1  ;;  %v3147_v33 = vpop.f32.mrb[23].mxu0  ;;  %v3919_v19 = vld [vmem:[%s3991_s9 + $0x410] ss:$36 sps:$4 sm:$0xff]  }
 0x125   : > { %v4371_v35 = vadd.f32 %v3233_v24, %v1700_v5  ;;  %v3236_v38 = vadd.f32 %v3235_v32, %v3234_v25  ;;  %v4373_v39 = vadd.f32 %v3147_v33, %v3146_v27  ;;  %v1719_v5 = vadd.f32 %v4338_v53, %v4343_v54 }
 0x126   : > { %2269 = vmatmul.mubr.bf16.gmra.mrb[128].mxu1 %v3905_v22  ;;  %3602 = vmatmul.mubr.bf16.gmra.mrb[128].mxu0 %v3906_v23  ;;  %v1724_v53 = vadd.f32 %v4349_v2, %v4343_v54 }
 0x127   : > { %v4375_v14 = vadd.f32 %v3236_v38, %v1703_v34  ;;  %2276 = vmatprep.mubr.bf16.mxu1 %v3907_v29  ;;  %3605 = vmatprep.mubr.bf16.mxu0 %v3909_v31  ;;  %v3920_v34 = vld [vmem:[%s3991_s9 + $0x450] ss:$36 sps:$4 sm:$0xff]   ;;  %v3921_v38 = vld [vmem:[%s3991_s9 + $0x458] ss:$36 sps:$4 sm:$0xff]   ;;  %s2718_s9 = sshll.u32 %s4735_s16, 2 }
 0x128   : > { %s4672_s22 = scalar_lea.vmem %s4733_s3, %s2718_s9 }
 0x129   : > { %v3237_v40 = vpop.f32.mrb[24].mxu1  ;;  %v3149_v41 = vpop.f32.mrb[24].mxu0 }
 0x12a   : > { %v3238_v42 = vpop.f32.mrb[25].mxu1  ;;  %v3150_v43 = vpop.f32.mrb[25].mxu0 }
 0x12b   : > { %v3239_v48 = vadd.f32 %v3238_v42, %v3237_v40  ;;  %v3240_v49 = vpop.f32.mrb[26].mxu1  ;;  %v4381_v50 = vadd.f32 %v3150_v43, %v3149_v41  ;;  %v3152_v51 = vpop.f32.mrb[26].mxu0 }
 0x12c   : > { %v3241_v57 = vpop.f32.mrb[27].mxu1  ;;  %v3153_v58 = vpop.f32.mrb[27].mxu0 }
 0x12d   : > { %v4387_v61 = vadd.f32 %v3239_v48, %v1708_v21  ;;  %v3242_v63 = vadd.f32 %v3241_v57, %v3240_v49  ;;  %v4389_v0 = vadd.f32 %v3153_v58, %v3152_v51  ;;  %v1727_v21 = vadd.f32 %v4357_v15, %v4343_v54 }
 0x12e   : > { %2277 = vmatmul.mubr.bf16.gmra.mrb[132].mxu1 %v3910_v45  ;;  %3606 = vmatmul.mubr.bf16.gmra.mrb[132].mxu0 %v3911_v47 }
 0x12f   : > { %v4391_v30 = vadd.f32 %v3242_v63, %v1711_v59  ;;  %2284 = vmatprep.mubr.bf16.mxu1 %v3912_v55  ;;  %3609 = vmatprep.mubr.bf16.mxu0 %v3914_v56  ;;  %v1732_v59 = vadd.f32 %v4365_v26, %v4343_v54 }
 0x131   : > { %v3243_v1 = vpop.f32.mrb[28].mxu1  ;;  %v3155_v3 = vpop.f32.mrb[28].mxu0 }
 0x132   : > { %v3244_v6 = vpop.f32.mrb[29].mxu1  ;;  %v3156_v7 = vpop.f32.mrb[29].mxu0 }
 0x133   : > { %v3245_v10 = vadd.f32 %v3244_v6, %v3243_v1  ;;  %v3246_v13 = vpop.f32.mrb[30].mxu1  ;;  %v4397_v16 = vadd.f32 %v3156_v7, %v3155_v3  ;;  %v3158_v17 = vpop.f32.mrb[30].mxu0 }
 0x134   : > { %v3247_v22 = vpop.f32.mrb[31].mxu1  ;;  %v3159_v23 = vpop.f32.mrb[31].mxu0 }
 0x135   : > { %v4403_v24 = vadd.f32 %v3245_v10, %v1716_v37  ;;  %v3248_v25 = vadd.f32 %v3247_v22, %v3246_v13  ;;  %v4405_v27 = vadd.f32 %v3159_v23, %v3158_v17  ;;  %v1740_v22 = vadd.f32 %v4381_v50, %v4343_v54 }
 0x136   : > { %2285 = vmatmul.mubr.bf16.gmra.mrb[136].mxu1 %v3915_v8  ;;  %3610 = vmatmul.mubr.bf16.gmra.mrb[136].mxu0 %v3916_v9  ;;  %v1735_v8 = vadd.f32 %v4373_v39, %v4343_v54 }
 0x137   : > { %v4407_v46 = vadd.f32 %v3248_v25, %v1719_v5  ;;  %2292 = vmatprep.mubr.bf16.mxu1 %v3917_v18  ;;  %3613 = vmatprep.mubr.bf16.mxu0 %v3919_v19 }
 0x139   : > { %v3249_v29 = vpop.f32.mrb[32].mxu1  ;;  %v3161_v31 = vpop.f32.mrb[32].mxu0 }
 0x13a   : > { %v3250_v32 = vpop.f32.mrb[33].mxu1  ;;  %v3162_v33 = vpop.f32.mrb[33].mxu0 }
 0x13b   : > { %v3251_v40 = vadd.f32 %v3250_v32, %v3249_v29  ;;  %v3252_v41 = vpop.f32.mrb[34].mxu1  ;;  %v4413_v42 = vadd.f32 %v3162_v33, %v3161_v31  ;;  %v3164_v43 = vpop.f32.mrb[34].mxu0  ;;  %v1743_v32 = vadd.f32 %v4389_v0, %v4343_v54 }
 0x13c   : > { %v3253_v45 = vpop.f32.mrb[35].mxu1  ;;  %v3165_v47 = vpop.f32.mrb[35].mxu0 }
 0x13d   : > { %v4417_v48 = vadd.f32 %v3251_v40, %v1724_v53  ;;  %v3254_v49 = vadd.f32 %v3253_v45, %v3252_v41  ;;  %v3166_v51 = vadd.f32 %v3165_v47, %v3164_v43  ;;  %v1748_v45 = vadd.f32 %v4397_v16, %v4343_v54 }
 0x13e   : > { %2293 = vmatmul.mubr.bf16.gmra.mrb[140].mxu1 %v3920_v34  ;;  %3614 = vmatmul.mubr.bf16.gmra.mrb[140].mxu0 %v3921_v38 }
 0x13f   : > { %v4419_v55 = vadd.f32 %v3254_v49, %v1727_v21 }
 0x141   : > { %v3255_v56 = vpop.f32.mrb[36].mxu1  ;;  %v3167_v2 = vpop.f32.mrb[36].mxu0 }
 0x142   : > { %v3256_v57 = vpop.f32.mrb[37].mxu1  ;;  %v3168_v58 = vpop.f32.mrb[37].mxu0 }
 0x143   : > { %v3257_v63 = vadd.f32 %v3256_v57, %v3255_v56  ;;  %v3258_v1 = vpop.f32.mrb[38].mxu1  ;;  %v4423_v3 = vadd.f32 %v3168_v58, %v3167_v2  ;;  %v3170_v15 = vpop.f32.mrb[38].mxu0  ;;  %v1751_v57 = vadd.f32 %v4405_v27, %v4343_v54  ;;  %v1759_v27 = vadd.f32 %v3166_v51, %v4343_v54 }
 0x144   : > { %v3259_v6 = vpop.f32.mrb[39].mxu1  ;;  %v3171_v7 = vpop.f32.mrb[39].mxu0 }
 0x145   : > { %v4427_v9 = vadd.f32 %v3257_v63, %v1732_v59  ;;  %v3260_v37 = vadd.f32 %v3259_v6, %v3258_v1  ;;  %v3172_v10 = vadd.f32 %v3171_v7, %v3170_v15  ;;  %v1764_v51 = vadd.f32 %v4423_v3, %v4343_v54 }
 0x147   : > { %v4429_v13 = vadd.f32 %v3260_v37, %v1735_v8  ;;  %v1756_v8 = vadd.f32 %v4413_v42, %v4343_v54 }
 0x149   : > { %v3261_v17 = vpop.f32.mrb[40].mxu1  ;;  %v3173_v18 = vpop.f32.mrb[40].mxu0 }
 0x14a   : > { %v3262_v19 = vpop.f32.mrb[41].mxu1  ;;  %v3174_v26 = vpop.f32.mrb[41].mxu0 }
 0x14b   : > { %v3263_v23 = vadd.f32 %v3262_v19, %v3261_v17  ;;  %v3264_v5 = vpop.f32.mrb[42].mxu1  ;;  %v4433_v25 = vadd.f32 %v3174_v26, %v3173_v18  ;;  %v3176_v29 = vpop.f32.mrb[42].mxu0 }
 0x14c   : > { %v3265_v31 = vpop.f32.mrb[43].mxu1  ;;  %v3177_v39 = vpop.f32.mrb[43].mxu0 }
 0x14d   : > { %v4437_v33 = vadd.f32 %v3263_v23, %v1740_v22  ;;  %v3266_v34 = vadd.f32 %v3265_v31, %v3264_v5  ;;  %v4439_v38 = vadd.f32 %v3177_v39, %v3176_v29 }
 0x14f   : > { %v4441_v53 = vadd.f32 %v3266_v34, %v1743_v32 }
 0x151   : > { %v3267_v40 = vpop.f32.mrb[44].mxu1  ;;  %v3179_v41 = vpop.f32.mrb[44].mxu0 }
 0x152   : > { %v3268_v50 = vpop.f32.mrb[45].mxu1  ;;  %v3180_v43 = vpop.f32.mrb[45].mxu0 }
 0x153   : > { %v3269_v47 = vadd.f32 %v3268_v50, %v3267_v40  ;;  %v3270_v21 = vpop.f32.mrb[46].mxu1  ;;  %v4445_v49 = vadd.f32 %v3180_v43, %v3179_v41  ;;  %v3182_v56 = vpop.f32.mrb[46].mxu0 }
 0x154   : > { %v3271_v0 = vpop.f32.mrb[47].mxu1  ;;  %v3183_v2 = vpop.f32.mrb[47].mxu0 }
 0x155   : > { %v4449_v58 = vadd.f32 %v3269_v47, %v1748_v45  ;;  %v3272_v59 = vadd.f32 %v3271_v0, %v3270_v21  ;;  %v4451_v63 = vadd.f32 %v3183_v2, %v3182_v56 }
 0x157   : > { %v4453_v1 = vadd.f32 %v3272_v59, %v1751_v57 }
 0x159   : > { %v3273_v15 = vpop.f32.mrb[48].mxu1  ;;  %v3337_v6 = vpop.f32.mrb[48].mxu0 }
 0x15a   : > { %v3274_v16 = vpop.f32.mrb[49].mxu1  ;;  %v3338_v7 = vpop.f32.mrb[49].mxu0 }
 0x15b   : > { %v3275_v37 = vadd.f32 %v3274_v16, %v3273_v15  ;;  %v3339_v17 = vadd.f32 %v3338_v7, %v3337_v6  ;;  %v3276_v18 = vpop.f32.mrb[50].mxu1  ;;  %v3340_v19 = vpop.f32.mrb[50].mxu0 }
 0x15c   : > { %v3277_v26 = vpop.f32.mrb[51].mxu1  ;;  %v3341_v22 = vpop.f32.mrb[51].mxu0 }
 0x15d   : > { %v4458_v23 = vadd.f32 %v3275_v37, %v1756_v8  ;;  %v4461_v5 = vadd.f32 %v3339_v17, %v4355_v11  ;;  %v3278_v29 = vadd.f32 %v3277_v26, %v3276_v18  ;;  %v3342_v31 = vadd.f32 %v3341_v22, %v3340_v19 }
 0x15e   : > { %v1767_v11 = vadd.f32 %v3172_v10, %v4343_v54  ;;  %v1772_v10 = vadd.f32 %v4433_v25, %v4343_v54 }
 0x15f   : > { %v4463_v39 = vadd.f32 %v3278_v29, %v1759_v27  ;;  %v4466_v32 = vadd.f32 %v3342_v31, %v4359_v62 }
 0x161   : > { %v3279_v42 = vpop.f32.mrb[52].mxu1  ;;  %v3343_v34 = vpop.f32.mrb[52].mxu0 }
 0x162   : > { %v3280_v40 = vpop.f32.mrb[53].mxu1  ;;  %v3344_v41 = vpop.f32.mrb[53].mxu0 }
 0x163   : > { %v3281_v50 = vadd.f32 %v3280_v40, %v3279_v42  ;;  %v3345_v43 = vadd.f32 %v3344_v41, %v3343_v34  ;;  %v3282_v45 = vpop.f32.mrb[54].mxu1  ;;  %v3346_v47 = vpop.f32.mrb[54].mxu0 }
 0x164   : > { %v3283_v21 = vpop.f32.mrb[55].mxu1  ;;  %v3347_v56 = vpop.f32.mrb[55].mxu0 }
 0x165   : > { %v4471_v0 = vadd.f32 %v3281_v50, %v1764_v51  ;;  %v4474_v62 = vadd.f32 %v3345_v43, %v4371_v35  ;;  %v3284_v2 = vadd.f32 %v3283_v21, %v3282_v45  ;;  %v3348_v57 = vadd.f32 %v3347_v56, %v3346_v47 }
 0x166   : > { %v1775_v35 = vadd.f32 %v4439_v38, %v4343_v54  ;;  %v1780_v38 = vadd.f32 %v4445_v49, %v4343_v54 }
 0x167   : > { %v4476_v59 = vadd.f32 %v3284_v2, %v1767_v11  ;;  %v4479_v15 = vadd.f32 %v3348_v57, %v4375_v14 }
 0x169   : > { %v3285_v3 = vpop.f32.mrb[56].mxu1  ;;  %v3349_v6 = vpop.f32.mrb[56].mxu0 }
 0x16a   : > { %v3286_v16 = vpop.f32.mrb[57].mxu1  ;;  %v3350_v7 = vpop.f32.mrb[57].mxu0 }
 0x16b   : > { %v3287_v8 = vadd.f32 %v3286_v16, %v3285_v3  ;;  %v3351_v37 = vadd.f32 %v3350_v7, %v3349_v6  ;;  %v3288_v17 = vpop.f32.mrb[58].mxu1  ;;  %v3352_v18 = vpop.f32.mrb[58].mxu0 }
 0x16c   : > { %v3289_v19 = vpop.f32.mrb[59].mxu1  ;;  %v3353_v27 = vpop.f32.mrb[59].mxu0 }
 0x16d   : > { %v4485_v26 = vadd.f32 %v3287_v8, %v1772_v10  ;;  %v4488_v14 = vadd.f32 %v3351_v37, %v4387_v61  ;;  %v3290_v22 = vadd.f32 %v3289_v19, %v3288_v17  ;;  %v3354_v29 = vadd.f32 %v3353_v27, %v3352_v18 }
 0x16e   : > { %v1783_v61 = vadd.f32 %v4451_v63, %v4343_v54  ;;  %v1788_v63 = vadd.f32 %v4294_v60, %v4343_v54 }
 0x16f   : > { %v4490_v31 = vadd.f32 %v3290_v22, %v1775_v35  ;;  %v4493_v25 = vadd.f32 %v3354_v29, %v4391_v30 }
 0x171   : > { %v3291_v42 = vpop.f32.mrb[60].mxu1  ;;  %v3355_v34 = vpop.f32.mrb[60].mxu0 }
 0x172   : > { %v3292_v40 = vpop.f32.mrb[61].mxu1  ;;  %v3356_v41 = vpop.f32.mrb[61].mxu0 }
 0x173   : > { %v3293_v51 = vadd.f32 %v3292_v40, %v3291_v42  ;;  %v3357_v50 = vadd.f32 %v3356_v41, %v3355_v34  ;;  %v3294_v43 = vpop.f32.mrb[62].mxu1  ;;  %v3358_v45 = vpop.f32.mrb[62].mxu0 }
 0x174   : > { %v3295_v47 = vpop.f32.mrb[63].mxu1  ;;  %v3359_v11 = vpop.f32.mrb[63].mxu0 }
 0x175   : > { %v4499_v21 = vadd.f32 %v3293_v51, %v1780_v38  ;;  %v4502_v30 = vadd.f32 %v3357_v50, %v4403_v24  ;;  %v3296_v56 = vadd.f32 %v3295_v47, %v3294_v43  ;;  %v3360_v2 = vadd.f32 %v3359_v11, %v3358_v45 }
 0x176   : > { %v1791_v24 = vadd.f32 %v4300_v4, %v4343_v54  ;;  %v1796_v4 = vadd.f32 %v4306_v12, %v4343_v54 }
 0x177   : > { %v4504_v57 = vadd.f32 %v3296_v56, %v1783_v61  ;;  %v4507_v49 = vadd.f32 %v3360_v2, %v4407_v46 }
 0x179   : > { %v3297_v3 = vpop.f32.mrb[64].mxu1  ;;  %v3361_v6 = vpop.f32.mrb[64].mxu0 }
 0x17a   : > { %v3298_v16 = vpop.f32.mrb[65].mxu1  ;;  %v3362_v7 = vpop.f32.mrb[65].mxu0 }
 0x17b   : > { %v3299_v10 = vadd.f32 %v3298_v16, %v3297_v3  ;;  %v3363_v8 = vadd.f32 %v3362_v7, %v3361_v6  ;;  %v3300_v37 = vpop.f32.mrb[66].mxu1  ;;  %v3364_v17 = vpop.f32.mrb[66].mxu0 }
 0x17c   : > { %v3301_v18 = vpop.f32.mrb[67].mxu1  ;;  %v3365_v35 = vpop.f32.mrb[67].mxu0 }
 0x17d   : > { %v4513_v19 = vadd.f32 %v3299_v10, %v1788_v63  ;;  %v4516_v46 = vadd.f32 %v3363_v8, %v4417_v48  ;;  %v3302_v27 = vadd.f32 %v3301_v18, %v3300_v37  ;;  %v3366_v22 = vadd.f32 %v3365_v35, %v3364_v17 }
 0x17e   : > { %v1799_v48 = vadd.f32 %v4312_v20, %v4343_v54  ;;  %v1804_v20 = vadd.f32 %v4318_v28, %v4343_v54 }
 0x17f   : > { %v4518_v29 = vadd.f32 %v3302_v27, %v1791_v24  ;;  %v4521_v60 = vadd.f32 %v3366_v22, %v4419_v55 }
 0x181   : > { %v3303_v42 = vpop.f32.mrb[68].mxu1  ;;  %v3367_v34 = vpop.f32.mrb[68].mxu0 }
 0x182   : > { %v3304_v40 = vpop.f32.mrb[69].mxu1  ;;  %v3368_v41 = vpop.f32.mrb[69].mxu0 }
 0x183   : > { %v3305_v38 = vadd.f32 %v3304_v40, %v3303_v42  ;;  %v3369_v51 = vadd.f32 %v3368_v41, %v3367_v34  ;;  %v3306_v50 = vpop.f32.mrb[70].mxu1  ;;  %v3370_v43 = vpop.f32.mrb[70].mxu0 }
 0x184   : > { %v3307_v45 = vpop.f32.mrb[71].mxu1  ;;  %v3371_v61 = vpop.f32.mrb[71].mxu0 }
 0x185   : > { %v4527_v47 = vadd.f32 %v3305_v38, %v1796_v4  ;;  %v4530_v55 = vadd.f32 %v3369_v51, %v4427_v9  ;;  %v3308_v11 = vadd.f32 %v3307_v45, %v3306_v50  ;;  %v3372_v56 = vadd.f32 %v3371_v61, %v3370_v43 }
 0x186   : > { %v1807_v9 = vadd.f32 %v4324_v36, %v4343_v54  ;;  %v1812_v36 = vadd.f32 %v4330_v44, %v4343_v54 }
 0x187   : > { %v4532_v2 = vadd.f32 %v3308_v11, %v1799_v48  ;;  %v4535_v12 = vadd.f32 %v3372_v56, %v4429_v13 }
 0x189   : > { %v3309_v3 = vpop.f32.mrb[72].mxu1  ;;  %v3373_v6 = vpop.f32.mrb[72].mxu0 }
 0x18a   : > { %v3310_v16 = vpop.f32.mrb[73].mxu1  ;;  %v3374_v7 = vpop.f32.mrb[73].mxu0 }
 0x18b   : > { %v3311_v63 = vadd.f32 %v3310_v16, %v3309_v3  ;;  %v3375_v10 = vadd.f32 %v3374_v7, %v3373_v6  ;;  %v3312_v8 = vpop.f32.mrb[74].mxu1  ;;  %v3376_v37 = vpop.f32.mrb[74].mxu0 }
 0x18c   : > { %v3313_v17 = vpop.f32.mrb[75].mxu1  ;;  %v3377_v24 = vpop.f32.mrb[75].mxu0 }
 0x18d   : > { %v4541_v18 = vadd.f32 %v3311_v63, %v1804_v20  ;;  %v4544_v13 = vadd.f32 %v3375_v10, %v4437_v33  ;;  %v3314_v35 = vadd.f32 %v3313_v17, %v3312_v8  ;;  %v3378_v27 = vadd.f32 %v3377_v24, %v3376_v37 }
 0x18e   : > { %v1815_v33 = vadd.f32 %v4336_v52, %v4343_v54 }
 0x18f   : > { %v4546_v22 = vadd.f32 %v3314_v35, %v1807_v9  ;;  %v4549_v28 = vadd.f32 %v3378_v27, %v4441_v53 }
 0x191   : > { %v3315_v42 = vpop.f32.mrb[76].mxu1  ;;  %v3379_v34 = vpop.f32.mrb[76].mxu0 }
 0x192   : > { %v3316_v40 = vpop.f32.mrb[77].mxu1  ;;  %v3380_v41 = vpop.f32.mrb[77].mxu0 }
 0x193   : > { %v3317_v4 = vadd.f32 %v3316_v40, %v3315_v42  ;;  %v3381_v38 = vadd.f32 %v3380_v41, %v3379_v34  ;;  %v3318_v51 = vpop.f32.mrb[78].mxu1  ;;  %v3382_v50 = vpop.f32.mrb[78].mxu0 }
 0x194   : > { %v3319_v43 = vpop.f32.mrb[79].mxu1  ;;  %v3383_v48 = vpop.f32.mrb[79].mxu0 }
 0x195   : > { %v4555_v45 = vadd.f32 %v3317_v4, %v1812_v36  ;;  %v4558_v53 = vadd.f32 %v3381_v38, %v4449_v58  ;;  %v3320_v61 = vadd.f32 %v3319_v43, %v3318_v51  ;;  %v3384_v11 = vadd.f32 %v3383_v48, %v3382_v50 }
 0x197   : > { %v4560_v56 = vadd.f32 %v3320_v61, %v1815_v33  ;;  %v4563_v44 = vadd.f32 %v3384_v11, %v4453_v1 }
 0x199   : > { %v3385_v3 = vpop.f32.mrb[80].mxu0  ;;  %v3449_v6 = vpop.f32.mrb[80].mxu1 }
 0x19a   : > { %v3386_v16 = vpop.f32.mrb[81].mxu0  ;;  %v3450_v7 = vpop.f32.mrb[81].mxu1 }
 0x19b   : > { %v3387_v20 = vadd.f32 %v3386_v16, %v3385_v3  ;;  %v3451_v52 = vadd.f32 %v3450_v7, %v3449_v6  ;;  %v3388_v54 = vpop.f32.mrb[82].mxu0  ;;  %v3452_v63 = vpop.f32.mrb[82].mxu1 }
 0x19c   : > { %v3389_v10 = vpop.f32.mrb[83].mxu0  ;;  %v3453_v8 = vpop.f32.mrb[83].mxu1 }
 0x19d   : > { %v4566_v58 = vadd.f32 %v3387_v20, %v4458_v23  ;;  %v3390_v37 = vadd.f32 %v3389_v10, %v3388_v54  ;;  %v3454_v9 = vadd.f32 %v3453_v8, %v3452_v63  ;;  %v4569_v17 = vadd.f32 %v3451_v52, %v4461_v5 }
 0x19f   : > { %v4572_v1 = vadd.f32 %v3390_v37, %v4463_v39  ;;  %v4575_v24 = vadd.f32 %v3454_v9, %v4466_v32 }
 0x1a1   : > { %v3391_v35 = vpop.f32.mrb[84].mxu0  ;;  %v3455_v27 = vpop.f32.mrb[84].mxu1 }
 0x1a2   : > { %v3392_v42 = vpop.f32.mrb[85].mxu0  ;;  %v3456_v34 = vpop.f32.mrb[85].mxu1 }
 0x1a3   : > { %v3393_v40 = vadd.f32 %v3392_v42, %v3391_v35  ;;  %v3457_v41 = vadd.f32 %v3456_v34, %v3455_v27  ;;  %v3394_v36 = vpop.f32.mrb[86].mxu0  ;;  %v3458_v23 = vpop.f32.mrb[86].mxu1 }
 0x1a4   : > { %v3395_v4 = vpop.f32.mrb[87].mxu0  ;;  %v3459_v38 = vpop.f32.mrb[87].mxu1 }
 0x1a5   : > { %v4578_v51 = vadd.f32 %v3393_v40, %v4471_v0  ;;  %v3396_v5 = vadd.f32 %v3395_v4, %v3394_v36  ;;  %v3460_v50 = vadd.f32 %v3459_v38, %v3458_v23  ;;  %v4581_v39 = vadd.f32 %v3457_v41, %v4474_v62 }
 0x1a7   : > { %v4584_v32 = vadd.f32 %v3396_v5, %v4476_v59  ;;  %v4587_v33 = vadd.f32 %v3460_v50, %v4479_v15 }
 0x1a9   : > { %v3397_v43 = vpop.f32.mrb[88].mxu0  ;;  %v3461_v48 = vpop.f32.mrb[88].mxu1 }
 0x1aa   : > { %v3398_v61 = vpop.f32.mrb[89].mxu0  ;;  %v3462_v11 = vpop.f32.mrb[89].mxu1 }
 0x1ab   : > { %v3399_v3 = vadd.f32 %v3398_v61, %v3397_v43  ;;  %v3463_v6 = vadd.f32 %v3462_v11, %v3461_v48  ;;  %v3400_v16 = vpop.f32.mrb[90].mxu0  ;;  %v3464_v0 = vpop.f32.mrb[90].mxu1 }
 0x1ac   : > { %v3401_v7 = vpop.f32.mrb[91].mxu0  ;;  %v3465_v20 = vpop.f32.mrb[91].mxu1 }
 0x1ad   : > { %v4590_v52 = vadd.f32 %v3399_v3, %v4485_v26  ;;  %v3402_v62 = vadd.f32 %v3401_v7, %v3400_v16  ;;  %v3466_v54 = vadd.f32 %v3465_v20, %v3464_v0  ;;  %v4593_v59 = vadd.f32 %v3463_v6, %v4488_v14 }
 0x1af   : > { %v4596_v15 = vadd.f32 %v3402_v62, %v4490_v31  ;;  %v4599_v63 = vadd.f32 %v3466_v54, %v4493_v25 }
 0x1b1   : > { %v3403_v10 = vpop.f32.mrb[92].mxu0  ;;  %v3467_v8 = vpop.f32.mrb[92].mxu1 }
 0x1b2   : > { %v3404_v37 = vpop.f32.mrb[93].mxu0  ;;  %v3468_v9 = vpop.f32.mrb[93].mxu1 }
 0x1b3   : > { %v3405_v35 = vadd.f32 %v3404_v37, %v3403_v10  ;;  %v3469_v27 = vadd.f32 %v3468_v9, %v3467_v8  ;;  %v3406_v42 = vpop.f32.mrb[94].mxu0  ;;  %v3470_v26 = vpop.f32.mrb[94].mxu1 }
 0x1b4   : > { %v3407_v34 = vpop.f32.mrb[95].mxu0  ;;  %v3471_v40 = vpop.f32.mrb[95].mxu1 }
 0x1b5   : > { %v4602_v41 = vadd.f32 %v3405_v35, %v4499_v21  ;;  %v3408_v14 = vadd.f32 %v3407_v34, %v3406_v42  ;;  %v3472_v36 = vadd.f32 %v3471_v40, %v3470_v26  ;;  %v4605_v31 = vadd.f32 %v3469_v27, %v4502_v30 }
 0x1b7   : > { %v4608_v25 = vadd.f32 %v3408_v14, %v4504_v57  ;;  %v4611_v23 = vadd.f32 %v3472_v36, %v4507_v49 }
 0x1b9   : > { %v3409_v4 = vpop.f32.mrb[96].mxu0  ;;  %v3473_v38 = vpop.f32.mrb[96].mxu1 }
 0x1ba   : > { %v3410_v5 = vpop.f32.mrb[97].mxu0  ;;  %v3474_v50 = vpop.f32.mrb[97].mxu1 }
 0x1bb   : > { %v3411_v43 = vadd.f32 %v3410_v5, %v3409_v4  ;;  %v3475_v48 = vadd.f32 %v3474_v50, %v3473_v38  ;;  %v3412_v61 = vpop.f32.mrb[98].mxu0  ;;  %v3476_v21 = vpop.f32.mrb[98].mxu1 }
 0x1bc   : > { %v3413_v11 = vpop.f32.mrb[99].mxu0  ;;  %v3477_v3 = vpop.f32.mrb[99].mxu1 }
 0x1bd   : > { %v4614_v6 = vadd.f32 %v3411_v43, %v4513_v19  ;;  %v3414_v30 = vadd.f32 %v3413_v11, %v3412_v61  ;;  %v3478_v16 = vadd.f32 %v3477_v3, %v3476_v21  ;;  %v4617_v57 = vadd.f32 %v3475_v48, %v4516_v46 }
 0x1bf   : > { %v4620_v49 = vadd.f32 %v3414_v30, %v4518_v29  ;;  %v4623_v0 = vadd.f32 %v3478_v16, %v4521_v60 }
 0x1c1   : > { %v3415_v7 = vpop.f32.mrb[100].mxu0  ;;  %v3479_v20 = vpop.f32.mrb[100].mxu1 }
 0x1c2   : > { %v3416_v62 = vpop.f32.mrb[101].mxu0  ;;  %v3480_v54 = vpop.f32.mrb[101].mxu1 }
 0x1c3   : > { %v3417_v10 = vadd.f32 %v3416_v62, %v3415_v7  ;;  %v3481_v8 = vadd.f32 %v3480_v54, %v3479_v20  ;;  %v3418_v37 = vpop.f32.mrb[102].mxu0  ;;  %v3482_v19 = vpop.f32.mrb[102].mxu1 }
 0x1c4   : > { %v3419_v9 = vpop.f32.mrb[103].mxu0  ;;  %v3483_v35 = vpop.f32.mrb[103].mxu1 }
 0x1c5   : > { %v4626_v27 = vadd.f32 %v3417_v10, %v4527_v47  ;;  %v3420_v46 = vadd.f32 %v3419_v9, %v3418_v37  ;;  %v3484_v42 = vadd.f32 %v3483_v35, %v3482_v19  ;;  %v4629_v29 = vadd.f32 %v3481_v8, %v4530_v55 }
 0x1c7   : > { %v4632_v60 = vadd.f32 %v3420_v46, %v4532_v2  ;;  %v4635_v26 = vadd.f32 %v3484_v42, %v4535_v12 }
 0x1c9   : > { %v3421_v34 = vpop.f32.mrb[104].mxu0  ;;  %v3485_v40 = vpop.f32.mrb[104].mxu1 }
 0x1ca   : > { %v3422_v14 = vpop.f32.mrb[105].mxu0  ;;  %v3486_v36 = vpop.f32.mrb[105].mxu1 }
 0x1cb   : > { %v3423_v4 = vadd.f32 %v3422_v14, %v3421_v34  ;;  %v3487_v38 = vadd.f32 %v3486_v36, %v3485_v40  ;;  %v3424_v5 = vpop.f32.mrb[106].mxu0  ;;  %v3488_v47 = vpop.f32.mrb[106].mxu1 }
 0x1cc   : > { %v3425_v50 = vpop.f32.mrb[107].mxu0  ;;  %v3489_v43 = vpop.f32.mrb[107].mxu1 }
 0x1cd   : > { %v4638_v48 = vadd.f32 %v3423_v4, %v4541_v18  ;;  %v3426_v55 = vadd.f32 %v3425_v50, %v3424_v5  ;;  %v3490_v61 = vadd.f32 %v3489_v43, %v3488_v47  ;;  %v4641_v2 = vadd.f32 %v3487_v38, %v4544_v13 }
 0x1cf   : > { %v4644_v12 = vadd.f32 %v3426_v55, %v4546_v22  ;;  %v4647_v21 = vadd.f32 %v3490_v61, %v4549_v28 }
 0x1d1   : > { %v3427_v11 = vpop.f32.mrb[108].mxu0  ;;  %v3491_v3 = vpop.f32.mrb[108].mxu1 }
 0x1d2   : > { %v3428_v30 = vpop.f32.mrb[109].mxu0  ;;  %v3492_v16 = vpop.f32.mrb[109].mxu1 }
 0x1d3   : > { %v3429_v7 = vadd.f32 %v3428_v30, %v3427_v11  ;;  %v3493_v20 = vadd.f32 %v3492_v16, %v3491_v3  ;;  %v3430_v62 = vpop.f32.mrb[110].mxu0  ;;  %v3494_v18 = vpop.f32.mrb[110].mxu1 }
 0x1d4   : > { %v3431_v54 = vpop.f32.mrb[111].mxu0  ;;  %v3495_v10 = vpop.f32.mrb[111].mxu1 }
 0x1d5   : > { %v4650_v13 = vadd.f32 %v3429_v7, %v4555_v45  ;;  %v3432_v8 = vadd.f32 %v3431_v54, %v3430_v62  ;;  %v3496_v22 = vadd.f32 %v3495_v10, %v3494_v18  ;;  %v4653_v37 = vadd.f32 %v3493_v20, %v4558_v53 }
 0x1d7   : > { %v4656_v28 = vadd.f32 %v3432_v8, %v4560_v56  ;;  %v4659_v19 = vadd.f32 %v3496_v22, %v4563_v44 }
 0x1d9   : > { %v3497_v9 = vpop.f32.mrb[112].mxu1  ;;  %v3587_v35 = vpop.f32.mrb[112].mxu0 }
 0x1da   : > { %v2344_v46 = vadd.f32 %v3587_v35, %v4581_v39  ;;  %v3498_v42 = vpop.f32.mrb[113].mxu1  ;;  %v2335_v34 = vpop.f32.mrb[113].mxu0 }
 0x1db   : > { %v3499_v40 = vadd.f32 %v3498_v42, %v3497_v9  ;;  %v2336_v45 = vadd.f32 %v2335_v34, %v4569_v17  ;;  %v3500_v14 = vpop.f32.mrb[114].mxu1  ;;  %v3588_v36 = vpop.f32.mrb[114].mxu0 }
 0x1dc   : > { %v2347_v53 = vadd.f32 %v3588_v36, %v4587_v33  ;;  %v3501_v4 = vpop.f32.mrb[115].mxu1  ;;  %v2338_v56 = vpop.f32.mrb[115].mxu0  ;;  %v2464_v47 = vmax.f32 %v2344_v46, 0.0 }
 0x1dd   : > { %v3502_v38 = vadd.f32 %v3501_v4, %v3500_v14  ;;  %v2339_v44 = vadd.f32 %v2338_v56, %v4575_v24  ;;  %v4667_v5 = vadd.f32 %v3499_v40, %v4566_v58  ;;  %v2462_v50 = vmax.f32 %v2336_v45, 0.0 }
 0x1de   : > { %v2465_v39 = vmax.f32 %v2347_v53, 0.0 }
 0x1df   : > { %v2463_v17 = vmax.f32 %v2339_v44, 0.0  ;;  %v4675_v33 = vadd.f32 %v3502_v38, %v4572_v1 }
 0x1e0   : > { %v3010_v43 = vpack.c.bf16 %v2465_v39, %v2464_v47 }
 0x1e1   : > { %v3005_v55 = vpack.c.bf16 %v2463_v17, %v2462_v50  ;;  %v3503_v24 = vpop.f32.mrb[116].mxu1  ;;  %v3591_v61 = vpop.f32.mrb[116].mxu0 }
 0x1e2   : > { %3082 = vst [vmem:[%s4672_s22 + $0x8] sm:$0xff] %v3010_v43   ;;  %v2360_v58 = vadd.f32 %v3591_v61, %v4605_v31  ;;  %v3504_v11 = vpop.f32.mrb[117].mxu1  ;;  %v2351_v3 = vpop.f32.mrb[117].mxu0 }
 0x1e3   : > { %3006 = vst [vmem:[%s4672_s22] sm:$0xff] %v3005_v55   ;;  %v3505_v30 = vadd.f32 %v3504_v11, %v3503_v24  ;;  %v2352_v16 = vadd.f32 %v2351_v3, %v4593_v59  ;;  %v3506_v7 = vpop.f32.mrb[118].mxu1  ;;  %v3592_v20 = vpop.f32.mrb[118].mxu0 }
 0x1e4   : > { %v2363_v62 = vadd.f32 %v3592_v20, %v4611_v23  ;;  %v3507_v1 = vpop.f32.mrb[119].mxu1  ;;  %v2354_v18 = vpop.f32.mrb[119].mxu0  ;;  %v2468_v31 = vmax.f32 %v2360_v58, 0.0 }
 0x1e5   : > { %v3508_v54 = vadd.f32 %v3507_v1, %v3506_v7  ;;  %v2355_v10 = vadd.f32 %v2354_v18, %v4599_v63  ;;  %v2247_v8 = vadd.f32 %v3505_v30, %v4578_v51  ;;  %v2466_v9 = vmax.f32 %v2352_v16, 0.0 }
 0x1e6   : > { %v2469_v22 = vmax.f32 %v2363_v62, 0.0 }
 0x1e7   : > { %v2467_v35 = vmax.f32 %v2355_v10, 0.0  ;;  %v2250_v46 = vadd.f32 %v3508_v54, %v4584_v32 }
 0x1e8   : > { %v3020_v59 = vpack.c.bf16 %v2469_v22, %v2468_v31 }
 0x1e9   : > { %v3015_v42 = vpack.c.bf16 %v2467_v35, %v2466_v9  ;;  %v3509_v34 = vpop.f32.mrb[120].mxu1  ;;  %v3595_v40 = vpop.f32.mrb[120].mxu0 }
 0x1ea   : > { %3084 = vst [vmem:[%s4672_s22 + $0x18] sm:$0xff] %v3020_v59   ;;  %v2376_v23 = vadd.f32 %v3595_v40, %v4629_v29  ;;  %v3510_v45 = vpop.f32.mrb[121].mxu1  ;;  %v2367_v14 = vpop.f32.mrb[121].mxu0 }
 0x1eb   : > { %3083 = vst [vmem:[%s4672_s22 + $0x10] sm:$0xff] %v3015_v42   ;;  %v3511_v36 = vadd.f32 %v3510_v45, %v3509_v34  ;;  %v2368_v63 = vadd.f32 %v2367_v14, %v4617_v57  ;;  %v3512_v51 = vpop.f32.mrb[122].mxu1  ;;  %v3596_v53 = vpop.f32.mrb[122].mxu0 }
 0x1ec   : > { %v2379_v4 = vadd.f32 %v3596_v53, %v4635_v26  ;;  %v3513_v56 = vpop.f32.mrb[123].mxu1  ;;  %v2370_v32 = vpop.f32.mrb[123].mxu0  ;;  %v2472_v29 = vmax.f32 %v2376_v23, 0.0 }
 0x1ed   : > { %v3514_v38 = vadd.f32 %v3513_v56, %v3512_v51  ;;  %v2371_v44 = vadd.f32 %v2370_v32, %v4623_v0  ;;  %v4692_v47 = vadd.f32 %v3511_v36, %v4590_v52  ;;  %v2470_v50 = vmax.f32 %v2368_v63, 0.0 }
 0x1ee   : > { %v2473_v39 = vmax.f32 %v2379_v4, 0.0 }
 0x1ef   : > { %v2471_v17 = vmax.f32 %v2371_v44, 0.0  ;;  %v4695_v57 = vadd.f32 %v3514_v38, %v4596_v15 }
 0x1f0   : > { %v3030_v43 = vpack.c.bf16 %v2473_v39, %v2472_v29 }
 0x1f1   : > { %v3025_v55 = vpack.c.bf16 %v2471_v17, %v2470_v50  ;;  %v3515_v24 = vpop.f32.mrb[124].mxu1  ;;  %v3599_v26 = vpop.f32.mrb[124].mxu0 }
 0x1f2   : > { %3086 = vst [vmem:[%s4672_s22 + $0x28] sm:$0xff] %v3030_v43   ;;  %v2392_v61 = vadd.f32 %v3599_v26, %v4653_v37  ;;  %v3516_v58 = vpop.f32.mrb[125].mxu1  ;;  %v2383_v11 = vpop.f32.mrb[125].mxu0 }
 0x1f3   : > { %3085 = vst [vmem:[%s4672_s22 + $0x20] sm:$0xff] %v3025_v55   ;;  %v3517_v0 = vadd.f32 %v3516_v58, %v3515_v24  ;;  %v2384_v52 = vadd.f32 %v2383_v11, %v4641_v2  ;;  %v3518_v3 = vpop.f32.mrb[126].mxu1  ;;  %v3600_v30 = vpop.f32.mrb[126].mxu0 }
 0x1f4   : > { %v2395_v16 = vadd.f32 %v3600_v30, %v4659_v19  ;;  %v3519_v15 = vpop.f32.mrb[127].mxu1  ;;  %v2386_v7 = vpop.f32.mrb[127].mxu0  ;;  %v2476_v37 = vmax.f32 %v2392_v61, 0.0 }
 0x1f5   : > { %v3520_v20 = vadd.f32 %v3519_v15, %v3518_v3  ;;  %v2387_v62 = vadd.f32 %v2386_v7, %v4647_v21  ;;  %v2263_v1 = vadd.f32 %v3517_v0, %v4602_v41  ;;  %v2474_v54 = vmax.f32 %v2384_v52, 0.0 }
 0x1f6   : > { %v2477_v18 = vmax.f32 %v2395_v16, 0.0 }
 0x1f7   : > { %v2475_v10 = vmax.f32 %v2387_v62, 0.0  ;;  %v2266_v31 = vadd.f32 %v3520_v20, %v4608_v25 }
 0x1f8   : > { %v3040_v2 = vpack.c.bf16 %v2477_v18, %v2476_v37 }
 0x1f9   : > { %v3035_v22 = vpack.c.bf16 %v2475_v10, %v2474_v54  ;;  %v3521_v9 = vpop.f32.mrb[128].mxu1  ;;  %v3603_v35 = vpop.f32.mrb[128].mxu0 }
 0x1fa   : > { %3088 = vst [vmem:[%s4672_s22 + $0x38] sm:$0xff] %v3040_v2   ;;  %v2408_v19 = vadd.f32 %v3603_v35, %v2247_v8  ;;  %v3522_v59 = vpop.f32.mrb[129].mxu1  ;;  %v2399_v42 = vpop.f32.mrb[129].mxu0 }
 0x1fb   : > { %3087 = vst [vmem:[%s4672_s22 + $0x30] sm:$0xff] %v3035_v22   ;;  %v3523_v34 = vadd.f32 %v3522_v59, %v3521_v9  ;;  %v2400_v21 = vadd.f32 %v2399_v42, %v4667_v5  ;;  %v3524_v40 = vpop.f32.mrb[130].mxu1  ;;  %v3604_v41 = vpop.f32.mrb[130].mxu0 }
 0x1fc   : > { %v2411_v23 = vadd.f32 %v3604_v41, %v2250_v46  ;;  %v3525_v45 = vpop.f32.mrb[131].mxu1  ;;  %v2402_v14 = vpop.f32.mrb[131].mxu0  ;;  %v2480_v51 = vmax.f32 %v2408_v19, 0.0 }
 0x1fd   : > { %v3526_v36 = vadd.f32 %v3525_v45, %v3524_v40  ;;  %v2403_v25 = vadd.f32 %v2402_v14, %v4675_v33  ;;  %v2271_v63 = vadd.f32 %v3523_v34, %v4614_v6  ;;  %v2478_v53 = vmax.f32 %v2400_v21, 0.0 }
 0x1fe   : > { %v2481_v8 = vmax.f32 %v2411_v23, 0.0 }
 0x1ff   : > { %v2479_v4 = vmax.f32 %v2403_v25, 0.0  ;;  %v2274_v56 = vadd.f32 %v3526_v36, %v4620_v49 }
 0x200   : > { %v3050_v32 = vpack.c.bf16 %v2481_v8, %v2480_v51 }
 0x201   : > { %v3045_v5 = vpack.c.bf16 %v2479_v4, %v2478_v53  ;;  %v3527_v38 = vpop.f32.mrb[132].mxu1  ;;  %v3607_v44 = vpop.f32.mrb[132].mxu0 }
 0x202   : > { %3090 = vst [vmem:[%s4672_s22 + $0x48] sm:$0xff] %v3050_v32   ;;  %v2424_v46 = vadd.f32 %v3607_v44, %v2263_v1  ;;  %v3528_v29 = vpop.f32.mrb[133].mxu1  ;;  %v2415_v39 = vpop.f32.mrb[133].mxu0 }
 0x203   : > { %3089 = vst [vmem:[%s4672_s22 + $0x40] sm:$0xff] %v3045_v5   ;;  %v3529_v50 = vadd.f32 %v3528_v29, %v3527_v38  ;;  %v2416_v33 = vadd.f32 %v2415_v39, %v4692_v47  ;;  %v3530_v17 = vpop.f32.mrb[134].mxu1  ;;  %v3608_v6 = vpop.f32.mrb[134].mxu0 }
 0x204   : > { %v2427_v43 = vadd.f32 %v3608_v6, %v2266_v31  ;;  %v3531_v55 = vpop.f32.mrb[135].mxu1  ;;  %v2418_v24 = vpop.f32.mrb[135].mxu0  ;;  %v2484_v58 = vmax.f32 %v2424_v46, 0.0 }
 0x205   : > { %v3532_v26 = vadd.f32 %v3531_v55, %v3530_v17  ;;  %v2419_v49 = vadd.f32 %v2418_v24, %v4695_v57  ;;  %v2279_v61 = vadd.f32 %v3529_v50, %v4626_v27  ;;  %v2482_v0 = vmax.f32 %v2416_v33, 0.0 }
 0x206   : > { %v2485_v11 = vmax.f32 %v2427_v43, 0.0 }
 0x207   : > { %v2483_v52 = vmax.f32 %v2419_v49, 0.0  ;;  %v2282_v3 = vadd.f32 %v3532_v26, %v4632_v60 }
 0x208   : > { %v3060_v30 = vpack.c.bf16 %v2485_v11, %v2484_v58 }
 0x209   : > { %v3055_v47 = vpack.c.bf16 %v2483_v52, %v2482_v0  ;;  %v3533_v16 = vpop.f32.mrb[136].mxu1  ;;  %v3611_v15 = vpop.f32.mrb[136].mxu0 }
 0x20a   : > { %3092 = vst [vmem:[%s4672_s22 + $0x58] sm:$0xff] %v3060_v30   ;;  %v2440_v7 = vadd.f32 %v3611_v15, %v2279_v61  ;;  %v3534_v20 = vpop.f32.mrb[137].mxu1  ;;  %v2431_v62 = vpop.f32.mrb[137].mxu0 }
 0x20b   : > { %3091 = vst [vmem:[%s4672_s22 + $0x50] sm:$0xff] %v3055_v47   ;;  %v3535_v1 = vadd.f32 %v3534_v20, %v3533_v16  ;;  %v2432_v37 = vadd.f32 %v2431_v62, %v2271_v63  ;;  %v3536_v57 = vpop.f32.mrb[138].mxu1  ;;  %v3612_v18 = vpop.f32.mrb[138].mxu0 }
 0x20c   : > { %v2443_v27 = vadd.f32 %v3612_v18, %v2282_v3  ;;  %v3537_v54 = vpop.f32.mrb[139].mxu1  ;;  %v2434_v10 = vpop.f32.mrb[139].mxu0  ;;  %v2488_v22 = vmax.f32 %v2440_v7, 0.0 }
 0x20d   : > { %v3538_v31 = vadd.f32 %v3537_v54, %v3536_v57  ;;  %v2435_v60 = vadd.f32 %v2434_v10, %v2274_v56  ;;  %v2287_v2 = vadd.f32 %v3535_v1, %v4638_v48  ;;  %v2486_v35 = vmax.f32 %v2432_v37, 0.0 }
 0x20e   : > { %v2489_v9 = vmax.f32 %v2443_v27, 0.0 }
 0x20f   : > { %v2487_v19 = vmax.f32 %v2435_v60, 0.0  ;;  %v2290_v59 = vadd.f32 %v3538_v31, %v4644_v12 }
 0x210   : > { %v3070_v42 = vpack.c.bf16 %v2489_v9, %v2488_v22 }
 0x211   : > { %v3065_v34 = vpack.c.bf16 %v2487_v19, %v2486_v35  ;;  %v3539_v21 = vpop.f32.mrb[140].mxu1  ;;  %v3615_v40 = vpop.f32.mrb[140].mxu0 }
 0x212   : > { %3094 = vst [vmem:[%s4672_s22 + $0x68] sm:$0xff] %v3070_v42   ;;  %v3540_v41 = vpop.f32.mrb[141].mxu1  ;;  %v2447_v23 = vpop.f32.mrb[141].mxu0 }
 0x213   : > { %3093 = vst [vmem:[%s4672_s22 + $0x60] sm:$0xff] %v3065_v34   ;;  %v3541_v45 = vadd.f32 %v3540_v41, %v3539_v21  ;;  %v2448_v14 = vadd.f32 %v2447_v23, %v2287_v2  ;;  %v3542_v36 = vpop.f32.mrb[142].mxu1  ;;  %v3616_v25 = vpop.f32.mrb[142].mxu0 }
 0x214   : > { %v3543_v48 = vpop.f32.mrb[143].mxu1  ;;  %v2450_v63 = vpop.f32.mrb[143].mxu0 }
 0x215   : > { %v2295_v51 = vadd.f32 %v3541_v45, %v4650_v13  ;;  %v3544_v8 = vadd.f32 %v3543_v48, %v3542_v36  ;;  %v2451_v12 = vadd.f32 %v2450_v63, %v2290_v59  ;;  %v2490_v4 = vmax.f32 %v2448_v14, 0.0 }
 0x217   : > { %v2456_v53 = vadd.f32 %v3615_v40, %v2295_v51  ;;  %v2298_v56 = vadd.f32 %v3544_v8, %v4656_v28  ;;  %v2491_v32 = vmax.f32 %v2451_v12, 0.0 }
 0x219   : > { %v2459_v5 = vadd.f32 %v3616_v25, %v2298_v56  ;;  %v3075_v38 = vpack.c.bf16 %v2491_v32, %v2490_v4  ;;  %v2492_v44 = vmax.f32 %v2456_v53, 0.0 }
 0x21b   : > { %v2493_v46 = vmax.f32 %v2459_v5, 0.0  ;;  %3095 = vst [vmem:[%s4672_s22 + $0x70] sm:$0xff] %v3075_v38  }
 0x21d   : > { %v3080_v29 = vpack.c.bf16 %v2493_v46, %v2492_v44 }
 0x21f   : > { %3096 = vst [vmem:[%s4672_s22 + $0x78] sm:$0xff] %v3080_v29  }
 0x220 PF: > { %s13_s12 = sadd.s32 1, %s3928_s12  }
 0x221   : > { %p10_p4 = scmp.ge.s32.totalorder %s13_s12, 4  }
 0x223   :  { %12 = sbr.rel (!%p10_p4) target bundleno = 1 (0x1), region = 62 }

// kernel: resnet_image_encoder_forward.14
= control target key start
LH: loop header
LB: loop body
LE: loop exit
PB: predicated region body
PF: predicated region fallthrough
CT: control target
= control target key end

     0   :  { %s4193_s15 = smov 0   ;;  %s5004_s0 = inlined_call_operand.vmem [shape: bf16[512,1152], index: 0, kind: input, shape index: {}]   ;;  %s5005_s1 = inlined_call_operand.vmem [shape: bf16[1152,128], index: 1, kind: input, shape index: {}]   ;;  %s5006_s2 = inlined_call_operand.vmem [shape: f32[1,128], index: 2, kind: input, shape index: {}]   ;;  %s5007_s3 = inlined_call_operand.vmem [shape: bf16[512,128], index: 3, kind: input, shape index: {}]   ;;  %s5008_s4 = inlined_call_operand.vmem [shape: bf16[512,128], index: 4, kind: output, shape index: {}]  }
   0x1 LB: > { %s2867_s16 = sadd.s32 4294967295, %s4166_s15   ;;  %p2871_p0 = scmp.ge.s32.totalorder %s4166_s15, 1  ;;  %s4166_s15 = sphi %s4193_s15, %s14_s15  }
   0x2   : > { %p175_p1 = scmp.lt.s32.totalorder %s4166_s15, 3 }
   0x4   : > { %p176_p2 = pnand %p2871_p0, %p175_p1 }
   0x5   : > { %v3880_v0 = vld [vmem:[%s5005_s1 + $0x40] sm:$0xff] (!%p176_p2)   ;;  %s2872_s19 = sshll.u32 (!%p176_p2), %s2867_s16, 5  ;;  %v3882_v2 = vld [vmem:[%s5005_s1 + $0x48] sm:$0xff] (!%p176_p2)   ;;  %v3884_v4 = vld [vmem:[%s5005_s1 + $0x50] sm:$0xff] (!%p176_p2)  }
   0x6   : > { %179 = sbr.rel (%p176_p2) target bundleno = 546 (0x222), region = 36  ;;  %v3881_v1 = vld [vmem:[%s5005_s1] sm:$0xff] (!%p176_p2)   ;;  %3335 = vmatprep.subr.bf16.mxu0 (!%p176_p2), %v3880_v0  ;;  %3855 = vmatprep.subr.bf16.mxu1 (!%p176_p2), %v3880_v0  ;;  %p208_p3 = scmp.lt.s32.totalorder (!%p176_p2), %s2872_s19, 63  ;;  %v3883_v3 = vld [vmem:[%s5005_s1 + $0x8] sm:$0xff] (!%p176_p2)   ;;  %v3885_v5 = vld [vmem:[%s5005_s1 + $0x10] sm:$0xff] (!%p176_p2)  }
   0x7   : > { %3336 = vmatpush3.bf16.msra.mxu0 (!%p176_p2), %v3881_v1  ;;  %3863 = vmatpush3.bf16.msra.mxu1 (!%p176_p2), %v3881_v1  ;;  %v3886_v6 = vld [vmem:[%s5005_s1 + $0x58] sm:$0xff] (!%p176_p2)   ;;  %v3888_v8 = vld [vmem:[%s5005_s1 + $0x60] sm:$0xff] (!%p176_p2)   ;;  %v3890_v10 = vld [vmem:[%s5005_s1 + $0x68] sm:$0xff] (!%p176_p2)  }
   0x8   : > { %3337 = vmatprep.subr.bf16.mxu0 (!%p176_p2), %v3882_v2  ;;  %3856 = vmatprep.subr.bf16.mxu1 (!%p176_p2), %v3882_v2  ;;  %v3887_v7 = vld [vmem:[%s5005_s1 + $0x18] sm:$0xff] (!%p176_p2)   ;;  %v3889_v9 = vld [vmem:[%s5005_s1 + $0x20] sm:$0xff] (!%p176_p2)   ;;  %v3891_v13 = vld [vmem:[%s5005_s1 + $0x28] sm:$0xff] (!%p176_p2)  }
   0x9   : > { %v3892_v14 = vld [vmem:[%s5005_s1 + $0x70] sm:$0xff] (!%p176_p2)   ;;  %v3894_v16 = vld [vmem:[%s5005_s1 + $0x78] sm:$0xff] (!%p176_p2)   ;;  %v3902_v18 = vld [vmem:[%s5005_s1 + $0xc0] sm:$0xff] (!%p176_p2)  }
   0xa   : > { %v3893_v15 = vld [vmem:[%s5005_s1 + $0x30] sm:$0xff] (!%p176_p2)   ;;  %v3895_v17 = vld [vmem:[%s5005_s1 + $0x38] sm:$0xff] (!%p176_p2)   ;;  %v3905_v21 = vld [vmem:[%s5005_s1 + $0x140] sm:$0xff] (!%p176_p2)  }
   0xb   : > { %3338 = vmatpush3.bf16.msra.mxu0 (!%p176_p2), %v3883_v3  ;;  %3864 = vmatpush3.bf16.msra.mxu1 (!%p176_p2), %v3883_v3  ;;  %v3903_v22 = vld [vmem:[%s5005_s1 + $0x80] sm:$0xff] (!%p176_p2)   ;;  %v3904_v23 = vld [vmem:[%s5005_s1 + $0xc8] sm:$0xff] (!%p176_p2)   ;;  %v3914_v31 = vld [vmem:[%s5005_s1 + $0xd0] sm:$0xff] (!%p176_p2)  }
   0xc   : > { %3339 = vmatprep.subr.bf16.mxu0 (!%p176_p2), %v3884_v4  ;;  %3857 = vmatprep.subr.bf16.mxu1 (!%p176_p2), %v3884_v4  ;;  %v3907_v24 = vld [vmem:[%s5005_s1 + $0x100] sm:$0xff] (!%p176_p2)   ;;  %v3906_v27 = vld [vmem:[%s5005_s1 + $0x88] sm:$0xff] (!%p176_p2)   ;;  %v3915_v32 = vld [vmem:[%s5005_s1 + $0x90] sm:$0xff] (!%p176_p2)  }
   0xd   : > { %s5010_s19 = smov (!%p208_p3, %s2872_s19), 63  ;;  %v3925_v28 = vld [vmem:[%s5005_s1 + $0x148] sm:$0xff]   ;;  %v3916_v34 = vld [vmem:[%s5005_s1 + $0xd8] sm:$0xff]   ;;  %v3924_v40 = vld [vmem:[%s5005_s1 + $0xe0] sm:$0xff]  }
   0xe   : > { %s3871_s6 = smul.u32 36, %s5010_s19  ;;  %v3927_v33 = vld [vmem:[%s5005_s1 + $0x108] sm:$0xff]   ;;  %v3917_v37 = vld [vmem:[%s5005_s1 + $0x98] sm:$0xff]   ;;  %v3926_v41 = vld [vmem:[%s5005_s1 + $0xa0] sm:$0xff]  }
   0xf   : > { %3340 = vmatpush3.bf16.msra.mxu0 %v3885_v5  ;;  %3865 = vmatpush3.bf16.msra.mxu1 %v3885_v5  ;;  %v3928_v42 = vld [vmem:[%s5005_s1 + $0xe8] sm:$0xff]   ;;  %v3939_v43 = vld [vmem:[%s5005_s1 + $0x150] sm:$0xff]   ;;  %v3938_v52 = vld [vmem:[%s5005_s1 + $0xf8] sm:$0xff]  }
  0x10   : > { %3341 = vmatprep.subr.bf16.mxu0 %v3886_v6  ;;  %3858 = vmatprep.subr.bf16.mxu1 %v3886_v6  ;;  %s4234_s13 = scalar_lea.vmem %s5004_s0, %s3871_s6  ;;  %v3941_v46 = vld [vmem:[%s5005_s1 + $0x110] sm:$0xff]   ;;  %v3929_v47 = vld [vmem:[%s5005_s1 + $0xa8] sm:$0xff]   ;;  %v3956_v55 = vld [vmem:[%s5005_s1 + $0x158] sm:$0xff]  }
  0x11   : > { %v3898_v11 = vld [vmem:[%s4234_s13 + $0x4] ss:$36 sps:$4 sm:$0xff]   ;;  %v3908_v25 = vld [vmem:[%s4234_s13 + $0x4c] ss:$36 sps:$4 sm:$0xff]   ;;  %v3918_v35 = vld [vmem:[%s4234_s13 + $0x94] ss:$36 sps:$4 sm:$0xff]  }
  0x12   : > { %v3901_v12 = vld [vmem:[%s4234_s13 + $0x364] ss:$36 sps:$4 sm:$0xff]   ;;  %1738 = vmatprep.mubr.bf16.mxu0 %v3898_v11  ;;  %v3910_v26 = vld [vmem:[%s4234_s13 + $0x3ac] ss:$36 sps:$4 sm:$0xff]   ;;  %v3920_v36 = vld [vmem:[%s4234_s13 + $0x3f4] ss:$36 sps:$4 sm:$0xff]  }
  0x13   : > { %3342 = vmatpush3.bf16.msra.mxu0 %v3887_v7  ;;  %3866 = vmatpush3.bf16.msra.mxu1 %v3887_v7  ;;  %v3896_v19 = vld [vmem:[%s4234_s13] ss:$36 sps:$4 sm:$0xff]   ;;  %v3912_v29 = vld [vmem:[%s4234_s13 + $0x48] ss:$36 sps:$4 sm:$0xff]   ;;  %v3922_v38 = vld [vmem:[%s4234_s13 + $0x90] ss:$36 sps:$4 sm:$0xff]  }
  0x14   : > { %3343 = vmatprep.subr.bf16.mxu0 %v3888_v8  ;;  %3859 = vmatprep.subr.bf16.mxu1 %v3888_v8  ;;  %v3899_v20 = vld [vmem:[%s4234_s13 + $0x360] ss:$36 sps:$4 sm:$0xff]   ;;  %v3913_v30 = vld [vmem:[%s4234_s13 + $0x3a8] ss:$36 sps:$4 sm:$0xff]   ;;  %v3923_v39 = vld [vmem:[%s4234_s13 + $0x3f0] ss:$36 sps:$4 sm:$0xff]  }
  0x15   : > { %1834 = vmatprep.mubr.bf16.mxu1 %v3901_v12  ;;  %v3930_v44 = vld [vmem:[%s4234_s13 + $0xdc] ss:$36 sps:$4 sm:$0xff]   ;;  %v3936_v48 = vld [vmem:[%s5005_s1 + $0xf0] sm:$0xff]   ;;  %v3942_v53 = vld [vmem:[%s4234_s13 + $0x124] ss:$36 sps:$4 sm:$0xff]  }
  0x16   : > { %v3932_v45 = vld [vmem:[%s4234_s13 + $0x43c] ss:$36 sps:$4 sm:$0xff]   ;;  %v3937_v51 = vld [vmem:[%s5005_s1 + $0xb0] sm:$0xff]   ;;  %v3944_v58 = vld [vmem:[%s4234_s13 + $0x8] ss:$36 sps:$4 sm:$0xff]  }
  0x17   : > { %3344 = vmatpush3.bf16.msra.mxu0 %v3889_v9  ;;  %3867 = vmatpush3.bf16.msra.mxu1 %v3889_v9  ;;  %v3934_v49 = vld [vmem:[%s4234_s13 + $0xd8] ss:$36 sps:$4 sm:$0xff]   ;;  %v3946_v54 = vld [vmem:[%s4234_s13 + $0xc] ss:$36 sps:$4 sm:$0xff]   ;;  %v3947_v59 = vld [vmem:[%s4234_s13 + $0x120] ss:$36 sps:$4 sm:$0xff]  }
  0x18   : > { %3345 = vmatprep.subr.bf16.mxu0 %v3890_v10  ;;  %3860 = vmatprep.subr.bf16.mxu1 %v3890_v10  ;;  %v3935_v50 = vld [vmem:[%s4234_s13 + $0x438] ss:$36 sps:$4 sm:$0xff]   ;;  %v3948_v60 = vld [vmem:[%s5005_s1 + $0x1c0] sm:$0xff]   ;;  %v3950_v62 = vld [vmem:[%s4234_s13 + $0x16c] ss:$36 sps:$4 sm:$0xff]  }
  0x19   : > { %v3957_v56 = vld [vmem:[%s5005_s1 + $0x118] sm:$0xff]   ;;  %v3949_v61 = vld [vmem:[%s5005_s1 + $0x180] sm:$0xff]   ;;  %v3964_v1 = vld [vmem:[%s5005_s1 + $0x1c8] sm:$0xff]  }
  0x1a   : > { %v3940_v57 = vld [vmem:[%s5005_s1 + $0xb8] sm:$0xff]   ;;  %v3966_v0 = vld [vmem:[%s5005_s1 + $0x160] sm:$0xff]   ;;  %v3965_v3 = vld [vmem:[%s5005_s1 + $0x188] sm:$0xff]  }
  0x1b   : > { %3346 = vmatpush3.bf16.msra.mxu0 %v3891_v13  ;;  %3868 = vmatpush3.bf16.msra.mxu1 %v3891_v13  ;;  %v3952_v63 = vld [vmem:[%s4234_s13 + $0x54] ss:$36 sps:$4 sm:$0xff]   ;;  %v3967_v2 = vld [vmem:[%s5005_s1 + $0x120] sm:$0xff]   ;;  %v3954_v4 = vld [vmem:[%s4234_s13 + $0x168] ss:$36 sps:$4 sm:$0xff]  }
  0x1c   : > { %3347 = vmatprep.subr.bf16.mxu0 %v3892_v14  ;;  %3861 = vmatprep.subr.bf16.mxu1 %v3892_v14  ;;  %v3955_v5 = vld [vmem:[%s4234_s13 + $0x50] ss:$36 sps:$4 sm:$0xff]   ;;  %v3960_v7 = vld [vmem:[%s4234_s13 + $0x9c] ss:$36 sps:$4 sm:$0xff]   ;;  %v3980_v8 = vld [vmem:[%s5005_s1 + $0x168] sm:$0xff]  }
  0x1d   : > { %v3958_v6 = vld [vmem:[%s4234_s13 + $0x1b4] ss:$36 sps:$4 sm:$0xff]   ;;  %v3982_v10 = vld [vmem:[%s5005_s1 + $0x128] sm:$0xff]   ;;  %v3968_v14 = vld [vmem:[%s4234_s13 + $0x1fc] ss:$36 sps:$4 sm:$0xff]  }
  0x1e   : > { %v3981_v9 = vld [vmem:[%s5005_s1 + $0x1d0] sm:$0xff]   ;;  %v3963_v13 = vld [vmem:[%s4234_s13 + $0x98] ss:$36 sps:$4 sm:$0xff]  }
  0x1f   : > { %3348 = vmatpush3.bf16.msra.mxu0 %v3893_v15  ;;  %3869 = vmatpush3.bf16.msra.mxu1 %v3893_v15  ;;  %v3983_v11 = vld [vmem:[%s5005_s1 + $0x190] sm:$0xff]  }
  0x20   : > { %3349 = vmatprep.subr.bf16.mxu0 %v3894_v16  ;;  %3862 = vmatprep.subr.bf16.mxu1 %v3894_v16  ;;  %v3962_v12 = vld [vmem:[%s4234_s13 + $0x1b0] ss:$36 sps:$4 sm:$0xff]  }
  0x21   : > { %v3990_v15 = vld [vmem:[%s5005_s1 + $0x170] sm:$0xff]  }
  0x22   : > { %v3991_v16 = vld [vmem:[%s5005_s1 + $0x130] sm:$0xff]  }
  0x23   : > { %3350 = vmatpush3.bf16.msra.mxu0 %v3895_v17  ;;  %3870 = vmatpush3.bf16.msra.mxu1 %v3895_v17  ;;  %v3970_v17 = vld [vmem:[%s4234_s13 + $0xe4] ss:$36 sps:$4 sm:$0xff]  }
  0x24   : > { %3447 = vmatprep.subr.bf16.mxu1 %v3902_v18  ;;  %3559 = vmatprep.subr.bf16.mxu0 %v3905_v21  ;;  %v3998_v18 = vld [vmem:[%s5005_s1 + $0x1d8] sm:$0xff]   ;;  %v3973_v21 = vld [vmem:[%s4234_s13 + $0xe0] ss:$36 sps:$4 sm:$0xff]  }
  0x26   : > { %1739 = vmatmul.mubr.bf16.vlgmr.msra.gmra.mrb[0].mxu0 %v3896_v19  ;;  %1835 = vmatmul.mubr.bf16.vlgmr.msra.gmra.mrb[0].mxu1 %v3899_v20  ;;  %v3999_v19 = vld [vmem:[%s5005_s1 + $0x198] sm:$0xff]  }
  0x27   : > { %3448 = vmatpush3.bf16.msra.mxu1 %v3903_v22  ;;  %3560 = vmatpush3.bf16.msra.mxu0 %v3907_v24  ;;  %v3972_v20 = vld [vmem:[%s4234_s13 + $0x1f8] ss:$36 sps:$4 sm:$0xff]   ;;  %v3974_v22 = vld [vmem:[%s4234_s13 + $0x244] ss:$36 sps:$4 sm:$0xff]  }
  0x28   : > { %3449 = vmatprep.subr.bf16.mxu1 %v3904_v23  ;;  %1746 = vmatprep.mubr.bf16.mxu0 %v3908_v25  ;;  %v3976_v23 = vld [vmem:[%s4234_s13 + $0x12c] ss:$36 sps:$4 sm:$0xff]   ;;  %v4006_v24 = vld [vmem:[%s5005_s1 + $0x178] sm:$0xff]  }
  0x29   : > { %1842 = vmatprep.mubr.bf16.mxu1 %v3910_v26  ;;  %3561 = vmatprep.subr.bf16.mxu0 %v3925_v28  ;;  %v4007_v25 = vld [vmem:[%s5005_s1 + $0x138] sm:$0xff]   ;;  %v4014_v26 = vld [vmem:[%s5005_s1 + $0x1e0] sm:$0xff]  }
  0x2a   : > { %v4015_v28 = vld [vmem:[%s5005_s1 + $0x1a0] sm:$0xff]  }
  0x2b   : > { %3450 = vmatpush3.bf16.msra.mxu1 %v3906_v27  ;;  %3562 = vmatpush3.bf16.msra.mxu0 %v3927_v33  ;;  %v3978_v27 = vld [vmem:[%s4234_s13 + $0x240] ss:$36 sps:$4 sm:$0xff]   ;;  %v4029_v33 = vld [vmem:[%s5005_s1 + $0x1e8] sm:$0xff]  }
  0x2c   : > { %3451 = vmatprep.subr.bf16.mxu1 %v3914_v31  ;;  %3563 = vmatprep.subr.bf16.mxu0 %v3939_v43  ;;  %v3984_v31 = vld [vmem:[%s4234_s13 + $0x28c] ss:$36 sps:$4 sm:$0xff]   ;;  %v4000_v43 = vld [vmem:[%s4234_s13 + $0x31c] ss:$36 sps:$4 sm:$0xff]  }
  0x2e   : > { %1747 = vmatmul.mubr.bf16.gmra.mrb[4].mxu0 %v3912_v29  ;;  %1843 = vmatmul.mubr.bf16.gmra.mrb[4].mxu1 %v3913_v30  ;;  %v4016_v29 = vld [vmem:[%s5005_s1 + $0x200] sm:$0xff]   ;;  %v3979_v30 = vld [vmem:[%s4234_s13 + $0x128] ss:$36 sps:$4 sm:$0xff]  }
  0x2f   : > { %3452 = vmatpush3.bf16.msra.mxu1 %v3915_v32  ;;  %1754 = vmatprep.mubr.bf16.mxu0 %v3918_v35  ;;  %v3986_v32 = vld [vmem:[%s4234_s13 + $0x174] ss:$36 sps:$4 sm:$0xff]   ;;  %v4030_v35 = vld [vmem:[%s5005_s1 + $0x1a8] sm:$0xff]  }
  0x30   : > { %3453 = vmatprep.subr.bf16.mxu1 %v3916_v34  ;;  %1850 = vmatprep.mubr.bf16.mxu1 %v3920_v36  ;;  %v3988_v34 = vld [vmem:[%s4234_s13 + $0x288] ss:$36 sps:$4 sm:$0xff]   ;;  %v3989_v36 = vld [vmem:[%s4234_s13 + $0x170] ss:$36 sps:$4 sm:$0xff]  }
  0x31   : > { %3564 = vmatpush3.bf16.msra.mxu0 %v3941_v46  ;;  %v4005_v46 = vld [vmem:[%s4234_s13 + $0x200] ss:$36 sps:$4 sm:$0xff]  }
  0x32   : > { %3565 = vmatprep.subr.bf16.mxu0 %v3956_v55  ;;  %v4031_v55 = vld [vmem:[%s5005_s1 + $0x208] sm:$0xff]  }
  0x33   : > { %3454 = vmatpush3.bf16.msra.mxu1 %v3917_v37  ;;  %v3992_v37 = vld [vmem:[%s4234_s13 + $0x2d4] ss:$36 sps:$4 sm:$0xff]  }
  0x34   : > { %3455 = vmatprep.subr.bf16.mxu1 %v3924_v40  ;;  %v3997_v40 = vld [vmem:[%s4234_s13 + $0x1b8] ss:$36 sps:$4 sm:$0xff]  }
  0x35   : > { %3566 = vmatpush3.bf16.msra.mxu0 %v3957_v56  ;;  %v4046_v56 = vld [vmem:[%s5005_s1 + $0x210] sm:$0xff]  }
  0x36   : > { %1755 = vmatmul.mubr.bf16.gmra.mrb[8].mxu0 %v3922_v38  ;;  %1851 = vmatmul.mubr.bf16.gmra.mrb[8].mxu1 %v3923_v39  ;;  %v3994_v38 = vld [vmem:[%s4234_s13 + $0x1bc] ss:$36 sps:$4 sm:$0xff]   ;;  %v3996_v39 = vld [vmem:[%s4234_s13 + $0x2d0] ss:$36 sps:$4 sm:$0xff]  }
  0x37   : > { %3456 = vmatpush3.bf16.msra.mxu1 %v3926_v41  ;;  %1762 = vmatprep.mubr.bf16.mxu0 %v3930_v44  ;;  %v4044_v41 = vld [vmem:[%s5005_s1 + $0x1f0] sm:$0xff]   ;;  %v4002_v44 = vld [vmem:[%s4234_s13 + $0x204] ss:$36 sps:$4 sm:$0xff]  }
  0x38   : > { %3457 = vmatprep.subr.bf16.mxu1 %v3928_v42  ;;  %1858 = vmatprep.mubr.bf16.mxu1 %v3932_v45  ;;  %v4045_v42 = vld [vmem:[%s5005_s1 + $0x1b0] sm:$0xff]   ;;  %v4004_v45 = vld [vmem:[%s4234_s13 + $0x318] ss:$36 sps:$4 sm:$0xff]  }
  0x39   : > { %3567 = vmatprep.subr.bf16.mxu0 %v3966_v0  ;;  %v4028_v0 = vld [vmem:[%s4234_s13 + $0xa0] ss:$36 sps:$4 sm:$0xff]  }
  0x3a   : > { %3568 = vmatpush3.bf16.msra.mxu0 %v3967_v2  ;;  %v4034_v2 = vld [vmem:[%s4234_s13 + $0xec] ss:$36 sps:$4 sm:$0xff]  }
  0x3b   : > { %3458 = vmatpush3.bf16.msra.mxu1 %v3929_v47  ;;  %3569 = vmatprep.subr.bf16.mxu0 %v3980_v8  ;;  %v4059_v47 = vld [vmem:[%s5005_s1 + $0x1f8] sm:$0xff]  }
  0x3c   : > { %3459 = vmatprep.subr.bf16.mxu1 %v3936_v48  ;;  %v4060_v48 = vld [vmem:[%s5005_s1 + $0x1b8] sm:$0xff]  }
  0x3d   : > { %v4040_v8 = vld [vmem:[%s4234_s13 + $0x134] ss:$36 sps:$4 sm:$0xff]  }
  0x3e   : > { %1763 = vmatmul.mubr.bf16.gmra.mrb[12].mxu0 %v3934_v49  ;;  %1859 = vmatmul.mubr.bf16.gmra.mrb[12].mxu1 %v3935_v50  ;;  %v4008_v49 = vld [vmem:[%s4234_s13 + $0x24c] ss:$36 sps:$4 sm:$0xff]   ;;  %v4012_v50 = vld [vmem:[%s4234_s13 + $0x14] ss:$36 sps:$4 sm:$0xff]  }
  0x3f   : > { %3460 = vmatpush3.bf16.msra.mxu1 %v3937_v51  ;;  %1770 = vmatprep.mubr.bf16.mxu0 %v3942_v53  ;;  %v4010_v51 = vld [vmem:[%s4234_s13 + $0x10] ss:$36 sps:$4 sm:$0xff]  }
  0x40   : > { %3461 = vmatprep.subr.bf16.mxu1 %v3938_v52  ;;  %1899 = vmatprep.mubr.bf16.mxu1 %v3946_v54  ;;  %v4013_v52 = vld [vmem:[%s4234_s13 + $0x248] ss:$36 sps:$4 sm:$0xff]   ;;  %v4017_v53 = vld [vmem:[%s4234_s13 + $0x294] ss:$36 sps:$4 sm:$0xff]   ;;  %v4019_v54 = vld [vmem:[%s4234_s13 + $0x5c] ss:$36 sps:$4 sm:$0xff]  }
  0x41   : > { %3570 = vmatpush3.bf16.msra.mxu0 %v3982_v10  ;;  %v4042_v10 = vld [vmem:[%s4234_s13 + $0x368] ss:$36 sps:$4 sm:$0xff]  }
  0x42   : > { %3571 = vmatprep.subr.bf16.mxu0 %v3990_v15  ;;  %v4052_v15 = vld [vmem:[%s4234_s13 + $0x178] ss:$36 sps:$4 sm:$0xff]  }
  0x43   : > { %3462 = vmatpush3.bf16.msra.mxu1 %v3940_v57  ;;  %v4021_v57 = vld [vmem:[%s4234_s13 + $0x290] ss:$36 sps:$4 sm:$0xff]  }
  0x44   : > { %3671 = vmatprep.subr.bf16.mxu1 %v3948_v60  ;;  %v4025_v60 = vld [vmem:[%s4234_s13 + $0xa4] ss:$36 sps:$4 sm:$0xff]  }
  0x45   : > { %3572 = vmatpush3.bf16.msra.mxu0 %v3991_v16  ;;  %v4053_v16 = vld [vmem:[%s4234_s13 + $0x3fc] ss:$36 sps:$4 sm:$0xff]  }
  0x46   : > { %1771 = vmatmul.mubr.bf16.gmra.mrb[16].mxu0 %v3947_v59  ;;  %1900 = vmatmul.mubr.bf16.vlgmr.msra.gmra.mrb[16].mxu1 %v3944_v58  ;;  %v4022_v58 = vld [vmem:[%s4234_s13 + $0x58] ss:$36 sps:$4 sm:$0xff]  }
  0x47   : > { %3672 = vmatpush3.bf16.msra.mxu1 %v3949_v61  ;;  %1778 = vmatprep.mubr.bf16.mxu0 %v3950_v62  ;;  %v4023_v59 = vld [vmem:[%s4234_s13 + $0x2dc] ss:$36 sps:$4 sm:$0xff]  }
  0x48   : > { %1907 = vmatprep.mubr.bf16.mxu1 %v3952_v63  ;;  %3673 = vmatprep.subr.bf16.mxu1 %v3964_v1  ;;  %v4061_v61 = vld [vmem:[%s5005_s1 + $0x218] sm:$0xff]   ;;  %v4074_v62 = vld [vmem:[%s5005_s1 + $0x220] sm:$0xff]  }
  0x49   : > { %3573 = vmatprep.subr.bf16.mxu0 %v4006_v24  ;;  %v4027_v63 = vld [vmem:[%s4234_s13 + $0x2d8] ss:$36 sps:$4 sm:$0xff]   ;;  %v4032_v1 = vld [vmem:[%s4234_s13 + $0x324] ss:$36 sps:$4 sm:$0xff]  }
  0x4a   : > { %3574 = vmatpush3.bf16.msra.mxu0 %v4007_v25  ;;  %v4068_v24 = vld [vmem:[%s4234_s13 + $0x254] ss:$36 sps:$4 sm:$0xff]   ;;  %v4072_v25 = vld [vmem:[%s4234_s13 + $0x1c] ss:$36 sps:$4 sm:$0xff]  }
  0x4b   : > { %3674 = vmatpush3.bf16.msra.mxu1 %v3965_v3  ;;  %3807 = vmatprep.subr.bf16.mxu0 %v4016_v29  ;;  %v4087_v3 = vld [vmem:[%s5005_s1 + $0x228] sm:$0xff]  }
  0x4c   : > { %3675 = vmatprep.subr.bf16.mxu1 %v3981_v9  ;;  %v4113_v9 = vld [vmem:[%s5005_s1 + $0x238] sm:$0xff]  }
  0x4e   : > { %1779 = vmatmul.mubr.bf16.gmra.mrb[20].mxu0 %v3954_v4  ;;  %1908 = vmatmul.mubr.bf16.gmra.mrb[20].mxu1 %v3955_v5  ;;  %v4036_v4 = vld [vmem:[%s4234_s13 + $0x320] ss:$36 sps:$4 sm:$0xff]   ;;  %v4037_v5 = vld [vmem:[%s4234_s13 + $0xe8] ss:$36 sps:$4 sm:$0xff]  }
  0x4f   : > { %1786 = vmatprep.mubr.bf16.mxu0 %v3958_v6  ;;  %1915 = vmatprep.mubr.bf16.mxu1 %v3960_v7  ;;  %v4100_v6 = vld [vmem:[%s5005_s1 + $0x230] sm:$0xff]  }
  0x50   : > { %3676 = vmatpush3.bf16.msra.mxu1 %v3983_v11  ;;  %v4038_v7 = vld [vmem:[%s4234_s13 + $0x36c] ss:$36 sps:$4 sm:$0xff]  }
  0x51   : > { %3677 = vmatprep.subr.bf16.mxu1 %v3998_v18  ;;  %v4043_v11 = vld [vmem:[%s4234_s13 + $0x130] ss:$36 sps:$4 sm:$0xff]   ;;  %v4057_v18 = vld [vmem:[%s4234_s13 + $0x3f8] ss:$36 sps:$4 sm:$0xff]  }
  0x54   : > { %3678 = vmatpush3.bf16.msra.mxu1 %v3999_v19  ;;  %v4058_v19 = vld [vmem:[%s4234_s13 + $0x1c0] ss:$36 sps:$4 sm:$0xff]  }
  0x55   : > { %3679 = vmatprep.subr.bf16.mxu1 %v4014_v26  ;;  %v4070_v26 = vld [vmem:[%s4234_s13 + $0x18] ss:$36 sps:$4 sm:$0xff]  }
  0x56   : > { %1787 = vmatmul.mubr.bf16.gmra.mrb[24].mxu0 %v3962_v12  ;;  %1916 = vmatmul.mubr.bf16.gmra.mrb[24].mxu1 %v3963_v13  ;;  %v4047_v12 = vld [vmem:[%s4234_s13 + $0x3b4] ss:$36 sps:$4 sm:$0xff]   ;;  %v4049_v13 = vld [vmem:[%s4234_s13 + $0x17c] ss:$36 sps:$4 sm:$0xff]  }
  0x57   : > { %1794 = vmatprep.mubr.bf16.mxu0 %v3968_v14  ;;  %1923 = vmatprep.mubr.bf16.mxu1 %v3970_v17  ;;  %v4051_v14 = vld [vmem:[%s4234_s13 + $0x3b0] ss:$36 sps:$4 sm:$0xff]   ;;  %v4055_v17 = vld [vmem:[%s4234_s13 + $0x1c4] ss:$36 sps:$4 sm:$0xff]  }
  0x58   : > { %3680 = vmatpush3.bf16.msra.mxu1 %v4015_v28  ;;  %v4075_v28 = vld [vmem:[%s4234_s13 + $0x29c] ss:$36 sps:$4 sm:$0xff]  }
  0x59   : > { %3681 = vmatprep.subr.bf16.mxu1 %v4029_v33  ;;  %v4083_v33 = vld [vmem:[%s4234_s13 + $0xac] ss:$36 sps:$4 sm:$0xff]  }
  0x5c   : > { %3682 = vmatpush3.bf16.msra.mxu1 %v4030_v35  ;;  %v4086_v35 = vld [vmem:[%s4234_s13 + $0xa8] ss:$36 sps:$4 sm:$0xff]  }
  0x5d   : > { %3683 = vmatprep.subr.bf16.mxu1 %v4044_v41  ;;  %v4096_v41 = vld [vmem:[%s4234_s13 + $0x13c] ss:$36 sps:$4 sm:$0xff]  }
  0x5e   : > { %1795 = vmatmul.mubr.bf16.gmra.mrb[28].mxu0 %v3972_v20  ;;  %1924 = vmatmul.mubr.bf16.gmra.mrb[28].mxu1 %v3973_v21  ;;  %v4062_v20 = vld [vmem:[%s4234_s13 + $0x444] ss:$36 sps:$4 sm:$0xff]   ;;  %v4064_v21 = vld [vmem:[%s4234_s13 + $0x20c] ss:$36 sps:$4 sm:$0xff]  }
  0x5f   : > { %1802 = vmatprep.mubr.bf16.mxu0 %v3974_v22  ;;  %1931 = vmatprep.mubr.bf16.mxu1 %v3976_v23  ;;  %v4066_v22 = vld [vmem:[%s4234_s13 + $0x440] ss:$36 sps:$4 sm:$0xff]   ;;  %v4067_v23 = vld [vmem:[%s4234_s13 + $0x208] ss:$36 sps:$4 sm:$0xff]  }
  0x60   : > { %3684 = vmatpush3.bf16.msra.mxu1 %v4045_v42  ;;  %v4098_v42 = vld [vmem:[%s4234_s13 + $0x370] ss:$36 sps:$4 sm:$0xff]  }
  0x61   : > { %3685 = vmatprep.subr.bf16.mxu1 %v4059_v47  ;;  %v4106_v47 = vld [vmem:[%s4234_s13 + $0x180] ss:$36 sps:$4 sm:$0xff]  }
  0x64   : > { %3686 = vmatpush3.bf16.msra.mxu1 %v4060_v48  ;;  %v4107_v48 = vld [vmem:[%s4234_s13 + $0x404] ss:$36 sps:$4 sm:$0xff]  }
  0x66   : > { %1803 = vmatmul.mubr.bf16.gmra.mrb[32].mxu0 %v3978_v27  ;;  %1932 = vmatmul.mubr.bf16.gmra.mrb[32].mxu1 %v3979_v30  ;;  %v4073_v27 = vld [vmem:[%s4234_s13 + $0x250] ss:$36 sps:$4 sm:$0xff]   ;;  %v4079_v30 = vld [vmem:[%s4234_s13 + $0x298] ss:$36 sps:$4 sm:$0xff]  }
  0x67   : > { %1810 = vmatprep.mubr.bf16.mxu0 %v3984_v31  ;;  %1939 = vmatprep.mubr.bf16.mxu1 %v3986_v32  ;;  %v4080_v31 = vld [vmem:[%s4234_s13 + $0x60] ss:$36 sps:$4 sm:$0xff]  }
  0x68   : > { %v4081_v32 = vld [vmem:[%s4234_s13 + $0x2e4] ss:$36 sps:$4 sm:$0xff]  }
  0x6e   : > { %1811 = vmatmul.mubr.bf16.gmra.mrb[36].mxu0 %v3988_v34  ;;  %1940 = vmatmul.mubr.bf16.gmra.mrb[36].mxu1 %v3989_v36  ;;  %v4085_v34 = vld [vmem:[%s4234_s13 + $0x2e0] ss:$36 sps:$4 sm:$0xff]   ;;  %v4088_v36 = vld [vmem:[%s4234_s13 + $0x32c] ss:$36 sps:$4 sm:$0xff]  }
  0x6f   : > { %1818 = vmatprep.mubr.bf16.mxu0 %v3992_v37  ;;  %1947 = vmatprep.mubr.bf16.mxu1 %v3994_v38  ;;  %v4090_v37 = vld [vmem:[%s4234_s13 + $0xf4] ss:$36 sps:$4 sm:$0xff]   ;;  %v4092_v38 = vld [vmem:[%s4234_s13 + $0x328] ss:$36 sps:$4 sm:$0xff]  }
  0x76   : > { %1819 = vmatmul.mubr.bf16.gmra.mrb[40].mxu0 %v3996_v39  ;;  %1948 = vmatmul.mubr.bf16.gmra.mrb[40].mxu1 %v3997_v40  ;;  %v4093_v39 = vld [vmem:[%s4234_s13 + $0xf0] ss:$36 sps:$4 sm:$0xff]  }
  0x77   : > { %1826 = vmatprep.mubr.bf16.mxu0 %v4000_v43  ;;  %1955 = vmatprep.mubr.bf16.mxu1 %v4002_v44  ;;  %v4094_v40 = vld [vmem:[%s4234_s13 + $0x374] ss:$36 sps:$4 sm:$0xff]   ;;  %v4101_v44 = vld [vmem:[%s4234_s13 + $0x3bc] ss:$36 sps:$4 sm:$0xff]  }
  0x78   : > { %v4099_v43 = vld [vmem:[%s4234_s13 + $0x138] ss:$36 sps:$4 sm:$0xff]  }
  0x7e   : > { %1827 = vmatmul.mubr.bf16.gmra.mrb[44].mxu0 %v4004_v45  ;;  %1956 = vmatmul.mubr.bf16.gmra.mrb[44].mxu1 %v4005_v46  ;;  %v4103_v45 = vld [vmem:[%s4234_s13 + $0x184] ss:$36 sps:$4 sm:$0xff]   ;;  %v4105_v46 = vld [vmem:[%s4234_s13 + $0x3b8] ss:$36 sps:$4 sm:$0xff]  }
  0x7f   : > { %1963 = vmatprep.mubr.bf16.mxu1 %v4008_v49  ;;  %2060 = vmatprep.mubr.bf16.mxu0 %v4012_v50  ;;  %v4109_v49 = vld [vmem:[%s4234_s13 + $0x1cc] ss:$36 sps:$4 sm:$0xff]   ;;  %v4111_v50 = vld [vmem:[%s4234_s13 + $0x400] ss:$36 sps:$4 sm:$0xff]  }
  0x86   : > { %1964 = vmatmul.mubr.bf16.gmra.mrb[48].mxu1 %v4013_v52  ;;  %2061 = vmatmul.mubr.bf16.vlgmr.msra.gmra.mrb[48].mxu0 %v4010_v51  ;;  %v4112_v51 = vld [vmem:[%s4234_s13 + $0x1c8] ss:$36 sps:$4 sm:$0xff]  }
  0x87   : > { %3808 = vmatpush3.bf16.msra.mxu0 %v4016_v29  ;;  %1971 = vmatprep.mubr.bf16.mxu1 %v4017_v53  ;;  %v4077_v29 = vld [vmem:[%s4234_s13 + $0x64] ss:$36 sps:$4 sm:$0xff]   ;;  %v4114_v52 = vld [vmem:[%s4234_s13 + $0x44c] ss:$36 sps:$4 sm:$0xff]   ;;  %v4116_v53 = vld [vmem:[%s4234_s13 + $0x214] ss:$36 sps:$4 sm:$0xff]  }
  0x88   : > { %2068 = vmatprep.mubr.bf16.mxu0 %v4019_v54  ;;  %3809 = vmatprep.subr.bf16.mxu0 %v4031_v55 }
  0x8b   : > { %3810 = vmatpush3.bf16.msra.mxu0 %v4031_v55 }
  0x8c   : > { %3811 = vmatprep.subr.bf16.mxu0 %v4046_v56 }
  0x8e   : > { %1972 = vmatmul.mubr.bf16.gmra.mrb[52].mxu1 %v4021_v57  ;;  %2069 = vmatmul.mubr.bf16.gmra.mrb[52].mxu0 %v4022_v58  ;;  %v4118_v58 = vld [vmem:[%s4234_s13 + $0x448] ss:$36 sps:$4 sm:$0xff]  }
  0x8f   : > { %1979 = vmatprep.mubr.bf16.mxu1 %v4023_v59  ;;  %2076 = vmatprep.mubr.bf16.mxu0 %v4025_v60  ;;  %v4119_v59 = vld [vmem:[%s4234_s13 + $0x210] ss:$36 sps:$4 sm:$0xff]  }
  0x90   : > { %3812 = vmatpush3.bf16.msra.mxu0 %v4046_v56 }
  0x91   : > { %3813 = vmatprep.subr.bf16.mxu0 %v4061_v61 }
  0x94   : > { %3814 = vmatpush3.bf16.msra.mxu0 %v4061_v61 }
  0x95   : > { %3815 = vmatprep.subr.bf16.mxu0 %v4074_v62 }
  0x96   : > { %1980 = vmatmul.mubr.bf16.gmra.mrb[56].mxu1 %v4027_v63  ;;  %2077 = vmatmul.mubr.bf16.gmra.mrb[56].mxu0 %v4028_v0  ;;  %v4120_v0 = vld [vmem:[%s4234_s13 + $0x25c] ss:$36 sps:$4 sm:$0xff]  }
  0x97   : > { %1987 = vmatprep.mubr.bf16.mxu1 %v4032_v1  ;;  %2084 = vmatprep.mubr.bf16.mxu0 %v4034_v2  ;;  %v4122_v1 = vld [vmem:[%s4234_s13 + $0x20] ss:$36 sps:$4 sm:$0xff]  }
  0x98   : > { %3816 = vmatpush3.bf16.msra.mxu0 %v4074_v62 }
  0x99   : > { %3817 = vmatprep.subr.bf16.mxu0 %v4087_v3 }
  0x9c   : > { %3818 = vmatpush3.bf16.msra.mxu0 %v4087_v3 }
  0x9d   : > { %3819 = vmatprep.subr.bf16.mxu0 %v4100_v6 }
  0x9e   : > { %1988 = vmatmul.mubr.bf16.gmra.mrb[60].mxu1 %v4036_v4  ;;  %2085 = vmatmul.mubr.bf16.gmra.mrb[60].mxu0 %v4037_v5 }
  0x9f   : > { %1995 = vmatprep.mubr.bf16.mxu1 %v4038_v7  ;;  %2092 = vmatprep.mubr.bf16.mxu0 %v4040_v8 }
  0xa0   : > { %3820 = vmatpush3.bf16.msra.mxu0 %v4100_v6 }
  0xa1   : > { %3821 = vmatprep.subr.bf16.mxu0 %v4113_v9 }
  0xa4   : > { %3822 = vmatpush3.bf16.msra.mxu0 %v4113_v9 }
  0xa6   : > { %1996 = vmatmul.mubr.bf16.gmra.mrb[64].mxu1 %v4042_v10  ;;  %2093 = vmatmul.mubr.bf16.gmra.mrb[64].mxu0 %v4043_v11  ;;  %v4123_v10 = vld [vmem:[%s4234_s13 + $0x258] ss:$36 sps:$4 sm:$0xff]   ;;  %v4124_v11 = vld [vmem:[%s4234_s13 + $0x68] ss:$36 sps:$4 sm:$0xff]  }
  0xa7   : > { %2003 = vmatprep.mubr.bf16.mxu1 %v4047_v12  ;;  %2100 = vmatprep.mubr.bf16.mxu0 %v4049_v13 }
  0xae   : > { %2004 = vmatmul.mubr.bf16.gmra.mrb[68].mxu1 %v4051_v14  ;;  %2101 = vmatmul.mubr.bf16.gmra.mrb[68].mxu0 %v4052_v15 }
  0xaf   : > { %2011 = vmatprep.mubr.bf16.mxu1 %v4053_v16  ;;  %2108 = vmatprep.mubr.bf16.mxu0 %v4055_v17  ;;  %v4125_v16 = vld [vmem:[%s4234_s13 + $0x2a4] ss:$36 sps:$4 sm:$0xff]   ;;  %v4127_v17 = vld [vmem:[%s4234_s13 + $0xb0] ss:$36 sps:$4 sm:$0xff]  }
  0xb6   : > { %2012 = vmatmul.mubr.bf16.gmra.mrb[72].mxu1 %v4057_v18  ;;  %2109 = vmatmul.mubr.bf16.gmra.mrb[72].mxu0 %v4058_v19 }
  0xb7   : > { %2019 = vmatprep.mubr.bf16.mxu1 %v4062_v20  ;;  %2116 = vmatprep.mubr.bf16.mxu0 %v4064_v21 }
  0xbe   : > { %2020 = vmatmul.mubr.bf16.gmra.mrb[76].mxu1 %v4066_v22  ;;  %2117 = vmatmul.mubr.bf16.gmra.mrb[76].mxu0 %v4067_v23 }
  0xbf   : > { %2124 = vmatprep.mubr.bf16.mxu0 %v4068_v24  ;;  %2221 = vmatprep.mubr.bf16.mxu1 %v4072_v25 }
  0xc6   : > { %2125 = vmatmul.mubr.bf16.gmra.mrb[80].mxu0 %v4073_v27  ;;  %2222 = vmatmul.mubr.bf16.vlgmr.msra.gmra.mrb[80].mxu1 %v4070_v26  ;;  %v4128_v26 = vld [vmem:[%s4234_s13 + $0x2a0] ss:$36 sps:$4 sm:$0xff]   ;;  %v4129_v27 = vld [vmem:[%s4234_s13 + $0xf8] ss:$36 sps:$4 sm:$0xff]  }
  0xc7   : > { %2132 = vmatprep.mubr.bf16.mxu0 %v4075_v28  ;;  %2229 = vmatprep.mubr.bf16.mxu1 %v4077_v29 }
  0xce   : > { %2133 = vmatmul.mubr.bf16.gmra.mrb[84].mxu0 %v4079_v30  ;;  %2230 = vmatmul.mubr.bf16.gmra.mrb[84].mxu1 %v4080_v31 }
  0xcf   : > { %2140 = vmatprep.mubr.bf16.mxu0 %v4081_v32  ;;  %2237 = vmatprep.mubr.bf16.mxu1 %v4083_v33  ;;  %v4130_v32 = vld [vmem:[%s4234_s13 + $0x2ec] ss:$36 sps:$4 sm:$0xff]   ;;  %v4132_v33 = vld [vmem:[%s4234_s13 + $0x140] ss:$36 sps:$4 sm:$0xff]  }
  0xd6   : > { %2141 = vmatmul.mubr.bf16.gmra.mrb[88].mxu0 %v4085_v34  ;;  %2238 = vmatmul.mubr.bf16.gmra.mrb[88].mxu1 %v4086_v35 }
  0xd7   : > { %2148 = vmatprep.mubr.bf16.mxu0 %v4088_v36  ;;  %2245 = vmatprep.mubr.bf16.mxu1 %v4090_v37 }
  0xde   : > { %2149 = vmatmul.mubr.bf16.gmra.mrb[92].mxu0 %v4092_v38  ;;  %2246 = vmatmul.mubr.bf16.gmra.mrb[92].mxu1 %v4093_v39 }
  0xdf   : > { %2156 = vmatprep.mubr.bf16.mxu0 %v4094_v40  ;;  %2253 = vmatprep.mubr.bf16.mxu1 %v4096_v41 }
  0xe6   : > { %2157 = vmatmul.mubr.bf16.gmra.mrb[96].mxu0 %v4098_v42  ;;  %2254 = vmatmul.mubr.bf16.gmra.mrb[96].mxu1 %v4099_v43  ;;  %v4133_v42 = vld [vmem:[%s4234_s13 + $0x2e8] ss:$36 sps:$4 sm:$0xff]  }
  0xe7   : > { %2164 = vmatprep.mubr.bf16.mxu0 %v4101_v44  ;;  %2261 = vmatprep.mubr.bf16.mxu1 %v4103_v45  ;;  %v4134_v43 = vld [vmem:[%s4234_s13 + $0x188] ss:$36 sps:$4 sm:$0xff]  }
  0xee   : > { %2165 = vmatmul.mubr.bf16.gmra.mrb[100].mxu0 %v4105_v46  ;;  %2262 = vmatmul.mubr.bf16.gmra.mrb[100].mxu1 %v4106_v47 }
  0xef   : > { %2172 = vmatprep.mubr.bf16.mxu0 %v4107_v48  ;;  %2269 = vmatprep.mubr.bf16.mxu1 %v4109_v49  ;;  %v4135_v48 = vld [vmem:[%s4234_s13 + $0x334] ss:$36 sps:$4 sm:$0xff]  }
  0xf0   : > { %v4137_v49 = vld [vmem:[%s4234_s13 + $0x1d0] ss:$36 sps:$4 sm:$0xff]  }
  0xf6   : > { %2173 = vmatmul.mubr.bf16.gmra.mrb[104].mxu0 %v4111_v50  ;;  %2270 = vmatmul.mubr.bf16.gmra.mrb[104].mxu1 %v4112_v51 }
  0xf7   : > { %2180 = vmatprep.mubr.bf16.mxu0 %v4114_v52  ;;  %2277 = vmatprep.mubr.bf16.mxu1 %v4116_v53 }
  0xf9   : > { %v3423_v54 = vpop.f32.mrb[0].mxu1  ;;  %v3351_v55 = vpop.f32.mrb[0].mxu0 }
  0xfa   : > { %v3424_v56 = vpop.f32.mrb[1].mxu1  ;;  %v3352_v57 = vpop.f32.mrb[1].mxu0 }
  0xfb   : > { %v4537_v60 = vadd.f32 %v3424_v56, %v3423_v54  ;;  %v3426_v61 = vpop.f32.mrb[2].mxu1  ;;  %v4539_v62 = vadd.f32 %v3352_v57, %v3351_v55  ;;  %v3354_v63 = vpop.f32.mrb[2].mxu0  ;;  %v4586_v54 = vld [vmem:[%s5006_s2] ss:$0 sm:$0xff] }
  0xfc   : > { %v3427_v2 = vpop.f32.mrb[3].mxu1  ;;  %v3355_v3 = vpop.f32.mrb[3].mxu0 }
  0xfd   : > { %v4543_v4 = vadd.f32 %v3427_v2, %v3426_v61  ;;  %v4545_v5 = vadd.f32 %v3355_v3, %v3354_v63  ;;  %v4139_v61 = vld [vmem:[%s4234_s13 + $0x218] ss:$36 sps:$4 sm:$0xff]   ;;  %v1741_v63 = vadd.f32 %v4539_v62, %v4586_v54 }
  0xfe   : > { %2181 = vmatmul.mubr.bf16.gmra.mrb[108].mxu0 %v4118_v58  ;;  %2278 = vmatmul.mubr.bf16.gmra.mrb[108].mxu1 %v4119_v59  ;;  %v4138_v59 = vld [vmem:[%s4234_s13 + $0x330] ss:$36 sps:$4 sm:$0xff]  }
  0xff   : > { %2285 = vmatprep.mubr.bf16.mxu1 %v4120_v0  ;;  %3823 = vmatprep.mubr.bf16.mxu0 %v4122_v1 }
 0x101   : > { %v3429_v6 = vpop.f32.mrb[4].mxu1  ;;  %v3357_v7 = vpop.f32.mrb[4].mxu0 }
 0x102   : > { %v3430_v8 = vpop.f32.mrb[5].mxu1  ;;  %v3358_v9 = vpop.f32.mrb[5].mxu0 }
 0x103   : > { %v4549_v12 = vadd.f32 %v3430_v8, %v3429_v6  ;;  %v3432_v13 = vpop.f32.mrb[6].mxu1  ;;  %v4551_v14 = vadd.f32 %v3358_v9, %v3357_v7  ;;  %v3360_v15 = vpop.f32.mrb[6].mxu0  ;;  %v4140_v6 = vld [vmem:[%s4234_s13 + $0x37c] ss:$36 sps:$4 sm:$0xff]  }
 0x104   : > { %v3433_v18 = vpop.f32.mrb[7].mxu1  ;;  %v3361_v19 = vpop.f32.mrb[7].mxu0  ;;  %v4142_v7 = vld [vmem:[%s4234_s13 + $0x260] ss:$36 sps:$4 sm:$0xff]  }
 0x105   : > { %v4555_v20 = vadd.f32 %v3433_v18, %v3432_v13  ;;  %v4557_v21 = vadd.f32 %v3361_v19, %v3360_v15 }
 0x106   : > { %2286 = vmatmul.mubr.bf16.gmra.mrb[112].mxu1 %v4123_v10  ;;  %3824 = vmatmul.mubr.bf16.vlgmr.msra.gmra.mrb[112].mxu0 %v4124_v11  ;;  %v1744_v10 = vadd.f32 %v4545_v5, %v4586_v54  ;;  %v1749_v5 = vadd.f32 %v4551_v14, %v4586_v54 }
 0x107   : > { %2293 = vmatprep.mubr.bf16.mxu1 %v4125_v16  ;;  %3827 = vmatprep.mubr.bf16.mxu0 %v4127_v17 }
 0x109   : > { %v3435_v22 = vpop.f32.mrb[8].mxu1  ;;  %v3363_v23 = vpop.f32.mrb[8].mxu0 }
 0x10a   : > { %v3436_v24 = vpop.f32.mrb[9].mxu1  ;;  %v3364_v25 = vpop.f32.mrb[9].mxu0 }
 0x10b   : > { %v4561_v28 = vadd.f32 %v3436_v24, %v3435_v22  ;;  %v3438_v29 = vpop.f32.mrb[10].mxu1  ;;  %v4563_v30 = vadd.f32 %v3364_v25, %v3363_v23  ;;  %v3366_v31 = vpop.f32.mrb[10].mxu0  ;;  %v4143_v22 = vld [vmem:[%s4234_s13 + $0x378] ss:$36 sps:$4 sm:$0xff]   ;;  %v4144_v23 = vld [vmem:[%s4234_s13 + $0x2a8] ss:$36 sps:$4 sm:$0xff]  }
 0x10c   : > { %v3439_v34 = vpop.f32.mrb[11].mxu1  ;;  %v3367_v35 = vpop.f32.mrb[11].mxu0 }
 0x10d   : > { %v4567_v36 = vadd.f32 %v3439_v34, %v3438_v29  ;;  %v4569_v37 = vadd.f32 %v3367_v35, %v3366_v31  ;;  %v4145_v29 = vld [vmem:[%s4234_s13 + $0x3c4] ss:$36 sps:$4 sm:$0xff]   ;;  %v4147_v31 = vld [vmem:[%s4234_s13 + $0x2f0] ss:$36 sps:$4 sm:$0xff]   ;;  %v1752_v34 = vadd.f32 %v4557_v21, %v4586_v54  ;;  %v1757_v21 = vadd.f32 %v4563_v30, %v4586_v54 }
 0x10e   : > { %2294 = vmatmul.mubr.bf16.gmra.mrb[116].mxu1 %v4128_v26  ;;  %3828 = vmatmul.mubr.bf16.gmra.mrb[116].mxu0 %v4129_v27 }
 0x10f   : > { %2301 = vmatprep.mubr.bf16.mxu1 %v4130_v32  ;;  %3831 = vmatprep.mubr.bf16.mxu0 %v4132_v33 }
 0x111   : > { %v3441_v38 = vpop.f32.mrb[12].mxu1  ;;  %v3369_v39 = vpop.f32.mrb[12].mxu0 }
 0x112   : > { %v3442_v40 = vpop.f32.mrb[13].mxu1  ;;  %v3370_v41 = vpop.f32.mrb[13].mxu0 }
 0x113   : > { %v4573_v44 = vadd.f32 %v3442_v40, %v3441_v38  ;;  %v3444_v45 = vpop.f32.mrb[14].mxu1  ;;  %v4575_v46 = vadd.f32 %v3370_v41, %v3369_v39  ;;  %v3372_v47 = vpop.f32.mrb[14].mxu0 }
 0x114   : > { %v3445_v50 = vpop.f32.mrb[15].mxu1  ;;  %v3373_v51 = vpop.f32.mrb[15].mxu0 }
 0x115   : > { %v4579_v52 = vadd.f32 %v3445_v50, %v3444_v45  ;;  %v4581_v53 = vadd.f32 %v3373_v51, %v3372_v47  ;;  %v4148_v45 = vld [vmem:[%s4234_s13 + $0x3c0] ss:$36 sps:$4 sm:$0xff]   ;;  %v4149_v47 = vld [vmem:[%s4234_s13 + $0x338] ss:$36 sps:$4 sm:$0xff]  }
 0x116   : > { %2302 = vmatmul.mubr.bf16.gmra.mrb[120].mxu1 %v4133_v42  ;;  %3832 = vmatmul.mubr.bf16.gmra.mrb[120].mxu0 %v4134_v43 }
 0x117   : > { %2309 = vmatprep.mubr.bf16.mxu1 %v4135_v48  ;;  %3835 = vmatprep.mubr.bf16.mxu0 %v4137_v49 }
 0x119   : > { %v3463_v55 = vpop.f32.mrb[16].mxu1  ;;  %v3375_v56 = vpop.f32.mrb[16].mxu0 }
 0x11a   : > { %v3464_v57 = vpop.f32.mrb[17].mxu1  ;;  %v3376_v58 = vpop.f32.mrb[17].mxu0 }
 0x11b   : > { %v3465_v0 = vadd.f32 %v3464_v57, %v3463_v55  ;;  %v3466_v1 = vpop.f32.mrb[18].mxu1  ;;  %v4592_v2 = vadd.f32 %v3376_v58, %v3375_v56  ;;  %v3378_v3 = vpop.f32.mrb[18].mxu0  ;;  %v4150_v55 = vld [vmem:[%s4234_s13 + $0x40c] ss:$36 sps:$4 sm:$0xff]   ;;  %v4152_v56 = vld [vmem:[%s4234_s13 + $0x380] ss:$36 sps:$4 sm:$0xff]  }
 0x11c   : > { %v3467_v8 = vpop.f32.mrb[19].mxu1  ;;  %v3379_v9 = vpop.f32.mrb[19].mxu0 }
 0x11d   : > { %v4598_v11 = vadd.f32 %v3465_v0, %v1741_v63  ;;  %v3468_v13 = vadd.f32 %v3467_v8, %v3466_v1  ;;  %v4600_v15 = vadd.f32 %v3379_v9, %v3378_v3  ;;  %v4153_v8 = vld [vmem:[%s4234_s13 + $0x408] ss:$36 sps:$4 sm:$0xff]  }
 0x11e   : > { %2310 = vmatmul.mubr.bf16.gmra.mrb[124].mxu1 %v4138_v59  ;;  %3836 = vmatmul.mubr.bf16.gmra.mrb[124].mxu0 %v4139_v61  ;;  %v1760_v59 = vadd.f32 %v4569_v37, %v4586_v54  ;;  %v4154_v9 = vld [vmem:[%s4234_s13 + $0x3c8] ss:$36 sps:$4 sm:$0xff]   ;;  %v1765_v37 = vadd.f32 %v4575_v46, %v4586_v54 }
 0x11f   : > { %v4602_v62 = vadd.f32 %v3468_v13, %v1744_v10  ;;  %2317 = vmatprep.mubr.bf16.mxu1 %v4140_v6  ;;  %3839 = vmatprep.mubr.bf16.mxu0 %v4142_v7 }
 0x121   : > { %v3469_v16 = vpop.f32.mrb[20].mxu1  ;;  %v3381_v17 = vpop.f32.mrb[20].mxu0 }
 0x122   : > { %v3470_v18 = vpop.f32.mrb[21].mxu1  ;;  %v3382_v19 = vpop.f32.mrb[21].mxu0 }
 0x123   : > { %v3471_v24 = vadd.f32 %v3470_v18, %v3469_v16  ;;  %v3472_v25 = vpop.f32.mrb[22].mxu1  ;;  %v4608_v26 = vadd.f32 %v3382_v19, %v3381_v17  ;;  %v3384_v27 = vpop.f32.mrb[22].mxu0  ;;  %v4155_v18 = vld [vmem:[%s4234_s13 + $0x454] ss:$36 sps:$4 sm:$0xff]  }
 0x124   : > { %v3473_v32 = vpop.f32.mrb[23].mxu1  ;;  %v3385_v33 = vpop.f32.mrb[23].mxu0  ;;  %v4157_v19 = vld [vmem:[%s4234_s13 + $0x410] ss:$36 sps:$4 sm:$0xff]  }
 0x125   : > { %v4614_v35 = vadd.f32 %v3471_v24, %v1749_v5  ;;  %v3474_v38 = vadd.f32 %v3473_v32, %v3472_v25  ;;  %v4616_v39 = vadd.f32 %v3385_v33, %v3384_v27  ;;  %v1768_v5 = vadd.f32 %v4581_v53, %v4586_v54 }
 0x126   : > { %2318 = vmatmul.mubr.bf16.gmra.mrb[128].mxu1 %v4143_v22  ;;  %3840 = vmatmul.mubr.bf16.gmra.mrb[128].mxu0 %v4144_v23  ;;  %v1773_v53 = vadd.f32 %v4592_v2, %v4586_v54 }
 0x127   : > { %v4618_v14 = vadd.f32 %v3474_v38, %v1752_v34  ;;  %2325 = vmatprep.mubr.bf16.mxu1 %v4145_v29  ;;  %3843 = vmatprep.mubr.bf16.mxu0 %v4147_v31  ;;  %v4158_v34 = vld [vmem:[%s4234_s13 + $0x450] ss:$36 sps:$4 sm:$0xff]   ;;  %v4159_v38 = vld [vmem:[%s4234_s13 + $0x458] ss:$36 sps:$4 sm:$0xff]   ;;  %s2875_s13 = sshll.u32 %s5010_s19, 2 }
 0x128   : > { %s4898_s5 = scalar_lea.vmem %s5007_s3, %s2875_s13  ;;  %s4931_s8 = scalar_lea.vmem %s5008_s4, %s2875_s13 }
 0x129   : > { %v3475_v40 = vpop.f32.mrb[24].mxu1  ;;  %v3387_v41 = vpop.f32.mrb[24].mxu0 }
 0x12a   : > { %v3476_v42 = vpop.f32.mrb[25].mxu1  ;;  %v3388_v43 = vpop.f32.mrb[25].mxu0 }
 0x12b   : > { %v3477_v48 = vadd.f32 %v3476_v42, %v3475_v40  ;;  %v3478_v49 = vpop.f32.mrb[26].mxu1  ;;  %v4624_v50 = vadd.f32 %v3388_v43, %v3387_v41  ;;  %v3390_v51 = vpop.f32.mrb[26].mxu0 }
 0x12c   : > { %v3479_v57 = vpop.f32.mrb[27].mxu1  ;;  %v3391_v58 = vpop.f32.mrb[27].mxu0 }
 0x12d   : > { %v4630_v61 = vadd.f32 %v3477_v48, %v1757_v21  ;;  %v3480_v63 = vadd.f32 %v3479_v57, %v3478_v49  ;;  %v4632_v0 = vadd.f32 %v3391_v58, %v3390_v51  ;;  %v1776_v21 = vadd.f32 %v4600_v15, %v4586_v54 }
 0x12e   : > { %2326 = vmatmul.mubr.bf16.gmra.mrb[132].mxu1 %v4148_v45  ;;  %3844 = vmatmul.mubr.bf16.gmra.mrb[132].mxu0 %v4149_v47 }
 0x12f   : > { %v4634_v30 = vadd.f32 %v3480_v63, %v1760_v59  ;;  %2333 = vmatprep.mubr.bf16.mxu1 %v4150_v55  ;;  %3847 = vmatprep.mubr.bf16.mxu0 %v4152_v56  ;;  %v1781_v59 = vadd.f32 %v4608_v26, %v4586_v54 }
 0x131   : > { %v3481_v1 = vpop.f32.mrb[28].mxu1  ;;  %v3393_v3 = vpop.f32.mrb[28].mxu0 }
 0x132   : > { %v3482_v6 = vpop.f32.mrb[29].mxu1  ;;  %v3394_v7 = vpop.f32.mrb[29].mxu0 }
 0x133   : > { %v3483_v10 = vadd.f32 %v3482_v6, %v3481_v1  ;;  %v3484_v13 = vpop.f32.mrb[30].mxu1  ;;  %v4640_v16 = vadd.f32 %v3394_v7, %v3393_v3  ;;  %v3396_v17 = vpop.f32.mrb[30].mxu0 }
 0x134   : > { %v3485_v22 = vpop.f32.mrb[31].mxu1  ;;  %v3397_v23 = vpop.f32.mrb[31].mxu0 }
 0x135   : > { %v4646_v24 = vadd.f32 %v3483_v10, %v1765_v37  ;;  %v3486_v25 = vadd.f32 %v3485_v22, %v3484_v13  ;;  %v4648_v27 = vadd.f32 %v3397_v23, %v3396_v17  ;;  %v1789_v22 = vadd.f32 %v4624_v50, %v4586_v54 }
 0x136   : > { %2334 = vmatmul.mubr.bf16.gmra.mrb[136].mxu1 %v4153_v8  ;;  %3848 = vmatmul.mubr.bf16.gmra.mrb[136].mxu0 %v4154_v9  ;;  %v1784_v8 = vadd.f32 %v4616_v39, %v4586_v54 }
 0x137   : > { %v4650_v46 = vadd.f32 %v3486_v25, %v1768_v5  ;;  %2341 = vmatprep.mubr.bf16.mxu1 %v4155_v18  ;;  %3851 = vmatprep.mubr.bf16.mxu0 %v4157_v19 }
 0x139   : > { %v3487_v29 = vpop.f32.mrb[32].mxu1  ;;  %v3399_v31 = vpop.f32.mrb[32].mxu0 }
 0x13a   : > { %v3488_v32 = vpop.f32.mrb[33].mxu1  ;;  %v3400_v33 = vpop.f32.mrb[33].mxu0 }
 0x13b   : > { %v3489_v40 = vadd.f32 %v3488_v32, %v3487_v29  ;;  %v3490_v41 = vpop.f32.mrb[34].mxu1  ;;  %v4656_v42 = vadd.f32 %v3400_v33, %v3399_v31  ;;  %v3402_v43 = vpop.f32.mrb[34].mxu0  ;;  %v1792_v32 = vadd.f32 %v4632_v0, %v4586_v54 }
 0x13c   : > { %v3491_v45 = vpop.f32.mrb[35].mxu1  ;;  %v3403_v47 = vpop.f32.mrb[35].mxu0 }
 0x13d   : > { %v4660_v48 = vadd.f32 %v3489_v40, %v1773_v53  ;;  %v3492_v49 = vadd.f32 %v3491_v45, %v3490_v41  ;;  %v3404_v51 = vadd.f32 %v3403_v47, %v3402_v43  ;;  %v1797_v45 = vadd.f32 %v4640_v16, %v4586_v54 }
 0x13e   : > { %2342 = vmatmul.mubr.bf16.gmra.mrb[140].mxu1 %v4158_v34  ;;  %3852 = vmatmul.mubr.bf16.gmra.mrb[140].mxu0 %v4159_v38 }
 0x13f   : > { %v4662_v55 = vadd.f32 %v3492_v49, %v1776_v21 }
 0x141   : > { %v3493_v56 = vpop.f32.mrb[36].mxu1  ;;  %v3405_v2 = vpop.f32.mrb[36].mxu0 }
 0x142   : > { %v3494_v57 = vpop.f32.mrb[37].mxu1  ;;  %v3406_v58 = vpop.f32.mrb[37].mxu0 }
 0x143   : > { %v3495_v63 = vadd.f32 %v3494_v57, %v3493_v56  ;;  %v3496_v1 = vpop.f32.mrb[38].mxu1  ;;  %v4666_v3 = vadd.f32 %v3406_v58, %v3405_v2  ;;  %v3408_v15 = vpop.f32.mrb[38].mxu0  ;;  %v1800_v57 = vadd.f32 %v4648_v27, %v4586_v54  ;;  %v1808_v27 = vadd.f32 %v3404_v51, %v4586_v54 }
 0x144   : > { %v3497_v6 = vpop.f32.mrb[39].mxu1  ;;  %v3409_v7 = vpop.f32.mrb[39].mxu0 }
 0x145   : > { %v4670_v9 = vadd.f32 %v3495_v63, %v1781_v59  ;;  %v3498_v37 = vadd.f32 %v3497_v6, %v3496_v1  ;;  %v3410_v10 = vadd.f32 %v3409_v7, %v3408_v15  ;;  %v1813_v51 = vadd.f32 %v4666_v3, %v4586_v54 }
 0x147   : > { %v4672_v13 = vadd.f32 %v3498_v37, %v1784_v8  ;;  %v1805_v8 = vadd.f32 %v4656_v42, %v4586_v54 }
 0x149   : > { %v3499_v17 = vpop.f32.mrb[40].mxu1  ;;  %v3411_v18 = vpop.f32.mrb[40].mxu0 }
 0x14a   : > { %v3500_v19 = vpop.f32.mrb[41].mxu1  ;;  %v3412_v26 = vpop.f32.mrb[41].mxu0 }
 0x14b   : > { %v3501_v23 = vadd.f32 %v3500_v19, %v3499_v17  ;;  %v3502_v5 = vpop.f32.mrb[42].mxu1  ;;  %v4676_v25 = vadd.f32 %v3412_v26, %v3411_v18  ;;  %v3414_v29 = vpop.f32.mrb[42].mxu0 }
 0x14c   : > { %v3503_v31 = vpop.f32.mrb[43].mxu1  ;;  %v3415_v39 = vpop.f32.mrb[43].mxu0 }
 0x14d   : > { %v4680_v33 = vadd.f32 %v3501_v23, %v1789_v22  ;;  %v3504_v34 = vadd.f32 %v3503_v31, %v3502_v5  ;;  %v4682_v38 = vadd.f32 %v3415_v39, %v3414_v29 }
 0x14f   : > { %v4684_v53 = vadd.f32 %v3504_v34, %v1792_v32 }
 0x151   : > { %v3505_v40 = vpop.f32.mrb[44].mxu1  ;;  %v3417_v41 = vpop.f32.mrb[44].mxu0 }
 0x152   : > { %v3506_v50 = vpop.f32.mrb[45].mxu1  ;;  %v3418_v43 = vpop.f32.mrb[45].mxu0 }
 0x153   : > { %v3507_v47 = vadd.f32 %v3506_v50, %v3505_v40  ;;  %v3508_v21 = vpop.f32.mrb[46].mxu1  ;;  %v4688_v49 = vadd.f32 %v3418_v43, %v3417_v41  ;;  %v3420_v56 = vpop.f32.mrb[46].mxu0 }
 0x154   : > { %v3509_v0 = vpop.f32.mrb[47].mxu1  ;;  %v3421_v2 = vpop.f32.mrb[47].mxu0 }
 0x155   : > { %v4692_v58 = vadd.f32 %v3507_v47, %v1797_v45  ;;  %v3510_v59 = vadd.f32 %v3509_v0, %v3508_v21  ;;  %v4694_v63 = vadd.f32 %v3421_v2, %v3420_v56 }
 0x157   : > { %v4696_v1 = vadd.f32 %v3510_v59, %v1800_v57 }
 0x159   : > { %v3511_v15 = vpop.f32.mrb[48].mxu1  ;;  %v3575_v6 = vpop.f32.mrb[48].mxu0 }
 0x15a   : > { %v3512_v16 = vpop.f32.mrb[49].mxu1  ;;  %v3576_v7 = vpop.f32.mrb[49].mxu0 }
 0x15b   : > { %v3513_v37 = vadd.f32 %v3512_v16, %v3511_v15  ;;  %v3577_v17 = vadd.f32 %v3576_v7, %v3575_v6  ;;  %v3514_v18 = vpop.f32.mrb[50].mxu1  ;;  %v3578_v19 = vpop.f32.mrb[50].mxu0 }
 0x15c   : > { %v3515_v26 = vpop.f32.mrb[51].mxu1  ;;  %v3579_v22 = vpop.f32.mrb[51].mxu0 }
 0x15d   : > { %v4701_v23 = vadd.f32 %v3513_v37, %v1805_v8  ;;  %v4704_v5 = vadd.f32 %v3577_v17, %v4598_v11  ;;  %v3516_v29 = vadd.f32 %v3515_v26, %v3514_v18  ;;  %v3580_v31 = vadd.f32 %v3579_v22, %v3578_v19 }
 0x15e   : > { %v1816_v11 = vadd.f32 %v3410_v10, %v4586_v54  ;;  %v1821_v10 = vadd.f32 %v4676_v25, %v4586_v54 }
 0x15f   : > { %v4706_v39 = vadd.f32 %v3516_v29, %v1808_v27  ;;  %v4709_v32 = vadd.f32 %v3580_v31, %v4602_v62 }
 0x161   : > { %v3517_v42 = vpop.f32.mrb[52].mxu1  ;;  %v3581_v34 = vpop.f32.mrb[52].mxu0 }
 0x162   : > { %v3518_v40 = vpop.f32.mrb[53].mxu1  ;;  %v3582_v41 = vpop.f32.mrb[53].mxu0 }
 0x163   : > { %v3519_v50 = vadd.f32 %v3518_v40, %v3517_v42  ;;  %v3583_v43 = vadd.f32 %v3582_v41, %v3581_v34  ;;  %v3520_v45 = vpop.f32.mrb[54].mxu1  ;;  %v3584_v47 = vpop.f32.mrb[54].mxu0 }
 0x164   : > { %v3521_v21 = vpop.f32.mrb[55].mxu1  ;;  %v3585_v56 = vpop.f32.mrb[55].mxu0 }
 0x165   : > { %v4714_v0 = vadd.f32 %v3519_v50, %v1813_v51  ;;  %v4717_v62 = vadd.f32 %v3583_v43, %v4614_v35  ;;  %v3522_v2 = vadd.f32 %v3521_v21, %v3520_v45  ;;  %v3586_v57 = vadd.f32 %v3585_v56, %v3584_v47 }
 0x166   : > { %v1824_v35 = vadd.f32 %v4682_v38, %v4586_v54  ;;  %v1829_v38 = vadd.f32 %v4688_v49, %v4586_v54 }
 0x167   : > { %v4719_v59 = vadd.f32 %v3522_v2, %v1816_v11  ;;  %v4722_v15 = vadd.f32 %v3586_v57, %v4618_v14 }
 0x169   : > { %v3523_v3 = vpop.f32.mrb[56].mxu1  ;;  %v3587_v6 = vpop.f32.mrb[56].mxu0 }
 0x16a   : > { %v3524_v16 = vpop.f32.mrb[57].mxu1  ;;  %v3588_v7 = vpop.f32.mrb[57].mxu0 }
 0x16b   : > { %v3525_v8 = vadd.f32 %v3524_v16, %v3523_v3  ;;  %v3589_v37 = vadd.f32 %v3588_v7, %v3587_v6  ;;  %v3526_v17 = vpop.f32.mrb[58].mxu1  ;;  %v3590_v18 = vpop.f32.mrb[58].mxu0 }
 0x16c   : > { %v3527_v19 = vpop.f32.mrb[59].mxu1  ;;  %v3591_v27 = vpop.f32.mrb[59].mxu0 }
 0x16d   : > { %v4728_v26 = vadd.f32 %v3525_v8, %v1821_v10  ;;  %v4731_v14 = vadd.f32 %v3589_v37, %v4630_v61  ;;  %v3528_v22 = vadd.f32 %v3527_v19, %v3526_v17  ;;  %v3592_v29 = vadd.f32 %v3591_v27, %v3590_v18 }
 0x16e   : > { %v1832_v61 = vadd.f32 %v4694_v63, %v4586_v54  ;;  %v1837_v63 = vadd.f32 %v4537_v60, %v4586_v54 }
 0x16f   : > { %v4733_v31 = vadd.f32 %v3528_v22, %v1824_v35  ;;  %v4736_v25 = vadd.f32 %v3592_v29, %v4634_v30 }
 0x171   : > { %v3529_v42 = vpop.f32.mrb[60].mxu1  ;;  %v3593_v34 = vpop.f32.mrb[60].mxu0 }
 0x172   : > { %v3530_v40 = vpop.f32.mrb[61].mxu1  ;;  %v3594_v41 = vpop.f32.mrb[61].mxu0 }
 0x173   : > { %v3531_v51 = vadd.f32 %v3530_v40, %v3529_v42  ;;  %v3595_v50 = vadd.f32 %v3594_v41, %v3593_v34  ;;  %v3532_v43 = vpop.f32.mrb[62].mxu1  ;;  %v3596_v45 = vpop.f32.mrb[62].mxu0 }
 0x174   : > { %v3533_v47 = vpop.f32.mrb[63].mxu1  ;;  %v3597_v11 = vpop.f32.mrb[63].mxu0 }
 0x175   : > { %v4742_v21 = vadd.f32 %v3531_v51, %v1829_v38  ;;  %v4745_v30 = vadd.f32 %v3595_v50, %v4646_v24  ;;  %v3534_v56 = vadd.f32 %v3533_v47, %v3532_v43  ;;  %v3598_v2 = vadd.f32 %v3597_v11, %v3596_v45 }
 0x176   : > { %v1840_v24 = vadd.f32 %v4543_v4, %v4586_v54  ;;  %v1845_v4 = vadd.f32 %v4549_v12, %v4586_v54 }
 0x177   : > { %v4747_v57 = vadd.f32 %v3534_v56, %v1832_v61  ;;  %v4750_v49 = vadd.f32 %v3598_v2, %v4650_v46 }
 0x179   : > { %v3535_v3 = vpop.f32.mrb[64].mxu1  ;;  %v3599_v6 = vpop.f32.mrb[64].mxu0 }
 0x17a   : > { %v3536_v16 = vpop.f32.mrb[65].mxu1  ;;  %v3600_v7 = vpop.f32.mrb[65].mxu0 }
 0x17b   : > { %v3537_v10 = vadd.f32 %v3536_v16, %v3535_v3  ;;  %v3601_v8 = vadd.f32 %v3600_v7, %v3599_v6  ;;  %v3538_v37 = vpop.f32.mrb[66].mxu1  ;;  %v3602_v17 = vpop.f32.mrb[66].mxu0 }
 0x17c   : > { %v3539_v18 = vpop.f32.mrb[67].mxu1  ;;  %v3603_v35 = vpop.f32.mrb[67].mxu0 }
 0x17d   : > { %v4756_v19 = vadd.f32 %v3537_v10, %v1837_v63  ;;  %v4759_v46 = vadd.f32 %v3601_v8, %v4660_v48  ;;  %v3540_v27 = vadd.f32 %v3539_v18, %v3538_v37  ;;  %v3604_v22 = vadd.f32 %v3603_v35, %v3602_v17 }
 0x17e   : > { %v1848_v48 = vadd.f32 %v4555_v20, %v4586_v54  ;;  %v1853_v20 = vadd.f32 %v4561_v28, %v4586_v54 }
 0x17f   : > { %v4761_v29 = vadd.f32 %v3540_v27, %v1840_v24  ;;  %v4764_v60 = vadd.f32 %v3604_v22, %v4662_v55 }
 0x181   : > { %v3541_v42 = vpop.f32.mrb[68].mxu1  ;;  %v3605_v34 = vpop.f32.mrb[68].mxu0 }
 0x182   : > { %v3542_v40 = vpop.f32.mrb[69].mxu1  ;;  %v3606_v41 = vpop.f32.mrb[69].mxu0 }
 0x183   : > { %v3543_v38 = vadd.f32 %v3542_v40, %v3541_v42  ;;  %v3607_v51 = vadd.f32 %v3606_v41, %v3605_v34  ;;  %v3544_v50 = vpop.f32.mrb[70].mxu1  ;;  %v3608_v43 = vpop.f32.mrb[70].mxu0 }
 0x184   : > { %v3545_v45 = vpop.f32.mrb[71].mxu1  ;;  %v3609_v61 = vpop.f32.mrb[71].mxu0 }
 0x185   : > { %v4770_v47 = vadd.f32 %v3543_v38, %v1845_v4  ;;  %v4773_v55 = vadd.f32 %v3607_v51, %v4670_v9  ;;  %v3546_v11 = vadd.f32 %v3545_v45, %v3544_v50  ;;  %v3610_v56 = vadd.f32 %v3609_v61, %v3608_v43 }
 0x186   : > { %v1856_v9 = vadd.f32 %v4567_v36, %v4586_v54  ;;  %v1861_v36 = vadd.f32 %v4573_v44, %v4586_v54 }
 0x187   : > { %v4775_v2 = vadd.f32 %v3546_v11, %v1848_v48  ;;  %v4778_v12 = vadd.f32 %v3610_v56, %v4672_v13 }
 0x189   : > { %v3547_v3 = vpop.f32.mrb[72].mxu1  ;;  %v3611_v6 = vpop.f32.mrb[72].mxu0 }
 0x18a   : > { %v3548_v16 = vpop.f32.mrb[73].mxu1  ;;  %v3612_v7 = vpop.f32.mrb[73].mxu0 }
 0x18b   : > { %v3549_v63 = vadd.f32 %v3548_v16, %v3547_v3  ;;  %v3613_v10 = vadd.f32 %v3612_v7, %v3611_v6  ;;  %v3550_v8 = vpop.f32.mrb[74].mxu1  ;;  %v3614_v37 = vpop.f32.mrb[74].mxu0 }
 0x18c   : > { %v3551_v17 = vpop.f32.mrb[75].mxu1  ;;  %v3615_v24 = vpop.f32.mrb[75].mxu0 }
 0x18d   : > { %v4784_v18 = vadd.f32 %v3549_v63, %v1853_v20  ;;  %v4787_v13 = vadd.f32 %v3613_v10, %v4680_v33  ;;  %v3552_v35 = vadd.f32 %v3551_v17, %v3550_v8  ;;  %v3616_v27 = vadd.f32 %v3615_v24, %v3614_v37 }
 0x18e   : > { %v1864_v33 = vadd.f32 %v4579_v52, %v4586_v54 }
 0x18f   : > { %v4789_v22 = vadd.f32 %v3552_v35, %v1856_v9  ;;  %v4792_v28 = vadd.f32 %v3616_v27, %v4684_v53 }
 0x191   : > { %v3553_v42 = vpop.f32.mrb[76].mxu1  ;;  %v3617_v34 = vpop.f32.mrb[76].mxu0 }
 0x192   : > { %v3554_v40 = vpop.f32.mrb[77].mxu1  ;;  %v3618_v41 = vpop.f32.mrb[77].mxu0 }
 0x193   : > { %v3555_v4 = vadd.f32 %v3554_v40, %v3553_v42  ;;  %v3619_v38 = vadd.f32 %v3618_v41, %v3617_v34  ;;  %v3556_v51 = vpop.f32.mrb[78].mxu1  ;;  %v3620_v50 = vpop.f32.mrb[78].mxu0 }
 0x194   : > { %v3557_v43 = vpop.f32.mrb[79].mxu1  ;;  %v3621_v48 = vpop.f32.mrb[79].mxu0 }
 0x195   : > { %v4798_v45 = vadd.f32 %v3555_v4, %v1861_v36  ;;  %v4801_v53 = vadd.f32 %v3619_v38, %v4692_v58  ;;  %v3558_v61 = vadd.f32 %v3557_v43, %v3556_v51  ;;  %v3622_v11 = vadd.f32 %v3621_v48, %v3620_v50 }
 0x197   : > { %v4803_v56 = vadd.f32 %v3558_v61, %v1864_v33  ;;  %v4806_v44 = vadd.f32 %v3622_v11, %v4696_v1 }
 0x199   : > { %v3623_v3 = vpop.f32.mrb[80].mxu0  ;;  %v3687_v6 = vpop.f32.mrb[80].mxu1 }
 0x19a   : > { %v3624_v16 = vpop.f32.mrb[81].mxu0  ;;  %v3688_v7 = vpop.f32.mrb[81].mxu1 }
 0x19b   : > { %v3625_v20 = vadd.f32 %v3624_v16, %v3623_v3  ;;  %v3689_v52 = vadd.f32 %v3688_v7, %v3687_v6  ;;  %v3626_v54 = vpop.f32.mrb[82].mxu0  ;;  %v3690_v63 = vpop.f32.mrb[82].mxu1 }
 0x19c   : > { %v3627_v10 = vpop.f32.mrb[83].mxu0  ;;  %v3691_v8 = vpop.f32.mrb[83].mxu1 }
 0x19d   : > { %v4809_v58 = vadd.f32 %v3625_v20, %v4701_v23  ;;  %v3628_v37 = vadd.f32 %v3627_v10, %v3626_v54  ;;  %v3692_v9 = vadd.f32 %v3691_v8, %v3690_v63  ;;  %v4812_v17 = vadd.f32 %v3689_v52, %v4704_v5 }
 0x19f   : > { %v4815_v1 = vadd.f32 %v3628_v37, %v4706_v39  ;;  %v4818_v24 = vadd.f32 %v3692_v9, %v4709_v32 }
 0x1a1   : > { %v3629_v35 = vpop.f32.mrb[84].mxu0  ;;  %v3693_v27 = vpop.f32.mrb[84].mxu1 }
 0x1a2   : > { %v3630_v42 = vpop.f32.mrb[85].mxu0  ;;  %v3694_v34 = vpop.f32.mrb[85].mxu1 }
 0x1a3   : > { %v3631_v40 = vadd.f32 %v3630_v42, %v3629_v35  ;;  %v3695_v41 = vadd.f32 %v3694_v34, %v3693_v27  ;;  %v3632_v36 = vpop.f32.mrb[86].mxu0  ;;  %v3696_v23 = vpop.f32.mrb[86].mxu1 }
 0x1a4   : > { %v3633_v4 = vpop.f32.mrb[87].mxu0  ;;  %v3697_v38 = vpop.f32.mrb[87].mxu1 }
 0x1a5   : > { %v4821_v51 = vadd.f32 %v3631_v40, %v4714_v0  ;;  %v3634_v5 = vadd.f32 %v3633_v4, %v3632_v36  ;;  %v3698_v50 = vadd.f32 %v3697_v38, %v3696_v23  ;;  %v4824_v39 = vadd.f32 %v3695_v41, %v4717_v62 }
 0x1a7   : > { %v4827_v32 = vadd.f32 %v3634_v5, %v4719_v59  ;;  %v4830_v33 = vadd.f32 %v3698_v50, %v4722_v15 }
 0x1a9   : > { %v3635_v43 = vpop.f32.mrb[88].mxu0  ;;  %v3699_v48 = vpop.f32.mrb[88].mxu1 }
 0x1aa   : > { %v3636_v61 = vpop.f32.mrb[89].mxu0  ;;  %v3700_v11 = vpop.f32.mrb[89].mxu1 }
 0x1ab   : > { %v3637_v3 = vadd.f32 %v3636_v61, %v3635_v43  ;;  %v3701_v6 = vadd.f32 %v3700_v11, %v3699_v48  ;;  %v3638_v16 = vpop.f32.mrb[90].mxu0  ;;  %v3702_v0 = vpop.f32.mrb[90].mxu1 }
 0x1ac   : > { %v3639_v7 = vpop.f32.mrb[91].mxu0  ;;  %v3703_v20 = vpop.f32.mrb[91].mxu1 }
 0x1ad   : > { %v4833_v52 = vadd.f32 %v3637_v3, %v4728_v26  ;;  %v3640_v62 = vadd.f32 %v3639_v7, %v3638_v16  ;;  %v3704_v54 = vadd.f32 %v3703_v20, %v3702_v0  ;;  %v4836_v59 = vadd.f32 %v3701_v6, %v4731_v14 }
 0x1af   : > { %v4839_v15 = vadd.f32 %v3640_v62, %v4733_v31  ;;  %v4842_v63 = vadd.f32 %v3704_v54, %v4736_v25 }
 0x1b1   : > { %v3641_v10 = vpop.f32.mrb[92].mxu0  ;;  %v3705_v8 = vpop.f32.mrb[92].mxu1 }
 0x1b2   : > { %v3642_v37 = vpop.f32.mrb[93].mxu0  ;;  %v3706_v9 = vpop.f32.mrb[93].mxu1 }
 0x1b3   : > { %v3643_v35 = vadd.f32 %v3642_v37, %v3641_v10  ;;  %v3707_v27 = vadd.f32 %v3706_v9, %v3705_v8  ;;  %v3644_v42 = vpop.f32.mrb[94].mxu0  ;;  %v3708_v26 = vpop.f32.mrb[94].mxu1 }
 0x1b4   : > { %v3645_v34 = vpop.f32.mrb[95].mxu0  ;;  %v3709_v40 = vpop.f32.mrb[95].mxu1 }
 0x1b5   : > { %v4845_v41 = vadd.f32 %v3643_v35, %v4742_v21  ;;  %v3646_v14 = vadd.f32 %v3645_v34, %v3644_v42  ;;  %v3710_v36 = vadd.f32 %v3709_v40, %v3708_v26  ;;  %v4848_v31 = vadd.f32 %v3707_v27, %v4745_v30 }
 0x1b7   : > { %v4851_v25 = vadd.f32 %v3646_v14, %v4747_v57  ;;  %v4854_v23 = vadd.f32 %v3710_v36, %v4750_v49 }
 0x1b9   : > { %v3647_v4 = vpop.f32.mrb[96].mxu0  ;;  %v3711_v38 = vpop.f32.mrb[96].mxu1 }
 0x1ba   : > { %v3648_v5 = vpop.f32.mrb[97].mxu0  ;;  %v3712_v50 = vpop.f32.mrb[97].mxu1 }
 0x1bb   : > { %v3649_v43 = vadd.f32 %v3648_v5, %v3647_v4  ;;  %v3713_v48 = vadd.f32 %v3712_v50, %v3711_v38  ;;  %v3650_v61 = vpop.f32.mrb[98].mxu0  ;;  %v3714_v21 = vpop.f32.mrb[98].mxu1 }
 0x1bc   : > { %v3651_v11 = vpop.f32.mrb[99].mxu0  ;;  %v3715_v3 = vpop.f32.mrb[99].mxu1 }
 0x1bd   : > { %v4857_v6 = vadd.f32 %v3649_v43, %v4756_v19  ;;  %v3652_v30 = vadd.f32 %v3651_v11, %v3650_v61  ;;  %v3716_v16 = vadd.f32 %v3715_v3, %v3714_v21  ;;  %v4860_v57 = vadd.f32 %v3713_v48, %v4759_v46 }
 0x1bf   : > { %v4863_v49 = vadd.f32 %v3652_v30, %v4761_v29  ;;  %v4866_v0 = vadd.f32 %v3716_v16, %v4764_v60 }
 0x1c1   : > { %v3653_v7 = vpop.f32.mrb[100].mxu0  ;;  %v3717_v20 = vpop.f32.mrb[100].mxu1 }
 0x1c2   : > { %v3654_v62 = vpop.f32.mrb[101].mxu0  ;;  %v3718_v54 = vpop.f32.mrb[101].mxu1 }
 0x1c3   : > { %v3655_v10 = vadd.f32 %v3654_v62, %v3653_v7  ;;  %v3719_v8 = vadd.f32 %v3718_v54, %v3717_v20  ;;  %v3656_v37 = vpop.f32.mrb[102].mxu0  ;;  %v3720_v19 = vpop.f32.mrb[102].mxu1 }
 0x1c4   : > { %v3657_v9 = vpop.f32.mrb[103].mxu0  ;;  %v3721_v35 = vpop.f32.mrb[103].mxu1 }
 0x1c5   : > { %v4869_v27 = vadd.f32 %v3655_v10, %v4770_v47  ;;  %v3658_v46 = vadd.f32 %v3657_v9, %v3656_v37  ;;  %v3722_v42 = vadd.f32 %v3721_v35, %v3720_v19  ;;  %v4872_v29 = vadd.f32 %v3719_v8, %v4773_v55  ;;  %v3305_v8 = vld [vmem:[%s4898_s5 + $0x8] sm:$0xff]   ;;  %v3162_v19 = vld [vmem:[%s4898_s5] sm:$0xff]  }
 0x1c7   : > { %v4875_v60 = vadd.f32 %v3658_v46, %v4775_v2  ;;  %v4878_v26 = vadd.f32 %v3722_v42, %v4778_v12  ;;  %v3167_v46 = vunpack.c.l.bf16 %v3305_v8 }
 0x1c9   : > { %v3659_v34 = vpop.f32.mrb[104].mxu0  ;;  %v3723_v40 = vpop.f32.mrb[104].mxu1 }
 0x1ca   : > { %v3660_v14 = vpop.f32.mrb[105].mxu0  ;;  %v3724_v36 = vpop.f32.mrb[105].mxu1 }
 0x1cb   : > { %v3661_v4 = vadd.f32 %v3660_v14, %v3659_v34  ;;  %v3725_v38 = vadd.f32 %v3724_v36, %v3723_v40  ;;  %v3662_v47 = vpop.f32.mrb[106].mxu0  ;;  %v3726_v5 = vpop.f32.mrb[106].mxu1  ;;  %v3163_v40 = vunpack.c.l.bf16 %v3162_v19 }
 0x1cc   : > { %v3663_v50 = vpop.f32.mrb[107].mxu0  ;;  %v3727_v43 = vpop.f32.mrb[107].mxu1 }
 0x1cd   : > { %v4881_v55 = vadd.f32 %v3661_v4, %v4784_v18  ;;  %v3664_v2 = vadd.f32 %v3663_v50, %v3662_v47  ;;  %v3728_v48 = vadd.f32 %v3727_v43, %v3726_v5  ;;  %v4884_v12 = vadd.f32 %v3725_v38, %v4787_v13 }
 0x1ce   : > { %v3168_v4 = vunpack.c.h.bf16 %v3305_v8  ;;  %v3164_v5 = vunpack.c.h.bf16 %v3162_v19 }
 0x1cf   : > { %v4887_v61 = vadd.f32 %v3664_v2, %v4789_v22  ;;  %v4891_v21 = vadd.f32 %v3728_v48, %v4792_v28 }
 0x1d1   : > { %v3665_v11 = vpop.f32.mrb[108].mxu0  ;;  %v3729_v3 = vpop.f32.mrb[108].mxu1 }
 0x1d2   : > { %v3666_v30 = vpop.f32.mrb[109].mxu0  ;;  %v3730_v16 = vpop.f32.mrb[109].mxu1 }
 0x1d3   : > { %v3667_v18 = vadd.f32 %v3666_v30, %v3665_v11  ;;  %v3731_v13 = vadd.f32 %v3730_v16, %v3729_v3  ;;  %v3668_v22 = vpop.f32.mrb[110].mxu0  ;;  %v3732_v7 = vpop.f32.mrb[110].mxu1  ;;  %v3307_v3 = vld [vmem:[%s4898_s5 + $0x18] sm:$0xff]  }
 0x1d4   : > { %v3669_v20 = vpop.f32.mrb[111].mxu0  ;;  %v3733_v62 = vpop.f32.mrb[111].mxu1 }
 0x1d5   : > { %v4901_v28 = vadd.f32 %v3667_v18, %v4798_v45  ;;  %v3670_v54 = vadd.f32 %v3669_v20, %v3668_v22  ;;  %v3734_v10 = vadd.f32 %v3733_v62, %v3732_v7  ;;  %v4905_v37 = vadd.f32 %v3731_v13, %v4801_v53  ;;  %v3306_v18 = vld [vmem:[%s4898_s5 + $0x10] sm:$0xff]  }
 0x1d7   : > { %v4909_v9 = vadd.f32 %v3670_v54, %v4803_v56  ;;  %v4912_v35 = vadd.f32 %v3734_v10, %v4806_v44  ;;  %v3171_v54 = vunpack.c.l.bf16 %v3306_v18 }
 0x1d9   : > { %v3735_v42 = vpop.f32.mrb[112].mxu1  ;;  %v3825_v34 = vpop.f32.mrb[112].mxu0 }
 0x1da   : > { %v2393_v45 = vadd.f32 %v3825_v34, %v4824_v39  ;;  %v3736_v14 = vpop.f32.mrb[113].mxu1  ;;  %v2384_v36 = vpop.f32.mrb[113].mxu0 }
 0x1db   : > { %v3737_v53 = vadd.f32 %v3736_v14, %v3735_v42  ;;  %v2385_v38 = vadd.f32 %v2384_v36, %v4812_v17  ;;  %v3738_v47 = vpop.f32.mrb[114].mxu1  ;;  %v3826_v56 = vpop.f32.mrb[114].mxu0  ;;  %v3172_v36 = vunpack.c.h.bf16 %v3306_v18 }
 0x1dc   : > { %v2577_v50 = vadd.f32 %v3167_v46, %v2393_v45  ;;  %v2396_v44 = vadd.f32 %v3826_v56, %v4830_v33  ;;  %v3739_v43 = vpop.f32.mrb[115].mxu1  ;;  %v2387_v2 = vpop.f32.mrb[115].mxu0  ;;  %v3175_v33 = vunpack.c.l.bf16 %v3307_v3  ;;  %v3176_v46 = vunpack.c.h.bf16 %v3307_v3 }
 0x1dd   : > { %v2575_v48 = vadd.f32 %v3163_v40, %v2385_v38  ;;  %v3740_v11 = vadd.f32 %v3739_v43, %v3738_v47  ;;  %v2388_v39 = vadd.f32 %v2387_v2, %v4818_v24  ;;  %v4920_v30 = vadd.f32 %v3737_v53, %v4809_v58  ;;  %v3308_v43 = vld [vmem:[%s4898_s5 + $0x20] sm:$0xff]  }
 0x1de   : > { %v2578_v16 = vadd.f32 %v3168_v4, %v2396_v44  ;;  %v2609_v22 = vmax.f32 %v2577_v50, 0.0  ;;  %v3309_v50 = vld [vmem:[%s4898_s5 + $0x28] sm:$0xff]  }
 0x1df   : > { %v2576_v17 = vadd.f32 %v3164_v5, %v2388_v39  ;;  %v4924_v13 = vadd.f32 %v3740_v11, %v4815_v1  ;;  %v2607_v20 = vmax.f32 %v2575_v48, 0.0 }
 0x1e0   : > { %v2610_v7 = vmax.f32 %v2578_v16, 0.0 }
 0x1e1   : > { %v2608_v24 = vmax.f32 %v2576_v17, 0.0  ;;  %v3741_v58 = vpop.f32.mrb[116].mxu1  ;;  %v3829_v62 = vpop.f32.mrb[116].mxu0 }
 0x1e2   : > { %v3233_v10 = vpack.c.bf16 %v2610_v7, %v2609_v22  ;;  %v2409_v1 = vadd.f32 %v3829_v62, %v4848_v31  ;;  %v3742_v8 = vpop.f32.mrb[117].mxu1  ;;  %v2400_v19 = vpop.f32.mrb[117].mxu0  ;;  %v3179_v22 = vunpack.c.l.bf16 %v3308_v43 }
 0x1e3   : > { %v3228_v42 = vpack.c.bf16 %v2608_v24, %v2607_v20  ;;  %v3743_v34 = vadd.f32 %v3742_v8, %v3741_v58  ;;  %v2401_v40 = vadd.f32 %v2400_v19, %v4836_v59  ;;  %v3744_v45 = vpop.f32.mrb[118].mxu1  ;;  %v3830_v14 = vpop.f32.mrb[118].mxu0  ;;  %v3184_v20 = vunpack.c.h.bf16 %v3309_v50 }
 0x1e4   : > { %3320 = vst [vmem:[%s4931_s8 + $0x8] sm:$0xff] %v3233_v10   ;;  %v2581_v4 = vadd.f32 %v3175_v33, %v2409_v1  ;;  %v2412_v53 = vadd.f32 %v3830_v14, %v4854_v23  ;;  %v3745_v38 = vpop.f32.mrb[119].mxu1  ;;  %v2403_v47 = vpop.f32.mrb[119].mxu0  ;;  %v3183_v23 = vunpack.c.l.bf16 %v3309_v50  ;;  %v3180_v10 = vunpack.c.h.bf16 %v3308_v43  ;;  %v3310_v14 = vld [vmem:[%s4898_s5 + $0x30] sm:$0xff]  }
 0x1e5   : > { %3229 = vst [vmem:[%s4931_s8] sm:$0xff] %v3228_v42   ;;  %v2579_v31 = vadd.f32 %v3171_v54, %v2401_v40  ;;  %v3746_v56 = vadd.f32 %v3745_v38, %v3744_v45  ;;  %v2404_v5 = vadd.f32 %v2403_v47, %v4842_v63  ;;  %v4941_v44 = vadd.f32 %v3743_v34, %v4821_v51  ;;  %v3311_v40 = vld [vmem:[%s4898_s5 + $0x38] sm:$0xff]  }
 0x1e6   : > { %v2582_v59 = vadd.f32 %v3176_v46, %v2412_v53  ;;  %v2613_v11 = vmax.f32 %v2581_v4, 0.0  ;;  %v3187_v50 = vunpack.c.l.bf16 %v3310_v14 }
 0x1e7   : > { %v2580_v2 = vadd.f32 %v3172_v36, %v2404_v5  ;;  %v4945_v48 = vadd.f32 %v3746_v56, %v4827_v32  ;;  %v2611_v3 = vmax.f32 %v2579_v31, 0.0 }
 0x1e8   : > { %v2614_v39 = vmax.f32 %v2582_v59, 0.0 }
 0x1e9   : > { %v2612_v16 = vmax.f32 %v2580_v2, 0.0  ;;  %v3747_v18 = vpop.f32.mrb[120].mxu1  ;;  %v3833_v17 = vpop.f32.mrb[120].mxu0  ;;  %v3192_v2 = vunpack.c.h.bf16 %v3311_v40 }
 0x1ea   : > { %v3243_v63 = vpack.c.bf16 %v2614_v39, %v2613_v11  ;;  %v2425_v51 = vadd.f32 %v3833_v17, %v4872_v29  ;;  %v3748_v7 = vpop.f32.mrb[121].mxu1  ;;  %v2416_v33 = vpop.f32.mrb[121].mxu0 }
 0x1eb   : > { %v3238_v24 = vpack.c.bf16 %v2612_v16, %v2611_v3  ;;  %v3749_v32 = vadd.f32 %v3748_v7, %v3747_v18  ;;  %v2417_v58 = vadd.f32 %v2416_v33, %v4860_v57  ;;  %v3750_v62 = vpop.f32.mrb[122].mxu1  ;;  %v3834_v54 = vpop.f32.mrb[122].mxu0  ;;  %v3188_v16 = vunpack.c.h.bf16 %v3310_v14  ;;  %v3313_v33 = vld [vmem:[%s4898_s5 + $0x48] sm:$0xff]  }
 0x1ec   : > { %3322 = vst [vmem:[%s4931_s8 + $0x18] sm:$0xff] %v3243_v63   ;;  %v2585_v1 = vadd.f32 %v3183_v23, %v2425_v51  ;;  %v2428_v8 = vadd.f32 %v3834_v54, %v4878_v26  ;;  %v3751_v19 = vpop.f32.mrb[123].mxu1  ;;  %v2419_v46 = vpop.f32.mrb[123].mxu0  ;;  %v3191_v26 = vunpack.c.l.bf16 %v3311_v40 }
 0x1ed   : > { %3321 = vst [vmem:[%s4931_s8 + $0x10] sm:$0xff] %v3238_v24   ;;  %v2583_v29 = vadd.f32 %v3179_v22, %v2417_v58  ;;  %v3752_v42 = vadd.f32 %v3751_v19, %v3750_v62  ;;  %v2420_v34 = vadd.f32 %v2419_v46, %v4866_v0  ;;  %v4955_v45 = vadd.f32 %v3749_v32, %v4833_v52 }
 0x1ee   : > { %v2586_v57 = vadd.f32 %v3184_v20, %v2428_v8  ;;  %v2617_v53 = vmax.f32 %v2585_v1, 0.0 }
 0x1ef   : > { %v2584_v36 = vadd.f32 %v3180_v10, %v2420_v34  ;;  %v4959_v4 = vadd.f32 %v3752_v42, %v4839_v15  ;;  %v2615_v47 = vmax.f32 %v2583_v29, 0.0  ;;  %v3199_v10 = vunpack.c.l.bf16 %v3313_v33 }
 0x1f0   : > { %v2618_v38 = vmax.f32 %v2586_v57, 0.0  ;;  %v3200_v34 = vunpack.c.h.bf16 %v3313_v33 }
 0x1f1   : > { %v2616_v31 = vmax.f32 %v2584_v36, 0.0  ;;  %v3753_v56 = vpop.f32.mrb[124].mxu1  ;;  %v3837_v5 = vpop.f32.mrb[124].mxu0 }
 0x1f2   : > { %v3253_v0 = vpack.c.bf16 %v2618_v38, %v2617_v53  ;;  %v2441_v52 = vadd.f32 %v3837_v5, %v4905_v37  ;;  %v3754_v59 = vpop.f32.mrb[125].mxu1  ;;  %v2432_v43 = vpop.f32.mrb[125].mxu0 }
 0x1f3   : > { %v3248_v11 = vpack.c.bf16 %v2616_v31, %v2615_v47  ;;  %v3755_v15 = vadd.f32 %v3754_v59, %v3753_v56  ;;  %v2433_v39 = vadd.f32 %v2432_v43, %v4884_v12  ;;  %v3756_v23 = vpop.f32.mrb[126].mxu1  ;;  %v3838_v3 = vpop.f32.mrb[126].mxu0  ;;  %v3312_v12 = vld [vmem:[%s4898_s5 + $0x40] sm:$0xff]  }
 0x1f4   : > { %3324 = vst [vmem:[%s4931_s8 + $0x28] sm:$0xff] %v3253_v0   ;;  %v2589_v18 = vadd.f32 %v3191_v26, %v2441_v52  ;;  %v2444_v17 = vadd.f32 %v3838_v3, %v4912_v35  ;;  %v3757_v22 = vpop.f32.mrb[127].mxu1  ;;  %v2435_v63 = vpop.f32.mrb[127].mxu0  ;;  %v3195_v46 = vunpack.c.l.bf16 %v3312_v12  ;;  %v3196_v53 = vunpack.c.h.bf16 %v3312_v12 }
 0x1f5   : > { %3323 = vst [vmem:[%s4931_s8 + $0x20] sm:$0xff] %v3248_v11   ;;  %v2587_v37 = vadd.f32 %v3187_v50, %v2433_v39  ;;  %v3758_v51 = vadd.f32 %v3757_v22, %v3756_v23  ;;  %v2436_v7 = vadd.f32 %v2435_v63, %v4891_v21  ;;  %v2312_v20 = vadd.f32 %v3755_v15, %v4845_v41  ;;  %v3315_v50 = vld [vmem:[%s4898_s5 + $0x58] sm:$0xff]  }
 0x1f6   : > { %v2590_v24 = vadd.f32 %v3192_v2, %v2444_v17  ;;  %v2621_v62 = vmax.f32 %v2589_v18, 0.0  ;;  %v3207_v15 = vunpack.c.l.bf16 %v3315_v50 }
 0x1f7   : > { %v2588_v32 = vadd.f32 %v3188_v16, %v2436_v7  ;;  %v2315_v58 = vadd.f32 %v3758_v51, %v4851_v25  ;;  %v2619_v1 = vmax.f32 %v2587_v37, 0.0 }
 0x1f8   : > { %v2622_v54 = vmax.f32 %v2590_v24, 0.0 }
 0x1f9   : > { %v2620_v35 = vmax.f32 %v2588_v32, 0.0  ;;  %v3759_v8 = vpop.f32.mrb[128].mxu1  ;;  %v3841_v19 = vpop.f32.mrb[128].mxu0 }
 0x1fa   : > { %v3263_v29 = vpack.c.bf16 %v2622_v54, %v2621_v62  ;;  %v2457_v21 = vadd.f32 %v3841_v19, %v4941_v44  ;;  %v3760_v42 = vpop.f32.mrb[129].mxu1  ;;  %v2448_v41 = vpop.f32.mrb[129].mxu0  ;;  %v3316_v19 = vld [vmem:[%s4898_s5 + $0x60] sm:$0xff]  }
 0x1fb   : > { %v3258_v40 = vpack.c.bf16 %v2620_v35, %v2619_v1  ;;  %v3761_v57 = vadd.f32 %v3760_v42, %v3759_v8  ;;  %v2449_v25 = vadd.f32 %v2448_v41, %v4920_v30  ;;  %v3762_v14 = vpop.f32.mrb[130].mxu1  ;;  %v3842_v36 = vpop.f32.mrb[130].mxu0  ;;  %v3314_v30 = vld [vmem:[%s4898_s5 + $0x50] sm:$0xff]   ;;  %v3317_v35 = vld [vmem:[%s4898_s5 + $0x68] sm:$0xff]  }
 0x1fc   : > { %3326 = vst [vmem:[%s4931_s8 + $0x38] sm:$0xff] %v3263_v29   ;;  %v2593_v38 = vadd.f32 %v3199_v10, %v2457_v21  ;;  %v2460_v26 = vadd.f32 %v3842_v36, %v4945_v48  ;;  %v3763_v47 = vpop.f32.mrb[131].mxu1  ;;  %v2451_v31 = vpop.f32.mrb[131].mxu0  ;;  %v3203_v16 = vunpack.c.l.bf16 %v3314_v30  ;;  %v3204_v33 = vunpack.c.h.bf16 %v3314_v30 }
 0x1fd   : > { %3325 = vst [vmem:[%s4931_s8 + $0x30] sm:$0xff] %v3258_v40   ;;  %v2591_v44 = vadd.f32 %v3195_v46, %v2449_v25  ;;  %v3764_v56 = vadd.f32 %v3763_v47, %v3762_v14  ;;  %v2452_v5 = vadd.f32 %v2451_v31, %v4924_v13  ;;  %v2320_v0 = vadd.f32 %v3761_v57, %v4857_v6 }
 0x1fe   : > { %v2594_v52 = vadd.f32 %v3200_v34, %v2460_v26  ;;  %v2625_v2 = vmax.f32 %v2593_v38, 0.0  ;;  %v3208_v6 = vunpack.c.h.bf16 %v3315_v50  ;;  %v3215_v42 = vunpack.c.l.bf16 %v3317_v35 }
 0x1ff   : > { %v2592_v59 = vadd.f32 %v3196_v53, %v2452_v5  ;;  %v2323_v43 = vadd.f32 %v3764_v56, %v4863_v49  ;;  %v2623_v39 = vmax.f32 %v2591_v44, 0.0  ;;  %v3211_v57 = vunpack.c.l.bf16 %v3316_v19 }
 0x200   : > { %v2626_v11 = vmax.f32 %v2594_v52, 0.0  ;;  %v3216_v36 = vunpack.c.h.bf16 %v3317_v35  ;;  %v3212_v31 = vunpack.c.h.bf16 %v3316_v19 }
 0x201   : > { %v2624_v48 = vmax.f32 %v2592_v59, 0.0  ;;  %v3765_v23 = vpop.f32.mrb[132].mxu1  ;;  %v3845_v3 = vpop.f32.mrb[132].mxu0 }
 0x202   : > { %v3273_v18 = vpack.c.bf16 %v2626_v11, %v2625_v2  ;;  %v2473_v13 = vadd.f32 %v3845_v3, %v2312_v20  ;;  %v3766_v17 = vpop.f32.mrb[133].mxu1  ;;  %v2464_v22 = vpop.f32.mrb[133].mxu0 }
 0x203   : > { %v3268_v63 = vpack.c.bf16 %v2624_v48, %v2623_v39  ;;  %v3767_v37 = vadd.f32 %v3766_v17, %v3765_v23  ;;  %v2465_v49 = vadd.f32 %v2464_v22, %v4955_v45  ;;  %v3768_v51 = vpop.f32.mrb[134].mxu1  ;;  %v3846_v7 = vpop.f32.mrb[134].mxu0  ;;  %v3319_v17 = vld [vmem:[%s4898_s5 + $0x78] sm:$0xff]  }
 0x204   : > { %3328 = vst [vmem:[%s4931_s8 + $0x48] sm:$0xff] %v3273_v18   ;;  %v2597_v24 = vadd.f32 %v3207_v15, %v2473_v13  ;;  %v2476_v12 = vadd.f32 %v3846_v7, %v2315_v58  ;;  %v3769_v32 = vpop.f32.mrb[135].mxu1  ;;  %v2467_v62 = vpop.f32.mrb[135].mxu0  ;;  %v3318_v15 = vld [vmem:[%s4898_s5 + $0x70] sm:$0xff]   ;;  %v3224_v35 = vunpack.c.h.bf16 %v3319_v17 }
 0x205   : > { %3327 = vst [vmem:[%s4931_s8 + $0x40] sm:$0xff] %v3268_v63   ;;  %v2595_v54 = vadd.f32 %v3203_v16, %v2465_v49  ;;  %v3770_v20 = vadd.f32 %v3769_v32, %v3768_v51  ;;  %v2468_v10 = vadd.f32 %v2467_v62, %v4959_v4  ;;  %v2328_v1 = vadd.f32 %v3767_v37, %v4869_v27 }
 0x206   : > { %v2598_v8 = vadd.f32 %v3208_v6, %v2476_v12  ;;  %v2629_v29 = vmax.f32 %v2597_v24, 0.0  ;;  %v3219_v22 = vunpack.c.l.bf16 %v3318_v15 }
 0x207   : > { %v2596_v45 = vadd.f32 %v3204_v33, %v2468_v10  ;;  %v2331_v46 = vadd.f32 %v3770_v20, %v4875_v60  ;;  %v2627_v41 = vmax.f32 %v2595_v54, 0.0  ;;  %v3220_v33 = vunpack.c.h.bf16 %v3318_v15 }
 0x208   : > { %v2630_v21 = vmax.f32 %v2598_v8, 0.0 }
 0x209   : > { %v2628_v58 = vmax.f32 %v2596_v45, 0.0  ;;  %v3771_v34 = vpop.f32.mrb[136].mxu1  ;;  %v3849_v40 = vpop.f32.mrb[136].mxu0 }
 0x20a   : > { %v3283_v25 = vpack.c.bf16 %v2630_v21, %v2629_v29  ;;  %v2489_v4 = vadd.f32 %v3849_v40, %v2328_v1  ;;  %v3772_v14 = vpop.f32.mrb[137].mxu1  ;;  %v2480_v27 = vpop.f32.mrb[137].mxu0 }
 0x20b   : > { %v3278_v53 = vpack.c.bf16 %v2628_v58, %v2627_v41  ;;  %v3773_v38 = vadd.f32 %v3772_v14, %v3771_v34  ;;  %v2481_v26 = vadd.f32 %v2480_v27, %v2320_v0  ;;  %v3774_v60 = vpop.f32.mrb[138].mxu1  ;;  %v3850_v47 = vpop.f32.mrb[138].mxu0 }
 0x20c   : > { %3330 = vst [vmem:[%s4931_s8 + $0x58] sm:$0xff] %v3283_v25   ;;  %v2601_v44 = vadd.f32 %v3215_v42, %v2489_v4  ;;  %v2492_v56 = vadd.f32 %v3850_v47, %v2331_v46  ;;  %v3775_v5 = vpop.f32.mrb[139].mxu1  ;;  %v2483_v50 = vpop.f32.mrb[139].mxu0 }
 0x20d   : > { %3329 = vst [vmem:[%s4931_s8 + $0x50] sm:$0xff] %v3278_v53   ;;  %v2599_v52 = vadd.f32 %v3211_v57, %v2481_v26  ;;  %v3776_v30 = vadd.f32 %v3775_v5, %v3774_v60  ;;  %v2484_v59 = vadd.f32 %v2483_v50, %v2323_v43  ;;  %v2336_v2 = vadd.f32 %v3773_v38, %v4881_v55 }
 0x20e   : > { %v2602_v11 = vadd.f32 %v3216_v36, %v2492_v56  ;;  %v2633_v48 = vmax.f32 %v2601_v44, 0.0 }
 0x20f   : > { %v2600_v39 = vadd.f32 %v3212_v31, %v2484_v59  ;;  %v2339_v0 = vadd.f32 %v3776_v30, %v4887_v61  ;;  %v2631_v3 = vmax.f32 %v2599_v52, 0.0  ;;  %v3223_v61 = vunpack.c.l.bf16 %v3319_v17 }
 0x210   : > { %v2634_v23 = vmax.f32 %v2602_v11, 0.0 }
 0x211   : > { %v2632_v16 = vmax.f32 %v2600_v39, 0.0  ;;  %v3777_v18 = vpop.f32.mrb[140].mxu1  ;;  %v3853_v13 = vpop.f32.mrb[140].mxu0 }
 0x212   : > { %v3293_v6 = vpack.c.bf16 %v2634_v23, %v2633_v48  ;;  %v3778_v63 = vpop.f32.mrb[141].mxu1  ;;  %v2496_v43 = vpop.f32.mrb[141].mxu0 }
 0x213   : > { %v3288_v37 = vpack.c.bf16 %v2632_v16, %v2631_v3  ;;  %v3779_v55 = vadd.f32 %v3778_v63, %v3777_v18  ;;  %v2497_v49 = vadd.f32 %v2496_v43, %v2336_v2  ;;  %v3780_v51 = vpop.f32.mrb[142].mxu1  ;;  %v3854_v7 = vpop.f32.mrb[142].mxu0 }
 0x214   : > { %3332 = vst [vmem:[%s4931_s8 + $0x68] sm:$0xff] %v3293_v6   ;;  %v3781_v24 = vpop.f32.mrb[143].mxu1  ;;  %v2499_v12 = vpop.f32.mrb[143].mxu0 }
 0x215   : > { %3331 = vst [vmem:[%s4931_s8 + $0x60] sm:$0xff] %v3288_v37   ;;  %v2344_v32 = vadd.f32 %v3779_v55, %v4901_v28  ;;  %v2603_v62 = vadd.f32 %v3219_v22, %v2497_v49  ;;  %v3782_v54 = vadd.f32 %v3781_v24, %v3780_v51  ;;  %v2500_v20 = vadd.f32 %v2499_v12, %v2339_v0 }
 0x217   : > { %v2505_v10 = vadd.f32 %v3853_v13, %v2344_v32  ;;  %v2347_v1 = vadd.f32 %v3782_v54, %v4909_v9  ;;  %v2604_v8 = vadd.f32 %v3220_v33, %v2500_v20  ;;  %v2635_v45 = vmax.f32 %v2603_v62, 0.0 }
 0x219   : > { %v2605_v19 = vadd.f32 %v3223_v61, %v2505_v10  ;;  %v2508_v46 = vadd.f32 %v3854_v7, %v2347_v1  ;;  %v2636_v29 = vmax.f32 %v2604_v8, 0.0 }
 0x21b   : > { %v2606_v21 = vadd.f32 %v3224_v35, %v2508_v46  ;;  %v3298_v42 = vpack.c.bf16 %v2636_v29, %v2635_v45  ;;  %v2637_v41 = vmax.f32 %v2605_v19, 0.0 }
 0x21d   : > { %v2638_v58 = vmax.f32 %v2606_v21, 0.0  ;;  %3333 = vst [vmem:[%s4931_s8 + $0x70] sm:$0xff] %v3298_v42  }
 0x21f   : > { %v3303_v28 = vpack.c.bf16 %v2638_v58, %v2637_v41 }
 0x221   : > { %3334 = vst [vmem:[%s4931_s8 + $0x78] sm:$0xff] %v3303_v28  }
 0x222 PF: > { %s14_s15 = sadd.s32 1, %s4166_s15  }
 0x223   : > { %p11_p4 = scmp.ge.s32.totalorder %s14_s15, 4  }
 0x225   :  { %13 = sbr.rel (!%p11_p4) target bundleno = 1 (0x1), region = 69 }

// kernel: resnet_image_encoder_forward.15
= control target key start
LH: loop header
LB: loop body
LE: loop exit
PB: predicated region body
PF: predicated region fallthrough
CT: control target
= control target key end

     0   :  { %s2541_s15 = smov 0   ;;  %s3084_s0 = inlined_call_operand.vmem [shape: bf16[128,1152], index: 0, kind: input, shape index: {}]   ;;  %s3085_s1 = inlined_call_operand.vmem [shape: bf16[1152,256], index: 1, kind: input, shape index: {}]   ;;  %s3086_s2 = inlined_call_operand.vmem [shape: f32[1,256], index: 2, kind: input, shape index: {}]   ;;  %s3087_s3 = inlined_call_operand.vmem [shape: bf16[128,128], index: 3, kind: output, shape index: {0}]   ;;  %s3088_s4 = inlined_call_operand.vmem [shape: bf16[128,128], index: 4, kind: output, shape index: {1}]  }
   0x1 LB: > { %s1862_s16 = sadd.s32 4294967295, %s2513_s15   ;;  %p1866_p0 = scmp.ge.s32.totalorder %s2513_s15, 1  ;;  %s2513_s15 = sphi %s2541_s15, %s15_s15  }
   0x2   : > { %p167_p1 = scmp.lt.s32.totalorder %s2513_s15, 3 }
   0x4   : > { %p168_p2 = pnand %p1866_p0, %p167_p1 }
   0x5   : > { %v2239_v0 = vld [vmem:[%s3085_s1 + $0x4] ss:$8 sps:$4 sm:$0xff] (!%p168_p2)   ;;  %v2243_v2 = vld [vmem:[%s3085_s1] ss:$8 sps:$4 sm:$0xff] (!%p168_p2)   ;;  %v2245_v4 = vld [vmem:[%s3085_s1 + $0x14] ss:$8 sps:$4 sm:$0xff] (!%p168_p2)  }
   0x6   : > { %171 = sbr.rel (%p168_p2) target bundleno = 396 (0x18c), region = 32  ;;  %v2241_v1 = vld [vmem:[%s3085_s1 + $0x204] ss:$8 sps:$4 sm:$0xff] (!%p168_p2)   ;;  %1319 = vmatprep.subr.bf16.mxu1 (!%p168_p2), %v2239_v0  ;;  %v2244_v3 = vld [vmem:[%s3085_s1 + $0x200] ss:$8 sps:$4 sm:$0xff] (!%p168_p2)   ;;  %s1867_s29 = sshll.u32 (!%p168_p2), %s1862_s16, 3 }
   0x7   : > { %1465 = vmatprep.subr.bf16.mxu0 (!%p168_p2), %v2241_v1  ;;  %1320 = vmatpush1.bf16.msra.mxu1 (!%p168_p2), %v2243_v2  ;;  %v2247_v5 = vld [vmem:[%s3085_s1 + $0x214] ss:$8 sps:$4 sm:$0xff] (!%p168_p2)   ;;  %v2249_v6 = vld [vmem:[%s3085_s1 + $0x10] ss:$8 sps:$4 sm:$0xff] (!%p168_p2)   ;;  %v2251_v8 = vld [vmem:[%s3085_s1 + $0x24] ss:$8 sps:$4 sm:$0xff] (!%p168_p2)  }
   0x8   : > { %1466 = vmatpush1.bf16.msra.mxu0 (!%p168_p2), %v2244_v3  ;;  %1321 = vmatprep.subr.bf16.mxu1 (!%p168_p2), %v2245_v4  ;;  %v2250_v7 = vld [vmem:[%s3085_s1 + $0x210] ss:$8 sps:$4 sm:$0xff] (!%p168_p2)   ;;  %v2253_v9 = vld [vmem:[%s3085_s1 + $0x224] ss:$8 sps:$4 sm:$0xff] (!%p168_p2)   ;;  %v2255_v10 = vld [vmem:[%s3085_s1 + $0x20] ss:$8 sps:$4 sm:$0xff] (!%p168_p2)  }
   0x9   : > { %1467 = vmatprep.subr.bf16.mxu0 (!%p168_p2), %v2247_v5  ;;  %v2256_v11 = vld [vmem:[%s3085_s1 + $0x220] ss:$8 sps:$4 sm:$0xff] (!%p168_p2)   ;;  %v2257_v12 = vld [vmem:[%s3085_s1 + $0x34] ss:$8 sps:$4 sm:$0xff] (!%p168_p2)   ;;  %v2261_v14 = vld [vmem:[%s3085_s1 + $0x30] ss:$8 sps:$4 sm:$0xff] (!%p168_p2)  }
   0xa   : > { %v2259_v13 = vld [vmem:[%s3085_s1 + $0x234] ss:$8 sps:$4 sm:$0xff] (!%p168_p2)   ;;  %v2262_v15 = vld [vmem:[%s3085_s1 + $0x230] ss:$8 sps:$4 sm:$0xff] (!%p168_p2)   ;;  %v2263_v16 = vld [vmem:[%s3085_s1 + $0x44] ss:$8 sps:$4 sm:$0xff] (!%p168_p2)  }
   0xb   : > { %1322 = vmatpush1.bf16.msra.mxu1 (!%p168_p2), %v2249_v6  ;;  %v2265_v17 = vld [vmem:[%s3085_s1 + $0x244] ss:$8 sps:$4 sm:$0xff] (!%p168_p2)   ;;  %v2267_v18 = vld [vmem:[%s3085_s1 + $0x40] ss:$8 sps:$4 sm:$0xff] (!%p168_p2)   ;;  %v2269_v20 = vld [vmem:[%s3085_s1 + $0x54] ss:$8 sps:$4 sm:$0xff] (!%p168_p2)  }
   0xc   : > { %1468 = vmatpush1.bf16.msra.mxu0 (!%p168_p2), %v2250_v7  ;;  %1323 = vmatprep.subr.bf16.mxu1 (!%p168_p2), %v2251_v8  ;;  %v2268_v19 = vld [vmem:[%s3085_s1 + $0x240] ss:$8 sps:$4 sm:$0xff] (!%p168_p2)   ;;  %v2271_v21 = vld [vmem:[%s3085_s1 + $0x254] ss:$8 sps:$4 sm:$0xff] (!%p168_p2)   ;;  %v2273_v22 = vld [vmem:[%s3085_s1 + $0x50] ss:$8 sps:$4 sm:$0xff] (!%p168_p2)  }
   0xd   : > { %1469 = vmatprep.subr.bf16.mxu0 %v2253_v9  ;;  %v2274_v23 = vld [vmem:[%s3085_s1 + $0x250] ss:$8 sps:$4 sm:$0xff]   ;;  %v2275_v24 = vld [vmem:[%s3085_s1 + $0x64] ss:$8 sps:$4 sm:$0xff]   ;;  %v2279_v26 = vld [vmem:[%s3085_s1 + $0x60] ss:$8 sps:$4 sm:$0xff]  }
   0xe   : > { %v2277_v25 = vld [vmem:[%s3085_s1 + $0x264] ss:$8 sps:$4 sm:$0xff]   ;;  %v2280_v27 = vld [vmem:[%s3085_s1 + $0x260] ss:$8 sps:$4 sm:$0xff]   ;;  %v2281_v28 = vld [vmem:[%s3085_s1 + $0x74] ss:$8 sps:$4 sm:$0xff]  }
   0xf   : > { %1324 = vmatpush1.bf16.msra.mxu1 %v2255_v10  ;;  %v2283_v29 = vld [vmem:[%s3085_s1 + $0x274] ss:$8 sps:$4 sm:$0xff]   ;;  %v2285_v30 = vld [vmem:[%s3085_s1 + $0x70] ss:$8 sps:$4 sm:$0xff]   ;;  %v2287_v32 = vld [vmem:[%s3085_s1 + $0x84] ss:$8 sps:$4 sm:$0xff]  }
  0x10   : > { %1470 = vmatpush1.bf16.msra.mxu0 %v2256_v11  ;;  %1325 = vmatprep.subr.bf16.mxu1 %v2257_v12  ;;  %v2286_v31 = vld [vmem:[%s3085_s1 + $0x270] ss:$8 sps:$4 sm:$0xff]   ;;  %p200_p3 = scmp.lt.s32.totalorder %s1867_s29, 15  ;;  %v2289_v33 = vld [vmem:[%s3085_s1 + $0x284] ss:$8 sps:$4 sm:$0xff]  }
  0x11   : > { %1471 = vmatprep.subr.bf16.mxu0 %v2259_v13  ;;  %v2291_v34 = vld [vmem:[%s3085_s1 + $0x80] ss:$8 sps:$4 sm:$0xff]   ;;  %v2293_v36 = vld [vmem:[%s3085_s1 + $0x94] ss:$8 sps:$4 sm:$0xff]   ;;  %v2297_v38 = vld [vmem:[%s3085_s1 + $0x90] ss:$8 sps:$4 sm:$0xff]  }
  0x12   : > { %v2292_v35 = vld [vmem:[%s3085_s1 + $0x280] ss:$8 sps:$4 sm:$0xff]   ;;  %s3090_s29 = smov (!%p200_p3, %s1867_s29), 15  ;;  %v2295_v37 = vld [vmem:[%s3085_s1 + $0x294] ss:$8 sps:$4 sm:$0xff]  }
  0x13   : > { %1326 = vmatpush1.bf16.msra.mxu1 %v2261_v14  ;;  %v2298_v39 = vld [vmem:[%s3085_s1 + $0x290] ss:$8 sps:$4 sm:$0xff]   ;;  %v2299_v40 = vld [vmem:[%s3085_s1 + $0xa4] ss:$8 sps:$4 sm:$0xff]   ;;  %s2229_s27 = smul.u32 36, %s3090_s29 }
  0x14   : > { %1472 = vmatpush1.bf16.msra.mxu0 %v2262_v15  ;;  %1327 = vmatprep.subr.bf16.mxu1 %v2263_v16  ;;  %v2301_v41 = vld [vmem:[%s3085_s1 + $0x2a4] ss:$8 sps:$4 sm:$0xff]   ;;  %v2303_v42 = vld [vmem:[%s3085_s1 + $0xa0] ss:$8 sps:$4 sm:$0xff]   ;;  %v2305_v44 = vld [vmem:[%s3085_s1 + $0xb4] ss:$8 sps:$4 sm:$0xff]  }
  0x15   : > { %1473 = vmatprep.subr.bf16.mxu0 %v2265_v17  ;;  %v2304_v43 = vld [vmem:[%s3085_s1 + $0x2a0] ss:$8 sps:$4 sm:$0xff]   ;;  %s2692_s12 = scalar_lea.vmem %s3084_s0, %s2229_s27  ;;  %v2307_v45 = vld [vmem:[%s3085_s1 + $0x2b4] ss:$8 sps:$4 sm:$0xff]   ;;  %v2309_v46 = vld [vmem:[%s3085_s1 + $0xb0] ss:$8 sps:$4 sm:$0xff]  }
  0x16   : > { %v2310_v47 = vld [vmem:[%s3085_s1 + $0x2b0] ss:$8 sps:$4 sm:$0xff]   ;;  %v2337_v48 = vld [vmem:[%s2692_s12 + $0x4] ss:$36 sps:$4 sm:$0xff]   ;;  %v2317_v54 = vld [vmem:[%s3085_s1 + $0xd4] ss:$8 sps:$4 sm:$0xff]  }
  0x17   : > { %1328 = vmatpush1.bf16.msra.mxu1 %v2267_v18  ;;  %v2311_v49 = vld [vmem:[%s3085_s1 + $0xc4] ss:$8 sps:$4 sm:$0xff]   ;;  %1351 = vmatprep.mubr.bf16.mxu1 %v2337_v48  ;;  %v2343_v51 = vld [vmem:[%s2692_s12 + $0x14] ss:$36 sps:$4 sm:$0xff]   ;;  %v2315_v52 = vld [vmem:[%s3085_s1 + $0xc0] ss:$8 sps:$4 sm:$0xff]  }
  0x18   : > { %1474 = vmatpush1.bf16.msra.mxu0 %v2268_v19  ;;  %1329 = vmatprep.subr.bf16.mxu1 %v2269_v20  ;;  %v2313_v50 = vld [vmem:[%s3085_s1 + $0x2c4] ss:$8 sps:$4 sm:$0xff]   ;;  %v2316_v53 = vld [vmem:[%s3085_s1 + $0x2c0] ss:$8 sps:$4 sm:$0xff]   ;;  %v2319_v55 = vld [vmem:[%s3085_s1 + $0x2d4] ss:$8 sps:$4 sm:$0xff]  }
  0x19   : > { %1475 = vmatprep.subr.bf16.mxu0 %v2271_v21  ;;  %1497 = vmatprep.mubr.bf16.mxu0 %v2343_v51  ;;  %v2321_v56 = vld [vmem:[%s3085_s1 + $0xd0] ss:$8 sps:$4 sm:$0xff]   ;;  %v2323_v58 = vld [vmem:[%s3085_s1 + $0xe4] ss:$8 sps:$4 sm:$0xff]   ;;  %v2327_v60 = vld [vmem:[%s3085_s1 + $0xe0] ss:$8 sps:$4 sm:$0xff]  }
  0x1a   : > { %v2322_v57 = vld [vmem:[%s3085_s1 + $0x2d0] ss:$8 sps:$4 sm:$0xff]   ;;  %v2325_v59 = vld [vmem:[%s3085_s1 + $0x2e4] ss:$8 sps:$4 sm:$0xff]   ;;  %v2328_v61 = vld [vmem:[%s3085_s1 + $0x2e0] ss:$8 sps:$4 sm:$0xff]  }
  0x1b   : > { %1330 = vmatpush1.bf16.msra.mxu1 %v2273_v22  ;;  %v2329_v62 = vld [vmem:[%s3085_s1 + $0xf4] ss:$8 sps:$4 sm:$0xff]   ;;  %v2333_v0 = vld [vmem:[%s3085_s1 + $0xf0] ss:$8 sps:$4 sm:$0xff]   ;;  %v2340_v2 = vld [vmem:[%s3085_s1 + $0x104] ss:$8 sps:$4 sm:$0xff]  }
  0x1c   : > { %1476 = vmatpush1.bf16.msra.mxu0 %v2274_v23  ;;  %1331 = vmatprep.subr.bf16.mxu1 %v2275_v24  ;;  %v2331_v63 = vld [vmem:[%s3085_s1 + $0x2f4] ss:$8 sps:$4 sm:$0xff]   ;;  %v2334_v1 = vld [vmem:[%s3085_s1 + $0x2f0] ss:$8 sps:$4 sm:$0xff]   ;;  %v2346_v3 = vld [vmem:[%s3085_s1 + $0x304] ss:$8 sps:$4 sm:$0xff]  }
  0x1d   : > { %1477 = vmatprep.subr.bf16.mxu0 %v2277_v25  ;;  %v2335_v4 = vld [vmem:[%s2692_s12] ss:$36 sps:$4 sm:$0xff]   ;;  %v2341_v6 = vld [vmem:[%s2692_s12 + $0x10] ss:$36 sps:$4 sm:$0xff]   ;;  %v2405_v20 = vld [vmem:[%s2692_s12 + $0x48] ss:$36 sps:$4 sm:$0xff]  }
  0x1e   : > { %v2338_v5 = vld [vmem:[%s3085_s1 + $0x100] ss:$8 sps:$4 sm:$0xff]   ;;  %v2349_v8 = vld [vmem:[%s3085_s1 + $0x114] ss:$8 sps:$4 sm:$0xff]   ;;  %v2347_v10 = vld [vmem:[%s3085_s1 + $0x110] ss:$8 sps:$4 sm:$0xff]  }
  0x1f   : > { %1332 = vmatpush1.bf16.msra.mxu1 %v2279_v26  ;;  %v2344_v7 = vld [vmem:[%s3085_s1 + $0x300] ss:$8 sps:$4 sm:$0xff]   ;;  %v2352_v9 = vld [vmem:[%s3085_s1 + $0x314] ss:$8 sps:$4 sm:$0xff]   ;;  %v2350_v11 = vld [vmem:[%s3085_s1 + $0x310] ss:$8 sps:$4 sm:$0xff]  }
  0x20   : > { %1478 = vmatpush1.bf16.msra.mxu0 %v2280_v27  ;;  %1333 = vmatprep.subr.bf16.mxu1 %v2281_v28  ;;  %v2355_v12 = vld [vmem:[%s3085_s1 + $0x124] ss:$8 sps:$4 sm:$0xff]   ;;  %v2353_v14 = vld [vmem:[%s3085_s1 + $0x120] ss:$8 sps:$4 sm:$0xff]   ;;  %v2361_v16 = vld [vmem:[%s3085_s1 + $0x134] ss:$8 sps:$4 sm:$0xff]  }
  0x21   : > { %1479 = vmatprep.subr.bf16.mxu0 %v2283_v29  ;;  %v2358_v13 = vld [vmem:[%s3085_s1 + $0x324] ss:$8 sps:$4 sm:$0xff]   ;;  %v2356_v15 = vld [vmem:[%s3085_s1 + $0x320] ss:$8 sps:$4 sm:$0xff]   ;;  %v2364_v17 = vld [vmem:[%s3085_s1 + $0x334] ss:$8 sps:$4 sm:$0xff]  }
  0x22   : > { %v2401_v18 = vld [vmem:[%s2692_s12 + $0x4c] ss:$36 sps:$4 sm:$0xff]   ;;  %v2403_v19 = vld [vmem:[%s2692_s12 + $0x5c] ss:$36 sps:$4 sm:$0xff]  }
  0x23   : > { %1334 = vmatpush1.bf16.msra.mxu1 %v2285_v30  ;;  %v2359_v21 = vld [vmem:[%s3085_s1 + $0x130] ss:$8 sps:$4 sm:$0xff]   ;;  %v2367_v24 = vld [vmem:[%s3085_s1 + $0x144] ss:$8 sps:$4 sm:$0xff]   ;;  %v2365_v26 = vld [vmem:[%s3085_s1 + $0x140] ss:$8 sps:$4 sm:$0xff]  }
  0x24   : > { %1480 = vmatpush1.bf16.msra.mxu0 %v2286_v31  ;;  %1335 = vmatprep.subr.bf16.mxu1 %v2287_v32  ;;  %v2362_v22 = vld [vmem:[%s3085_s1 + $0x330] ss:$8 sps:$4 sm:$0xff]   ;;  %v2370_v25 = vld [vmem:[%s3085_s1 + $0x344] ss:$8 sps:$4 sm:$0xff]   ;;  %v2368_v27 = vld [vmem:[%s3085_s1 + $0x340] ss:$8 sps:$4 sm:$0xff]  }
  0x25   : > { %1481 = vmatprep.subr.bf16.mxu0 %v2289_v33  ;;  %v2409_v23 = vld [vmem:[%s2692_s12 + $0x58] ss:$36 sps:$4 sm:$0xff]   ;;  %v2421_v31 = vld [vmem:[%s2692_s12 + $0xa4] ss:$36 sps:$4 sm:$0xff]   ;;  %v2423_v32 = vld [vmem:[%s2692_s12 + $0x90] ss:$36 sps:$4 sm:$0xff]  }
  0x26   : > { %v2373_v28 = vld [vmem:[%s3085_s1 + $0x154] ss:$8 sps:$4 sm:$0xff]   ;;  %v2371_v33 = vld [vmem:[%s3085_s1 + $0x150] ss:$8 sps:$4 sm:$0xff]   ;;  %v2391_v48 = vld [vmem:[%s3085_s1 + $0x184] ss:$8 sps:$4 sm:$0xff]  }
  0x27   : > { %1336 = vmatpush1.bf16.msra.mxu1 %v2291_v34  ;;  %v2376_v29 = vld [vmem:[%s3085_s1 + $0x354] ss:$8 sps:$4 sm:$0xff]   ;;  %v2374_v34 = vld [vmem:[%s3085_s1 + $0x350] ss:$8 sps:$4 sm:$0xff]   ;;  %v2392_v51 = vld [vmem:[%s3085_s1 + $0x380] ss:$8 sps:$4 sm:$0xff]  }
  0x28   : > { %1482 = vmatpush1.bf16.msra.mxu0 %v2292_v35  ;;  %1337 = vmatprep.subr.bf16.mxu1 %v2293_v36  ;;  %v2419_v30 = vld [vmem:[%s2692_s12 + $0x94] ss:$36 sps:$4 sm:$0xff]   ;;  %v2427_v35 = vld [vmem:[%s2692_s12 + $0xa0] ss:$36 sps:$4 sm:$0xff]  }
  0x29   : > { %1483 = vmatprep.subr.bf16.mxu0 %v2295_v37  ;;  %v2379_v36 = vld [vmem:[%s3085_s1 + $0x164] ss:$8 sps:$4 sm:$0xff]  }
  0x2a   : > { %v2382_v37 = vld [vmem:[%s3085_s1 + $0x364] ss:$8 sps:$4 sm:$0xff]  }
  0x2b   : > { %1338 = vmatpush1.bf16.msra.mxu1 %v2297_v38  ;;  %v2377_v38 = vld [vmem:[%s3085_s1 + $0x160] ss:$8 sps:$4 sm:$0xff]  }
  0x2c   : > { %1484 = vmatpush1.bf16.msra.mxu0 %v2298_v39  ;;  %1339 = vmatprep.subr.bf16.mxu1 %v2299_v40  ;;  %v2380_v39 = vld [vmem:[%s3085_s1 + $0x360] ss:$8 sps:$4 sm:$0xff]   ;;  %v2385_v40 = vld [vmem:[%s3085_s1 + $0x174] ss:$8 sps:$4 sm:$0xff]  }
  0x2d   : > { %1485 = vmatprep.subr.bf16.mxu0 %v2301_v41  ;;  %v2388_v41 = vld [vmem:[%s3085_s1 + $0x374] ss:$8 sps:$4 sm:$0xff]  }
  0x2f   : > { %1340 = vmatpush1.bf16.msra.mxu1 %v2303_v42  ;;  %v2437_v42 = vld [vmem:[%s2692_s12 + $0xdc] ss:$36 sps:$4 sm:$0xff]  }
  0x30   : > { %1486 = vmatpush1.bf16.msra.mxu0 %v2304_v43  ;;  %1341 = vmatprep.subr.bf16.mxu1 %v2305_v44  ;;  %v2439_v43 = vld [vmem:[%s2692_s12 + $0xec] ss:$36 sps:$4 sm:$0xff]   ;;  %v2441_v44 = vld [vmem:[%s2692_s12 + $0xd8] ss:$36 sps:$4 sm:$0xff]  }
  0x31   : > { %1487 = vmatprep.subr.bf16.mxu0 %v2307_v45  ;;  %v2383_v45 = vld [vmem:[%s3085_s1 + $0x170] ss:$8 sps:$4 sm:$0xff]  }
  0x33   : > { %1342 = vmatpush1.bf16.msra.mxu1 %v2309_v46  ;;  %v2386_v46 = vld [vmem:[%s3085_s1 + $0x370] ss:$8 sps:$4 sm:$0xff]  }
  0x34   : > { %1488 = vmatpush1.bf16.msra.mxu0 %v2310_v47  ;;  %1343 = vmatprep.subr.bf16.mxu1 %v2311_v49  ;;  %v2445_v47 = vld [vmem:[%s2692_s12 + $0xe8] ss:$36 sps:$4 sm:$0xff]  }
  0x35   : > { %1489 = vmatprep.subr.bf16.mxu0 %v2313_v50  ;;  %v2394_v49 = vld [vmem:[%s3085_s1 + $0x384] ss:$8 sps:$4 sm:$0xff]   ;;  %v2389_v50 = vld [vmem:[%s3085_s1 + $0x180] ss:$8 sps:$4 sm:$0xff]  }
  0x37   : > { %1344 = vmatpush1.bf16.msra.mxu1 %v2315_v52  ;;  %v2397_v52 = vld [vmem:[%s3085_s1 + $0x194] ss:$8 sps:$4 sm:$0xff]  }
  0x38   : > { %1490 = vmatpush1.bf16.msra.mxu0 %v2316_v53  ;;  %1345 = vmatprep.subr.bf16.mxu1 %v2317_v54  ;;  %v2400_v53 = vld [vmem:[%s3085_s1 + $0x394] ss:$8 sps:$4 sm:$0xff]   ;;  %v2457_v54 = vld [vmem:[%s2692_s12 + $0xc] ss:$36 sps:$4 sm:$0xff]  }
  0x39   : > { %1491 = vmatprep.subr.bf16.mxu0 %v2319_v55  ;;  %v2460_v55 = vld [vmem:[%s2692_s12 + $0x1c] ss:$36 sps:$4 sm:$0xff]  }
  0x3b   : > { %1346 = vmatpush1.bf16.msra.mxu1 %v2321_v56  ;;  %v2395_v56 = vld [vmem:[%s3085_s1 + $0x190] ss:$8 sps:$4 sm:$0xff]  }
  0x3c   : > { %1492 = vmatpush1.bf16.msra.mxu0 %v2322_v57  ;;  %1347 = vmatprep.subr.bf16.mxu1 %v2323_v58  ;;  %v2398_v57 = vld [vmem:[%s3085_s1 + $0x390] ss:$8 sps:$4 sm:$0xff]   ;;  %v2408_v58 = vld [vmem:[%s3085_s1 + $0x1a4] ss:$8 sps:$4 sm:$0xff]  }
  0x3d   : > { %1493 = vmatprep.subr.bf16.mxu0 %v2325_v59  ;;  %v2412_v59 = vld [vmem:[%s3085_s1 + $0x3a4] ss:$8 sps:$4 sm:$0xff]  }
  0x3f   : > { %1348 = vmatpush1.bf16.msra.mxu1 %v2327_v60  ;;  %v2406_v60 = vld [vmem:[%s3085_s1 + $0x1a0] ss:$8 sps:$4 sm:$0xff]  }
  0x40   : > { %1494 = vmatpush1.bf16.msra.mxu0 %v2328_v61  ;;  %1349 = vmatprep.subr.bf16.mxu1 %v2329_v62  ;;  %v2410_v61 = vld [vmem:[%s3085_s1 + $0x3a0] ss:$8 sps:$4 sm:$0xff]   ;;  %v2415_v62 = vld [vmem:[%s3085_s1 + $0x1b4] ss:$8 sps:$4 sm:$0xff]  }
  0x41   : > { %1495 = vmatprep.subr.bf16.mxu0 %v2331_v63  ;;  %v2418_v63 = vld [vmem:[%s3085_s1 + $0x3b4] ss:$8 sps:$4 sm:$0xff]  }
  0x43   : > { %1350 = vmatpush1.bf16.msra.mxu1 %v2333_v0  ;;  %v2413_v0 = vld [vmem:[%s3085_s1 + $0x1b0] ss:$8 sps:$4 sm:$0xff]  }
  0x44   : > { %1496 = vmatpush1.bf16.msra.mxu0 %v2334_v1  ;;  %1392 = vmatprep.subr.bf16.mxu1 %v2340_v2  ;;  %v2416_v1 = vld [vmem:[%s3085_s1 + $0x3b0] ss:$8 sps:$4 sm:$0xff]   ;;  %v2426_v2 = vld [vmem:[%s3085_s1 + $0x1c4] ss:$8 sps:$4 sm:$0xff]  }
  0x45   : > { %1538 = vmatprep.subr.bf16.mxu0 %v2346_v3  ;;  %v2430_v3 = vld [vmem:[%s3085_s1 + $0x3c4] ss:$8 sps:$4 sm:$0xff]  }
  0x46   : > { %1352 = vmatmul.mubr.bf16.vlgmr.msra.gmra.mrb[0].mxu1 %v2335_v4  ;;  %v2424_v4 = vld [vmem:[%s3085_s1 + $0x1c0] ss:$8 sps:$4 sm:$0xff]  }
  0x47   : > { %1498 = vmatmul.mubr.bf16.vlgmr.msra.gmra.mrb[0].mxu0 %v2341_v6  ;;  %1393 = vmatpush1.bf16.msra.mxu1 %v2338_v5  ;;  %v2428_v5 = vld [vmem:[%s3085_s1 + $0x3c0] ss:$8 sps:$4 sm:$0xff]   ;;  %v2433_v6 = vld [vmem:[%s3085_s1 + $0x1d4] ss:$8 sps:$4 sm:$0xff]  }
  0x48   : > { %1539 = vmatpush1.bf16.msra.mxu0 %v2344_v7  ;;  %1394 = vmatprep.subr.bf16.mxu1 %v2349_v8  ;;  %v2436_v7 = vld [vmem:[%s3085_s1 + $0x3d4] ss:$8 sps:$4 sm:$0xff]   ;;  %v2431_v8 = vld [vmem:[%s3085_s1 + $0x1d0] ss:$8 sps:$4 sm:$0xff]  }
  0x49   : > { %1540 = vmatprep.subr.bf16.mxu0 %v2352_v9  ;;  %1361 = vmatprep.mubr.bf16.mxu1 %v2401_v18  ;;  %v2434_v9 = vld [vmem:[%s3085_s1 + $0x3d0] ss:$8 sps:$4 sm:$0xff]   ;;  %v2463_v18 = vld [vmem:[%s3085_s1 + $0x404] ss:$8 sps:$4 sm:$0xff]  }
  0x4a   : > { %1507 = vmatprep.mubr.bf16.mxu0 %v2403_v19  ;;  %v2455_v19 = vld [vmem:[%s2692_s12 + $0x8] ss:$36 sps:$4 sm:$0xff]  }
  0x4b   : > { %1395 = vmatpush1.bf16.msra.mxu1 %v2347_v10  ;;  %v2444_v10 = vld [vmem:[%s3085_s1 + $0x1e4] ss:$8 sps:$4 sm:$0xff]  }
  0x4c   : > { %1541 = vmatpush1.bf16.msra.mxu0 %v2350_v11  ;;  %1396 = vmatprep.subr.bf16.mxu1 %v2355_v12  ;;  %v2448_v11 = vld [vmem:[%s3085_s1 + $0x3e4] ss:$8 sps:$4 sm:$0xff]   ;;  %v2442_v12 = vld [vmem:[%s3085_s1 + $0x1e0] ss:$8 sps:$4 sm:$0xff]  }
  0x4d   : > { %1542 = vmatprep.subr.bf16.mxu0 %v2358_v13  ;;  %v2446_v13 = vld [vmem:[%s3085_s1 + $0x3e0] ss:$8 sps:$4 sm:$0xff]  }
  0x4e   : > { %1362 = vmatmul.mubr.bf16.gmra.mrb[4].mxu1 %v2405_v20  ;;  %v2458_v20 = vld [vmem:[%s2692_s12 + $0x18] ss:$36 sps:$4 sm:$0xff]  }
  0x4f   : > { %1397 = vmatpush1.bf16.msra.mxu1 %v2353_v14  ;;  %1508 = vmatmul.mubr.bf16.gmra.mrb[4].mxu0 %v2409_v23  ;;  %v2451_v14 = vld [vmem:[%s3085_s1 + $0x1f4] ss:$8 sps:$4 sm:$0xff]  }
  0x50   : > { %1543 = vmatpush1.bf16.msra.mxu0 %v2356_v15  ;;  %1398 = vmatprep.subr.bf16.mxu1 %v2361_v16  ;;  %v2454_v15 = vld [vmem:[%s3085_s1 + $0x3f4] ss:$8 sps:$4 sm:$0xff]   ;;  %v2449_v16 = vld [vmem:[%s3085_s1 + $0x1f0] ss:$8 sps:$4 sm:$0xff]  }
  0x51   : > { %1544 = vmatprep.subr.bf16.mxu0 %v2364_v17  ;;  %1371 = vmatprep.mubr.bf16.mxu1 %v2419_v30  ;;  %v2452_v17 = vld [vmem:[%s3085_s1 + $0x3f0] ss:$8 sps:$4 sm:$0xff]   ;;  %v2478_v30 = vld [vmem:[%s3085_s1 + $0x434] ss:$8 sps:$4 sm:$0xff]  }
  0x52   : > { %1517 = vmatprep.mubr.bf16.mxu0 %v2421_v31  ;;  %v2467_v23 = vld [vmem:[%s2692_s12 + $0x54] ss:$36 sps:$4 sm:$0xff]   ;;  %v2479_v31 = vld [vmem:[%s2692_s12 + $0x9c] ss:$36 sps:$4 sm:$0xff]  }
  0x53   : > { %1399 = vmatpush1.bf16.msra.mxu1 %v2359_v21  ;;  %v2461_v21 = vld [vmem:[%s3085_s1 + $0x400] ss:$8 sps:$4 sm:$0xff]  }
  0x54   : > { %1545 = vmatpush1.bf16.msra.mxu0 %v2362_v22  ;;  %1400 = vmatprep.subr.bf16.mxu1 %v2367_v24  ;;  %v2466_v22 = vld [vmem:[%s3085_s1 + $0x414] ss:$8 sps:$4 sm:$0xff]   ;;  %v2469_v24 = vld [vmem:[%s2692_s12 + $0x64] ss:$36 sps:$4 sm:$0xff]  }
  0x55   : > { %1546 = vmatprep.subr.bf16.mxu0 %v2370_v25  ;;  %v2464_v25 = vld [vmem:[%s3085_s1 + $0x410] ss:$8 sps:$4 sm:$0xff]  }
  0x56   : > { %1372 = vmatmul.mubr.bf16.gmra.mrb[8].mxu1 %v2423_v32  ;;  %v2481_v32 = vld [vmem:[%s2692_s12 + $0xac] ss:$36 sps:$4 sm:$0xff]  }
  0x57   : > { %1401 = vmatpush1.bf16.msra.mxu1 %v2365_v26  ;;  %1518 = vmatmul.mubr.bf16.gmra.mrb[8].mxu0 %v2427_v35  ;;  %v2475_v26 = vld [vmem:[%s3085_s1 + $0x424] ss:$8 sps:$4 sm:$0xff]   ;;  %v2483_v35 = vld [vmem:[%s2692_s12 + $0x98] ss:$36 sps:$4 sm:$0xff]  }
  0x58   : > { %1547 = vmatpush1.bf16.msra.mxu0 %v2368_v27  ;;  %1402 = vmatprep.subr.bf16.mxu1 %v2373_v28  ;;  %v2471_v27 = vld [vmem:[%s2692_s12 + $0x50] ss:$36 sps:$4 sm:$0xff]   ;;  %v2472_v28 = vld [vmem:[%s2692_s12 + $0x60] ss:$36 sps:$4 sm:$0xff]  }
  0x59   : > { %1548 = vmatprep.subr.bf16.mxu0 %v2376_v29  ;;  %1381 = vmatprep.mubr.bf16.mxu1 %v2437_v42  ;;  %v2473_v29 = vld [vmem:[%s3085_s1 + $0x420] ss:$8 sps:$4 sm:$0xff]   ;;  %v2499_v42 = vld [vmem:[%s3085_s1 + $0x464] ss:$8 sps:$4 sm:$0xff]  }
  0x5a   : > { %1527 = vmatprep.mubr.bf16.mxu0 %v2439_v43  ;;  %v2495_v43 = vld [vmem:[%s2692_s12 + $0xe0] ss:$36 sps:$4 sm:$0xff]  }
  0x5b   : > { %1403 = vmatpush1.bf16.msra.mxu1 %v2371_v33  ;;  %v2476_v33 = vld [vmem:[%s3085_s1 + $0x430] ss:$8 sps:$4 sm:$0xff]  }
  0x5c   : > { %1549 = vmatpush1.bf16.msra.mxu0 %v2374_v34  ;;  %1404 = vmatprep.subr.bf16.mxu1 %v2379_v36  ;;  %v2487_v34 = vld [vmem:[%s3085_s1 + $0x444] ss:$8 sps:$4 sm:$0xff]  }
  0x5d   : > { %1550 = vmatprep.subr.bf16.mxu0 %v2382_v37  ;;  %v2484_v36 = vld [vmem:[%s2692_s12 + $0xa8] ss:$36 sps:$4 sm:$0xff]  }
  0x5e   : > { %1382 = vmatmul.mubr.bf16.gmra.mrb[12].mxu1 %v2441_v44  ;;  %v2485_v37 = vld [vmem:[%s3085_s1 + $0x440] ss:$8 sps:$4 sm:$0xff]   ;;  %v2496_v44 = vld [vmem:[%s2692_s12 + $0xf0] ss:$36 sps:$4 sm:$0xff]  }
  0x5f   : > { %1405 = vmatpush1.bf16.msra.mxu1 %v2377_v38  ;;  %1528 = vmatmul.mubr.bf16.gmra.mrb[12].mxu0 %v2445_v47  ;;  %v2490_v38 = vld [vmem:[%s3085_s1 + $0x454] ss:$8 sps:$4 sm:$0xff]   ;;  %v2500_v47 = vld [vmem:[%s3085_s1 + $0x470] ss:$8 sps:$4 sm:$0xff]  }
  0x60   : > { %1551 = vmatpush1.bf16.msra.mxu0 %v2380_v39  ;;  %1406 = vmatprep.subr.bf16.mxu1 %v2385_v40  ;;  %v2491_v39 = vld [vmem:[%s2692_s12 + $0xe4] ss:$36 sps:$4 sm:$0xff]   ;;  %v2493_v40 = vld [vmem:[%s2692_s12 + $0xf4] ss:$36 sps:$4 sm:$0xff]  }
  0x61   : > { %1552 = vmatprep.subr.bf16.mxu0 %v2388_v41  ;;  %1424 = vmatprep.mubr.bf16.mxu1 %v2457_v54  ;;  %v2488_v41 = vld [vmem:[%s3085_s1 + $0x450] ss:$8 sps:$4 sm:$0xff]  }
  0x62   : > { %1570 = vmatprep.mubr.bf16.mxu0 %v2460_v55 }
  0x63   : > { %1407 = vmatpush1.bf16.msra.mxu1 %v2383_v45  ;;  %v2497_v45 = vld [vmem:[%s3085_s1 + $0x460] ss:$8 sps:$4 sm:$0xff]  }
  0x64   : > { %1553 = vmatpush1.bf16.msra.mxu0 %v2386_v46  ;;  %1408 = vmatprep.subr.bf16.mxu1 %v2391_v48  ;;  %v2502_v46 = vld [vmem:[%s3085_s1 + $0x474] ss:$8 sps:$4 sm:$0xff]   ;;  %v2515_v48 = vmov 0  }
  0x65   : > { %1554 = vmatprep.subr.bf16.mxu0 %v2394_v49  ;;  %v2503_v49 = vld [vmem:[%s2692_s12 + $0x20] ss:$36 sps:$4 sm:$0xff]  }
  0x67   : > { %1409 = vmatpush1.bf16.msra.mxu1 %v2389_v50  ;;  %v2504_v50 = vld [vmem:[%s2692_s12 + $0xb0] ss:$36 sps:$4 sm:$0xff]  }
  0x68   : > { %1555 = vmatpush1.bf16.msra.mxu0 %v2392_v51  ;;  %1410 = vmatprep.subr.bf16.mxu1 %v2397_v52  ;;  %v2505_v51 = vld [vmem:[%s2692_s12 + $0x68] ss:$36 sps:$4 sm:$0xff]   ;;  %v2506_v52 = vld [vmem:[%s2692_s12 + $0xf8] ss:$36 sps:$4 sm:$0xff]   ;;  %s1870_s12 = sshll.u32 %s3090_s29, 2 }
  0x69   : > { %1556 = vmatprep.subr.bf16.mxu0 %v2400_v53  ;;  %s3058_s8 = scalar_lea.vmem %s3088_s4, %s1870_s12  ;;  %s3063_s29 = scalar_lea.vmem %s3087_s3, %s1870_s12 }
  0x6b   : > { %1411 = vmatpush1.bf16.msra.mxu1 %v2395_v56  ;;  %v405_v56 = vlaneseq }
  0x6c   : > { %1557 = vmatpush1.bf16.msra.mxu0 %v2398_v57  ;;  %1412 = vmatprep.subr.bf16.mxu1 %v2408_v58 }
  0x6d   : > { %1558 = vmatprep.subr.bf16.mxu0 %v2412_v59  ;;  %v406_v58 = vshrl.u32 %v405_v56, 7 }
  0x6f   : > { %1413 = vmatpush1.bf16.msra.mxu1 %v2406_v60 }
  0x70   : > { %1559 = vmatpush1.bf16.msra.mxu0 %v2410_v61  ;;  %1414 = vmatprep.subr.bf16.mxu1 %v2415_v62  ;;  %v407_v62 = vsub.s32 0, %v406_v58 }
  0x71   : > { %1560 = vmatprep.subr.bf16.mxu0 %v2418_v63 }
  0x73   : > { %1415 = vmatpush1.bf16.msra.mxu1 %v2413_v0  ;;  %v403_v0 = vld [vmem:[%s3086_s2] sm:$0x3] }
  0x74   : > { %1561 = vmatpush1.bf16.msra.mxu0 %v2416_v1  ;;  %1416 = vmatprep.subr.bf16.mxu1 %v2426_v2  ;;  %v411_v1 = vsub.s32 1, %v406_v58  ;;  %v3038_v2 = vrot.slane %v403_v0, %v407_v62 }
  0x75   : > { %1562 = vmatprep.subr.bf16.mxu0 %v2430_v3 }
  0x76   : > { %v3040_v3 = vrot.slane %v403_v0, %v411_v1 }
  0x77   : > { %1417 = vmatpush1.bf16.msra.mxu1 %v2424_v4 }
  0x78   : > { %1563 = vmatpush1.bf16.msra.mxu0 %v2428_v5  ;;  %1418 = vmatprep.subr.bf16.mxu1 %v2433_v6 }
  0x79   : > { %1564 = vmatprep.subr.bf16.mxu0 %v2436_v7 }
  0x7b   : > { %1419 = vmatpush1.bf16.msra.mxu1 %v2431_v8 }
  0x7c   : > { %1565 = vmatpush1.bf16.msra.mxu0 %v2434_v9  ;;  %1420 = vmatprep.subr.bf16.mxu1 %v2444_v10 }
  0x7d   : > { %1566 = vmatprep.subr.bf16.mxu0 %v2448_v11 }
  0x7f   : > { %1421 = vmatpush1.bf16.msra.mxu1 %v2442_v12 }
  0x80   : > { %1567 = vmatpush1.bf16.msra.mxu0 %v2446_v13  ;;  %1422 = vmatprep.subr.bf16.mxu1 %v2451_v14 }
  0x81   : > { %1568 = vmatprep.subr.bf16.mxu0 %v2454_v15 }
  0x83   : > { %1423 = vmatpush1.bf16.msra.mxu1 %v2449_v16 }
  0x84   : > { %1569 = vmatpush1.bf16.msra.mxu0 %v2452_v17  ;;  %2133 = vmatprep.subr.bf16.mxu1 %v2463_v18 }
  0x85   : > { %1611 = vmatprep.subr.bf16.mxu0 %v2463_v18 }
  0x86   : > { %1425 = vmatmul.mubr.bf16.vlgmr.msra.gmra.mrb[0].mxu1 %v2455_v19 }
  0x87   : > { %1571 = vmatmul.mubr.bf16.vlgmr.msra.gmra.mrb[0].mxu0 %v2458_v20  ;;  %2141 = vmatpush1.bf16.msra.mxu1 %v2461_v21 }
  0x88   : > { %1612 = vmatpush1.bf16.msra.mxu0 %v2461_v21  ;;  %2134 = vmatprep.subr.bf16.mxu1 %v2466_v22 }
  0x89   : > { %1613 = vmatprep.subr.bf16.mxu0 %v2466_v22  ;;  %1434 = vmatprep.mubr.bf16.mxu1 %v2467_v23 }
  0x8a   : > { %1580 = vmatprep.mubr.bf16.mxu0 %v2469_v24 }
  0x8b   : > { %2142 = vmatpush1.bf16.msra.mxu1 %v2464_v25 }
  0x8c   : > { %1614 = vmatpush1.bf16.msra.mxu0 %v2464_v25  ;;  %2135 = vmatprep.subr.bf16.mxu1 %v2475_v26 }
  0x8d   : > { %1615 = vmatprep.subr.bf16.mxu0 %v2475_v26 }
  0x8e   : > { %1435 = vmatmul.mubr.bf16.gmra.mrb[4].mxu1 %v2471_v27 }
  0x8f   : > { %1581 = vmatmul.mubr.bf16.gmra.mrb[4].mxu0 %v2472_v28  ;;  %2143 = vmatpush1.bf16.msra.mxu1 %v2473_v29 }
  0x90   : > { %1616 = vmatpush1.bf16.msra.mxu0 %v2473_v29  ;;  %2136 = vmatprep.subr.bf16.mxu1 %v2478_v30 }
  0x91   : > { %1617 = vmatprep.subr.bf16.mxu0 %v2478_v30  ;;  %1444 = vmatprep.mubr.bf16.mxu1 %v2479_v31 }
  0x92   : > { %1590 = vmatprep.mubr.bf16.mxu0 %v2481_v32 }
  0x93   : > { %2144 = vmatpush1.bf16.msra.mxu1 %v2476_v33 }
  0x94   : > { %1618 = vmatpush1.bf16.msra.mxu0 %v2476_v33  ;;  %2137 = vmatprep.subr.bf16.mxu1 %v2487_v34 }
  0x95   : > { %1619 = vmatprep.subr.bf16.mxu0 %v2487_v34 }
  0x96   : > { %1445 = vmatmul.mubr.bf16.gmra.mrb[8].mxu1 %v2483_v35 }
  0x97   : > { %1591 = vmatmul.mubr.bf16.gmra.mrb[8].mxu0 %v2484_v36  ;;  %2145 = vmatpush1.bf16.msra.mxu1 %v2485_v37 }
  0x98   : > { %1620 = vmatpush1.bf16.msra.mxu0 %v2485_v37  ;;  %2138 = vmatprep.subr.bf16.mxu1 %v2490_v38 }
  0x99   : > { %1621 = vmatprep.subr.bf16.mxu0 %v2490_v38  ;;  %1454 = vmatprep.mubr.bf16.mxu1 %v2491_v39 }
  0x9a   : > { %1600 = vmatprep.mubr.bf16.mxu0 %v2493_v40 }
  0x9b   : > { %2146 = vmatpush1.bf16.msra.mxu1 %v2488_v41 }
  0x9c   : > { %1622 = vmatpush1.bf16.msra.mxu0 %v2488_v41  ;;  %2139 = vmatprep.subr.bf16.mxu1 %v2499_v42 }
  0x9d   : > { %1623 = vmatprep.subr.bf16.mxu0 %v2499_v42 }
  0x9e   : > { %1455 = vmatmul.mubr.bf16.gmra.mrb[12].mxu1 %v2495_v43 }
  0x9f   : > { %1601 = vmatmul.mubr.bf16.gmra.mrb[12].mxu0 %v2496_v44  ;;  %2147 = vmatpush1.bf16.msra.mxu1 %v2497_v45 }
  0xa0   : > { %1624 = vmatpush1.bf16.msra.mxu0 %v2497_v45  ;;  %2140 = vmatprep.subr.bf16.mxu1 %v2502_v46 }
  0xa1   : > { %1625 = vmatprep.subr.bf16.mxu0 %v2502_v46  ;;  %1643 = vmatprep.mubr.bf16.mxu0 %v2515_v48 }
  0xa2   : > { %1663 = vmatprep.mubr.bf16.mxu1 %v2515_v48 }
  0xa3   : > { %2148 = vmatpush1.bf16.msra.mxu1 %v2500_v47 }
  0xa4   : > { %1626 = vmatpush1.bf16.msra.mxu0 %v2500_v47 }
  0xa6   : > { %1664 = vmatmul.mubr.bf16.vlgmr.msra.gmra.mrb[16].mxu1 %v2504_v50 }
  0xa7   : > { %1644 = vmatmul.mubr.bf16.vlgmr.msra.gmra.mrb[0].mxu0 %v2503_v49  ;;  %1673 = vmatprep.mubr.bf16.mxu1 %v2515_v48 }
  0xa8   : > { %1653 = vmatprep.mubr.bf16.mxu0 %v2515_v48 }
  0xae   : > { %1674 = vmatmul.mubr.bf16.gmra.mrb[20].mxu1 %v2506_v52 }
  0xaf   : > { %1654 = vmatmul.mubr.bf16.gmra.mrb[4].mxu0 %v2505_v51 }
 0x159   : > { %v1426_v53 = vpop.f32.mrb[0].mxu1 }
 0x15a   : > { %v1428_v54 = vpop.f32.mrb[1].mxu1  ;;  %v2149_v36 = vadd.f32 %v1426_v53, %v3038_v2 }
 0x15b   : > { %v1430_v55 = vpop.f32.mrb[2].mxu1  ;;  %v2151_v37 = vadd.f32 %v1428_v54, %v3040_v3 }
 0x15c   : > { %v1432_v57 = vpop.f32.mrb[3].mxu1  ;;  %v2153_v40 = vadd.f32 %v1430_v55, %v3038_v2 }
 0x15d   : > { %v2155_v45 = vadd.f32 %v1432_v57, %v3040_v3 }
 0x161   : > { %v3027_v59 = vpop.f32.mrb[4].mxu1 }
 0x162   : > { %v3029_v60 = vpop.f32.mrb[5].mxu1 }
 0x163   : > { %v3031_v61 = vpop.f32.mrb[6].mxu1 }
 0x164   : > { %v3033_v63 = vpop.f32.mrb[7].mxu1 }
 0x169   : > { %v1446_v4 = vpop.f32.mrb[8].mxu1 }
 0x16a   : > { %v1592_v5 = vpop.f32.mrb[8].mxu0  ;;  %v2165_v6 = vadd.f32 %v1446_v4, %v3038_v2  ;;  %v1448_v7 = vpop.f32.mrb[9].mxu1  ;;  %v2157_v4 = vadd.f32 %v3027_v59, %v3038_v2  ;;  %v2163_v59 = vadd.f32 %v3033_v63, %v3040_v3 }
 0x16b   : > { %v1594_v8 = vpop.f32.mrb[9].mxu0  ;;  %v2168_v9 = vadd.f32 %v1448_v7, %v3040_v3  ;;  %v1450_v10 = vpop.f32.mrb[10].mxu1  ;;  %v2159_v7 = vadd.f32 %v3029_v60, %v3040_v3 }
 0x16c   : > { %v1596_v11 = vpop.f32.mrb[10].mxu0  ;;  %v2166_v12 = vadd.f32 %v2165_v6, %v1592_v5  ;;  %v2171_v13 = vadd.f32 %v1450_v10, %v3038_v2  ;;  %v1452_v14 = vpop.f32.mrb[11].mxu1  ;;  %v2161_v10 = vadd.f32 %v3031_v61, %v3038_v2 }
 0x16d   : > { %v1598_v15 = vpop.f32.mrb[11].mxu0  ;;  %v2169_v16 = vadd.f32 %v2168_v9, %v1594_v8  ;;  %v2174_v17 = vadd.f32 %v1452_v14, %v3040_v3 }
 0x16e   : > { %v2172_v18 = vadd.f32 %v2171_v13, %v1596_v11 }
 0x16f   : > { %v2175_v19 = vadd.f32 %v2174_v17, %v1598_v15 }
 0x171   : > { %v1456_v20 = vpop.f32.mrb[12].mxu1 }
 0x172   : > { %v1602_v21 = vpop.f32.mrb[12].mxu0  ;;  %v2177_v22 = vadd.f32 %v1456_v20, %v3038_v2  ;;  %v1458_v23 = vpop.f32.mrb[13].mxu1 }
 0x173   : > { %v1604_v24 = vpop.f32.mrb[13].mxu0  ;;  %v2180_v25 = vadd.f32 %v1458_v23, %v3040_v3  ;;  %v1460_v26 = vpop.f32.mrb[14].mxu1 }
 0x174   : > { %v1606_v27 = vpop.f32.mrb[14].mxu0  ;;  %v2178_v28 = vadd.f32 %v2177_v22, %v1602_v21  ;;  %v2183_v29 = vadd.f32 %v1460_v26, %v3038_v2  ;;  %v1462_v30 = vpop.f32.mrb[15].mxu1 }
 0x175   : > { %v1608_v31 = vpop.f32.mrb[15].mxu0  ;;  %v2181_v32 = vadd.f32 %v2180_v25, %v1604_v24  ;;  %v2186_v33 = vadd.f32 %v1462_v30, %v3040_v3 }
 0x176   : > { %v2184_v34 = vadd.f32 %v2183_v29, %v1606_v27 }
 0x177   : > { %v2187_v35 = vadd.f32 %v2186_v33, %v1608_v31 }
 0x179   : > { %v1665_v39 = vpop.f32.mrb[16].mxu1 }
 0x17a   : > { %v1645_v38 = vpop.f32.mrb[0].mxu0  ;;  %v2167_v42 = vadd.f32 %v2166_v12, %v1665_v39  ;;  %v1667_v44 = vpop.f32.mrb[17].mxu1 }
 0x17b   : > { %v2150_v41 = vadd.f32 %v2149_v36, %v1645_v38  ;;  %v1647_v43 = vpop.f32.mrb[1].mxu0  ;;  %v2170_v47 = vadd.f32 %v2169_v16, %v1667_v44  ;;  %v1669_v49 = vpop.f32.mrb[18].mxu1 }
 0x17c   : > { %v2152_v46 = vadd.f32 %v2151_v37, %v1647_v43  ;;  %v1649_v48 = vpop.f32.mrb[2].mxu0  ;;  %v2173_v51 = vadd.f32 %v2172_v18, %v1669_v49  ;;  %v1671_v53 = vpop.f32.mrb[19].mxu1  ;;  %v1688_v62 = vmax.f32 %v2167_v42, 0.0 }
 0x17d   : > { %v2154_v50 = vadd.f32 %v2153_v40, %v1649_v48  ;;  %v1651_v52 = vpop.f32.mrb[3].mxu0  ;;  %v2176_v56 = vadd.f32 %v2175_v19, %v1671_v53  ;;  %v1684_v58 = vmax.f32 %v2150_v41, 0.0 }
 0x17e   : > { %v2156_v54 = vadd.f32 %v2155_v45, %v1651_v52  ;;  %v1689_v0 = vmax.f32 %v2173_v51, 0.0 }
 0x17f   : > { %v1685_v55 = vmax.f32 %v2154_v50, 0.0  ;;  %v2120_v1 = vpack.c.bf16 %v2176_v56, %v2170_v47 }
 0x180   : > { %v2110_v57 = vpack.c.bf16 %v2156_v54, %v2152_v46  ;;  %v2100_v6 = vpack.c.bf16 %v1689_v0, %v1688_v62 }
 0x181   : > { %v2090_v5 = vpack.c.bf16 %v1685_v55, %v1684_v58  ;;  %2131 = vst [vmem:[%s3058_s8 + $0x10] sm:$0xff] %v2120_v1   ;;  %v1675_v9 = vpop.f32.mrb[20].mxu1 }
 0x182   : > { %2111 = vst [vmem:[%s3058_s8] sm:$0xff] %v2110_v57   ;;  %v1655_v8 = vpop.f32.mrb[4].mxu0  ;;  %2128 = vst [vmem:[%s3063_s29 + $0x10] sm:$0xff] %v2100_v6   ;;  %v2179_v12 = vadd.f32 %v2178_v28, %v1675_v9  ;;  %v1677_v14 = vpop.f32.mrb[21].mxu1 }
 0x183   : > { %2091 = vst [vmem:[%s3063_s29] sm:$0xff] %v2090_v5   ;;  %v2158_v11 = vadd.f32 %v2157_v4, %v1655_v8  ;;  %v1657_v13 = vpop.f32.mrb[5].mxu0  ;;  %v2182_v16 = vadd.f32 %v2181_v32, %v1677_v14  ;;  %v1679_v60 = vpop.f32.mrb[22].mxu1 }
 0x184   : > { %v2160_v15 = vadd.f32 %v2159_v7, %v1657_v13  ;;  %v1659_v17 = vpop.f32.mrb[6].mxu0  ;;  %v2185_v19 = vadd.f32 %v2184_v34, %v1679_v60  ;;  %v1681_v2 = vpop.f32.mrb[23].mxu1  ;;  %v1690_v23 = vmax.f32 %v2179_v12, 0.0 }
 0x185   : > { %v2162_v18 = vadd.f32 %v2161_v10, %v1659_v17  ;;  %v1661_v61 = vpop.f32.mrb[7].mxu0  ;;  %v2188_v21 = vadd.f32 %v2187_v35, %v1681_v2  ;;  %v1686_v22 = vmax.f32 %v2158_v11, 0.0 }
 0x186   : > { %v2164_v20 = vadd.f32 %v2163_v59, %v1661_v61  ;;  %v1691_v25 = vmax.f32 %v2185_v19, 0.0 }
 0x187   : > { %v1687_v24 = vmax.f32 %v2162_v18, 0.0  ;;  %v2125_v63 = vpack.c.bf16 %v2188_v21, %v2182_v16 }
 0x188   : > { %v2115_v26 = vpack.c.bf16 %v2164_v20, %v2160_v15  ;;  %v2105_v27 = vpack.c.bf16 %v1691_v25, %v1690_v23 }
 0x189   : > { %v2095_v3 = vpack.c.bf16 %v1687_v24, %v1686_v22  ;;  %2132 = vst [vmem:[%s3058_s8 + $0x18] sm:$0xff] %v2125_v63  }
 0x18a   : > { %2130 = vst [vmem:[%s3058_s8 + $0x8] sm:$0xff] %v2115_v26   ;;  %2129 = vst [vmem:[%s3063_s29 + $0x18] sm:$0xff] %v2105_v27  }
 0x18b   : > { %2127 = vst [vmem:[%s3063_s29 + $0x8] sm:$0xff] %v2095_v3  }
 0x18c PF: > { %s15_s15 = sadd.s32 1, %s2513_s15  }
 0x18d   : > { %p12_p4 = scmp.ge.s32.totalorder %s15_s15, 4  }
 0x18f   :  { %14 = sbr.rel (!%p12_p4) target bundleno = 1 (0x1), region = 74 }

// kernel: resnet_image_encoder_forward.16
= control target key start
LH: loop header
LB: loop body
LE: loop exit
PB: predicated region body
PF: predicated region fallthrough
CT: control target
= control target key end

     0   :  { %s2057_s15 = smov 0   ;;  %s2353_s0 = inlined_call_operand.vmem [shape: bf16[128,1152], index: 0, kind: input, shape index: {}]   ;;  %s2354_s1 = inlined_call_operand.vmem [shape: bf16[1152,128], index: 1, kind: input, shape index: {}]   ;;  %s2355_s2 = inlined_call_operand.vmem [shape: f32[1,128], index: 2, kind: input, shape index: {}]   ;;  %s2356_s3 = inlined_call_operand.vmem [shape: bf16[128,128], index: 3, kind: input, shape index: {}]   ;;  %s2357_s4 = inlined_call_operand.vmem [shape: bf16[128,128], index: 4, kind: output, shape index: {}]  }
   0x1 LB: > { %s1499_s16 = sadd.s32 4294967295, %s2030_s15   ;;  %p1503_p0 = scmp.ge.s32.totalorder %s2030_s15, 1  ;;  %s2030_s15 = sphi %s2057_s15, %s14_s15  }
   0x2   : > { %p175_p1 = scmp.lt.s32.totalorder %s2030_s15, 3 }
   0x4   : > { %p176_p2 = pnand %p1503_p0, %p175_p1 }
   0x5   : > { %v1900_v0 = vld [vmem:[%s2354_s1 + $0x40] sm:$0xff] (!%p176_p2)   ;;  %v1904_v4 = vld [vmem:[%s2354_s1 + $0x48] sm:$0xff] (!%p176_p2)   ;;  %v1908_v8 = vld [vmem:[%s2354_s1 + $0x50] sm:$0xff] (!%p176_p2)   ;;  %s1504_s23 = sshll.u32 (!%p176_p2), %s1499_s16, 3 }
   0x6   : > { %179 = sbr.rel (%p176_p2) target bundleno = 329 (0x149), region = 36  ;;  %v1901_v1 = vld [vmem:[%s2354_s1 + $0xc0] sm:$0xff] (!%p176_p2)   ;;  %1679 = vmatprep.subr.bf16.mxu0 (!%p176_p2), %v1900_v0  ;;  %v1905_v5 = vld [vmem:[%s2354_s1 + $0xc8] sm:$0xff] (!%p176_p2)   ;;  %v1909_v9 = vld [vmem:[%s2354_s1 + $0xd0] sm:$0xff] (!%p176_p2)   ;;  %p208_p3 = scmp.lt.s32.totalorder (!%p176_p2), %s1504_s23, 15 }
   0x7   : > { %v1902_v2 = vld [vmem:[%s2354_s1] sm:$0xff] (!%p176_p2)   ;;  %1719 = vmatprep.subr.bf16.mxu1 (!%p176_p2), %v1901_v1  ;;  %v1906_v6 = vld [vmem:[%s2354_s1 + $0x8] sm:$0xff] (!%p176_p2)   ;;  %v1910_v10 = vld [vmem:[%s2354_s1 + $0x10] sm:$0xff] (!%p176_p2)  }
   0x8   : > { %v1903_v3 = vld [vmem:[%s2354_s1 + $0x80] sm:$0xff] (!%p176_p2)   ;;  %1680 = vmatpush3.bf16.msra.mxu0 (!%p176_p2), %v1902_v2  ;;  %v1907_v7 = vld [vmem:[%s2354_s1 + $0x88] sm:$0xff] (!%p176_p2)   ;;  %v1911_v11 = vld [vmem:[%s2354_s1 + $0x90] sm:$0xff] (!%p176_p2)  }
   0x9   : > { %1720 = vmatpush3.bf16.msra.mxu1 (!%p176_p2), %v1903_v3  ;;  %1681 = vmatprep.subr.bf16.mxu0 (!%p176_p2), %v1904_v4  ;;  %v1912_v12 = vld [vmem:[%s2354_s1 + $0x58] sm:$0xff] (!%p176_p2)   ;;  %v1916_v16 = vld [vmem:[%s2354_s1 + $0x60] sm:$0xff] (!%p176_p2)   ;;  %v1920_v20 = vld [vmem:[%s2354_s1 + $0x68] sm:$0xff] (!%p176_p2)  }
   0xa   : > { %1721 = vmatprep.subr.bf16.mxu1 (!%p176_p2), %v1905_v5  ;;  %v1913_v13 = vld [vmem:[%s2354_s1 + $0xd8] sm:$0xff] (!%p176_p2)   ;;  %v1917_v17 = vld [vmem:[%s2354_s1 + $0xe0] sm:$0xff] (!%p176_p2)   ;;  %v1921_v21 = vld [vmem:[%s2354_s1 + $0xe8] sm:$0xff] (!%p176_p2)  }
   0xb   : > { %v1914_v14 = vld [vmem:[%s2354_s1 + $0x18] sm:$0xff] (!%p176_p2)   ;;  %v1918_v18 = vld [vmem:[%s2354_s1 + $0x20] sm:$0xff] (!%p176_p2)   ;;  %v1922_v22 = vld [vmem:[%s2354_s1 + $0x28] sm:$0xff] (!%p176_p2)  }
   0xc   : > { %1682 = vmatpush3.bf16.msra.mxu0 (!%p176_p2), %v1906_v6  ;;  %v1915_v15 = vld [vmem:[%s2354_s1 + $0x98] sm:$0xff] (!%p176_p2)   ;;  %v1919_v19 = vld [vmem:[%s2354_s1 + $0xa0] sm:$0xff] (!%p176_p2)   ;;  %v1923_v23 = vld [vmem:[%s2354_s1 + $0xa8] sm:$0xff] (!%p176_p2)  }
   0xd   : > { %1722 = vmatpush3.bf16.msra.mxu1 %v1907_v7  ;;  %1683 = vmatprep.subr.bf16.mxu0 %v1908_v8  ;;  %s2359_s23 = smov (!%p208_p3, %s1504_s23), 15  ;;  %v1924_v24 = vld [vmem:[%s2354_s1 + $0x70] sm:$0xff]   ;;  %v1928_v28 = vld [vmem:[%s2354_s1 + $0x78] sm:$0xff]   ;;  %v1938_v36 = vld [vmem:[%s2354_s1 + $0x140] sm:$0xff]  }
   0xe   : > { %1723 = vmatprep.subr.bf16.mxu1 %v1909_v9  ;;  %v1925_v25 = vld [vmem:[%s2354_s1 + $0xf0] sm:$0xff]   ;;  %s1891_s21 = smul.u32 36, %s2359_s23  ;;  %v1929_v29 = vld [vmem:[%s2354_s1 + $0xf8] sm:$0xff]   ;;  %v1939_v37 = vld [vmem:[%s2354_s1 + $0x1c0] sm:$0xff]  }
   0xf   : > { %v1926_v26 = vld [vmem:[%s2354_s1 + $0x30] sm:$0xff]   ;;  %v1930_v30 = vld [vmem:[%s2354_s1 + $0x38] sm:$0xff]   ;;  %v1940_v38 = vld [vmem:[%s2354_s1 + $0x100] sm:$0xff]  }
  0x10   : > { %1684 = vmatpush3.bf16.msra.mxu0 %v1910_v10  ;;  %v1927_v27 = vld [vmem:[%s2354_s1 + $0xb0] sm:$0xff]   ;;  %s2163_s6 = scalar_lea.vmem %s2353_s0, %s1891_s21  ;;  %v1931_v31 = vld [vmem:[%s2354_s1 + $0xb8] sm:$0xff]   ;;  %v1941_v39 = vld [vmem:[%s2354_s1 + $0x180] sm:$0xff]  }
  0x11   : > { %1724 = vmatpush3.bf16.msra.mxu1 %v1911_v11  ;;  %1685 = vmatprep.subr.bf16.mxu0 %v1912_v12  ;;  %v1932_v32 = vld [vmem:[%s2163_s6] ss:$36 sps:$4 sm:$0xff]   ;;  %v1935_v34 = vld [vmem:[%s2163_s6 + $0x8] ss:$36 sps:$4 sm:$0xff]   ;;  %v1948_v45 = vld [vmem:[%s2163_s6 + $0x54] ss:$36 sps:$4 sm:$0xff]  }
  0x12   : > { %1725 = vmatprep.subr.bf16.mxu1 %v1913_v13  ;;  %v1934_v33 = vld [vmem:[%s2163_s6 + $0x4] ss:$36 sps:$4 sm:$0xff]   ;;  %v1937_v35 = vld [vmem:[%s2163_s6 + $0xc] ss:$36 sps:$4 sm:$0xff]   ;;  %v1956_v52 = vld [vmem:[%s2354_s1 + $0x158] sm:$0xff]  }
  0x13   : > { %1066 = vmatprep.mubr.bf16.mxu0 %v1934_v33  ;;  %1131 = vmatprep.mubr.bf16.mxu1 %v1937_v35  ;;  %v1942_v40 = vld [vmem:[%s2354_s1 + $0x148] sm:$0xff]   ;;  %v1951_v47 = vld [vmem:[%s2163_s6 + $0x50] ss:$36 sps:$4 sm:$0xff]   ;;  %v1957_v53 = vld [vmem:[%s2354_s1 + $0x1d8] sm:$0xff]  }
  0x14   : > { %1686 = vmatpush3.bf16.msra.mxu0 %v1914_v14  ;;  %v1943_v41 = vld [vmem:[%s2354_s1 + $0x1c8] sm:$0xff]   ;;  %v1952_v48 = vld [vmem:[%s2354_s1 + $0x150] sm:$0xff]   ;;  %v1958_v54 = vld [vmem:[%s2354_s1 + $0x118] sm:$0xff]  }
  0x15   : > { %1726 = vmatpush3.bf16.msra.mxu1 %v1915_v15  ;;  %1687 = vmatprep.subr.bf16.mxu0 %v1916_v16  ;;  %v1944_v42 = vld [vmem:[%s2354_s1 + $0x108] sm:$0xff]   ;;  %v1953_v49 = vld [vmem:[%s2354_s1 + $0x1d0] sm:$0xff]   ;;  %v1959_v55 = vld [vmem:[%s2354_s1 + $0x198] sm:$0xff]  }
  0x16   : > { %1727 = vmatprep.subr.bf16.mxu1 %v1917_v17  ;;  %v1945_v43 = vld [vmem:[%s2354_s1 + $0x188] sm:$0xff]   ;;  %v1954_v50 = vld [vmem:[%s2354_s1 + $0x110] sm:$0xff]   ;;  %v1962_v57 = vld [vmem:[%s2163_s6 + $0x9c] ss:$36 sps:$4 sm:$0xff]  }
  0x17   : > { %v1946_v44 = vld [vmem:[%s2163_s6 + $0x4c] ss:$36 sps:$4 sm:$0xff]   ;;  %v1960_v56 = vld [vmem:[%s2163_s6 + $0x94] ss:$36 sps:$4 sm:$0xff]   ;;  %v1966_v60 = vld [vmem:[%s2354_s1 + $0x160] sm:$0xff]  }
  0x18   : > { %1688 = vmatpush3.bf16.msra.mxu0 %v1918_v18  ;;  %v1950_v46 = vld [vmem:[%s2163_s6 + $0x48] ss:$36 sps:$4 sm:$0xff]   ;;  %v1955_v51 = vld [vmem:[%s2354_s1 + $0x190] sm:$0xff]   ;;  %v1965_v59 = vld [vmem:[%s2163_s6 + $0x98] ss:$36 sps:$4 sm:$0xff]  }
  0x19   : > { %1728 = vmatpush3.bf16.msra.mxu1 %v1919_v19  ;;  %1689 = vmatprep.subr.bf16.mxu0 %v1920_v20  ;;  %v1964_v58 = vld [vmem:[%s2163_s6 + $0x90] ss:$36 sps:$4 sm:$0xff]   ;;  %v1967_v61 = vld [vmem:[%s2354_s1 + $0x1e0] sm:$0xff]   ;;  %v1970_v0 = vld [vmem:[%s2354_s1 + $0x168] sm:$0xff]  }
  0x1a   : > { %1729 = vmatprep.subr.bf16.mxu1 %v1921_v21  ;;  %v1968_v62 = vld [vmem:[%s2354_s1 + $0x120] sm:$0xff]   ;;  %v1971_v1 = vld [vmem:[%s2354_s1 + $0x1e8] sm:$0xff]   ;;  %v1978_v6 = vld [vmem:[%s2163_s6 + $0xd8] ss:$36 sps:$4 sm:$0xff]  }
  0x1b   : > { %v1969_v63 = vld [vmem:[%s2354_s1 + $0x1a0] sm:$0xff]   ;;  %v1972_v2 = vld [vmem:[%s2354_s1 + $0x128] sm:$0xff]   ;;  %v1980_v8 = vld [vmem:[%s2354_s1 + $0x170] sm:$0xff]  }
  0x1c   : > { %1690 = vmatpush3.bf16.msra.mxu0 %v1922_v22  ;;  %v1973_v3 = vld [vmem:[%s2354_s1 + $0x1a8] sm:$0xff]   ;;  %v1974_v4 = vld [vmem:[%s2163_s6 + $0xdc] ss:$36 sps:$4 sm:$0xff]   ;;  %v1981_v9 = vld [vmem:[%s2354_s1 + $0x1f0] sm:$0xff]  }
  0x1d   : > { %1730 = vmatpush3.bf16.msra.mxu1 %v1923_v23  ;;  %1691 = vmatprep.subr.bf16.mxu0 %v1924_v24  ;;  %v1976_v5 = vld [vmem:[%s2163_s6 + $0xe4] ss:$36 sps:$4 sm:$0xff]   ;;  %v1982_v10 = vld [vmem:[%s2354_s1 + $0x130] sm:$0xff]   ;;  %v1984_v12 = vld [vmem:[%s2354_s1 + $0x178] sm:$0xff]  }
  0x1e   : > { %1731 = vmatprep.subr.bf16.mxu1 %v1925_v25  ;;  %v1979_v7 = vld [vmem:[%s2163_s6 + $0xe0] ss:$36 sps:$4 sm:$0xff]   ;;  %v1983_v11 = vld [vmem:[%s2354_s1 + $0x1b0] sm:$0xff]   ;;  %v1985_v13 = vld [vmem:[%s2354_s1 + $0x1f8] sm:$0xff]  }
  0x1f   : > { %v1986_v14 = vld [vmem:[%s2354_s1 + $0x138] sm:$0xff]   ;;  %v1988_v16 = vld [vmem:[%s2163_s6 + $0x10] ss:$36 sps:$4 sm:$0xff]   ;;  %v1994_v20 = vld [vmem:[%s2354_s1 + $0x200] sm:$0xff]  }
  0x20   : > { %1692 = vmatpush3.bf16.msra.mxu0 %v1926_v26  ;;  %v1987_v15 = vld [vmem:[%s2354_s1 + $0x1b8] sm:$0xff]   ;;  %v1995_v21 = vld [vmem:[%s2354_s1 + $0x208] sm:$0xff]   ;;  %v2001_v25 = vld [vmem:[%s2163_s6 + $0x60] ss:$36 sps:$4 sm:$0xff]  }
  0x21   : > { %1732 = vmatpush3.bf16.msra.mxu1 %v1927_v27  ;;  %1693 = vmatprep.subr.bf16.mxu0 %v1928_v28  ;;  %v1990_v17 = vld [vmem:[%s2163_s6 + $0x14] ss:$36 sps:$4 sm:$0xff]   ;;  %v1993_v19 = vld [vmem:[%s2163_s6 + $0x1c] ss:$36 sps:$4 sm:$0xff]   ;;  %v1998_v23 = vld [vmem:[%s2163_s6 + $0x64] ss:$36 sps:$4 sm:$0xff]  }
  0x22   : > { %1733 = vmatprep.subr.bf16.mxu1 %v1929_v29  ;;  %v1991_v18 = vld [vmem:[%s2163_s6 + $0x18] ss:$36 sps:$4 sm:$0xff]   ;;  %v2002_v26 = vld [vmem:[%s2354_s1 + $0x210] sm:$0xff]   ;;  %v2004_v27 = vld [vmem:[%s2163_s6 + $0xa4] ss:$36 sps:$4 sm:$0xff]  }
  0x23   : > { %v1996_v22 = vld [vmem:[%s2163_s6 + $0x5c] ss:$36 sps:$4 sm:$0xff]   ;;  %v2006_v28 = vld [vmem:[%s2163_s6 + $0xac] ss:$36 sps:$4 sm:$0xff]  }
  0x24   : > { %1694 = vmatpush3.bf16.msra.mxu0 %v1930_v30  ;;  %v2000_v24 = vld [vmem:[%s2163_s6 + $0x58] ss:$36 sps:$4 sm:$0xff]   ;;  %v2008_v30 = vld [vmem:[%s2163_s6 + $0xa0] ss:$36 sps:$4 sm:$0xff]   ;;  %v2012_v33 = vld [vmem:[%s2163_s6 + $0xec] ss:$36 sps:$4 sm:$0xff]  }
  0x25   : > { %1734 = vmatpush3.bf16.msra.mxu1 %v1931_v31  ;;  %1759 = vmatprep.subr.bf16.mxu0 %v1938_v36  ;;  %v2003_v29 = vld [vmem:[%s2354_s1 + $0x218] sm:$0xff]   ;;  %v2009_v31 = vld [vmem:[%s2163_s6 + $0xa8] ss:$36 sps:$4 sm:$0xff]  }
  0x26   : > { %1799 = vmatprep.subr.bf16.mxu1 %v1939_v37  ;;  %v2011_v35 = vld [vmem:[%s2354_s1 + $0x228] sm:$0xff]   ;;  %v2018_v37 = vld [vmem:[%s2354_s1 + $0x230] sm:$0xff]  }
  0x27   : > { %1067 = vmatmul.mubr.bf16.vlgmr.msra.gmra.mrb[0].mxu0 %v1932_v32  ;;  %v2010_v32 = vld [vmem:[%s2354_s1 + $0x220] sm:$0xff]   ;;  %v2016_v36 = vld [vmem:[%s2163_s6 + $0xe8] ss:$36 sps:$4 sm:$0xff]  }
  0x28   : > { %1132 = vmatmul.mubr.bf16.vlgmr.msra.gmra.mrb[0].mxu1 %v1935_v34  ;;  %1760 = vmatpush3.bf16.msra.mxu0 %v1940_v38  ;;  %v2014_v34 = vld [vmem:[%s2163_s6 + $0xf4] ss:$36 sps:$4 sm:$0xff]  }
  0x29   : > { %1800 = vmatpush3.bf16.msra.mxu1 %v1941_v39  ;;  %1761 = vmatprep.subr.bf16.mxu0 %v1942_v40  ;;  %v2017_v38 = vld [vmem:[%s2163_s6 + $0xf0] ss:$36 sps:$4 sm:$0xff]   ;;  %v2020_v39 = vld [vmem:[%s2163_s6 + $0x20] ss:$36 sps:$4 sm:$0xff]  }
  0x2a   : > { %1801 = vmatprep.subr.bf16.mxu1 %v1943_v41  ;;  %1074 = vmatprep.mubr.bf16.mxu0 %v1946_v44  ;;  %v2021_v40 = vld [vmem:[%s2163_s6 + $0xb0] ss:$36 sps:$4 sm:$0xff]   ;;  %v2019_v41 = vld [vmem:[%s2354_s1 + $0x238] sm:$0xff]  }
  0x2b   : > { %1139 = vmatprep.mubr.bf16.mxu1 %v1948_v45 }
  0x2c   : > { %1762 = vmatpush3.bf16.msra.mxu0 %v1944_v42  ;;  %v2022_v42 = vld [vmem:[%s2163_s6 + $0x68] ss:$36 sps:$4 sm:$0xff]  }
  0x2d   : > { %1802 = vmatpush3.bf16.msra.mxu1 %v1945_v43  ;;  %1763 = vmatprep.subr.bf16.mxu0 %v1952_v48  ;;  %v2023_v43 = vld [vmem:[%s2163_s6 + $0xf8] ss:$36 sps:$4 sm:$0xff]   ;;  %s1507_s6 = sshll.u32 %s2359_s23, 2 }
  0x2e   : > { %1803 = vmatprep.subr.bf16.mxu1 %v1953_v49  ;;  %s218_s29 = scalar_lea.vmem %s2356_s3, %s1507_s6  ;;  %s224_s16 = scalar_lea.vmem %s2357_s4, %s1507_s6 }
  0x2f   : > { %1075 = vmatmul.mubr.bf16.gmra.mrb[4].mxu0 %v1950_v46  ;;  %v1510_v46 = vld [vmem:[%s2355_s2] ss:$0 sm:$0xff] }
  0x30   : > { %1140 = vmatmul.mubr.bf16.gmra.mrb[4].mxu1 %v1951_v47  ;;  %1764 = vmatpush3.bf16.msra.mxu0 %v1954_v50 }
  0x31   : > { %1804 = vmatpush3.bf16.msra.mxu1 %v1955_v51  ;;  %1765 = vmatprep.subr.bf16.mxu0 %v1956_v52 }
  0x32   : > { %1805 = vmatprep.subr.bf16.mxu1 %v1957_v53  ;;  %1082 = vmatprep.mubr.bf16.mxu0 %v1960_v56 }
  0x33   : > { %1147 = vmatprep.mubr.bf16.mxu1 %v1962_v57 }
  0x34   : > { %1766 = vmatpush3.bf16.msra.mxu0 %v1958_v54 }
  0x35   : > { %1806 = vmatpush3.bf16.msra.mxu1 %v1959_v55  ;;  %1767 = vmatprep.subr.bf16.mxu0 %v1966_v60 }
  0x36   : > { %1807 = vmatprep.subr.bf16.mxu1 %v1967_v61 }
  0x37   : > { %1083 = vmatmul.mubr.bf16.gmra.mrb[8].mxu0 %v1964_v58 }
  0x38   : > { %1148 = vmatmul.mubr.bf16.gmra.mrb[8].mxu1 %v1965_v59  ;;  %1768 = vmatpush3.bf16.msra.mxu0 %v1968_v62 }
  0x39   : > { %1808 = vmatpush3.bf16.msra.mxu1 %v1969_v63  ;;  %1769 = vmatprep.subr.bf16.mxu0 %v1970_v0 }
  0x3a   : > { %1809 = vmatprep.subr.bf16.mxu1 %v1971_v1  ;;  %1090 = vmatprep.mubr.bf16.mxu0 %v1974_v4 }
  0x3b   : > { %1155 = vmatprep.mubr.bf16.mxu1 %v1976_v5 }
  0x3c   : > { %1770 = vmatpush3.bf16.msra.mxu0 %v1972_v2 }
  0x3d   : > { %1810 = vmatpush3.bf16.msra.mxu1 %v1973_v3  ;;  %1771 = vmatprep.subr.bf16.mxu0 %v1980_v8 }
  0x3e   : > { %1811 = vmatprep.subr.bf16.mxu1 %v1981_v9 }
  0x3f   : > { %1091 = vmatmul.mubr.bf16.gmra.mrb[12].mxu0 %v1978_v6 }
  0x40   : > { %1156 = vmatmul.mubr.bf16.gmra.mrb[12].mxu1 %v1979_v7  ;;  %1772 = vmatpush3.bf16.msra.mxu0 %v1982_v10 }
  0x41   : > { %1812 = vmatpush3.bf16.msra.mxu1 %v1983_v11  ;;  %1773 = vmatprep.subr.bf16.mxu0 %v1984_v12 }
  0x42   : > { %1813 = vmatprep.subr.bf16.mxu1 %v1985_v13  ;;  %1196 = vmatprep.mubr.bf16.mxu0 %v1990_v17 }
  0x43   : > { %1261 = vmatprep.mubr.bf16.mxu1 %v1993_v19 }
  0x44   : > { %1774 = vmatpush3.bf16.msra.mxu0 %v1986_v14 }
  0x45   : > { %1814 = vmatpush3.bf16.msra.mxu1 %v1987_v15  ;;  %1851 = vmatprep.subr.bf16.mxu0 %v1994_v20 }
  0x46   : > { %1875 = vmatprep.subr.bf16.mxu1 %v1994_v20 }
  0x47   : > { %1197 = vmatmul.mubr.bf16.vlgmr.msra.gmra.mrb[16].mxu0 %v1988_v16 }
  0x48   : > { %1262 = vmatmul.mubr.bf16.vlgmr.msra.gmra.mrb[16].mxu1 %v1991_v18  ;;  %1852 = vmatpush3.bf16.msra.mxu0 %v1994_v20 }
  0x49   : > { %1883 = vmatpush3.bf16.msra.mxu1 %v1994_v20  ;;  %1853 = vmatprep.subr.bf16.mxu0 %v1995_v21 }
  0x4a   : > { %1876 = vmatprep.subr.bf16.mxu1 %v1995_v21  ;;  %1204 = vmatprep.mubr.bf16.mxu0 %v1996_v22 }
  0x4b   : > { %1269 = vmatprep.mubr.bf16.mxu1 %v1998_v23 }
  0x4c   : > { %1854 = vmatpush3.bf16.msra.mxu0 %v1995_v21 }
  0x4d   : > { %1884 = vmatpush3.bf16.msra.mxu1 %v1995_v21  ;;  %1855 = vmatprep.subr.bf16.mxu0 %v2002_v26 }
  0x4e   : > { %1877 = vmatprep.subr.bf16.mxu1 %v2002_v26 }
  0x4f   : > { %1205 = vmatmul.mubr.bf16.gmra.mrb[20].mxu0 %v2000_v24 }
  0x50   : > { %1270 = vmatmul.mubr.bf16.gmra.mrb[20].mxu1 %v2001_v25  ;;  %1212 = vmatprep.mubr.bf16.mxu0 %v2004_v27 }
  0x51   : > { %1856 = vmatpush3.bf16.msra.mxu0 %v2002_v26  ;;  %1277 = vmatprep.mubr.bf16.mxu1 %v2006_v28 }
  0x52   : > { %1885 = vmatpush3.bf16.msra.mxu1 %v2002_v26  ;;  %1857 = vmatprep.subr.bf16.mxu0 %v2003_v29 }
  0x53   : > { %1878 = vmatprep.subr.bf16.mxu1 %v2003_v29 }
  0x55   : > { %1858 = vmatpush3.bf16.msra.mxu0 %v2003_v29 }
  0x56   : > { %1886 = vmatpush3.bf16.msra.mxu1 %v2003_v29  ;;  %1859 = vmatprep.subr.bf16.mxu0 %v2010_v32 }
  0x57   : > { %1213 = vmatmul.mubr.bf16.gmra.mrb[24].mxu0 %v2008_v30  ;;  %1879 = vmatprep.subr.bf16.mxu1 %v2010_v32 }
  0x58   : > { %1278 = vmatmul.mubr.bf16.gmra.mrb[24].mxu1 %v2009_v31  ;;  %1220 = vmatprep.mubr.bf16.mxu0 %v2012_v33 }
  0x59   : > { %1860 = vmatpush3.bf16.msra.mxu0 %v2010_v32  ;;  %1285 = vmatprep.mubr.bf16.mxu1 %v2014_v34 }
  0x5a   : > { %1887 = vmatpush3.bf16.msra.mxu1 %v2010_v32  ;;  %1861 = vmatprep.subr.bf16.mxu0 %v2011_v35 }
  0x5b   : > { %1880 = vmatprep.subr.bf16.mxu1 %v2011_v35 }
  0x5d   : > { %1862 = vmatpush3.bf16.msra.mxu0 %v2011_v35 }
  0x5e   : > { %1888 = vmatpush3.bf16.msra.mxu1 %v2011_v35  ;;  %1863 = vmatprep.subr.bf16.mxu0 %v2018_v37 }
  0x5f   : > { %1221 = vmatmul.mubr.bf16.gmra.mrb[28].mxu0 %v2016_v36  ;;  %1881 = vmatprep.subr.bf16.mxu1 %v2018_v37 }
  0x60   : > { %1286 = vmatmul.mubr.bf16.gmra.mrb[28].mxu1 %v2017_v38  ;;  %1867 = vmatprep.mubr.bf16.mxu0 %v2020_v39 }
  0x61   : > { %1864 = vmatpush3.bf16.msra.mxu0 %v2018_v37  ;;  %1871 = vmatprep.mubr.bf16.mxu1 %v2021_v40 }
  0x62   : > { %1889 = vmatpush3.bf16.msra.mxu1 %v2018_v37  ;;  %1865 = vmatprep.subr.bf16.mxu0 %v2019_v41 }
  0x63   : > { %1882 = vmatprep.subr.bf16.mxu1 %v2019_v41 }
  0x65   : > { %1866 = vmatpush3.bf16.msra.mxu0 %v2019_v41 }
  0x66   : > { %1890 = vmatpush3.bf16.msra.mxu1 %v2019_v41 }
  0x68   : > { %1868 = vmatmul.mubr.bf16.vlgmr.msra.gmra.mrb[32].mxu0 %v2022_v42 }
  0x69   : > { %1872 = vmatmul.mubr.bf16.vlgmr.msra.gmra.mrb[32].mxu1 %v2023_v43 }
  0xfa   : > { %v1695_v44 = vpop.f32.mrb[0].mxu0 }
  0xfb   : > { %v1735_v45 = vpop.f32.mrb[0].mxu1  ;;  %v1696_v47 = vpop.f32.mrb[1].mxu0 }
  0xfc   : > { %v1697_v48 = vadd.f32 %v1696_v47, %v1695_v44  ;;  %v1736_v49 = vpop.f32.mrb[1].mxu1  ;;  %v1698_v50 = vpop.f32.mrb[2].mxu0 }
  0xfd   : > { %v1737_v51 = vadd.f32 %v1736_v49, %v1735_v45  ;;  %v1738_v52 = vpop.f32.mrb[2].mxu1  ;;  %v1699_v53 = vpop.f32.mrb[3].mxu0 }
  0xfe   : > { %v1069_v54 = vadd.f32 %v1697_v48, %v1510_v46  ;;  %v1700_v55 = vadd.f32 %v1699_v53, %v1698_v50  ;;  %v1739_v56 = vpop.f32.mrb[3].mxu1 }
  0xff   : > { %v1740_v57 = vadd.f32 %v1739_v56, %v1738_v52 }
 0x100   : > { %v1134_v58 = vadd.f32 %v1737_v51, %v1069_v54  ;;  %v1072_v59 = vadd.f32 %v1700_v55, %v1510_v46 }
 0x102   : > { %v1137_v60 = vadd.f32 %v1740_v57, %v1072_v59  ;;  %v1701_v61 = vpop.f32.mrb[4].mxu0 }
 0x103   : > { %v1741_v62 = vpop.f32.mrb[4].mxu1  ;;  %v1702_v63 = vpop.f32.mrb[5].mxu0 }
 0x104   : > { %v1703_v0 = vadd.f32 %v1702_v63, %v1701_v61  ;;  %v1742_v1 = vpop.f32.mrb[5].mxu1  ;;  %v1704_v2 = vpop.f32.mrb[6].mxu0 }
 0x105   : > { %v1743_v3 = vadd.f32 %v1742_v1, %v1741_v62  ;;  %v1744_v4 = vpop.f32.mrb[6].mxu1  ;;  %v1705_v5 = vpop.f32.mrb[7].mxu0 }
 0x106   : > { %v1077_v6 = vadd.f32 %v1703_v0, %v1510_v46  ;;  %v1706_v7 = vadd.f32 %v1705_v5, %v1704_v2  ;;  %v1745_v8 = vpop.f32.mrb[7].mxu1 }
 0x107   : > { %v1746_v9 = vadd.f32 %v1745_v8, %v1744_v4 }
 0x108   : > { %v1142_v10 = vadd.f32 %v1743_v3, %v1077_v6  ;;  %v1080_v11 = vadd.f32 %v1706_v7, %v1510_v46 }
 0x10a   : > { %v1145_v12 = vadd.f32 %v1746_v9, %v1080_v11  ;;  %v1707_v13 = vpop.f32.mrb[8].mxu0 }
 0x10b   : > { %v1747_v14 = vpop.f32.mrb[8].mxu1  ;;  %v1708_v15 = vpop.f32.mrb[9].mxu0 }
 0x10c   : > { %v1709_v16 = vadd.f32 %v1708_v15, %v1707_v13  ;;  %v1748_v17 = vpop.f32.mrb[9].mxu1  ;;  %v1710_v18 = vpop.f32.mrb[10].mxu0 }
 0x10d   : > { %v1749_v19 = vadd.f32 %v1748_v17, %v1747_v14  ;;  %v1750_v20 = vpop.f32.mrb[10].mxu1  ;;  %v1711_v21 = vpop.f32.mrb[11].mxu0 }
 0x10e   : > { %v1085_v22 = vadd.f32 %v1709_v16, %v1510_v46  ;;  %v1712_v23 = vadd.f32 %v1711_v21, %v1710_v18  ;;  %v1751_v24 = vpop.f32.mrb[11].mxu1 }
 0x10f   : > { %v1752_v25 = vadd.f32 %v1751_v24, %v1750_v20 }
 0x110   : > { %v1150_v26 = vadd.f32 %v1749_v19, %v1085_v22  ;;  %v1088_v27 = vadd.f32 %v1712_v23, %v1510_v46 }
 0x112   : > { %v1153_v28 = vadd.f32 %v1752_v25, %v1088_v27  ;;  %v1713_v29 = vpop.f32.mrb[12].mxu0 }
 0x113   : > { %v1753_v30 = vpop.f32.mrb[12].mxu1  ;;  %v1714_v31 = vpop.f32.mrb[13].mxu0 }
 0x114   : > { %v1754_v32 = vpop.f32.mrb[13].mxu1  ;;  %v1715_v33 = vadd.f32 %v1714_v31, %v1713_v29  ;;  %v1716_v35 = vpop.f32.mrb[14].mxu0 }
 0x115   : > { %v1755_v34 = vadd.f32 %v1754_v32, %v1753_v30  ;;  %v1756_v36 = vpop.f32.mrb[14].mxu1  ;;  %v1717_v37 = vpop.f32.mrb[15].mxu0 }
 0x116   : > { %v1757_v38 = vpop.f32.mrb[15].mxu1  ;;  %v1093_v39 = vadd.f32 %v1715_v33, %v1510_v46  ;;  %v1718_v40 = vadd.f32 %v1717_v37, %v1716_v35 }
 0x117   : > { %v1758_v41 = vadd.f32 %v1757_v38, %v1756_v36 }
 0x118   : > { %v1158_v42 = vadd.f32 %v1755_v34, %v1093_v39  ;;  %v1096_v43 = vadd.f32 %v1718_v40, %v1510_v46 }
 0x11a   : > { %v2330_v44 = vadd.f32 %v1758_v41, %v1096_v43  ;;  %v1775_v45 = vpop.f32.mrb[16].mxu0 }
 0x11b   : > { %v1776_v47 = vpop.f32.mrb[17].mxu0  ;;  %v1815_v48 = vpop.f32.mrb[16].mxu1 }
 0x11c   : > { %v1777_v49 = vadd.f32 %v1776_v47, %v1775_v45  ;;  %v1778_v50 = vpop.f32.mrb[18].mxu0  ;;  %v1816_v51 = vpop.f32.mrb[17].mxu1  ;;  %v1673_v45 = vld [vmem:[%s218_s29 + $0x8] sm:$0xff]  }
 0x11d   : > { %v1779_v52 = vpop.f32.mrb[19].mxu0  ;;  %v1817_v54 = vadd.f32 %v1816_v51, %v1815_v48  ;;  %v1818_v55 = vpop.f32.mrb[18].mxu1  ;;  %v1675_v48 = vld [vmem:[%s218_s29 + $0x18] sm:$0xff]  }
 0x11e   : > { %v1199_v53 = vadd.f32 %v1777_v49, %v1134_v58  ;;  %v1780_v56 = vadd.f32 %v1779_v52, %v1778_v50  ;;  %v1819_v57 = vpop.f32.mrb[19].mxu1  ;;  %v1638_v49 = vld [vmem:[%s218_s29] sm:$0xff]   ;;  %v1674_v50 = vld [vmem:[%s218_s29 + $0x10] sm:$0xff]   ;;  %v1643_v52 = vunpack.c.l.bf16 %v1673_v45 }
 0x11f   : > { %v1820_v61 = vadd.f32 %v1819_v57, %v1818_v55  ;;  %v1639_v55 = vunpack.c.l.bf16 %v1638_v49 }
 0x120   : > { %v1202_v59 = vadd.f32 %v1780_v56, %v1137_v60  ;;  %v2332_v62 = vadd.f32 %v1817_v54, %v1199_v53  ;;  %v1651_v54 = vunpack.c.l.bf16 %v1675_v48 }
 0x122   : > { %v1781_v63 = vpop.f32.mrb[20].mxu0  ;;  %v2334_v46 = vadd.f32 %v1820_v61, %v1202_v59  ;;  %v1647_v59 = vunpack.c.l.bf16 %v1674_v50  ;;  %v1644_v61 = vunpack.c.h.bf16 %v1673_v45 }
 0x123   : > { %v1782_v0 = vpop.f32.mrb[21].mxu0  ;;  %v1821_v1 = vpop.f32.mrb[20].mxu1 }
 0x124   : > { %v1783_v2 = vadd.f32 %v1782_v0, %v1781_v63  ;;  %v1784_v3 = vpop.f32.mrb[22].mxu0  ;;  %v1822_v4 = vpop.f32.mrb[21].mxu1 }
 0x125   : > { %v1785_v5 = vpop.f32.mrb[23].mxu0  ;;  %v1823_v7 = vadd.f32 %v1822_v4, %v1821_v1  ;;  %v1824_v58 = vpop.f32.mrb[22].mxu1 }
 0x126   : > { %v1207_v6 = vadd.f32 %v1783_v2, %v1142_v10  ;;  %v1786_v8 = vadd.f32 %v1785_v5, %v1784_v3  ;;  %v1825_v9 = vpop.f32.mrb[23].mxu1  ;;  %v1652_v2 = vunpack.c.h.bf16 %v1675_v48  ;;  %v1640_v3 = vunpack.c.h.bf16 %v1638_v49 }
 0x127   : > { %v1826_v13 = vadd.f32 %v1825_v9, %v1824_v58 }
 0x128   : > { %v1210_v11 = vadd.f32 %v1786_v8, %v1145_v12  ;;  %v1272_v60 = vadd.f32 %v1823_v7, %v1207_v6  ;;  %v1648_v8 = vunpack.c.h.bf16 %v1674_v50 }
 0x12a   : > { %v1787_v14 = vpop.f32.mrb[24].mxu0  ;;  %v1275_v15 = vadd.f32 %v1826_v13, %v1210_v11 }
 0x12b   : > { %v1788_v16 = vpop.f32.mrb[25].mxu0  ;;  %v1827_v17 = vpop.f32.mrb[24].mxu1 }
 0x12c   : > { %v1789_v18 = vadd.f32 %v1788_v16, %v1787_v14  ;;  %v1790_v19 = vpop.f32.mrb[26].mxu0  ;;  %v1828_v20 = vpop.f32.mrb[25].mxu1 }
 0x12d   : > { %v1791_v21 = vpop.f32.mrb[27].mxu0  ;;  %v1829_v23 = vadd.f32 %v1828_v20, %v1827_v17  ;;  %v1830_v10 = vpop.f32.mrb[26].mxu1 }
 0x12e   : > { %v1215_v22 = vadd.f32 %v1789_v18, %v1150_v26  ;;  %v1792_v24 = vadd.f32 %v1791_v21, %v1790_v19  ;;  %v1831_v25 = vpop.f32.mrb[27].mxu1 }
 0x12f   : > { %v1832_v29 = vadd.f32 %v1831_v25, %v1830_v10 }
 0x130   : > { %v1218_v27 = vadd.f32 %v1792_v24, %v1153_v28  ;;  %v1280_v12 = vadd.f32 %v1829_v23, %v1215_v22 }
 0x132   : > { %v1793_v30 = vpop.f32.mrb[28].mxu0  ;;  %v1283_v31 = vadd.f32 %v1832_v29, %v1218_v27 }
 0x133   : > { %v1794_v32 = vpop.f32.mrb[29].mxu0  ;;  %v1833_v33 = vpop.f32.mrb[28].mxu1 }
 0x134   : > { %v1795_v34 = vadd.f32 %v1794_v32, %v1793_v30  ;;  %v1796_v35 = vpop.f32.mrb[30].mxu0  ;;  %v1834_v36 = vpop.f32.mrb[29].mxu1 }
 0x135   : > { %v1797_v37 = vpop.f32.mrb[31].mxu0  ;;  %v1835_v38 = vadd.f32 %v1834_v36, %v1833_v33  ;;  %v1836_v39 = vpop.f32.mrb[30].mxu1 }
 0x136   : > { %v1223_v26 = vadd.f32 %v1795_v34, %v1158_v42  ;;  %v1798_v28 = vadd.f32 %v1797_v37, %v1796_v35  ;;  %v1837_v40 = vpop.f32.mrb[31].mxu1 }
 0x137   : > { %v1838_v43 = vadd.f32 %v1837_v40, %v1836_v39 }
 0x138   : > { %v1226_v41 = vadd.f32 %v1798_v28, %v2330_v44  ;;  %v1288_v47 = vadd.f32 %v1835_v38, %v1223_v26 }
 0x13a   : > { %v1291_v51 = vadd.f32 %v1838_v43, %v1226_v41 }
 0x13b   : > { %v1869_v53 = vpop.f32.mrb[32].mxu0 }
 0x13c   : > { %v1337_v56 = vadd.f32 %v1869_v53, %v1272_v60  ;;  %v1873_v57 = vpop.f32.mrb[32].mxu1  ;;  %v1328_v42 = vpop.f32.mrb[33].mxu0 }
 0x13d   : > { %v1353_v63 = vadd.f32 %v1873_v57, %v1288_v47  ;;  %v1329_v0 = vadd.f32 %v1328_v42, %v2332_v62  ;;  %v1344_v44 = vpop.f32.mrb[33].mxu1  ;;  %v1870_v1 = vpop.f32.mrb[34].mxu0 }
 0x13e   : > { %v1377_v4 = vadd.f32 %v1643_v52, %v1337_v56  ;;  %v1345_v5 = vadd.f32 %v1344_v44, %v1280_v12  ;;  %v1340_v6 = vadd.f32 %v1870_v1, %v1275_v15  ;;  %v1874_v7 = vpop.f32.mrb[34].mxu1  ;;  %v1331_v58 = vpop.f32.mrb[35].mxu0 }
 0x13f   : > { %v1381_v9 = vadd.f32 %v1651_v54, %v1353_v63  ;;  %v1375_v11 = vadd.f32 %v1639_v55, %v1329_v0  ;;  %v1356_v13 = vadd.f32 %v1874_v7, %v1291_v51  ;;  %v1332_v60 = vadd.f32 %v1331_v58, %v2334_v46  ;;  %v1347_v14 = vpop.f32.mrb[35].mxu1 }
 0x140   : > { %v1379_v16 = vadd.f32 %v1647_v59, %v1345_v5  ;;  %v1378_v17 = vadd.f32 %v1644_v61, %v1340_v6  ;;  %v1348_v62 = vadd.f32 %v1347_v14, %v1283_v31  ;;  %v1385_v20 = vmax.f32 %v1377_v4, 0.0 }
 0x141   : > { %v1382_v18 = vadd.f32 %v1652_v2, %v1356_v13  ;;  %v1376_v19 = vadd.f32 %v1640_v3, %v1332_v60  ;;  %v1389_v23 = vmax.f32 %v1381_v9, 0.0  ;;  %v1383_v15 = vmax.f32 %v1375_v11, 0.0 }
 0x142   : > { %v1386_v21 = vmax.f32 %v1378_v17, 0.0  ;;  %v1380_v22 = vadd.f32 %v1648_v8, %v1348_v62  ;;  %v1387_v25 = vmax.f32 %v1379_v16, 0.0 }
 0x143   : > { %v1390_v10 = vmax.f32 %v1382_v18, 0.0  ;;  %v1384_v24 = vmax.f32 %v1376_v19, 0.0 }
 0x144   : > { %v1661_v46 = vpack.c.bf16 %v1386_v21, %v1385_v20  ;;  %v1388_v27 = vmax.f32 %v1380_v22, 0.0 }
 0x145   : > { %v1671_v29 = vpack.c.bf16 %v1390_v10, %v1389_v23  ;;  %v1656_v12 = vpack.c.bf16 %v1384_v24, %v1383_v15 }
 0x146   : > { %1676 = vst [vmem:[%s224_s16 + $0x8] sm:$0xff] %v1661_v46   ;;  %v1666_v30 = vpack.c.bf16 %v1388_v27, %v1387_v25 }
 0x147   : > { %1678 = vst [vmem:[%s224_s16 + $0x18] sm:$0xff] %v1671_v29   ;;  %1657 = vst [vmem:[%s224_s16] sm:$0xff] %v1656_v12  }
 0x148   : > { %1677 = vst [vmem:[%s224_s16 + $0x10] sm:$0xff] %v1666_v30  }
 0x149 PF: > { %s14_s15 = sadd.s32 1, %s2030_s15  }
 0x14a   : > { %p11_p4 = scmp.ge.s32.totalorder %s14_s15, 4  }
 0x14c   :  { %13 = sbr.rel (!%p11_p4) target bundleno = 1 (0x1), region = 69 }

// kernel: resnet_image_encoder_forward.17
= control target key start
LH: loop header
LB: loop body
LE: loop exit
PB: predicated region body
PF: predicated region fallthrough
CT: control target
= control target key end

     0   :  { %s1955_s15 = smov 0   ;;  %s2427_s0 = inlined_call_operand.vmem [shape: bf16[32,1152], index: 0, kind: input, shape index: {}]   ;;  %s2428_s1 = inlined_call_operand.vmem [shape: bf16[1152,256], index: 1, kind: input, shape index: {}]   ;;  %s2429_s2 = inlined_call_operand.vmem [shape: f32[1,256], index: 2, kind: input, shape index: {}]   ;;  %s2430_s3 = inlined_call_operand.vmem [shape: bf16[32,128], index: 3, kind: output, shape index: {0}]   ;;  %s2431_s4 = inlined_call_operand.vmem [shape: bf16[32,128], index: 4, kind: output, shape index: {1}]  }
   0x1 LB: > { %s1478_s16 = sadd.s32 4294967295, %s1927_s15   ;;  %p1482_p0 = scmp.ge.s32.totalorder %s1927_s15, 1  ;;  %s1927_s15 = sphi %s1955_s15, %s15_s15  }
   0x2   : > { %p167_p1 = scmp.lt.s32.totalorder %s1927_s15, 3 }
   0x4   : > { %p168_p2 = pnand %p1482_p0, %p167_p1 }
   0x5   : > { %v1692_v0 = vld [vmem:[%s2428_s1 + $0x4] ss:$8 sps:$4 sm:$0xff] (!%p168_p2)   ;;  %v1696_v2 = vld [vmem:[%s2428_s1] ss:$8 sps:$4 sm:$0xff] (!%p168_p2)   ;;  %v1698_v4 = vld [vmem:[%s2428_s1 + $0x14] ss:$8 sps:$4 sm:$0xff] (!%p168_p2)  }
   0x6   : > { %171 = sbr.rel (%p168_p2) target bundleno = 388 (0x184), region = 32  ;;  %v1694_v1 = vld [vmem:[%s2428_s1 + $0x204] ss:$8 sps:$4 sm:$0xff] (!%p168_p2)   ;;  %1151 = vmatprep.subr.bf16.mxu1 (!%p168_p2), %v1692_v0  ;;  %v1697_v3 = vld [vmem:[%s2428_s1 + $0x200] ss:$8 sps:$4 sm:$0xff] (!%p168_p2)   ;;  %s1483_s29 = sshll.u32 (!%p168_p2), %s1478_s16, 1 }
   0x7   : > { %1237 = vmatprep.subr.bf16.mxu0 (!%p168_p2), %v1694_v1  ;;  %1152 = vmatpush1.bf16.msra.mxu1 (!%p168_p2), %v1696_v2  ;;  %v1700_v5 = vld [vmem:[%s2428_s1 + $0x214] ss:$8 sps:$4 sm:$0xff] (!%p168_p2)   ;;  %v1702_v6 = vld [vmem:[%s2428_s1 + $0x10] ss:$8 sps:$4 sm:$0xff] (!%p168_p2)   ;;  %v1704_v8 = vld [vmem:[%s2428_s1 + $0x24] ss:$8 sps:$4 sm:$0xff] (!%p168_p2)  }
   0x8   : > { %1238 = vmatpush1.bf16.msra.mxu0 (!%p168_p2), %v1697_v3  ;;  %1153 = vmatprep.subr.bf16.mxu1 (!%p168_p2), %v1698_v4  ;;  %v1703_v7 = vld [vmem:[%s2428_s1 + $0x210] ss:$8 sps:$4 sm:$0xff] (!%p168_p2)   ;;  %v1706_v9 = vld [vmem:[%s2428_s1 + $0x224] ss:$8 sps:$4 sm:$0xff] (!%p168_p2)   ;;  %v1708_v10 = vld [vmem:[%s2428_s1 + $0x20] ss:$8 sps:$4 sm:$0xff] (!%p168_p2)  }
   0x9   : > { %1239 = vmatprep.subr.bf16.mxu0 (!%p168_p2), %v1700_v5  ;;  %v1709_v11 = vld [vmem:[%s2428_s1 + $0x220] ss:$8 sps:$4 sm:$0xff] (!%p168_p2)   ;;  %v1710_v12 = vld [vmem:[%s2428_s1 + $0x34] ss:$8 sps:$4 sm:$0xff] (!%p168_p2)   ;;  %v1714_v14 = vld [vmem:[%s2428_s1 + $0x30] ss:$8 sps:$4 sm:$0xff] (!%p168_p2)  }
   0xa   : > { %v1712_v13 = vld [vmem:[%s2428_s1 + $0x234] ss:$8 sps:$4 sm:$0xff] (!%p168_p2)   ;;  %v1715_v15 = vld [vmem:[%s2428_s1 + $0x230] ss:$8 sps:$4 sm:$0xff] (!%p168_p2)   ;;  %v1716_v16 = vld [vmem:[%s2428_s1 + $0x44] ss:$8 sps:$4 sm:$0xff] (!%p168_p2)  }
   0xb   : > { %1154 = vmatpush1.bf16.msra.mxu1 (!%p168_p2), %v1702_v6  ;;  %v1718_v17 = vld [vmem:[%s2428_s1 + $0x244] ss:$8 sps:$4 sm:$0xff] (!%p168_p2)   ;;  %v1720_v18 = vld [vmem:[%s2428_s1 + $0x40] ss:$8 sps:$4 sm:$0xff] (!%p168_p2)   ;;  %v1722_v20 = vld [vmem:[%s2428_s1 + $0x54] ss:$8 sps:$4 sm:$0xff] (!%p168_p2)  }
   0xc   : > { %1240 = vmatpush1.bf16.msra.mxu0 (!%p168_p2), %v1703_v7  ;;  %1155 = vmatprep.subr.bf16.mxu1 (!%p168_p2), %v1704_v8  ;;  %v1721_v19 = vld [vmem:[%s2428_s1 + $0x240] ss:$8 sps:$4 sm:$0xff] (!%p168_p2)   ;;  %v1724_v21 = vld [vmem:[%s2428_s1 + $0x254] ss:$8 sps:$4 sm:$0xff] (!%p168_p2)   ;;  %v1726_v22 = vld [vmem:[%s2428_s1 + $0x50] ss:$8 sps:$4 sm:$0xff] (!%p168_p2)  }
   0xd   : > { %1241 = vmatprep.subr.bf16.mxu0 %v1706_v9  ;;  %v1727_v23 = vld [vmem:[%s2428_s1 + $0x250] ss:$8 sps:$4 sm:$0xff]   ;;  %v1728_v24 = vld [vmem:[%s2428_s1 + $0x64] ss:$8 sps:$4 sm:$0xff]   ;;  %v1732_v26 = vld [vmem:[%s2428_s1 + $0x60] ss:$8 sps:$4 sm:$0xff]  }
   0xe   : > { %v1730_v25 = vld [vmem:[%s2428_s1 + $0x264] ss:$8 sps:$4 sm:$0xff]   ;;  %v1733_v27 = vld [vmem:[%s2428_s1 + $0x260] ss:$8 sps:$4 sm:$0xff]   ;;  %v1734_v28 = vld [vmem:[%s2428_s1 + $0x74] ss:$8 sps:$4 sm:$0xff]  }
   0xf   : > { %1156 = vmatpush1.bf16.msra.mxu1 %v1708_v10  ;;  %v1736_v29 = vld [vmem:[%s2428_s1 + $0x274] ss:$8 sps:$4 sm:$0xff]   ;;  %v1738_v30 = vld [vmem:[%s2428_s1 + $0x70] ss:$8 sps:$4 sm:$0xff]   ;;  %v1740_v32 = vld [vmem:[%s2428_s1 + $0x84] ss:$8 sps:$4 sm:$0xff]  }
  0x10   : > { %1242 = vmatpush1.bf16.msra.mxu0 %v1709_v11  ;;  %1157 = vmatprep.subr.bf16.mxu1 %v1710_v12  ;;  %v1739_v31 = vld [vmem:[%s2428_s1 + $0x270] ss:$8 sps:$4 sm:$0xff]   ;;  %p200_p3 = scmp.lt.s32.totalorder %s1483_s29, 3  ;;  %v1742_v33 = vld [vmem:[%s2428_s1 + $0x284] ss:$8 sps:$4 sm:$0xff]  }
  0x11   : > { %1243 = vmatprep.subr.bf16.mxu0 %v1712_v13  ;;  %v1744_v34 = vld [vmem:[%s2428_s1 + $0x80] ss:$8 sps:$4 sm:$0xff]   ;;  %v1746_v36 = vld [vmem:[%s2428_s1 + $0x94] ss:$8 sps:$4 sm:$0xff]   ;;  %v1750_v38 = vld [vmem:[%s2428_s1 + $0x90] ss:$8 sps:$4 sm:$0xff]  }
  0x12   : > { %v1745_v35 = vld [vmem:[%s2428_s1 + $0x280] ss:$8 sps:$4 sm:$0xff]   ;;  %s2433_s29 = smov (!%p200_p3, %s1483_s29), 3  ;;  %v1748_v37 = vld [vmem:[%s2428_s1 + $0x294] ss:$8 sps:$4 sm:$0xff]  }
  0x13   : > { %1158 = vmatpush1.bf16.msra.mxu1 %v1714_v14  ;;  %v1751_v39 = vld [vmem:[%s2428_s1 + $0x290] ss:$8 sps:$4 sm:$0xff]   ;;  %v1752_v40 = vld [vmem:[%s2428_s1 + $0xa4] ss:$8 sps:$4 sm:$0xff]   ;;  %s1682_s27 = smul.u32 36, %s2433_s29 }
  0x14   : > { %1244 = vmatpush1.bf16.msra.mxu0 %v1715_v15  ;;  %1159 = vmatprep.subr.bf16.mxu1 %v1716_v16  ;;  %v1754_v41 = vld [vmem:[%s2428_s1 + $0x2a4] ss:$8 sps:$4 sm:$0xff]   ;;  %v1756_v42 = vld [vmem:[%s2428_s1 + $0xa0] ss:$8 sps:$4 sm:$0xff]   ;;  %v1758_v44 = vld [vmem:[%s2428_s1 + $0xb4] ss:$8 sps:$4 sm:$0xff]  }
  0x15   : > { %1245 = vmatprep.subr.bf16.mxu0 %v1718_v17  ;;  %v1757_v43 = vld [vmem:[%s2428_s1 + $0x2a0] ss:$8 sps:$4 sm:$0xff]   ;;  %s2106_s12 = scalar_lea.vmem %s2427_s0, %s1682_s27  ;;  %v1760_v45 = vld [vmem:[%s2428_s1 + $0x2b4] ss:$8 sps:$4 sm:$0xff]   ;;  %v1762_v46 = vld [vmem:[%s2428_s1 + $0xb0] ss:$8 sps:$4 sm:$0xff]  }
  0x16   : > { %v1763_v47 = vld [vmem:[%s2428_s1 + $0x2b0] ss:$8 sps:$4 sm:$0xff]   ;;  %v1790_v48 = vld [vmem:[%s2106_s12 + $0x4] ss:$36 sps:$4 sm:$0xff]   ;;  %v1770_v54 = vld [vmem:[%s2428_s1 + $0xd4] ss:$8 sps:$4 sm:$0xff]  }
  0x17   : > { %1160 = vmatpush1.bf16.msra.mxu1 %v1720_v18  ;;  %v1764_v49 = vld [vmem:[%s2428_s1 + $0xc4] ss:$8 sps:$4 sm:$0xff]   ;;  %1183 = vmatprep.mubr.bf16.mxu1 %v1790_v48  ;;  %v1796_v51 = vld [vmem:[%s2106_s12 + $0x14] ss:$36 sps:$4 sm:$0xff]   ;;  %v1768_v52 = vld [vmem:[%s2428_s1 + $0xc0] ss:$8 sps:$4 sm:$0xff]  }
  0x18   : > { %1246 = vmatpush1.bf16.msra.mxu0 %v1721_v19  ;;  %1161 = vmatprep.subr.bf16.mxu1 %v1722_v20  ;;  %v1766_v50 = vld [vmem:[%s2428_s1 + $0x2c4] ss:$8 sps:$4 sm:$0xff]   ;;  %v1769_v53 = vld [vmem:[%s2428_s1 + $0x2c0] ss:$8 sps:$4 sm:$0xff]   ;;  %v1772_v55 = vld [vmem:[%s2428_s1 + $0x2d4] ss:$8 sps:$4 sm:$0xff]  }
  0x19   : > { %1247 = vmatprep.subr.bf16.mxu0 %v1724_v21  ;;  %1269 = vmatprep.mubr.bf16.mxu0 %v1796_v51  ;;  %v1774_v56 = vld [vmem:[%s2428_s1 + $0xd0] ss:$8 sps:$4 sm:$0xff]   ;;  %v1776_v58 = vld [vmem:[%s2428_s1 + $0xe4] ss:$8 sps:$4 sm:$0xff]   ;;  %v1780_v60 = vld [vmem:[%s2428_s1 + $0xe0] ss:$8 sps:$4 sm:$0xff]  }
  0x1a   : > { %v1775_v57 = vld [vmem:[%s2428_s1 + $0x2d0] ss:$8 sps:$4 sm:$0xff]   ;;  %v1778_v59 = vld [vmem:[%s2428_s1 + $0x2e4] ss:$8 sps:$4 sm:$0xff]   ;;  %v1781_v61 = vld [vmem:[%s2428_s1 + $0x2e0] ss:$8 sps:$4 sm:$0xff]  }
  0x1b   : > { %1162 = vmatpush1.bf16.msra.mxu1 %v1726_v22  ;;  %v1782_v62 = vld [vmem:[%s2428_s1 + $0xf4] ss:$8 sps:$4 sm:$0xff]   ;;  %v1786_v0 = vld [vmem:[%s2428_s1 + $0xf0] ss:$8 sps:$4 sm:$0xff]   ;;  %v1793_v2 = vld [vmem:[%s2428_s1 + $0x104] ss:$8 sps:$4 sm:$0xff]  }
  0x1c   : > { %1248 = vmatpush1.bf16.msra.mxu0 %v1727_v23  ;;  %1163 = vmatprep.subr.bf16.mxu1 %v1728_v24  ;;  %v1784_v63 = vld [vmem:[%s2428_s1 + $0x2f4] ss:$8 sps:$4 sm:$0xff]   ;;  %v1787_v1 = vld [vmem:[%s2428_s1 + $0x2f0] ss:$8 sps:$4 sm:$0xff]   ;;  %v1799_v3 = vld [vmem:[%s2428_s1 + $0x304] ss:$8 sps:$4 sm:$0xff]  }
  0x1d   : > { %1249 = vmatprep.subr.bf16.mxu0 %v1730_v25  ;;  %v1788_v4 = vld [vmem:[%s2106_s12] ss:$36 sps:$4 sm:$0xff]   ;;  %v1794_v6 = vld [vmem:[%s2106_s12 + $0x10] ss:$36 sps:$4 sm:$0xff]  }
  0x1e   : > { %v1791_v5 = vld [vmem:[%s2428_s1 + $0x100] ss:$8 sps:$4 sm:$0xff]   ;;  %v1802_v8 = vld [vmem:[%s2428_s1 + $0x114] ss:$8 sps:$4 sm:$0xff]   ;;  %v1800_v10 = vld [vmem:[%s2428_s1 + $0x110] ss:$8 sps:$4 sm:$0xff]  }
  0x1f   : > { %1164 = vmatpush1.bf16.msra.mxu1 %v1732_v26  ;;  %v1797_v7 = vld [vmem:[%s2428_s1 + $0x300] ss:$8 sps:$4 sm:$0xff]   ;;  %v1805_v9 = vld [vmem:[%s2428_s1 + $0x314] ss:$8 sps:$4 sm:$0xff]   ;;  %v1803_v11 = vld [vmem:[%s2428_s1 + $0x310] ss:$8 sps:$4 sm:$0xff]  }
  0x20   : > { %1250 = vmatpush1.bf16.msra.mxu0 %v1733_v27  ;;  %1165 = vmatprep.subr.bf16.mxu1 %v1734_v28  ;;  %v1808_v12 = vld [vmem:[%s2428_s1 + $0x124] ss:$8 sps:$4 sm:$0xff]   ;;  %v1806_v14 = vld [vmem:[%s2428_s1 + $0x120] ss:$8 sps:$4 sm:$0xff]   ;;  %v1814_v16 = vld [vmem:[%s2428_s1 + $0x134] ss:$8 sps:$4 sm:$0xff]  }
  0x21   : > { %1251 = vmatprep.subr.bf16.mxu0 %v1736_v29  ;;  %v1811_v13 = vld [vmem:[%s2428_s1 + $0x324] ss:$8 sps:$4 sm:$0xff]   ;;  %v1809_v15 = vld [vmem:[%s2428_s1 + $0x320] ss:$8 sps:$4 sm:$0xff]   ;;  %v1817_v17 = vld [vmem:[%s2428_s1 + $0x334] ss:$8 sps:$4 sm:$0xff]  }
  0x22   : > { %v1812_v18 = vld [vmem:[%s2428_s1 + $0x130] ss:$8 sps:$4 sm:$0xff]   ;;  %v1820_v20 = vld [vmem:[%s2428_s1 + $0x144] ss:$8 sps:$4 sm:$0xff]   ;;  %v1818_v22 = vld [vmem:[%s2428_s1 + $0x140] ss:$8 sps:$4 sm:$0xff]  }
  0x23   : > { %1166 = vmatpush1.bf16.msra.mxu1 %v1738_v30  ;;  %v1815_v19 = vld [vmem:[%s2428_s1 + $0x330] ss:$8 sps:$4 sm:$0xff]   ;;  %v1823_v21 = vld [vmem:[%s2428_s1 + $0x344] ss:$8 sps:$4 sm:$0xff]   ;;  %v1821_v23 = vld [vmem:[%s2428_s1 + $0x340] ss:$8 sps:$4 sm:$0xff]  }
  0x24   : > { %1252 = vmatpush1.bf16.msra.mxu0 %v1739_v31  ;;  %1167 = vmatprep.subr.bf16.mxu1 %v1740_v32  ;;  %v1826_v24 = vld [vmem:[%s2428_s1 + $0x154] ss:$8 sps:$4 sm:$0xff]   ;;  %v1824_v26 = vld [vmem:[%s2428_s1 + $0x150] ss:$8 sps:$4 sm:$0xff]   ;;  %v1832_v28 = vld [vmem:[%s2428_s1 + $0x164] ss:$8 sps:$4 sm:$0xff]  }
  0x25   : > { %1253 = vmatprep.subr.bf16.mxu0 %v1742_v33  ;;  %v1829_v25 = vld [vmem:[%s2428_s1 + $0x354] ss:$8 sps:$4 sm:$0xff]   ;;  %v1827_v27 = vld [vmem:[%s2428_s1 + $0x350] ss:$8 sps:$4 sm:$0xff]   ;;  %v1835_v29 = vld [vmem:[%s2428_s1 + $0x364] ss:$8 sps:$4 sm:$0xff]  }
  0x26   : > { %v1830_v30 = vld [vmem:[%s2428_s1 + $0x160] ss:$8 sps:$4 sm:$0xff]   ;;  %v1838_v32 = vld [vmem:[%s2428_s1 + $0x174] ss:$8 sps:$4 sm:$0xff]  }
  0x27   : > { %1168 = vmatpush1.bf16.msra.mxu1 %v1744_v34  ;;  %v1833_v31 = vld [vmem:[%s2428_s1 + $0x360] ss:$8 sps:$4 sm:$0xff]   ;;  %v1841_v33 = vld [vmem:[%s2428_s1 + $0x374] ss:$8 sps:$4 sm:$0xff]   ;;  %v1892_v34 = vld [vmem:[%s2106_s12 + $0xc] ss:$36 sps:$4 sm:$0xff]  }
  0x28   : > { %1254 = vmatpush1.bf16.msra.mxu0 %v1745_v35  ;;  %1169 = vmatprep.subr.bf16.mxu1 %v1746_v36  ;;  %v1895_v35 = vld [vmem:[%s2106_s12 + $0x1c] ss:$36 sps:$4 sm:$0xff]   ;;  %v1836_v36 = vld [vmem:[%s2428_s1 + $0x170] ss:$8 sps:$4 sm:$0xff]  }
  0x29   : > { %1255 = vmatprep.subr.bf16.mxu0 %v1748_v37  ;;  %v1839_v37 = vld [vmem:[%s2428_s1 + $0x370] ss:$8 sps:$4 sm:$0xff]   ;;  %v1854_v48 = vld [vmem:[%s2428_s1 + $0x1a0] ss:$8 sps:$4 sm:$0xff]   ;;  %v1865_v51 = vld [vmem:[%s2428_s1 + $0x3b4] ss:$8 sps:$4 sm:$0xff]  }
  0x2b   : > { %1170 = vmatpush1.bf16.msra.mxu1 %v1750_v38  ;;  %v1844_v38 = vld [vmem:[%s2428_s1 + $0x184] ss:$8 sps:$4 sm:$0xff]  }
  0x2c   : > { %1256 = vmatpush1.bf16.msra.mxu0 %v1751_v39  ;;  %1171 = vmatprep.subr.bf16.mxu1 %v1752_v40  ;;  %v1847_v39 = vld [vmem:[%s2428_s1 + $0x384] ss:$8 sps:$4 sm:$0xff]   ;;  %v1842_v40 = vld [vmem:[%s2428_s1 + $0x180] ss:$8 sps:$4 sm:$0xff]  }
  0x2d   : > { %1257 = vmatprep.subr.bf16.mxu0 %v1754_v41  ;;  %v1845_v41 = vld [vmem:[%s2428_s1 + $0x380] ss:$8 sps:$4 sm:$0xff]  }
  0x2f   : > { %1172 = vmatpush1.bf16.msra.mxu1 %v1756_v42  ;;  %v1850_v42 = vld [vmem:[%s2428_s1 + $0x194] ss:$8 sps:$4 sm:$0xff]  }
  0x30   : > { %1258 = vmatpush1.bf16.msra.mxu0 %v1757_v43  ;;  %1173 = vmatprep.subr.bf16.mxu1 %v1758_v44  ;;  %v1853_v43 = vld [vmem:[%s2428_s1 + $0x394] ss:$8 sps:$4 sm:$0xff]   ;;  %v1848_v44 = vld [vmem:[%s2428_s1 + $0x190] ss:$8 sps:$4 sm:$0xff]  }
  0x31   : > { %1259 = vmatprep.subr.bf16.mxu0 %v1760_v45  ;;  %v1851_v45 = vld [vmem:[%s2428_s1 + $0x390] ss:$8 sps:$4 sm:$0xff]  }
  0x33   : > { %1174 = vmatpush1.bf16.msra.mxu1 %v1762_v46  ;;  %v1856_v46 = vld [vmem:[%s2428_s1 + $0x1a4] ss:$8 sps:$4 sm:$0xff]  }
  0x34   : > { %1260 = vmatpush1.bf16.msra.mxu0 %v1763_v47  ;;  %1175 = vmatprep.subr.bf16.mxu1 %v1764_v49  ;;  %v1859_v47 = vld [vmem:[%s2428_s1 + $0x3a4] ss:$8 sps:$4 sm:$0xff]   ;;  %v1857_v49 = vld [vmem:[%s2428_s1 + $0x3a0] ss:$8 sps:$4 sm:$0xff]  }
  0x35   : > { %1261 = vmatprep.subr.bf16.mxu0 %v1766_v50  ;;  %v1862_v50 = vld [vmem:[%s2428_s1 + $0x1b4] ss:$8 sps:$4 sm:$0xff]  }
  0x37   : > { %1176 = vmatpush1.bf16.msra.mxu1 %v1768_v52  ;;  %v1860_v52 = vld [vmem:[%s2428_s1 + $0x1b0] ss:$8 sps:$4 sm:$0xff]  }
  0x38   : > { %1262 = vmatpush1.bf16.msra.mxu0 %v1769_v53  ;;  %1177 = vmatprep.subr.bf16.mxu1 %v1770_v54  ;;  %v1863_v53 = vld [vmem:[%s2428_s1 + $0x3b0] ss:$8 sps:$4 sm:$0xff]   ;;  %v1868_v54 = vld [vmem:[%s2428_s1 + $0x1c4] ss:$8 sps:$4 sm:$0xff]  }
  0x39   : > { %1263 = vmatprep.subr.bf16.mxu0 %v1772_v55  ;;  %v1871_v55 = vld [vmem:[%s2428_s1 + $0x3c4] ss:$8 sps:$4 sm:$0xff]  }
  0x3b   : > { %1178 = vmatpush1.bf16.msra.mxu1 %v1774_v56  ;;  %v1866_v56 = vld [vmem:[%s2428_s1 + $0x1c0] ss:$8 sps:$4 sm:$0xff]  }
  0x3c   : > { %1264 = vmatpush1.bf16.msra.mxu0 %v1775_v57  ;;  %1179 = vmatprep.subr.bf16.mxu1 %v1776_v58  ;;  %v1869_v57 = vld [vmem:[%s2428_s1 + $0x3c0] ss:$8 sps:$4 sm:$0xff]   ;;  %v1874_v58 = vld [vmem:[%s2428_s1 + $0x1d4] ss:$8 sps:$4 sm:$0xff]  }
  0x3d   : > { %1265 = vmatprep.subr.bf16.mxu0 %v1778_v59  ;;  %v1877_v59 = vld [vmem:[%s2428_s1 + $0x3d4] ss:$8 sps:$4 sm:$0xff]  }
  0x3f   : > { %1180 = vmatpush1.bf16.msra.mxu1 %v1780_v60  ;;  %v1872_v60 = vld [vmem:[%s2428_s1 + $0x1d0] ss:$8 sps:$4 sm:$0xff]  }
  0x40   : > { %1266 = vmatpush1.bf16.msra.mxu0 %v1781_v61  ;;  %1181 = vmatprep.subr.bf16.mxu1 %v1782_v62  ;;  %v1875_v61 = vld [vmem:[%s2428_s1 + $0x3d0] ss:$8 sps:$4 sm:$0xff]   ;;  %v1880_v62 = vld [vmem:[%s2428_s1 + $0x1e4] ss:$8 sps:$4 sm:$0xff]  }
  0x41   : > { %1267 = vmatprep.subr.bf16.mxu0 %v1784_v63  ;;  %v1883_v63 = vld [vmem:[%s2428_s1 + $0x3e4] ss:$8 sps:$4 sm:$0xff]  }
  0x43   : > { %1182 = vmatpush1.bf16.msra.mxu1 %v1786_v0  ;;  %v1878_v0 = vld [vmem:[%s2428_s1 + $0x1e0] ss:$8 sps:$4 sm:$0xff]  }
  0x44   : > { %1268 = vmatpush1.bf16.msra.mxu0 %v1787_v1  ;;  %1194 = vmatprep.subr.bf16.mxu1 %v1793_v2  ;;  %v1881_v1 = vld [vmem:[%s2428_s1 + $0x3e0] ss:$8 sps:$4 sm:$0xff]   ;;  %v1886_v2 = vld [vmem:[%s2428_s1 + $0x1f4] ss:$8 sps:$4 sm:$0xff]  }
  0x45   : > { %1280 = vmatprep.subr.bf16.mxu0 %v1799_v3  ;;  %v1889_v3 = vld [vmem:[%s2428_s1 + $0x3f4] ss:$8 sps:$4 sm:$0xff]  }
  0x46   : > { %1184 = vmatmul.mubr.bf16.vlgmr.msra.gmra.mrb[0].mxu1 %v1788_v4  ;;  %v1884_v4 = vld [vmem:[%s2428_s1 + $0x1f0] ss:$8 sps:$4 sm:$0xff]  }
  0x47   : > { %1270 = vmatmul.mubr.bf16.vlgmr.msra.gmra.mrb[0].mxu0 %v1794_v6  ;;  %1195 = vmatpush1.bf16.msra.mxu1 %v1791_v5  ;;  %v1887_v5 = vld [vmem:[%s2428_s1 + $0x3f0] ss:$8 sps:$4 sm:$0xff]   ;;  %v1898_v6 = vld [vmem:[%s2428_s1 + $0x404] ss:$8 sps:$4 sm:$0xff]  }
  0x48   : > { %1281 = vmatpush1.bf16.msra.mxu0 %v1797_v7  ;;  %1196 = vmatprep.subr.bf16.mxu1 %v1802_v8  ;;  %v1890_v7 = vld [vmem:[%s2106_s12 + $0x8] ss:$36 sps:$4 sm:$0xff]   ;;  %v1893_v8 = vld [vmem:[%s2106_s12 + $0x18] ss:$36 sps:$4 sm:$0xff]  }
  0x49   : > { %1282 = vmatprep.subr.bf16.mxu0 %v1805_v9  ;;  %1226 = vmatprep.mubr.bf16.mxu1 %v1892_v34  ;;  %v1896_v9 = vld [vmem:[%s2428_s1 + $0x400] ss:$8 sps:$4 sm:$0xff]  }
  0x4a   : > { %1312 = vmatprep.mubr.bf16.mxu0 %v1895_v35 }
  0x4b   : > { %1197 = vmatpush1.bf16.msra.mxu1 %v1800_v10  ;;  %v1901_v10 = vld [vmem:[%s2428_s1 + $0x414] ss:$8 sps:$4 sm:$0xff]  }
  0x4c   : > { %1283 = vmatpush1.bf16.msra.mxu0 %v1803_v11  ;;  %1198 = vmatprep.subr.bf16.mxu1 %v1808_v12  ;;  %v1899_v11 = vld [vmem:[%s2428_s1 + $0x410] ss:$8 sps:$4 sm:$0xff]   ;;  %v1929_v12 = vmov 0  }
  0x4d   : > { %1284 = vmatprep.subr.bf16.mxu0 %v1811_v13  ;;  %v1904_v13 = vld [vmem:[%s2428_s1 + $0x424] ss:$8 sps:$4 sm:$0xff]  }
  0x4f   : > { %1199 = vmatpush1.bf16.msra.mxu1 %v1806_v14  ;;  %v1902_v14 = vld [vmem:[%s2428_s1 + $0x420] ss:$8 sps:$4 sm:$0xff]  }
  0x50   : > { %1285 = vmatpush1.bf16.msra.mxu0 %v1809_v15  ;;  %1200 = vmatprep.subr.bf16.mxu1 %v1814_v16  ;;  %v1907_v15 = vld [vmem:[%s2428_s1 + $0x434] ss:$8 sps:$4 sm:$0xff]   ;;  %v1905_v16 = vld [vmem:[%s2428_s1 + $0x430] ss:$8 sps:$4 sm:$0xff]  }
  0x51   : > { %1286 = vmatprep.subr.bf16.mxu0 %v1817_v17  ;;  %v1910_v17 = vld [vmem:[%s2428_s1 + $0x444] ss:$8 sps:$4 sm:$0xff]  }
  0x53   : > { %1201 = vmatpush1.bf16.msra.mxu1 %v1812_v18  ;;  %v1908_v18 = vld [vmem:[%s2428_s1 + $0x440] ss:$8 sps:$4 sm:$0xff]  }
  0x54   : > { %1287 = vmatpush1.bf16.msra.mxu0 %v1815_v19  ;;  %1202 = vmatprep.subr.bf16.mxu1 %v1820_v20  ;;  %v1913_v19 = vld [vmem:[%s2428_s1 + $0x454] ss:$8 sps:$4 sm:$0xff]   ;;  %v1911_v20 = vld [vmem:[%s2428_s1 + $0x450] ss:$8 sps:$4 sm:$0xff]  }
  0x55   : > { %1288 = vmatprep.subr.bf16.mxu0 %v1823_v21  ;;  %v1916_v21 = vld [vmem:[%s2428_s1 + $0x464] ss:$8 sps:$4 sm:$0xff]  }
  0x57   : > { %1203 = vmatpush1.bf16.msra.mxu1 %v1818_v22  ;;  %v1914_v22 = vld [vmem:[%s2428_s1 + $0x460] ss:$8 sps:$4 sm:$0xff]  }
  0x58   : > { %1289 = vmatpush1.bf16.msra.mxu0 %v1821_v23  ;;  %1204 = vmatprep.subr.bf16.mxu1 %v1826_v24  ;;  %v1919_v23 = vld [vmem:[%s2428_s1 + $0x474] ss:$8 sps:$4 sm:$0xff]   ;;  %v1917_v24 = vld [vmem:[%s2428_s1 + $0x470] ss:$8 sps:$4 sm:$0xff]  }
  0x59   : > { %1290 = vmatprep.subr.bf16.mxu0 %v1829_v25  ;;  %v1920_v25 = vld [vmem:[%s2106_s12 + $0x20] ss:$36 sps:$4 sm:$0xff]   ;;  %s1486_s12 = sshll.u32 %s2433_s29, 2 }
  0x5a   : > { %s216_s8 = scalar_lea.vmem %s2431_s4, %s1486_s12  ;;  %s210_s11 = scalar_lea.vmem %s2430_s3, %s1486_s12 }
  0x5b   : > { %1205 = vmatpush1.bf16.msra.mxu1 %v1824_v26 }
  0x5c   : > { %1291 = vmatpush1.bf16.msra.mxu0 %v1827_v27  ;;  %1206 = vmatprep.subr.bf16.mxu1 %v1832_v28 }
  0x5d   : > { %1292 = vmatprep.subr.bf16.mxu0 %v1835_v29 }
  0x5f   : > { %1207 = vmatpush1.bf16.msra.mxu1 %v1830_v30  ;;  %v375_v30 = vlaneseq }
  0x60   : > { %1293 = vmatpush1.bf16.msra.mxu0 %v1833_v31  ;;  %1208 = vmatprep.subr.bf16.mxu1 %v1838_v32 }
  0x61   : > { %1294 = vmatprep.subr.bf16.mxu0 %v1841_v33  ;;  %v376_v31 = vshrl.u32 %v375_v30, 7  ;;  %v373_v33 = vld [vmem:[%s2429_s2] sm:$0x3] }
  0x63   : > { %1209 = vmatpush1.bf16.msra.mxu1 %v1836_v36  ;;  %v377_v32 = vsub.s32 0, %v376_v31  ;;  %v381_v34 = vsub.s32 1, %v376_v31 }
  0x64   : > { %1295 = vmatpush1.bf16.msra.mxu0 %v1839_v37  ;;  %1210 = vmatprep.subr.bf16.mxu1 %v1844_v38 }
  0x65   : > { %1296 = vmatprep.subr.bf16.mxu0 %v1847_v39  ;;  %v378_v35 = vrot.slane %v373_v33, %v377_v32  ;;  %v382_v36 = vrot.slane %v373_v33, %v381_v34 }
  0x67   : > { %1211 = vmatpush1.bf16.msra.mxu1 %v1842_v40 }
  0x68   : > { %1297 = vmatpush1.bf16.msra.mxu0 %v1845_v41  ;;  %1212 = vmatprep.subr.bf16.mxu1 %v1850_v42 }
  0x69   : > { %1298 = vmatprep.subr.bf16.mxu0 %v1853_v43 }
  0x6b   : > { %1213 = vmatpush1.bf16.msra.mxu1 %v1848_v44 }
  0x6c   : > { %1299 = vmatpush1.bf16.msra.mxu0 %v1851_v45  ;;  %1214 = vmatprep.subr.bf16.mxu1 %v1856_v46 }
  0x6d   : > { %1300 = vmatprep.subr.bf16.mxu0 %v1859_v47 }
  0x6f   : > { %1215 = vmatpush1.bf16.msra.mxu1 %v1854_v48 }
  0x70   : > { %1301 = vmatpush1.bf16.msra.mxu0 %v1857_v49  ;;  %1216 = vmatprep.subr.bf16.mxu1 %v1862_v50 }
  0x71   : > { %1302 = vmatprep.subr.bf16.mxu0 %v1865_v51 }
  0x73   : > { %1217 = vmatpush1.bf16.msra.mxu1 %v1860_v52 }
  0x74   : > { %1303 = vmatpush1.bf16.msra.mxu0 %v1863_v53  ;;  %1218 = vmatprep.subr.bf16.mxu1 %v1868_v54 }
  0x75   : > { %1304 = vmatprep.subr.bf16.mxu0 %v1871_v55 }
  0x77   : > { %1219 = vmatpush1.bf16.msra.mxu1 %v1866_v56 }
  0x78   : > { %1305 = vmatpush1.bf16.msra.mxu0 %v1869_v57  ;;  %1220 = vmatprep.subr.bf16.mxu1 %v1874_v58 }
  0x79   : > { %1306 = vmatprep.subr.bf16.mxu0 %v1877_v59 }
  0x7b   : > { %1221 = vmatpush1.bf16.msra.mxu1 %v1872_v60 }
  0x7c   : > { %1307 = vmatpush1.bf16.msra.mxu0 %v1875_v61  ;;  %1222 = vmatprep.subr.bf16.mxu1 %v1880_v62 }
  0x7d   : > { %1308 = vmatprep.subr.bf16.mxu0 %v1883_v63 }
  0x7f   : > { %1223 = vmatpush1.bf16.msra.mxu1 %v1878_v0 }
  0x80   : > { %1309 = vmatpush1.bf16.msra.mxu0 %v1881_v1  ;;  %1224 = vmatprep.subr.bf16.mxu1 %v1886_v2 }
  0x81   : > { %1310 = vmatprep.subr.bf16.mxu0 %v1889_v3 }
  0x83   : > { %1225 = vmatpush1.bf16.msra.mxu1 %v1884_v4 }
  0x84   : > { %1311 = vmatpush1.bf16.msra.mxu0 %v1887_v5 }
  0x85   : > { %1323 = vmatprep.subr.bf16.mxu0 %v1898_v6 }
  0x86   : > { %1227 = vmatmul.mubr.bf16.vlgmr.msra.gmra.mrb[0].mxu1 %v1890_v7 }
  0x87   : > { %1313 = vmatmul.mubr.bf16.vlgmr.msra.gmra.mrb[0].mxu0 %v1893_v8 }
  0x88   : > { %1324 = vmatpush1.bf16.msra.mxu0 %v1896_v9  ;;  %1355 = vmatprep.mubr.bf16.mxu0 %v1929_v12 }
  0x89   : > { %1325 = vmatprep.subr.bf16.mxu0 %v1901_v10 }
  0x8c   : > { %1326 = vmatpush1.bf16.msra.mxu0 %v1899_v11 }
  0x8d   : > { %1327 = vmatprep.subr.bf16.mxu0 %v1904_v13 }
  0x90   : > { %1328 = vmatpush1.bf16.msra.mxu0 %v1902_v14 }
  0x91   : > { %1329 = vmatprep.subr.bf16.mxu0 %v1907_v15 }
  0x94   : > { %1330 = vmatpush1.bf16.msra.mxu0 %v1905_v16 }
  0x95   : > { %1331 = vmatprep.subr.bf16.mxu0 %v1910_v17 }
  0x98   : > { %1332 = vmatpush1.bf16.msra.mxu0 %v1908_v18 }
  0x99   : > { %1333 = vmatprep.subr.bf16.mxu0 %v1913_v19 }
  0x9c   : > { %1334 = vmatpush1.bf16.msra.mxu0 %v1911_v20 }
  0x9d   : > { %1335 = vmatprep.subr.bf16.mxu0 %v1916_v21 }
  0xa0   : > { %1336 = vmatpush1.bf16.msra.mxu0 %v1914_v22 }
  0xa1   : > { %1337 = vmatprep.subr.bf16.mxu0 %v1919_v23 }
  0xa4   : > { %1338 = vmatpush1.bf16.msra.mxu0 %v1917_v24 }
  0xa7   : > { %1356 = vmatmul.mubr.bf16.vlgmr.msra.gmra.mrb[0].mxu0 %v1920_v25 }
 0x159   : > { %v1228_v26 = vpop.f32.mrb[0].mxu1 }
 0x15a   : > { %v1230_v27 = vpop.f32.mrb[1].mxu1  ;;  %v1662_v37 = vadd.f32 %v1228_v26, %v378_v35 }
 0x15b   : > { %v1232_v28 = vpop.f32.mrb[2].mxu1  ;;  %v1664_v38 = vadd.f32 %v1230_v27, %v382_v36 }
 0x15c   : > { %v1234_v29 = vpop.f32.mrb[3].mxu1  ;;  %v1666_v40 = vadd.f32 %v1232_v28, %v378_v35 }
 0x15d   : > { %v1668_v43 = vadd.f32 %v1234_v29, %v382_v36 }
 0x17a   : > { %v1357_v39 = vpop.f32.mrb[0].mxu0 }
 0x17b   : > { %v1663_v41 = vadd.f32 %v1662_v37, %v1357_v39  ;;  %v1359_v42 = vpop.f32.mrb[1].mxu0 }
 0x17c   : > { %v1665_v44 = vadd.f32 %v1664_v38, %v1359_v42  ;;  %v1361_v45 = vpop.f32.mrb[2].mxu0 }
 0x17d   : > { %v1667_v46 = vadd.f32 %v1666_v40, %v1361_v45  ;;  %v1363_v47 = vpop.f32.mrb[3].mxu0  ;;  %v1366_v49 = vmax.f32 %v1663_v41, 0.0 }
 0x17e   : > { %v1669_v48 = vadd.f32 %v1668_v43, %v1363_v47 }
 0x17f   : > { %v1367_v50 = vmax.f32 %v1667_v46, 0.0 }
 0x180   : > { %v1660_v51 = vpack.c.bf16 %v1669_v48, %v1665_v44 }
 0x181   : > { %v1655_v52 = vpack.c.bf16 %v1367_v50, %v1366_v49 }
 0x182   : > { %1661 = vst [vmem:[%s216_s8] sm:$0xff] %v1660_v51  }
 0x183   : > { %1656 = vst [vmem:[%s210_s11] sm:$0xff] %v1655_v52  }
 0x184 PF: > { %s15_s15 = sadd.s32 1, %s1927_s15  }
 0x185   : > { %p12_p4 = scmp.ge.s32.totalorder %s15_s15, 4  }
 0x187   :  { %14 = sbr.rel (!%p12_p4) target bundleno = 1 (0x1), region = 74 }

// kernel: resnet_image_encoder_forward.18
= control target key start
LH: loop header
LB: loop body
LE: loop exit
PB: predicated region body
PF: predicated region fallthrough
CT: control target
= control target key end

     0   :  { %s1513_s15 = smov 0   ;;  %s1769_s0 = inlined_call_operand.vmem [shape: bf16[32,1152], index: 0, kind: input, shape index: {}]   ;;  %s1770_s1 = inlined_call_operand.vmem [shape: bf16[1152,128], index: 1, kind: input, shape index: {}]   ;;  %s1771_s2 = inlined_call_operand.vmem [shape: f32[1,128], index: 2, kind: input, shape index: {}]   ;;  %s1772_s3 = inlined_call_operand.vmem [shape: bf16[32,128], index: 3, kind: input, shape index: {}]   ;;  %s1773_s4 = inlined_call_operand.vmem [shape: bf16[32,128], index: 4, kind: output, shape index: {}]  }
   0x1 LB: > { %s1157_s16 = sadd.s32 4294967295, %s1484_s15   ;;  %p1161_p0 = scmp.ge.s32.totalorder %s1484_s15, 1  ;;  %s1484_s15 = sphi %s1513_s15, %s14_s15  }
   0x2   : > { %p175_p1 = scmp.lt.s32.totalorder %s1484_s15, 3 }
   0x4   : > { %p176_p2 = pnand %p1161_p0, %p175_p1 }
   0x5   : > { %v1393_v0 = vld [vmem:[%s1770_s1 + $0x40] sm:$0xff] (!%p176_p2)   ;;  %v1397_v4 = vld [vmem:[%s1770_s1 + $0x48] sm:$0xff] (!%p176_p2)   ;;  %v1401_v8 = vld [vmem:[%s1770_s1 + $0x50] sm:$0xff] (!%p176_p2)   ;;  %s1162_s21 = sshll.u32 (!%p176_p2), %s1157_s16, 1  ;;  %vm1487_vm0 = vmmov (!%p176_p2), 0  }
   0x6   : > { %179 = sbr.rel (%p176_p2) target bundleno = 325 (0x145), region = 36  ;;  %v1394_v1 = vld [vmem:[%s1770_s1] sm:$0xff] (!%p176_p2)   ;;  %1265 = vmatprep.subr.bf16.mxu0 (!%p176_p2), %v1393_v0  ;;  %v1398_v5 = vld [vmem:[%s1770_s1 + $0x8] sm:$0xff] (!%p176_p2)   ;;  %v1402_v9 = vld [vmem:[%s1770_s1 + $0x10] sm:$0xff] (!%p176_p2)   ;;  %p208_p3 = scmp.lt.s32.totalorder (!%p176_p2), %s1162_s21, 3 }
   0x7   : > { %v1395_v2 = vld [vmem:[%s1770_s1 + $0xc0] sm:$0xff] (!%p176_p2)   ;;  %1266 = vmatpush3.bf16.msra.mxu0 (!%p176_p2), %v1394_v1  ;;  %v1399_v6 = vld [vmem:[%s1770_s1 + $0xc8] sm:$0xff] (!%p176_p2)   ;;  %v1403_v10 = vld [vmem:[%s1770_s1 + $0xd0] sm:$0xff] (!%p176_p2)  }
   0x8   : > { %v1396_v3 = vld [vmem:[%s1770_s1 + $0x80] sm:$0xff] (!%p176_p2)   ;;  %1287 = vmatprep.subr.bf16.mxu1 (!%p176_p2), %v1395_v2  ;;  %1267 = vmatprep.subr.bf16.mxu0 (!%p176_p2), %v1397_v4  ;;  %v1400_v7 = vld [vmem:[%s1770_s1 + $0x88] sm:$0xff] (!%p176_p2)   ;;  %v1404_v11 = vld [vmem:[%s1770_s1 + $0x90] sm:$0xff] (!%p176_p2)  }
   0x9   : > { %1288 = vmatpush3.bf16.msra.mxu1 (!%p176_p2), %v1396_v3  ;;  %v1405_v12 = vld [vmem:[%s1770_s1 + $0x58] sm:$0xff] (!%p176_p2)   ;;  %v1409_v16 = vld [vmem:[%s1770_s1 + $0x60] sm:$0xff] (!%p176_p2)   ;;  %v1413_v20 = vld [vmem:[%s1770_s1 + $0x68] sm:$0xff] (!%p176_p2)  }
   0xa   : > { %1289 = vmatprep.subr.bf16.mxu1 (!%p176_p2), %v1399_v6  ;;  %v1406_v13 = vld [vmem:[%s1770_s1 + $0x18] sm:$0xff] (!%p176_p2)   ;;  %v1410_v17 = vld [vmem:[%s1770_s1 + $0x20] sm:$0xff] (!%p176_p2)   ;;  %v1414_v21 = vld [vmem:[%s1770_s1 + $0x28] sm:$0xff] (!%p176_p2)   ;;  %v1486_v6 = vmov (!%p176_p2), 0.0  }
   0xb   : > { %1268 = vmatpush3.bf16.msra.mxu0 (!%p176_p2), %v1398_v5  ;;  %v1407_v14 = vld [vmem:[%s1770_s1 + $0xd8] sm:$0xff] (!%p176_p2)   ;;  %v1411_v18 = vld [vmem:[%s1770_s1 + $0xe0] sm:$0xff] (!%p176_p2)   ;;  %v1415_v22 = vld [vmem:[%s1770_s1 + $0xe8] sm:$0xff] (!%p176_p2)  }
   0xc   : > { %1269 = vmatprep.subr.bf16.mxu0 (!%p176_p2), %v1401_v8  ;;  %v1408_v15 = vld [vmem:[%s1770_s1 + $0x98] sm:$0xff] (!%p176_p2)   ;;  %v1412_v19 = vld [vmem:[%s1770_s1 + $0xa0] sm:$0xff] (!%p176_p2)   ;;  %v1416_v23 = vld [vmem:[%s1770_s1 + $0xa8] sm:$0xff] (!%p176_p2)  }
   0xd   : > { %1290 = vmatpush3.bf16.msra.mxu1 %v1400_v7  ;;  %s1775_s21 = smov (!%p208_p3, %s1162_s21), 3  ;;  %v1417_v24 = vld [vmem:[%s1770_s1 + $0x70] sm:$0xff]   ;;  %v1421_v28 = vld [vmem:[%s1770_s1 + $0x78] sm:$0xff]   ;;  %v1428_v34 = vld [vmem:[%s1770_s1 + $0x140] sm:$0xff]  }
   0xe   : > { %1291 = vmatprep.subr.bf16.mxu1 %v1403_v10  ;;  %s1382_s19 = smul.u32 36, %s1775_s21  ;;  %v1418_v25 = vld [vmem:[%s1770_s1 + $0x30] sm:$0xff]   ;;  %v1422_v29 = vld [vmem:[%s1770_s1 + $0x38] sm:$0xff]   ;;  %v1432_v37 = vld [vmem:[%s1770_s1 + $0x100] sm:$0xff]  }
   0xf   : > { %1270 = vmatpush3.bf16.msra.mxu0 %v1402_v9  ;;  %v1419_v26 = vld [vmem:[%s1770_s1 + $0xf0] sm:$0xff]   ;;  %v1423_v30 = vld [vmem:[%s1770_s1 + $0xf8] sm:$0xff]   ;;  %v1433_v38 = vld [vmem:[%s1770_s1 + $0x1c0] sm:$0xff]  }
  0x10   : > { %1271 = vmatprep.subr.bf16.mxu0 %v1405_v12  ;;  %v1420_v27 = vld [vmem:[%s1770_s1 + $0xb0] sm:$0xff]   ;;  %s1616_s30 = scalar_lea.vmem %s1769_s0, %s1382_s19  ;;  %v1427_v33 = vld [vmem:[%s1770_s1 + $0xb8] sm:$0xff]   ;;  %v1434_v39 = vld [vmem:[%s1770_s1 + $0x180] sm:$0xff]  }
  0x11   : > { %1292 = vmatpush3.bf16.msra.mxu1 %v1404_v11  ;;  %v1424_v31 = vld [vmem:[%s1616_s30] ss:$36 sps:$4 sm:$0xff]   ;;  %v1429_v35 = vld [vmem:[%s1616_s30 + $0x8] ss:$36 sps:$4 sm:$0xff]   ;;  %v1439_v44 = vld [vmem:[%s1770_s1 + $0x150] sm:$0xff]  }
  0x12   : > { %1293 = vmatprep.subr.bf16.mxu1 %v1407_v14  ;;  %v1426_v32 = vld [vmem:[%s1616_s30 + $0x4] ss:$36 sps:$4 sm:$0xff]   ;;  %v1431_v36 = vld [vmem:[%s1616_s30 + $0xc] ss:$36 sps:$4 sm:$0xff]   ;;  %v1443_v48 = vld [vmem:[%s1770_s1 + $0x158] sm:$0xff]  }
  0x13   : > { %1272 = vmatpush3.bf16.msra.mxu0 %v1406_v13  ;;  %898 = vmatprep.mubr.bf16.mxu0 %v1426_v32  ;;  %v1435_v40 = vld [vmem:[%s1770_s1 + $0x148] sm:$0xff]   ;;  %v1440_v45 = vld [vmem:[%s1770_s1 + $0x110] sm:$0xff]   ;;  %v1444_v49 = vld [vmem:[%s1770_s1 + $0x118] sm:$0xff]  }
  0x14   : > { %1273 = vmatprep.subr.bf16.mxu0 %v1409_v16  ;;  %939 = vmatprep.mubr.bf16.mxu1 %v1431_v36  ;;  %v1436_v41 = vld [vmem:[%s1770_s1 + $0x108] sm:$0xff]   ;;  %v1441_v46 = vld [vmem:[%s1770_s1 + $0x1d0] sm:$0xff]   ;;  %v1445_v50 = vld [vmem:[%s1770_s1 + $0x1d8] sm:$0xff]  }
  0x15   : > { %1294 = vmatpush3.bf16.msra.mxu1 %v1408_v15  ;;  %v1437_v42 = vld [vmem:[%s1770_s1 + $0x1c8] sm:$0xff]   ;;  %v1442_v47 = vld [vmem:[%s1770_s1 + $0x190] sm:$0xff]   ;;  %v1446_v51 = vld [vmem:[%s1770_s1 + $0x198] sm:$0xff]  }
  0x16   : > { %1295 = vmatprep.subr.bf16.mxu1 %v1411_v18  ;;  %v1438_v43 = vld [vmem:[%s1770_s1 + $0x188] sm:$0xff]   ;;  %v1447_v52 = vld [vmem:[%s1770_s1 + $0x160] sm:$0xff]   ;;  %v1455_v60 = vld [vmem:[%s1770_s1 + $0x170] sm:$0xff]  }
  0x17   : > { %1274 = vmatpush3.bf16.msra.mxu0 %v1410_v17  ;;  %v1448_v53 = vld [vmem:[%s1770_s1 + $0x120] sm:$0xff]   ;;  %v1451_v56 = vld [vmem:[%s1770_s1 + $0x168] sm:$0xff]   ;;  %v1456_v61 = vld [vmem:[%s1770_s1 + $0x130] sm:$0xff]  }
  0x18   : > { %1275 = vmatprep.subr.bf16.mxu0 %v1413_v20  ;;  %v1449_v54 = vld [vmem:[%s1770_s1 + $0x1e0] sm:$0xff]   ;;  %v1452_v57 = vld [vmem:[%s1770_s1 + $0x128] sm:$0xff]   ;;  %v1457_v62 = vld [vmem:[%s1770_s1 + $0x1f0] sm:$0xff]  }
  0x19   : > { %1296 = vmatpush3.bf16.msra.mxu1 %v1412_v19  ;;  %v1450_v55 = vld [vmem:[%s1770_s1 + $0x1a0] sm:$0xff]   ;;  %v1453_v58 = vld [vmem:[%s1770_s1 + $0x1e8] sm:$0xff]   ;;  %v1458_v63 = vld [vmem:[%s1770_s1 + $0x1b0] sm:$0xff]  }
  0x1a   : > { %1297 = vmatprep.subr.bf16.mxu1 %v1415_v22  ;;  %v1454_v59 = vld [vmem:[%s1770_s1 + $0x1a8] sm:$0xff]   ;;  %v1459_v0 = vld [vmem:[%s1770_s1 + $0x178] sm:$0xff]   ;;  %v1462_v3 = vld [vmem:[%s1616_s30 + $0x10] ss:$36 sps:$4 sm:$0xff]  }
  0x1b   : > { %1276 = vmatpush3.bf16.msra.mxu0 %v1414_v21  ;;  %v1460_v1 = vld [vmem:[%s1770_s1 + $0x138] sm:$0xff]   ;;  %v1469_v9 = vld [vmem:[%s1770_s1 + $0x200] sm:$0xff]   ;;  %v1470_v10 = vld [vmem:[%s1770_s1 + $0x208] sm:$0xff]  }
  0x1c   : > { %1277 = vmatprep.subr.bf16.mxu0 %v1417_v24  ;;  %v1461_v2 = vld [vmem:[%s1770_s1 + $0x1f8] sm:$0xff]   ;;  %v1471_v11 = vld [vmem:[%s1770_s1 + $0x210] sm:$0xff]   ;;  %v1473_v13 = vld [vmem:[%s1770_s1 + $0x220] sm:$0xff]  }
  0x1d   : > { %1298 = vmatpush3.bf16.msra.mxu1 %v1416_v23  ;;  %v1464_v4 = vld [vmem:[%s1616_s30 + $0x14] ss:$36 sps:$4 sm:$0xff]   ;;  %v1468_v8 = vld [vmem:[%s1616_s30 + $0x1c] ss:$36 sps:$4 sm:$0xff]   ;;  %v1474_v14 = vld [vmem:[%s1770_s1 + $0x228] sm:$0xff]  }
  0x1e   : > { %1299 = vmatprep.subr.bf16.mxu1 %v1419_v26  ;;  %v1465_v5 = vld [vmem:[%s1770_s1 + $0x1b8] sm:$0xff]   ;;  %v1475_v15 = vld [vmem:[%s1770_s1 + $0x230] sm:$0xff]   ;;  %v1477_v17 = vld [vmem:[%s1616_s30 + $0x20] ss:$36 sps:$4 sm:$0xff]  }
  0x1f   : > { %1278 = vmatpush3.bf16.msra.mxu0 %v1418_v25  ;;  %v1466_v7 = vld [vmem:[%s1616_s30 + $0x18] ss:$36 sps:$4 sm:$0xff]   ;;  %v1168_v19 = vld [vmem:[%s1771_s2] ss:$0 sm:$0xff]  ;;  %s1165_s30 = sshll.u32 %s1775_s21, 2 }
  0x20   : > { %1279 = vmatprep.subr.bf16.mxu0 %v1421_v28  ;;  %v1472_v12 = vld [vmem:[%s1770_s1 + $0x218] sm:$0xff]   ;;  %s218_s29 = scalar_lea.vmem %s1772_s3, %s1165_s30  ;;  %s224_s21 = scalar_lea.vmem %s1773_s4, %s1165_s30 }
  0x21   : > { %1300 = vmatpush3.bf16.msra.mxu1 %v1420_v27  ;;  %v1476_v16 = vld [vmem:[%s1770_s1 + $0x238] sm:$0xff]  }
  0x22   : > { %1301 = vmatprep.subr.bf16.mxu1 %v1423_v30 }
  0x23   : > { %1280 = vmatpush3.bf16.msra.mxu0 %v1422_v29 }
  0x24   : > { %1309 = vmatprep.subr.bf16.mxu0 %v1428_v34 }
  0x25   : > { %1302 = vmatpush3.bf16.msra.mxu1 %v1427_v33 }
  0x26   : > { %899 = vmatmul.mubr.bf16.vlgmr.msra.gmra.mrb[0].mxu0 %v1424_v31  ;;  %1331 = vmatprep.subr.bf16.mxu1 %v1433_v38 }
  0x27   : > { %1310 = vmatpush3.bf16.msra.mxu0 %v1432_v37  ;;  %980 = vmatprep.mubr.bf16.mxu0 %v1464_v4 }
  0x28   : > { %940 = vmatmul.mubr.bf16.vlgmr.msra.gmra.mrb[0].mxu1 %v1429_v35  ;;  %1311 = vmatprep.subr.bf16.mxu0 %v1435_v40 }
  0x29   : > { %1332 = vmatpush3.bf16.msra.mxu1 %v1434_v39  ;;  %1021 = vmatprep.mubr.bf16.mxu1 %v1468_v8 }
  0x2a   : > { %1333 = vmatprep.subr.bf16.mxu1 %v1437_v42 }
  0x2b   : > { %1312 = vmatpush3.bf16.msra.mxu0 %v1436_v41 }
  0x2c   : > { %1313 = vmatprep.subr.bf16.mxu0 %v1439_v44 }
  0x2d   : > { %1334 = vmatpush3.bf16.msra.mxu1 %v1438_v43 }
  0x2e   : > { %1335 = vmatprep.subr.bf16.mxu1 %v1441_v46 }
  0x2f   : > { %1314 = vmatpush3.bf16.msra.mxu0 %v1440_v45 }
  0x30   : > { %1315 = vmatprep.subr.bf16.mxu0 %v1443_v48 }
  0x31   : > { %1336 = vmatpush3.bf16.msra.mxu1 %v1442_v47 }
  0x32   : > { %1337 = vmatprep.subr.bf16.mxu1 %v1445_v50 }
  0x33   : > { %1316 = vmatpush3.bf16.msra.mxu0 %v1444_v49 }
  0x34   : > { %1317 = vmatprep.subr.bf16.mxu0 %v1447_v52 }
  0x35   : > { %1338 = vmatpush3.bf16.msra.mxu1 %v1446_v51  ;;  %v1257_v51 = vld [vmem:[%s218_s29] sm:$0xff]  }
  0x36   : > { %1339 = vmatprep.subr.bf16.mxu1 %v1449_v54  ;;  %v1258_v52 = vunpack.c.l.bf16 %v1257_v51 }
  0x37   : > { %1318 = vmatpush3.bf16.msra.mxu0 %v1448_v53 }
  0x38   : > { %1319 = vmatprep.subr.bf16.mxu0 %v1451_v56  ;;  %v1259_v56 = vunpack.c.h.bf16 %v1257_v51 }
  0x39   : > { %1340 = vmatpush3.bf16.msra.mxu1 %v1450_v55 }
  0x3a   : > { %1341 = vmatprep.subr.bf16.mxu1 %v1453_v58 }
  0x3b   : > { %1320 = vmatpush3.bf16.msra.mxu0 %v1452_v57 }
  0x3c   : > { %1321 = vmatprep.subr.bf16.mxu0 %v1455_v60 }
  0x3d   : > { %1342 = vmatpush3.bf16.msra.mxu1 %v1454_v59 }
  0x3e   : > { %1343 = vmatprep.subr.bf16.mxu1 %v1457_v62 }
  0x3f   : > { %1322 = vmatpush3.bf16.msra.mxu0 %v1456_v61 }
  0x40   : > { %1323 = vmatprep.subr.bf16.mxu0 %v1459_v0 }
  0x41   : > { %1344 = vmatpush3.bf16.msra.mxu1 %v1458_v63 }
  0x42   : > { %1345 = vmatprep.subr.bf16.mxu1 %v1461_v2 }
  0x43   : > { %1324 = vmatpush3.bf16.msra.mxu0 %v1460_v1 }
  0x44   : > { %1362 = vmatprep.subr.bf16.mxu0 %v1486_v6 }
  0x45   : > { %1346 = vmatpush3.bf16.msra.mxu1 %v1465_v5 }
  0x46   : > { %981 = vmatmul.mubr.bf16.vlgmr.msra.gmra.mrb[4].mxu0 %v1462_v3 }
  0x47   : > { %1378 = vmatprep.mubr.msk.bf16.mxu0 %vm1487_vm0, %v1486_v6  ;;  %1363 = vmatpush3.bf16.msra.mxu0 %v1469_v9 }
  0x48   : > { %1022 = vmatmul.mubr.bf16.vlgmr.msra.gmra.mrb[4].mxu1 %v1466_v7  ;;  %1364 = vmatprep.subr.bf16.mxu0 %v1486_v6 }
  0x4b   : > { %1365 = vmatpush3.bf16.msra.mxu0 %v1470_v10 }
  0x4c   : > { %1366 = vmatprep.subr.bf16.mxu0 %v1486_v6 }
  0x4f   : > { %1367 = vmatpush3.bf16.msra.mxu0 %v1471_v11 }
  0x50   : > { %1368 = vmatprep.subr.bf16.mxu0 %v1486_v6 }
  0x53   : > { %1369 = vmatpush3.bf16.msra.mxu0 %v1472_v12 }
  0x54   : > { %1370 = vmatprep.subr.bf16.mxu0 %v1486_v6 }
  0x57   : > { %1371 = vmatpush3.bf16.msra.mxu0 %v1473_v13 }
  0x58   : > { %1372 = vmatprep.subr.bf16.mxu0 %v1486_v6 }
  0x5b   : > { %1373 = vmatpush3.bf16.msra.mxu0 %v1474_v14 }
  0x5c   : > { %1374 = vmatprep.subr.bf16.mxu0 %v1486_v6 }
  0x5f   : > { %1375 = vmatpush3.bf16.msra.mxu0 %v1475_v15 }
  0x60   : > { %1376 = vmatprep.subr.bf16.mxu0 %v1486_v6 }
  0x63   : > { %1377 = vmatpush3.bf16.msra.mxu0 %v1476_v16 }
  0x66   : > { %1379 = vmatmul.mubr.bf16.vlgmr.msra.gmra.mrb[8].mxu0 %v1477_v17 }
  0xf9   : > { %v1281_v18 = vpop.f32.mrb[0].mxu0 }
  0xfa   : > { %v1282_v20 = vpop.f32.mrb[1].mxu0 }
  0xfb   : > { %v1283_v21 = vadd.f32 %v1282_v20, %v1281_v18  ;;  %v1284_v22 = vpop.f32.mrb[2].mxu0  ;;  %v1303_v23 = vpop.f32.mrb[0].mxu1 }
  0xfc   : > { %v1285_v24 = vpop.f32.mrb[3].mxu0  ;;  %v1304_v27 = vpop.f32.mrb[1].mxu1 }
  0xfd   : > { %v901_v25 = vadd.f32 %v1283_v21, %v1168_v19  ;;  %v1286_v26 = vadd.f32 %v1285_v24, %v1284_v22  ;;  %v1305_v28 = vadd.f32 %v1304_v27, %v1303_v23  ;;  %v1306_v29 = vpop.f32.mrb[2].mxu1 }
  0xfe   : > { %v1307_v31 = vpop.f32.mrb[3].mxu1 }
  0xff   : > { %v904_v30 = vadd.f32 %v1286_v26, %v1168_v19  ;;  %v942_v32 = vadd.f32 %v1305_v28, %v901_v25  ;;  %v1308_v33 = vadd.f32 %v1307_v31, %v1306_v29 }
 0x101   : > { %v945_v34 = vadd.f32 %v1308_v33, %v904_v30 }
 0x119   : > { %v1325_v35 = vpop.f32.mrb[4].mxu0 }
 0x11a   : > { %v1326_v36 = vpop.f32.mrb[5].mxu0 }
 0x11b   : > { %v1327_v37 = vadd.f32 %v1326_v36, %v1325_v35  ;;  %v1328_v38 = vpop.f32.mrb[6].mxu0  ;;  %v1347_v39 = vpop.f32.mrb[4].mxu1 }
 0x11c   : > { %v1329_v40 = vpop.f32.mrb[7].mxu0  ;;  %v1348_v43 = vpop.f32.mrb[5].mxu1 }
 0x11d   : > { %v983_v41 = vadd.f32 %v1327_v37, %v942_v32  ;;  %v1330_v42 = vadd.f32 %v1329_v40, %v1328_v38  ;;  %v1349_v44 = vadd.f32 %v1348_v43, %v1347_v39  ;;  %v1350_v45 = vpop.f32.mrb[6].mxu1 }
 0x11e   : > { %v1351_v47 = vpop.f32.mrb[7].mxu1 }
 0x11f   : > { %v986_v46 = vadd.f32 %v1330_v42, %v945_v34  ;;  %v1352_v48 = vadd.f32 %v1351_v47, %v1350_v45  ;;  %v1024_v49 = vadd.f32 %v1349_v44, %v983_v41 }
 0x121   : > { %v1027_v50 = vadd.f32 %v1352_v48, %v986_v46 }
 0x139   : > { %v1064_v53 = vpop.f32.mrb[8].mxu0 }
 0x13a   : > { %v1065_v54 = vadd.f32 %v1064_v53, %v1024_v49  ;;  %v1380_v55 = vpop.f32.mrb[9].mxu0 }
 0x13b   : > { %v1067_v57 = vpop.f32.mrb[10].mxu0 }
 0x13c   : > { %v1075_v58 = vadd.f32 %v1258_v52, %v1065_v54  ;;  %v1068_v59 = vadd.f32 %v1067_v57, %v1027_v50  ;;  %v1381_v60 = vpop.f32.mrb[11].mxu0 }
 0x13e   : > { %v1076_v61 = vadd.f32 %v1259_v56, %v1068_v59  ;;  %v1077_v62 = vmax.f32 %v1075_v58, 0.0 }
 0x140   : > { %v1078_v63 = vmax.f32 %v1076_v61, 0.0 }
 0x142   : > { %v1263_v0 = vpack.c.bf16 %v1078_v63, %v1077_v62 }
 0x144   : > { %1264 = vst [vmem:[%s224_s21] sm:$0xff] %v1263_v0  }
 0x145 PF: > { %s14_s15 = sadd.s32 1, %s1484_s15  }
 0x146   : > { %p11_p4 = scmp.ge.s32.totalorder %s14_s15, 4  }
 0x148   :  { %13 = sbr.rel (!%p11_p4) target bundleno = 1 (0x1), region = 69 }

// kernel: resnet_image_encoder_forward.21
= control target key start
LH: loop header
LB: loop body
LE: loop exit
PB: predicated region body
PF: predicated region fallthrough
CT: control target
= control target key end

     0   :  { %v193_v0 = vmov 0.0   ;;  %vm194_vm0 = vmmov 0   ;;  %s251_s1 = inlined_call_operand.vmem [shape: bf16[128,128], index: 1, kind: input, shape index: {}]   ;;  %s252_s0 = inlined_call_operand.vmem [shape: bf16[16,128], index: 0, kind: input, shape index: {}]   ;;  %s253_s2 = inlined_call_operand.vmem [shape: f32[1,128], index: 2, kind: input, shape index: {}]   ;;  %s254_s3 = inlined_call_operand.vmem [shape: f32[16,128], index: 3, kind: output, shape index: {}]  }
   0x1   :  { %162 = vmatprep.subr.bf16.mxu0 %v193_v0  ;;  %v184_v1 = vld [vmem:[%s251_s1] sm:$0xff]   ;;  %178 = vmatprep.mubr.msk.bf16.mxu0 %vm194_vm0, %v193_v0  ;;  %v185_v2 = vld [vmem:[%s251_s1 + $0x8] sm:$0xff]   ;;  %v186_v3 = vld [vmem:[%s251_s1 + $0x10] sm:$0xff]  }
   0x2   :  { %163 = vmatpush3.bf16.msra.mxu0 %v184_v1  ;;  %v187_v4 = vld [vmem:[%s251_s1 + $0x18] sm:$0xff]   ;;  %v188_v5 = vld [vmem:[%s251_s1 + $0x20] sm:$0xff]   ;;  %v189_v6 = vld [vmem:[%s251_s1 + $0x28] sm:$0xff]  }
   0x3   :  { %164 = vmatprep.subr.bf16.mxu0 %v193_v0  ;;  %v190_v7 = vld [vmem:[%s251_s1 + $0x30] sm:$0xff]   ;;  %v191_v8 = vld [vmem:[%s251_s1 + $0x38] sm:$0xff]   ;;  %v192_v9 = vld [vmem:[%s252_s0] sm:$0xff]  }
   0x4   :  { %v143_v10 = vld [vmem:[%s253_s2] ss:$0 sm:$0xff] }
   0x6   :  { %165 = vmatpush3.bf16.msra.mxu0 %v185_v2 }
   0x7   :  { %166 = vmatprep.subr.bf16.mxu0 %v193_v0 }
   0xa   :  { %167 = vmatpush3.bf16.msra.mxu0 %v186_v3 }
   0xb   :  { %168 = vmatprep.subr.bf16.mxu0 %v193_v0 }
   0xe   :  { %169 = vmatpush3.bf16.msra.mxu0 %v187_v4 }
   0xf   :  { %170 = vmatprep.subr.bf16.mxu0 %v193_v0 }
  0x12   :  { %171 = vmatpush3.bf16.msra.mxu0 %v188_v5 }
  0x13   :  { %172 = vmatprep.subr.bf16.mxu0 %v193_v0 }
  0x16   :  { %173 = vmatpush3.bf16.msra.mxu0 %v189_v6 }
  0x17   :  { %174 = vmatprep.subr.bf16.mxu0 %v193_v0 }
  0x1a   :  { %175 = vmatpush3.bf16.msra.mxu0 %v190_v7 }
  0x1b   :  { %176 = vmatprep.subr.bf16.mxu0 %v193_v0 }
  0x1e   :  { %177 = vmatpush3.bf16.msra.mxu0 %v191_v8 }
  0x21   :  { %179 = vmatmul.mubr.bf16.vlgmr.msra.gmra.mrb[0].mxu0 %v192_v9 }
  0xf4   :  { %v128_v11 = vpop.f32.mrb[0].mxu0 }
  0xf5   :  { %v129_v12 = vadd.f32 %v143_v10, %v128_v11  ;;  %v180_v13 = vpop.f32.mrb[1].mxu0 }
  0xf6   :  { %v131_v14 = vpop.f32.mrb[2].mxu0 }
  0xf7   :  { %v135_v15 = vmax.f32 %v129_v12, 0.0  ;;  %v132_v16 = vadd.f32 %v143_v10, %v131_v14  ;;  %v181_v17 = vpop.f32.mrb[3].mxu0 }
  0xf9   :  { %137 = vst [vmem:[%s254_s3] sm:$0xff] %v135_v15  ;;  %v136_v18 = vmax.f32 %v132_v16, 0.0 }
  0xfb   :  { %138 = vst [vmem:[%s254_s3 + $0x8] sm:$0xff] %v136_v18 }

// kernel: resnet_image_encoder_forward.20
= control target key start
LH: loop header
LB: loop body
LE: loop exit
PB: predicated region body
PF: predicated region fallthrough
CT: control target
= control target key end

     0   :  { %vm1184_vm0 = vmmov 0   ;;  %s1462_s1 = inlined_call_operand.vmem [shape: bf16[1152,128], index: 1, kind: input, shape index: {}]   ;;  %s1463_s0 = inlined_call_operand.vmem [shape: bf16[16,1152], index: 0, kind: input, shape index: {}]   ;;  %s1464_s2 = inlined_call_operand.vmem [shape: f32[1,128], index: 2, kind: input, shape index: {}]   ;;  %s1465_s3 = inlined_call_operand.vmem [shape: bf16[16,128], index: 3, kind: input, shape index: {}]   ;;  %s1466_s4 = inlined_call_operand.vmem [shape: bf16[16,128], index: 4, kind: output, shape index: {}]  }
   0x1   :  { %v1098_v0 = vld [vmem:[%s1462_s1 + $0x40] sm:$0xff]   ;;  %v1102_v4 = vld [vmem:[%s1462_s1 + $0x48] sm:$0xff]   ;;  %v1106_v8 = vld [vmem:[%s1462_s1 + $0x50] sm:$0xff]  }
   0x2   :  { %v1099_v1 = vld [vmem:[%s1462_s1] sm:$0xff]   ;;  %979 = vmatprep.subr.bf16.mxu0 %v1098_v0  ;;  %v1103_v5 = vld [vmem:[%s1462_s1 + $0x8] sm:$0xff]   ;;  %v1107_v9 = vld [vmem:[%s1462_s1 + $0x10] sm:$0xff]  }
   0x3   :  { %v1100_v2 = vld [vmem:[%s1462_s1 + $0xc0] sm:$0xff]   ;;  %980 = vmatpush3.bf16.msra.mxu0 %v1099_v1  ;;  %v1104_v6 = vld [vmem:[%s1462_s1 + $0xc8] sm:$0xff]   ;;  %v1108_v10 = vld [vmem:[%s1462_s1 + $0xd0] sm:$0xff]  }
   0x4   :  { %v1101_v3 = vld [vmem:[%s1462_s1 + $0x80] sm:$0xff]   ;;  %1001 = vmatprep.subr.bf16.mxu1 %v1100_v2  ;;  %981 = vmatprep.subr.bf16.mxu0 %v1102_v4  ;;  %v1105_v7 = vld [vmem:[%s1462_s1 + $0x88] sm:$0xff]   ;;  %v1109_v11 = vld [vmem:[%s1462_s1 + $0x90] sm:$0xff]  }
   0x5   :  { %1002 = vmatpush3.bf16.msra.mxu1 %v1101_v3  ;;  %v1110_v12 = vld [vmem:[%s1462_s1 + $0x58] sm:$0xff]   ;;  %v1114_v16 = vld [vmem:[%s1462_s1 + $0x60] sm:$0xff]   ;;  %v1118_v20 = vld [vmem:[%s1462_s1 + $0x68] sm:$0xff]  }
   0x6   :  { %1003 = vmatprep.subr.bf16.mxu1 %v1104_v6  ;;  %v1111_v13 = vld [vmem:[%s1462_s1 + $0x18] sm:$0xff]   ;;  %v1115_v17 = vld [vmem:[%s1462_s1 + $0x20] sm:$0xff]   ;;  %v1119_v21 = vld [vmem:[%s1462_s1 + $0x28] sm:$0xff]   ;;  %v1183_v6 = vmov 0.0  }
   0x7   :  { %982 = vmatpush3.bf16.msra.mxu0 %v1103_v5  ;;  %v1112_v14 = vld [vmem:[%s1462_s1 + $0xd8] sm:$0xff]   ;;  %v1116_v18 = vld [vmem:[%s1462_s1 + $0xe0] sm:$0xff]   ;;  %v1120_v22 = vld [vmem:[%s1462_s1 + $0xe8] sm:$0xff]  }
   0x8   :  { %983 = vmatprep.subr.bf16.mxu0 %v1106_v8  ;;  %v1113_v15 = vld [vmem:[%s1462_s1 + $0x98] sm:$0xff]   ;;  %v1117_v19 = vld [vmem:[%s1462_s1 + $0xa0] sm:$0xff]   ;;  %v1121_v23 = vld [vmem:[%s1462_s1 + $0xa8] sm:$0xff]  }
   0x9   :  { %1004 = vmatpush3.bf16.msra.mxu1 %v1105_v7  ;;  %v1122_v24 = vld [vmem:[%s1462_s1 + $0x70] sm:$0xff]   ;;  %v1126_v28 = vld [vmem:[%s1462_s1 + $0x78] sm:$0xff]   ;;  %v1129_v31 = vld [vmem:[%s1463_s0] ss:$36 sps:$4 sm:$0xff]  }
   0xa   :  { %1005 = vmatprep.subr.bf16.mxu1 %v1108_v10  ;;  %v1123_v25 = vld [vmem:[%s1462_s1 + $0x30] sm:$0xff]   ;;  %v1127_v29 = vld [vmem:[%s1462_s1 + $0x38] sm:$0xff]   ;;  %v1131_v32 = vld [vmem:[%s1463_s0 + $0x4] ss:$36 sps:$4 sm:$0xff]  }
   0xb   :  { %984 = vmatpush3.bf16.msra.mxu0 %v1107_v9  ;;  %v1124_v26 = vld [vmem:[%s1462_s1 + $0xf0] sm:$0xff]   ;;  %v1128_v30 = vld [vmem:[%s1462_s1 + $0xf8] sm:$0xff]   ;;  %689 = vmatprep.mubr.bf16.mxu0 %v1131_v32  ;;  %v1133_v34 = vld [vmem:[%s1462_s1 + $0x140] sm:$0xff]  }
   0xc   :  { %985 = vmatprep.subr.bf16.mxu0 %v1110_v12  ;;  %v1125_v27 = vld [vmem:[%s1462_s1 + $0xb0] sm:$0xff]   ;;  %v1132_v33 = vld [vmem:[%s1462_s1 + $0xb8] sm:$0xff]   ;;  %v1134_v35 = vld [vmem:[%s1463_s0 + $0x8] ss:$36 sps:$4 sm:$0xff]  }
   0xd   :  { %1006 = vmatpush3.bf16.msra.mxu1 %v1109_v11  ;;  %v1136_v36 = vld [vmem:[%s1463_s0 + $0xc] ss:$36 sps:$4 sm:$0xff]   ;;  %v1137_v37 = vld [vmem:[%s1462_s1 + $0x100] sm:$0xff]   ;;  %v1148_v48 = vld [vmem:[%s1462_s1 + $0x158] sm:$0xff]  }
   0xe   :  { %1007 = vmatprep.subr.bf16.mxu1 %v1112_v14  ;;  %730 = vmatprep.mubr.bf16.mxu1 %v1136_v36  ;;  %v1138_v38 = vld [vmem:[%s1462_s1 + $0x1c0] sm:$0xff]   ;;  %v1140_v40 = vld [vmem:[%s1462_s1 + $0x148] sm:$0xff]   ;;  %v1144_v44 = vld [vmem:[%s1462_s1 + $0x150] sm:$0xff]  }
   0xf   :  { %986 = vmatpush3.bf16.msra.mxu0 %v1111_v13  ;;  %v1139_v39 = vld [vmem:[%s1462_s1 + $0x180] sm:$0xff]   ;;  %v1141_v41 = vld [vmem:[%s1462_s1 + $0x108] sm:$0xff]   ;;  %v1145_v45 = vld [vmem:[%s1462_s1 + $0x110] sm:$0xff]  }
  0x10   :  { %987 = vmatprep.subr.bf16.mxu0 %v1114_v16  ;;  %v1142_v42 = vld [vmem:[%s1462_s1 + $0x1c8] sm:$0xff]   ;;  %v1146_v46 = vld [vmem:[%s1462_s1 + $0x1d0] sm:$0xff]   ;;  %v1149_v49 = vld [vmem:[%s1462_s1 + $0x118] sm:$0xff]  }
  0x11   :  { %1008 = vmatpush3.bf16.msra.mxu1 %v1113_v15  ;;  %v1143_v43 = vld [vmem:[%s1462_s1 + $0x188] sm:$0xff]   ;;  %v1147_v47 = vld [vmem:[%s1462_s1 + $0x190] sm:$0xff]   ;;  %v1150_v50 = vld [vmem:[%s1462_s1 + $0x1d8] sm:$0xff]  }
  0x12   :  { %1009 = vmatprep.subr.bf16.mxu1 %v1116_v18  ;;  %v1151_v51 = vld [vmem:[%s1462_s1 + $0x198] sm:$0xff]   ;;  %v1152_v52 = vld [vmem:[%s1462_s1 + $0x160] sm:$0xff]   ;;  %v1156_v56 = vld [vmem:[%s1462_s1 + $0x168] sm:$0xff]  }
  0x13   :  { %988 = vmatpush3.bf16.msra.mxu0 %v1115_v17  ;;  %v1153_v53 = vld [vmem:[%s1462_s1 + $0x120] sm:$0xff]   ;;  %v1157_v57 = vld [vmem:[%s1462_s1 + $0x128] sm:$0xff]   ;;  %v1160_v60 = vld [vmem:[%s1462_s1 + $0x170] sm:$0xff]  }
  0x14   :  { %989 = vmatprep.subr.bf16.mxu0 %v1118_v20  ;;  %v1154_v54 = vld [vmem:[%s1462_s1 + $0x1e0] sm:$0xff]   ;;  %v1158_v58 = vld [vmem:[%s1462_s1 + $0x1e8] sm:$0xff]   ;;  %v1161_v61 = vld [vmem:[%s1462_s1 + $0x130] sm:$0xff]  }
  0x15   :  { %1010 = vmatpush3.bf16.msra.mxu1 %v1117_v19  ;;  %v1155_v55 = vld [vmem:[%s1462_s1 + $0x1a0] sm:$0xff]   ;;  %v1159_v59 = vld [vmem:[%s1462_s1 + $0x1a8] sm:$0xff]   ;;  %v1162_v62 = vld [vmem:[%s1462_s1 + $0x1f0] sm:$0xff]  }
  0x16   :  { %1011 = vmatprep.subr.bf16.mxu1 %v1120_v22  ;;  %v1163_v63 = vld [vmem:[%s1462_s1 + $0x1b0] sm:$0xff]   ;;  %v1164_v0 = vld [vmem:[%s1462_s1 + $0x178] sm:$0xff]   ;;  %v1174_v9 = vld [vmem:[%s1462_s1 + $0x200] sm:$0xff]  }
  0x17   :  { %990 = vmatpush3.bf16.msra.mxu0 %v1119_v21  ;;  %v1165_v1 = vld [vmem:[%s1462_s1 + $0x138] sm:$0xff]   ;;  %v1167_v3 = vld [vmem:[%s1463_s0 + $0x10] ss:$36 sps:$4 sm:$0xff]   ;;  %v1175_v10 = vld [vmem:[%s1462_s1 + $0x208] sm:$0xff]  }
  0x18   :  { %991 = vmatprep.subr.bf16.mxu0 %v1122_v24  ;;  %v1166_v2 = vld [vmem:[%s1462_s1 + $0x1f8] sm:$0xff]   ;;  %v1176_v11 = vld [vmem:[%s1462_s1 + $0x210] sm:$0xff]   ;;  %v1178_v13 = vld [vmem:[%s1462_s1 + $0x220] sm:$0xff]  }
  0x19   :  { %1012 = vmatpush3.bf16.msra.mxu1 %v1121_v23  ;;  %v1169_v4 = vld [vmem:[%s1463_s0 + $0x14] ss:$36 sps:$4 sm:$0xff]   ;;  %v1173_v8 = vld [vmem:[%s1463_s0 + $0x1c] ss:$36 sps:$4 sm:$0xff]   ;;  %v1179_v14 = vld [vmem:[%s1462_s1 + $0x228] sm:$0xff]  }
  0x1a   :  { %1013 = vmatprep.subr.bf16.mxu1 %v1124_v26  ;;  %v1170_v5 = vld [vmem:[%s1462_s1 + $0x1b8] sm:$0xff]   ;;  %v1180_v15 = vld [vmem:[%s1462_s1 + $0x230] sm:$0xff]   ;;  %v1182_v17 = vld [vmem:[%s1463_s0 + $0x20] ss:$36 sps:$4 sm:$0xff]  }
  0x1b   :  { %992 = vmatpush3.bf16.msra.mxu0 %v1123_v25  ;;  %v1171_v7 = vld [vmem:[%s1463_s0 + $0x18] ss:$36 sps:$4 sm:$0xff]   ;;  %v884_v19 = vld [vmem:[%s1464_s2] ss:$0 sm:$0xff] }
  0x1c   :  { %993 = vmatprep.subr.bf16.mxu0 %v1126_v28  ;;  %v1177_v12 = vld [vmem:[%s1462_s1 + $0x218] sm:$0xff]  }
  0x1d   :  { %1014 = vmatpush3.bf16.msra.mxu1 %v1125_v27  ;;  %v1181_v16 = vld [vmem:[%s1462_s1 + $0x238] sm:$0xff]  }
  0x1e   :  { %1015 = vmatprep.subr.bf16.mxu1 %v1128_v30 }
  0x1f   :  { %994 = vmatpush3.bf16.msra.mxu0 %v1127_v29 }
  0x20   :  { %1023 = vmatprep.subr.bf16.mxu0 %v1133_v34 }
  0x21   :  { %1016 = vmatpush3.bf16.msra.mxu1 %v1132_v33 }
  0x22   :  { %690 = vmatmul.mubr.bf16.vlgmr.msra.gmra.mrb[0].mxu0 %v1129_v31  ;;  %1045 = vmatprep.subr.bf16.mxu1 %v1138_v38 }
  0x23   :  { %1024 = vmatpush3.bf16.msra.mxu0 %v1137_v37  ;;  %771 = vmatprep.mubr.bf16.mxu0 %v1169_v4 }
  0x24   :  { %731 = vmatmul.mubr.bf16.vlgmr.msra.gmra.mrb[0].mxu1 %v1134_v35  ;;  %1025 = vmatprep.subr.bf16.mxu0 %v1140_v40 }
  0x25   :  { %1046 = vmatpush3.bf16.msra.mxu1 %v1139_v39  ;;  %812 = vmatprep.mubr.bf16.mxu1 %v1173_v8 }
  0x26   :  { %1047 = vmatprep.subr.bf16.mxu1 %v1142_v42 }
  0x27   :  { %1026 = vmatpush3.bf16.msra.mxu0 %v1141_v41 }
  0x28   :  { %1027 = vmatprep.subr.bf16.mxu0 %v1144_v44 }
  0x29   :  { %1048 = vmatpush3.bf16.msra.mxu1 %v1143_v43 }
  0x2a   :  { %1049 = vmatprep.subr.bf16.mxu1 %v1146_v46 }
  0x2b   :  { %1028 = vmatpush3.bf16.msra.mxu0 %v1145_v45 }
  0x2c   :  { %1029 = vmatprep.subr.bf16.mxu0 %v1148_v48 }
  0x2d   :  { %1050 = vmatpush3.bf16.msra.mxu1 %v1147_v47 }
  0x2e   :  { %1051 = vmatprep.subr.bf16.mxu1 %v1150_v50 }
  0x2f   :  { %1030 = vmatpush3.bf16.msra.mxu0 %v1149_v49 }
  0x30   :  { %1031 = vmatprep.subr.bf16.mxu0 %v1152_v52 }
  0x31   :  { %1052 = vmatpush3.bf16.msra.mxu1 %v1151_v51  ;;  %v971_v51 = vld [vmem:[%s1465_s3] sm:$0xff]  }
  0x32   :  { %1053 = vmatprep.subr.bf16.mxu1 %v1154_v54  ;;  %v972_v52 = vunpack.c.l.bf16 %v971_v51 }
  0x33   :  { %1032 = vmatpush3.bf16.msra.mxu0 %v1153_v53 }
  0x34   :  { %1033 = vmatprep.subr.bf16.mxu0 %v1156_v56  ;;  %v973_v56 = vunpack.c.h.bf16 %v971_v51 }
  0x35   :  { %1054 = vmatpush3.bf16.msra.mxu1 %v1155_v55 }
  0x36   :  { %1055 = vmatprep.subr.bf16.mxu1 %v1158_v58 }
  0x37   :  { %1034 = vmatpush3.bf16.msra.mxu0 %v1157_v57 }
  0x38   :  { %1035 = vmatprep.subr.bf16.mxu0 %v1160_v60 }
  0x39   :  { %1056 = vmatpush3.bf16.msra.mxu1 %v1159_v59 }
  0x3a   :  { %1057 = vmatprep.subr.bf16.mxu1 %v1162_v62 }
  0x3b   :  { %1036 = vmatpush3.bf16.msra.mxu0 %v1161_v61 }
  0x3c   :  { %1037 = vmatprep.subr.bf16.mxu0 %v1164_v0 }
  0x3d   :  { %1058 = vmatpush3.bf16.msra.mxu1 %v1163_v63 }
  0x3e   :  { %1059 = vmatprep.subr.bf16.mxu1 %v1166_v2 }
  0x3f   :  { %1038 = vmatpush3.bf16.msra.mxu0 %v1165_v1 }
  0x40   :  { %1076 = vmatprep.subr.bf16.mxu0 %v1183_v6 }
  0x41   :  { %1060 = vmatpush3.bf16.msra.mxu1 %v1170_v5 }
  0x42   :  { %772 = vmatmul.mubr.bf16.vlgmr.msra.gmra.mrb[4].mxu0 %v1167_v3 }
  0x43   :  { %1092 = vmatprep.mubr.msk.bf16.mxu0 %vm1184_vm0, %v1183_v6  ;;  %1077 = vmatpush3.bf16.msra.mxu0 %v1174_v9 }
  0x44   :  { %813 = vmatmul.mubr.bf16.vlgmr.msra.gmra.mrb[4].mxu1 %v1171_v7  ;;  %1078 = vmatprep.subr.bf16.mxu0 %v1183_v6 }
  0x47   :  { %1079 = vmatpush3.bf16.msra.mxu0 %v1175_v10 }
  0x48   :  { %1080 = vmatprep.subr.bf16.mxu0 %v1183_v6 }
  0x4b   :  { %1081 = vmatpush3.bf16.msra.mxu0 %v1176_v11 }
  0x4c   :  { %1082 = vmatprep.subr.bf16.mxu0 %v1183_v6 }
  0x4f   :  { %1083 = vmatpush3.bf16.msra.mxu0 %v1177_v12 }
  0x50   :  { %1084 = vmatprep.subr.bf16.mxu0 %v1183_v6 }
  0x53   :  { %1085 = vmatpush3.bf16.msra.mxu0 %v1178_v13 }
  0x54   :  { %1086 = vmatprep.subr.bf16.mxu0 %v1183_v6 }
  0x57   :  { %1087 = vmatpush3.bf16.msra.mxu0 %v1179_v14 }
  0x58   :  { %1088 = vmatprep.subr.bf16.mxu0 %v1183_v6 }
  0x5b   :  { %1089 = vmatpush3.bf16.msra.mxu0 %v1180_v15 }
  0x5c   :  { %1090 = vmatprep.subr.bf16.mxu0 %v1183_v6 }
  0x5f   :  { %1091 = vmatpush3.bf16.msra.mxu0 %v1181_v16 }
  0x62   :  { %1093 = vmatmul.mubr.bf16.vlgmr.msra.gmra.mrb[8].mxu0 %v1182_v17 }
  0xf5   :  { %v995_v18 = vpop.f32.mrb[0].mxu0 }
  0xf6   :  { %v996_v20 = vpop.f32.mrb[1].mxu0 }
  0xf7   :  { %v997_v21 = vadd.f32 %v996_v20, %v995_v18  ;;  %v998_v22 = vpop.f32.mrb[2].mxu0  ;;  %v1017_v23 = vpop.f32.mrb[0].mxu1 }
  0xf8   :  { %v999_v24 = vpop.f32.mrb[3].mxu0  ;;  %v1018_v27 = vpop.f32.mrb[1].mxu1 }
  0xf9   :  { %v692_v25 = vadd.f32 %v997_v21, %v884_v19  ;;  %v1000_v26 = vadd.f32 %v999_v24, %v998_v22  ;;  %v1019_v28 = vadd.f32 %v1018_v27, %v1017_v23  ;;  %v1020_v29 = vpop.f32.mrb[2].mxu1 }
  0xfa   :  { %v1021_v31 = vpop.f32.mrb[3].mxu1 }
  0xfb   :  { %v695_v30 = vadd.f32 %v1000_v26, %v884_v19  ;;  %v733_v32 = vadd.f32 %v1019_v28, %v692_v25  ;;  %v1022_v33 = vadd.f32 %v1021_v31, %v1020_v29 }
  0xfd   :  { %v736_v34 = vadd.f32 %v1022_v33, %v695_v30 }
 0x115   :  { %v1039_v35 = vpop.f32.mrb[4].mxu0 }
 0x116   :  { %v1040_v36 = vpop.f32.mrb[5].mxu0 }
 0x117   :  { %v1041_v37 = vadd.f32 %v1040_v36, %v1039_v35  ;;  %v1042_v38 = vpop.f32.mrb[6].mxu0  ;;  %v1061_v39 = vpop.f32.mrb[4].mxu1 }
 0x118   :  { %v1043_v40 = vpop.f32.mrb[7].mxu0  ;;  %v1062_v43 = vpop.f32.mrb[5].mxu1 }
 0x119   :  { %v774_v41 = vadd.f32 %v1041_v37, %v733_v32  ;;  %v1044_v42 = vadd.f32 %v1043_v40, %v1042_v38  ;;  %v1063_v44 = vadd.f32 %v1062_v43, %v1061_v39  ;;  %v1064_v45 = vpop.f32.mrb[6].mxu1 }
 0x11a   :  { %v1065_v47 = vpop.f32.mrb[7].mxu1 }
 0x11b   :  { %v777_v46 = vadd.f32 %v1044_v42, %v736_v34  ;;  %v1066_v48 = vadd.f32 %v1065_v47, %v1064_v45  ;;  %v815_v49 = vadd.f32 %v1063_v44, %v774_v41 }
 0x11d   :  { %v818_v50 = vadd.f32 %v1066_v48, %v777_v46 }
 0x135   :  { %v855_v53 = vpop.f32.mrb[8].mxu0 }
 0x136   :  { %v856_v54 = vadd.f32 %v855_v53, %v815_v49  ;;  %v1094_v55 = vpop.f32.mrb[9].mxu0 }
 0x137   :  { %v858_v57 = vpop.f32.mrb[10].mxu0 }
 0x138   :  { %v866_v58 = vadd.f32 %v972_v52, %v856_v54  ;;  %v859_v59 = vadd.f32 %v858_v57, %v818_v50  ;;  %v1095_v60 = vpop.f32.mrb[11].mxu0 }
 0x13a   :  { %v867_v61 = vadd.f32 %v973_v56, %v859_v59  ;;  %v868_v62 = vmax.f32 %v866_v58, 0.0 }
 0x13c   :  { %v869_v63 = vmax.f32 %v867_v61, 0.0 }
 0x13e   :  { %v977_v0 = vpack.c.bf16 %v869_v63, %v868_v62 }
 0x140   :  { %978 = vst [vmem:[%s1466_s4] sm:$0xff] %v977_v0  }

// kernel: resnet_image_encoder_forward.19
= control target key start
LH: loop header
LB: loop body
LE: loop exit
PB: predicated region body
PF: predicated region fallthrough
CT: control target
= control target key end

     0   :  { %s2109_s1 = inlined_call_operand.vmem [shape: bf16[1152,256], index: 1, kind: input, shape index: {}]   ;;  %s2110_s0 = inlined_call_operand.vmem [shape: bf16[16,1152], index: 0, kind: input, shape index: {}]   ;;  %s2111_s2 = inlined_call_operand.vmem [shape: f32[1,256], index: 2, kind: input, shape index: {}]   ;;  %s2112_s4 = inlined_call_operand.vmem [shape: bf16[16,128], index: 4, kind: output, shape index: {1}]   ;;  %s2113_s3 = inlined_call_operand.vmem [shape: bf16[16,128], index: 3, kind: output, shape index: {0}]  }
   0x1   :  { %v1386_v0 = vld [vmem:[%s2109_s1 + $0x4] ss:$8 sps:$4 sm:$0xff]   ;;  %v1390_v2 = vld [vmem:[%s2109_s1] ss:$8 sps:$4 sm:$0xff]   ;;  %v1392_v4 = vld [vmem:[%s2109_s1 + $0x14] ss:$8 sps:$4 sm:$0xff]  }
   0x2   :  { %v1388_v1 = vld [vmem:[%s2109_s1 + $0x204] ss:$8 sps:$4 sm:$0xff]   ;;  %949 = vmatprep.subr.bf16.mxu1 %v1386_v0  ;;  %v1391_v3 = vld [vmem:[%s2109_s1 + $0x200] ss:$8 sps:$4 sm:$0xff]   ;;  %v1394_v5 = vld [vmem:[%s2109_s1 + $0x214] ss:$8 sps:$4 sm:$0xff]  }
   0x3   :  { %1035 = vmatprep.subr.bf16.mxu0 %v1388_v1  ;;  %950 = vmatpush1.bf16.msra.mxu1 %v1390_v2  ;;  %v1396_v6 = vld [vmem:[%s2109_s1 + $0x10] ss:$8 sps:$4 sm:$0xff]   ;;  %v1398_v8 = vld [vmem:[%s2109_s1 + $0x24] ss:$8 sps:$4 sm:$0xff]   ;;  %v1402_v10 = vld [vmem:[%s2109_s1 + $0x20] ss:$8 sps:$4 sm:$0xff]  }
   0x4   :  { %1036 = vmatpush1.bf16.msra.mxu0 %v1391_v3  ;;  %951 = vmatprep.subr.bf16.mxu1 %v1392_v4  ;;  %v1397_v7 = vld [vmem:[%s2109_s1 + $0x210] ss:$8 sps:$4 sm:$0xff]   ;;  %v1400_v9 = vld [vmem:[%s2109_s1 + $0x224] ss:$8 sps:$4 sm:$0xff]   ;;  %v1403_v11 = vld [vmem:[%s2109_s1 + $0x220] ss:$8 sps:$4 sm:$0xff]  }
   0x5   :  { %1037 = vmatprep.subr.bf16.mxu0 %v1394_v5  ;;  %v1404_v12 = vld [vmem:[%s2109_s1 + $0x34] ss:$8 sps:$4 sm:$0xff]   ;;  %v1408_v14 = vld [vmem:[%s2109_s1 + $0x30] ss:$8 sps:$4 sm:$0xff]   ;;  %v1410_v16 = vld [vmem:[%s2109_s1 + $0x44] ss:$8 sps:$4 sm:$0xff]  }
   0x6   :  { %v1406_v13 = vld [vmem:[%s2109_s1 + $0x234] ss:$8 sps:$4 sm:$0xff]   ;;  %v1409_v15 = vld [vmem:[%s2109_s1 + $0x230] ss:$8 sps:$4 sm:$0xff]   ;;  %v1412_v17 = vld [vmem:[%s2109_s1 + $0x244] ss:$8 sps:$4 sm:$0xff]  }
   0x7   :  { %952 = vmatpush1.bf16.msra.mxu1 %v1396_v6  ;;  %v1414_v18 = vld [vmem:[%s2109_s1 + $0x40] ss:$8 sps:$4 sm:$0xff]   ;;  %v1416_v20 = vld [vmem:[%s2109_s1 + $0x54] ss:$8 sps:$4 sm:$0xff]   ;;  %v1420_v22 = vld [vmem:[%s2109_s1 + $0x50] ss:$8 sps:$4 sm:$0xff]  }
   0x8   :  { %1038 = vmatpush1.bf16.msra.mxu0 %v1397_v7  ;;  %953 = vmatprep.subr.bf16.mxu1 %v1398_v8  ;;  %v1415_v19 = vld [vmem:[%s2109_s1 + $0x240] ss:$8 sps:$4 sm:$0xff]   ;;  %v1418_v21 = vld [vmem:[%s2109_s1 + $0x254] ss:$8 sps:$4 sm:$0xff]   ;;  %v1421_v23 = vld [vmem:[%s2109_s1 + $0x250] ss:$8 sps:$4 sm:$0xff]  }
   0x9   :  { %1039 = vmatprep.subr.bf16.mxu0 %v1400_v9  ;;  %v1422_v24 = vld [vmem:[%s2109_s1 + $0x64] ss:$8 sps:$4 sm:$0xff]   ;;  %v1426_v26 = vld [vmem:[%s2109_s1 + $0x60] ss:$8 sps:$4 sm:$0xff]   ;;  %v1428_v28 = vld [vmem:[%s2109_s1 + $0x74] ss:$8 sps:$4 sm:$0xff]  }
   0xa   :  { %v1424_v25 = vld [vmem:[%s2109_s1 + $0x264] ss:$8 sps:$4 sm:$0xff]   ;;  %v1427_v27 = vld [vmem:[%s2109_s1 + $0x260] ss:$8 sps:$4 sm:$0xff]   ;;  %v1430_v29 = vld [vmem:[%s2109_s1 + $0x274] ss:$8 sps:$4 sm:$0xff]  }
   0xb   :  { %954 = vmatpush1.bf16.msra.mxu1 %v1402_v10  ;;  %v1432_v30 = vld [vmem:[%s2109_s1 + $0x70] ss:$8 sps:$4 sm:$0xff]   ;;  %v1434_v32 = vld [vmem:[%s2109_s1 + $0x84] ss:$8 sps:$4 sm:$0xff]   ;;  %v1438_v34 = vld [vmem:[%s2109_s1 + $0x80] ss:$8 sps:$4 sm:$0xff]  }
   0xc   :  { %1040 = vmatpush1.bf16.msra.mxu0 %v1403_v11  ;;  %955 = vmatprep.subr.bf16.mxu1 %v1404_v12  ;;  %v1433_v31 = vld [vmem:[%s2109_s1 + $0x270] ss:$8 sps:$4 sm:$0xff]   ;;  %v1436_v33 = vld [vmem:[%s2109_s1 + $0x284] ss:$8 sps:$4 sm:$0xff]   ;;  %v1439_v35 = vld [vmem:[%s2109_s1 + $0x280] ss:$8 sps:$4 sm:$0xff]  }
   0xd   :  { %1041 = vmatprep.subr.bf16.mxu0 %v1406_v13  ;;  %v1440_v36 = vld [vmem:[%s2109_s1 + $0x94] ss:$8 sps:$4 sm:$0xff]   ;;  %v1444_v38 = vld [vmem:[%s2109_s1 + $0x90] ss:$8 sps:$4 sm:$0xff]   ;;  %v1446_v40 = vld [vmem:[%s2109_s1 + $0xa4] ss:$8 sps:$4 sm:$0xff]  }
   0xe   :  { %v1442_v37 = vld [vmem:[%s2109_s1 + $0x294] ss:$8 sps:$4 sm:$0xff]   ;;  %v1445_v39 = vld [vmem:[%s2109_s1 + $0x290] ss:$8 sps:$4 sm:$0xff]   ;;  %v1448_v41 = vld [vmem:[%s2109_s1 + $0x2a4] ss:$8 sps:$4 sm:$0xff]  }
   0xf   :  { %956 = vmatpush1.bf16.msra.mxu1 %v1408_v14  ;;  %v1450_v42 = vld [vmem:[%s2109_s1 + $0xa0] ss:$8 sps:$4 sm:$0xff]   ;;  %v1452_v44 = vld [vmem:[%s2109_s1 + $0xb4] ss:$8 sps:$4 sm:$0xff]   ;;  %v1456_v46 = vld [vmem:[%s2109_s1 + $0xb0] ss:$8 sps:$4 sm:$0xff]  }
  0x10   :  { %1042 = vmatpush1.bf16.msra.mxu0 %v1409_v15  ;;  %957 = vmatprep.subr.bf16.mxu1 %v1410_v16  ;;  %v1451_v43 = vld [vmem:[%s2109_s1 + $0x2a0] ss:$8 sps:$4 sm:$0xff]   ;;  %v1454_v45 = vld [vmem:[%s2109_s1 + $0x2b4] ss:$8 sps:$4 sm:$0xff]   ;;  %v1457_v47 = vld [vmem:[%s2109_s1 + $0x2b0] ss:$8 sps:$4 sm:$0xff]  }
  0x11   :  { %1043 = vmatprep.subr.bf16.mxu0 %v1412_v17  ;;  %v1484_v48 = vld [vmem:[%s2110_s0 + $0x4] ss:$36 sps:$4 sm:$0xff]   ;;  %v1490_v51 = vld [vmem:[%s2110_s0 + $0x14] ss:$36 sps:$4 sm:$0xff]  }
  0x12   :  { %v1458_v49 = vld [vmem:[%s2109_s1 + $0xc4] ss:$8 sps:$4 sm:$0xff]   ;;  %981 = vmatprep.mubr.bf16.mxu1 %v1484_v48  ;;  %v1462_v52 = vld [vmem:[%s2109_s1 + $0xc0] ss:$8 sps:$4 sm:$0xff]   ;;  %v1464_v54 = vld [vmem:[%s2109_s1 + $0xd4] ss:$8 sps:$4 sm:$0xff]   ;;  %1067 = vmatprep.mubr.bf16.mxu0 %v1490_v51 }
  0x13   :  { %958 = vmatpush1.bf16.msra.mxu1 %v1414_v18  ;;  %v1460_v50 = vld [vmem:[%s2109_s1 + $0x2c4] ss:$8 sps:$4 sm:$0xff]   ;;  %v1463_v53 = vld [vmem:[%s2109_s1 + $0x2c0] ss:$8 sps:$4 sm:$0xff]   ;;  %v1466_v55 = vld [vmem:[%s2109_s1 + $0x2d4] ss:$8 sps:$4 sm:$0xff]  }
  0x14   :  { %1044 = vmatpush1.bf16.msra.mxu0 %v1415_v19  ;;  %959 = vmatprep.subr.bf16.mxu1 %v1416_v20  ;;  %v1468_v56 = vld [vmem:[%s2109_s1 + $0xd0] ss:$8 sps:$4 sm:$0xff]   ;;  %v1470_v58 = vld [vmem:[%s2109_s1 + $0xe4] ss:$8 sps:$4 sm:$0xff]   ;;  %v1474_v60 = vld [vmem:[%s2109_s1 + $0xe0] ss:$8 sps:$4 sm:$0xff]  }
  0x15   :  { %1045 = vmatprep.subr.bf16.mxu0 %v1418_v21  ;;  %v1469_v57 = vld [vmem:[%s2109_s1 + $0x2d0] ss:$8 sps:$4 sm:$0xff]   ;;  %v1472_v59 = vld [vmem:[%s2109_s1 + $0x2e4] ss:$8 sps:$4 sm:$0xff]   ;;  %v1475_v61 = vld [vmem:[%s2109_s1 + $0x2e0] ss:$8 sps:$4 sm:$0xff]  }
  0x16   :  { %v1476_v62 = vld [vmem:[%s2109_s1 + $0xf4] ss:$8 sps:$4 sm:$0xff]   ;;  %v1480_v0 = vld [vmem:[%s2109_s1 + $0xf0] ss:$8 sps:$4 sm:$0xff]   ;;  %v1487_v2 = vld [vmem:[%s2109_s1 + $0x104] ss:$8 sps:$4 sm:$0xff]  }
  0x17   :  { %960 = vmatpush1.bf16.msra.mxu1 %v1420_v22  ;;  %v1478_v63 = vld [vmem:[%s2109_s1 + $0x2f4] ss:$8 sps:$4 sm:$0xff]   ;;  %v1481_v1 = vld [vmem:[%s2109_s1 + $0x2f0] ss:$8 sps:$4 sm:$0xff]   ;;  %v1493_v3 = vld [vmem:[%s2109_s1 + $0x304] ss:$8 sps:$4 sm:$0xff]  }
  0x18   :  { %1046 = vmatpush1.bf16.msra.mxu0 %v1421_v23  ;;  %961 = vmatprep.subr.bf16.mxu1 %v1422_v24  ;;  %v1482_v4 = vld [vmem:[%s2110_s0] ss:$36 sps:$4 sm:$0xff]   ;;  %v1488_v6 = vld [vmem:[%s2110_s0 + $0x10] ss:$36 sps:$4 sm:$0xff]  }
  0x19   :  { %1047 = vmatprep.subr.bf16.mxu0 %v1424_v25  ;;  %v1485_v5 = vld [vmem:[%s2109_s1 + $0x100] ss:$8 sps:$4 sm:$0xff]   ;;  %v1496_v8 = vld [vmem:[%s2109_s1 + $0x114] ss:$8 sps:$4 sm:$0xff]   ;;  %v1494_v10 = vld [vmem:[%s2109_s1 + $0x110] ss:$8 sps:$4 sm:$0xff]  }
  0x1a   :  { %v1491_v7 = vld [vmem:[%s2109_s1 + $0x300] ss:$8 sps:$4 sm:$0xff]   ;;  %v1499_v9 = vld [vmem:[%s2109_s1 + $0x314] ss:$8 sps:$4 sm:$0xff]   ;;  %v1497_v11 = vld [vmem:[%s2109_s1 + $0x310] ss:$8 sps:$4 sm:$0xff]  }
  0x1b   :  { %962 = vmatpush1.bf16.msra.mxu1 %v1426_v26  ;;  %v1502_v12 = vld [vmem:[%s2109_s1 + $0x124] ss:$8 sps:$4 sm:$0xff]   ;;  %v1500_v14 = vld [vmem:[%s2109_s1 + $0x120] ss:$8 sps:$4 sm:$0xff]   ;;  %v1508_v16 = vld [vmem:[%s2109_s1 + $0x134] ss:$8 sps:$4 sm:$0xff]  }
  0x1c   :  { %1048 = vmatpush1.bf16.msra.mxu0 %v1427_v27  ;;  %963 = vmatprep.subr.bf16.mxu1 %v1428_v28  ;;  %v1505_v13 = vld [vmem:[%s2109_s1 + $0x324] ss:$8 sps:$4 sm:$0xff]   ;;  %v1503_v15 = vld [vmem:[%s2109_s1 + $0x320] ss:$8 sps:$4 sm:$0xff]   ;;  %v1511_v17 = vld [vmem:[%s2109_s1 + $0x334] ss:$8 sps:$4 sm:$0xff]  }
  0x1d   :  { %1049 = vmatprep.subr.bf16.mxu0 %v1430_v29  ;;  %v1506_v18 = vld [vmem:[%s2109_s1 + $0x130] ss:$8 sps:$4 sm:$0xff]   ;;  %v1514_v20 = vld [vmem:[%s2109_s1 + $0x144] ss:$8 sps:$4 sm:$0xff]   ;;  %v1512_v22 = vld [vmem:[%s2109_s1 + $0x140] ss:$8 sps:$4 sm:$0xff]  }
  0x1e   :  { %v1509_v19 = vld [vmem:[%s2109_s1 + $0x330] ss:$8 sps:$4 sm:$0xff]   ;;  %v1517_v21 = vld [vmem:[%s2109_s1 + $0x344] ss:$8 sps:$4 sm:$0xff]   ;;  %v1515_v23 = vld [vmem:[%s2109_s1 + $0x340] ss:$8 sps:$4 sm:$0xff]  }
  0x1f   :  { %964 = vmatpush1.bf16.msra.mxu1 %v1432_v30  ;;  %v1520_v24 = vld [vmem:[%s2109_s1 + $0x154] ss:$8 sps:$4 sm:$0xff]   ;;  %v1518_v26 = vld [vmem:[%s2109_s1 + $0x150] ss:$8 sps:$4 sm:$0xff]   ;;  %v1526_v28 = vld [vmem:[%s2109_s1 + $0x164] ss:$8 sps:$4 sm:$0xff]  }
  0x20   :  { %1050 = vmatpush1.bf16.msra.mxu0 %v1433_v31  ;;  %965 = vmatprep.subr.bf16.mxu1 %v1434_v32  ;;  %v1523_v25 = vld [vmem:[%s2109_s1 + $0x354] ss:$8 sps:$4 sm:$0xff]   ;;  %v1521_v27 = vld [vmem:[%s2109_s1 + $0x350] ss:$8 sps:$4 sm:$0xff]   ;;  %v1529_v29 = vld [vmem:[%s2109_s1 + $0x364] ss:$8 sps:$4 sm:$0xff]  }
  0x21   :  { %1051 = vmatprep.subr.bf16.mxu0 %v1436_v33  ;;  %v1524_v30 = vld [vmem:[%s2109_s1 + $0x160] ss:$8 sps:$4 sm:$0xff]   ;;  %v1532_v32 = vld [vmem:[%s2109_s1 + $0x174] ss:$8 sps:$4 sm:$0xff]  }
  0x22   :  { %v1527_v31 = vld [vmem:[%s2109_s1 + $0x360] ss:$8 sps:$4 sm:$0xff]   ;;  %v1535_v33 = vld [vmem:[%s2109_s1 + $0x374] ss:$8 sps:$4 sm:$0xff]  }
  0x23   :  { %966 = vmatpush1.bf16.msra.mxu1 %v1438_v34  ;;  %v1586_v34 = vld [vmem:[%s2110_s0 + $0xc] ss:$36 sps:$4 sm:$0xff]   ;;  %v1548_v48 = vld [vmem:[%s2109_s1 + $0x1a0] ss:$8 sps:$4 sm:$0xff]   ;;  %v1559_v51 = vld [vmem:[%s2109_s1 + $0x3b4] ss:$8 sps:$4 sm:$0xff]  }
  0x24   :  { %1052 = vmatpush1.bf16.msra.mxu0 %v1439_v35  ;;  %967 = vmatprep.subr.bf16.mxu1 %v1440_v36  ;;  %v1589_v35 = vld [vmem:[%s2110_s0 + $0x1c] ss:$36 sps:$4 sm:$0xff]   ;;  %v1530_v36 = vld [vmem:[%s2109_s1 + $0x170] ss:$8 sps:$4 sm:$0xff]  }
  0x25   :  { %1053 = vmatprep.subr.bf16.mxu0 %v1442_v37  ;;  %v1533_v37 = vld [vmem:[%s2109_s1 + $0x370] ss:$8 sps:$4 sm:$0xff]  }
  0x27   :  { %968 = vmatpush1.bf16.msra.mxu1 %v1444_v38  ;;  %v1538_v38 = vld [vmem:[%s2109_s1 + $0x184] ss:$8 sps:$4 sm:$0xff]  }
  0x28   :  { %1054 = vmatpush1.bf16.msra.mxu0 %v1445_v39  ;;  %969 = vmatprep.subr.bf16.mxu1 %v1446_v40  ;;  %v1541_v39 = vld [vmem:[%s2109_s1 + $0x384] ss:$8 sps:$4 sm:$0xff]   ;;  %v1536_v40 = vld [vmem:[%s2109_s1 + $0x180] ss:$8 sps:$4 sm:$0xff]  }
  0x29   :  { %1055 = vmatprep.subr.bf16.mxu0 %v1448_v41  ;;  %v1539_v41 = vld [vmem:[%s2109_s1 + $0x380] ss:$8 sps:$4 sm:$0xff]  }
  0x2b   :  { %970 = vmatpush1.bf16.msra.mxu1 %v1450_v42  ;;  %v1544_v42 = vld [vmem:[%s2109_s1 + $0x194] ss:$8 sps:$4 sm:$0xff]  }
  0x2c   :  { %1056 = vmatpush1.bf16.msra.mxu0 %v1451_v43  ;;  %971 = vmatprep.subr.bf16.mxu1 %v1452_v44  ;;  %v1547_v43 = vld [vmem:[%s2109_s1 + $0x394] ss:$8 sps:$4 sm:$0xff]   ;;  %v1542_v44 = vld [vmem:[%s2109_s1 + $0x190] ss:$8 sps:$4 sm:$0xff]  }
  0x2d   :  { %1057 = vmatprep.subr.bf16.mxu0 %v1454_v45  ;;  %v1545_v45 = vld [vmem:[%s2109_s1 + $0x390] ss:$8 sps:$4 sm:$0xff]  }
  0x2f   :  { %972 = vmatpush1.bf16.msra.mxu1 %v1456_v46  ;;  %v1550_v46 = vld [vmem:[%s2109_s1 + $0x1a4] ss:$8 sps:$4 sm:$0xff]  }
  0x30   :  { %1058 = vmatpush1.bf16.msra.mxu0 %v1457_v47  ;;  %973 = vmatprep.subr.bf16.mxu1 %v1458_v49  ;;  %v1553_v47 = vld [vmem:[%s2109_s1 + $0x3a4] ss:$8 sps:$4 sm:$0xff]   ;;  %v1551_v49 = vld [vmem:[%s2109_s1 + $0x3a0] ss:$8 sps:$4 sm:$0xff]  }
  0x31   :  { %1059 = vmatprep.subr.bf16.mxu0 %v1460_v50  ;;  %v1556_v50 = vld [vmem:[%s2109_s1 + $0x1b4] ss:$8 sps:$4 sm:$0xff]  }
  0x33   :  { %974 = vmatpush1.bf16.msra.mxu1 %v1462_v52  ;;  %v1554_v52 = vld [vmem:[%s2109_s1 + $0x1b0] ss:$8 sps:$4 sm:$0xff]  }
  0x34   :  { %1060 = vmatpush1.bf16.msra.mxu0 %v1463_v53  ;;  %975 = vmatprep.subr.bf16.mxu1 %v1464_v54  ;;  %v1557_v53 = vld [vmem:[%s2109_s1 + $0x3b0] ss:$8 sps:$4 sm:$0xff]   ;;  %v1562_v54 = vld [vmem:[%s2109_s1 + $0x1c4] ss:$8 sps:$4 sm:$0xff]  }
  0x35   :  { %1061 = vmatprep.subr.bf16.mxu0 %v1466_v55  ;;  %v1565_v55 = vld [vmem:[%s2109_s1 + $0x3c4] ss:$8 sps:$4 sm:$0xff]  }
  0x37   :  { %976 = vmatpush1.bf16.msra.mxu1 %v1468_v56  ;;  %v1560_v56 = vld [vmem:[%s2109_s1 + $0x1c0] ss:$8 sps:$4 sm:$0xff]  }
  0x38   :  { %1062 = vmatpush1.bf16.msra.mxu0 %v1469_v57  ;;  %977 = vmatprep.subr.bf16.mxu1 %v1470_v58  ;;  %v1563_v57 = vld [vmem:[%s2109_s1 + $0x3c0] ss:$8 sps:$4 sm:$0xff]   ;;  %v1568_v58 = vld [vmem:[%s2109_s1 + $0x1d4] ss:$8 sps:$4 sm:$0xff]  }
  0x39   :  { %1063 = vmatprep.subr.bf16.mxu0 %v1472_v59  ;;  %v1571_v59 = vld [vmem:[%s2109_s1 + $0x3d4] ss:$8 sps:$4 sm:$0xff]  }
  0x3b   :  { %978 = vmatpush1.bf16.msra.mxu1 %v1474_v60  ;;  %v1566_v60 = vld [vmem:[%s2109_s1 + $0x1d0] ss:$8 sps:$4 sm:$0xff]  }
  0x3c   :  { %1064 = vmatpush1.bf16.msra.mxu0 %v1475_v61  ;;  %979 = vmatprep.subr.bf16.mxu1 %v1476_v62  ;;  %v1569_v61 = vld [vmem:[%s2109_s1 + $0x3d0] ss:$8 sps:$4 sm:$0xff]   ;;  %v1574_v62 = vld [vmem:[%s2109_s1 + $0x1e4] ss:$8 sps:$4 sm:$0xff]  }
  0x3d   :  { %1065 = vmatprep.subr.bf16.mxu0 %v1478_v63  ;;  %v1577_v63 = vld [vmem:[%s2109_s1 + $0x3e4] ss:$8 sps:$4 sm:$0xff]  }
  0x3f   :  { %980 = vmatpush1.bf16.msra.mxu1 %v1480_v0  ;;  %v1572_v0 = vld [vmem:[%s2109_s1 + $0x1e0] ss:$8 sps:$4 sm:$0xff]  }
  0x40   :  { %1066 = vmatpush1.bf16.msra.mxu0 %v1481_v1  ;;  %992 = vmatprep.subr.bf16.mxu1 %v1487_v2  ;;  %v1575_v1 = vld [vmem:[%s2109_s1 + $0x3e0] ss:$8 sps:$4 sm:$0xff]   ;;  %v1580_v2 = vld [vmem:[%s2109_s1 + $0x1f4] ss:$8 sps:$4 sm:$0xff]  }
  0x41   :  { %1078 = vmatprep.subr.bf16.mxu0 %v1493_v3  ;;  %v1583_v3 = vld [vmem:[%s2109_s1 + $0x3f4] ss:$8 sps:$4 sm:$0xff]  }
  0x42   :  { %982 = vmatmul.mubr.bf16.vlgmr.msra.gmra.mrb[0].mxu1 %v1482_v4  ;;  %v1578_v4 = vld [vmem:[%s2109_s1 + $0x1f0] ss:$8 sps:$4 sm:$0xff]  }
  0x43   :  { %1068 = vmatmul.mubr.bf16.vlgmr.msra.gmra.mrb[0].mxu0 %v1488_v6  ;;  %993 = vmatpush1.bf16.msra.mxu1 %v1485_v5  ;;  %v1581_v5 = vld [vmem:[%s2109_s1 + $0x3f0] ss:$8 sps:$4 sm:$0xff]   ;;  %v1592_v6 = vld [vmem:[%s2109_s1 + $0x404] ss:$8 sps:$4 sm:$0xff]  }
  0x44   :  { %1079 = vmatpush1.bf16.msra.mxu0 %v1491_v7  ;;  %994 = vmatprep.subr.bf16.mxu1 %v1496_v8  ;;  %v1584_v7 = vld [vmem:[%s2110_s0 + $0x8] ss:$36 sps:$4 sm:$0xff]   ;;  %v1587_v8 = vld [vmem:[%s2110_s0 + $0x18] ss:$36 sps:$4 sm:$0xff]  }
  0x45   :  { %1080 = vmatprep.subr.bf16.mxu0 %v1499_v9  ;;  %1024 = vmatprep.mubr.bf16.mxu1 %v1586_v34  ;;  %v1590_v9 = vld [vmem:[%s2109_s1 + $0x400] ss:$8 sps:$4 sm:$0xff]  }
  0x46   :  { %1110 = vmatprep.mubr.bf16.mxu0 %v1589_v35 }
  0x47   :  { %995 = vmatpush1.bf16.msra.mxu1 %v1494_v10  ;;  %v1595_v10 = vld [vmem:[%s2109_s1 + $0x414] ss:$8 sps:$4 sm:$0xff]  }
  0x48   :  { %1081 = vmatpush1.bf16.msra.mxu0 %v1497_v11  ;;  %996 = vmatprep.subr.bf16.mxu1 %v1502_v12  ;;  %v1593_v11 = vld [vmem:[%s2109_s1 + $0x410] ss:$8 sps:$4 sm:$0xff]   ;;  %v1615_v12 = vmov 0  }
  0x49   :  { %1082 = vmatprep.subr.bf16.mxu0 %v1505_v13  ;;  %v1598_v13 = vld [vmem:[%s2109_s1 + $0x424] ss:$8 sps:$4 sm:$0xff]  }
  0x4b   :  { %997 = vmatpush1.bf16.msra.mxu1 %v1500_v14  ;;  %v1596_v14 = vld [vmem:[%s2109_s1 + $0x420] ss:$8 sps:$4 sm:$0xff]  }
  0x4c   :  { %1083 = vmatpush1.bf16.msra.mxu0 %v1503_v15  ;;  %998 = vmatprep.subr.bf16.mxu1 %v1508_v16  ;;  %v1601_v15 = vld [vmem:[%s2109_s1 + $0x434] ss:$8 sps:$4 sm:$0xff]   ;;  %v1599_v16 = vld [vmem:[%s2109_s1 + $0x430] ss:$8 sps:$4 sm:$0xff]  }
  0x4d   :  { %1084 = vmatprep.subr.bf16.mxu0 %v1511_v17  ;;  %v1604_v17 = vld [vmem:[%s2109_s1 + $0x444] ss:$8 sps:$4 sm:$0xff]  }
  0x4f   :  { %999 = vmatpush1.bf16.msra.mxu1 %v1506_v18  ;;  %v1602_v18 = vld [vmem:[%s2109_s1 + $0x440] ss:$8 sps:$4 sm:$0xff]  }
  0x50   :  { %1085 = vmatpush1.bf16.msra.mxu0 %v1509_v19  ;;  %1000 = vmatprep.subr.bf16.mxu1 %v1514_v20  ;;  %v1607_v19 = vld [vmem:[%s2109_s1 + $0x454] ss:$8 sps:$4 sm:$0xff]   ;;  %v1605_v20 = vld [vmem:[%s2109_s1 + $0x450] ss:$8 sps:$4 sm:$0xff]  }
  0x51   :  { %1086 = vmatprep.subr.bf16.mxu0 %v1517_v21  ;;  %v1610_v21 = vld [vmem:[%s2109_s1 + $0x464] ss:$8 sps:$4 sm:$0xff]  }
  0x53   :  { %1001 = vmatpush1.bf16.msra.mxu1 %v1512_v22  ;;  %v1608_v22 = vld [vmem:[%s2109_s1 + $0x460] ss:$8 sps:$4 sm:$0xff]  }
  0x54   :  { %1087 = vmatpush1.bf16.msra.mxu0 %v1515_v23  ;;  %1002 = vmatprep.subr.bf16.mxu1 %v1520_v24  ;;  %v1613_v23 = vld [vmem:[%s2109_s1 + $0x474] ss:$8 sps:$4 sm:$0xff]   ;;  %v1611_v24 = vld [vmem:[%s2109_s1 + $0x470] ss:$8 sps:$4 sm:$0xff]  }
  0x55   :  { %1088 = vmatprep.subr.bf16.mxu0 %v1523_v25  ;;  %v1614_v25 = vld [vmem:[%s2110_s0 + $0x20] ss:$36 sps:$4 sm:$0xff]  }
  0x57   :  { %1003 = vmatpush1.bf16.msra.mxu1 %v1518_v26 }
  0x58   :  { %1089 = vmatpush1.bf16.msra.mxu0 %v1521_v27  ;;  %1004 = vmatprep.subr.bf16.mxu1 %v1526_v28 }
  0x59   :  { %1090 = vmatprep.subr.bf16.mxu0 %v1529_v29 }
  0x5b   :  { %1005 = vmatpush1.bf16.msra.mxu1 %v1524_v30  ;;  %v173_v30 = vlaneseq }
  0x5c   :  { %1091 = vmatpush1.bf16.msra.mxu0 %v1527_v31  ;;  %1006 = vmatprep.subr.bf16.mxu1 %v1532_v32 }
  0x5d   :  { %1092 = vmatprep.subr.bf16.mxu0 %v1535_v33  ;;  %v174_v31 = vshrl.u32 %v173_v30, 7  ;;  %v171_v33 = vld [vmem:[%s2111_s2] sm:$0x3] }
  0x5f   :  { %1007 = vmatpush1.bf16.msra.mxu1 %v1530_v36  ;;  %v175_v32 = vsub.s32 0, %v174_v31  ;;  %v179_v34 = vsub.s32 1, %v174_v31 }
  0x60   :  { %1093 = vmatpush1.bf16.msra.mxu0 %v1533_v37  ;;  %1008 = vmatprep.subr.bf16.mxu1 %v1538_v38 }
  0x61   :  { %1094 = vmatprep.subr.bf16.mxu0 %v1541_v39  ;;  %v176_v35 = vrot.slane %v171_v33, %v175_v32  ;;  %v180_v36 = vrot.slane %v171_v33, %v179_v34 }
  0x63   :  { %1009 = vmatpush1.bf16.msra.mxu1 %v1536_v40 }
  0x64   :  { %1095 = vmatpush1.bf16.msra.mxu0 %v1539_v41  ;;  %1010 = vmatprep.subr.bf16.mxu1 %v1544_v42 }
  0x65   :  { %1096 = vmatprep.subr.bf16.mxu0 %v1547_v43 }
  0x67   :  { %1011 = vmatpush1.bf16.msra.mxu1 %v1542_v44 }
  0x68   :  { %1097 = vmatpush1.bf16.msra.mxu0 %v1545_v45  ;;  %1012 = vmatprep.subr.bf16.mxu1 %v1550_v46 }
  0x69   :  { %1098 = vmatprep.subr.bf16.mxu0 %v1553_v47 }
  0x6b   :  { %1013 = vmatpush1.bf16.msra.mxu1 %v1548_v48 }
  0x6c   :  { %1099 = vmatpush1.bf16.msra.mxu0 %v1551_v49  ;;  %1014 = vmatprep.subr.bf16.mxu1 %v1556_v50 }
  0x6d   :  { %1100 = vmatprep.subr.bf16.mxu0 %v1559_v51 }
  0x6f   :  { %1015 = vmatpush1.bf16.msra.mxu1 %v1554_v52 }
  0x70   :  { %1101 = vmatpush1.bf16.msra.mxu0 %v1557_v53  ;;  %1016 = vmatprep.subr.bf16.mxu1 %v1562_v54 }
  0x71   :  { %1102 = vmatprep.subr.bf16.mxu0 %v1565_v55 }
  0x73   :  { %1017 = vmatpush1.bf16.msra.mxu1 %v1560_v56 }
  0x74   :  { %1103 = vmatpush1.bf16.msra.mxu0 %v1563_v57  ;;  %1018 = vmatprep.subr.bf16.mxu1 %v1568_v58 }
  0x75   :  { %1104 = vmatprep.subr.bf16.mxu0 %v1571_v59 }
  0x77   :  { %1019 = vmatpush1.bf16.msra.mxu1 %v1566_v60 }
  0x78   :  { %1105 = vmatpush1.bf16.msra.mxu0 %v1569_v61  ;;  %1020 = vmatprep.subr.bf16.mxu1 %v1574_v62 }
  0x79   :  { %1106 = vmatprep.subr.bf16.mxu0 %v1577_v63 }
  0x7b   :  { %1021 = vmatpush1.bf16.msra.mxu1 %v1572_v0 }
  0x7c   :  { %1107 = vmatpush1.bf16.msra.mxu0 %v1575_v1  ;;  %1022 = vmatprep.subr.bf16.mxu1 %v1580_v2 }
  0x7d   :  { %1108 = vmatprep.subr.bf16.mxu0 %v1583_v3 }
  0x7f   :  { %1023 = vmatpush1.bf16.msra.mxu1 %v1578_v4 }
  0x80   :  { %1109 = vmatpush1.bf16.msra.mxu0 %v1581_v5 }
  0x81   :  { %1121 = vmatprep.subr.bf16.mxu0 %v1592_v6 }
  0x82   :  { %1025 = vmatmul.mubr.bf16.vlgmr.msra.gmra.mrb[0].mxu1 %v1584_v7 }
  0x83   :  { %1111 = vmatmul.mubr.bf16.vlgmr.msra.gmra.mrb[0].mxu0 %v1587_v8 }
  0x84   :  { %1122 = vmatpush1.bf16.msra.mxu0 %v1590_v9  ;;  %1153 = vmatprep.mubr.bf16.mxu0 %v1615_v12 }
  0x85   :  { %1123 = vmatprep.subr.bf16.mxu0 %v1595_v10 }
  0x88   :  { %1124 = vmatpush1.bf16.msra.mxu0 %v1593_v11 }
  0x89   :  { %1125 = vmatprep.subr.bf16.mxu0 %v1598_v13 }
  0x8c   :  { %1126 = vmatpush1.bf16.msra.mxu0 %v1596_v14 }
  0x8d   :  { %1127 = vmatprep.subr.bf16.mxu0 %v1601_v15 }
  0x90   :  { %1128 = vmatpush1.bf16.msra.mxu0 %v1599_v16 }
  0x91   :  { %1129 = vmatprep.subr.bf16.mxu0 %v1604_v17 }
  0x94   :  { %1130 = vmatpush1.bf16.msra.mxu0 %v1602_v18 }
  0x95   :  { %1131 = vmatprep.subr.bf16.mxu0 %v1607_v19 }
  0x98   :  { %1132 = vmatpush1.bf16.msra.mxu0 %v1605_v20 }
  0x99   :  { %1133 = vmatprep.subr.bf16.mxu0 %v1610_v21 }
  0x9c   :  { %1134 = vmatpush1.bf16.msra.mxu0 %v1608_v22 }
  0x9d   :  { %1135 = vmatprep.subr.bf16.mxu0 %v1613_v23 }
  0xa0   :  { %1136 = vmatpush1.bf16.msra.mxu0 %v1611_v24 }
  0xa3   :  { %1154 = vmatmul.mubr.bf16.vlgmr.msra.gmra.mrb[0].mxu0 %v1614_v25 }
 0x155   :  { %v1026_v26 = vpop.f32.mrb[0].mxu1 }
 0x156   :  { %v1028_v27 = vpop.f32.mrb[1].mxu1  ;;  %v1365_v37 = vadd.f32 %v1026_v26, %v176_v35 }
 0x157   :  { %v1030_v28 = vpop.f32.mrb[2].mxu1  ;;  %v1367_v38 = vadd.f32 %v1028_v27, %v180_v36 }
 0x158   :  { %v1032_v29 = vpop.f32.mrb[3].mxu1  ;;  %v1369_v40 = vadd.f32 %v1030_v28, %v176_v35 }
 0x159   :  { %v1371_v43 = vadd.f32 %v1032_v29, %v180_v36 }
 0x176   :  { %v1155_v39 = vpop.f32.mrb[0].mxu0 }
 0x177   :  { %v1366_v41 = vadd.f32 %v1365_v37, %v1155_v39  ;;  %v1157_v42 = vpop.f32.mrb[1].mxu0 }
 0x178   :  { %v1368_v44 = vadd.f32 %v1367_v38, %v1157_v42  ;;  %v1159_v45 = vpop.f32.mrb[2].mxu0 }
 0x179   :  { %v1370_v46 = vadd.f32 %v1369_v40, %v1159_v45  ;;  %v1161_v47 = vpop.f32.mrb[3].mxu0  ;;  %v1164_v49 = vmax.f32 %v1366_v41, 0.0 }
 0x17a   :  { %v1372_v48 = vadd.f32 %v1371_v43, %v1161_v47 }
 0x17b   :  { %v1165_v50 = vmax.f32 %v1370_v46, 0.0 }
 0x17c   :  { %v1363_v51 = vpack.c.bf16 %v1372_v48, %v1368_v44 }
 0x17d   :  { %v1358_v52 = vpack.c.bf16 %v1165_v50, %v1164_v49 }
 0x17e   :  { %1364 = vst [vmem:[%s2112_s4] sm:$0xff] %v1363_v51  }
 0x17f   :  { %1359 = vst [vmem:[%s2113_s3] sm:$0xff] %v1358_v52  }

</bundles_post_ra>
